<compile_context>
chip_gen: v5e
topology: v5e:2x2
jax: 0.10.0
libtpu: 0.0.40
codegen_flags: <defaults>
</compile_context>

<pallas_src>
import functools

import numpy as np
import jax
import jax.numpy as jnp
from jax import lax
from jax.experimental import pallas as pl
from jax.experimental.pallas import tpu as pltpu


def _dncnn_fused_kernel(H, W, col_dtype,
                        x_ref, masks_ref, w0_ref, wmid_ref,
                        shift_ref, wlast_ref, o_ref, col_ref):
    """Fused DnCNN forward for one program (B lane-batched images).

    Layouts (channel-major, B images flattened+concatenated onto lanes, L=B*H*W):
      x_ref     : (1, 1, L)        input images
      masks_ref : (9, 1, L)        per-tap zero-padding masks (tiled per image)
      w0_ref    : (9, F, 1)        first conv  (Cin=1 -> F)
      wmid_ref  : (n_mid, F, 9*F)  middle convs, tap-stacked K, BN scale folded in
      shift_ref : (n_mid, F, 1)    folded eval-BN shift
      wlast_ref : (9, F, 1)        last conv   (F -> Cout=1)
      o_ref     : (1, 1, L)        output (x - dncnn(x))
      col_ref   : (9*F, L) VMEM    im2col scratch (f32 or bf16)
    """
    L = x_ref.shape[2]
    F = wmid_ref.shape[1]
    n_mid = wmid_ref.shape[0]

    # Flattened-spatial offsets for the 9 taps (dy, dx in {-1,0,1}); same
    # order as the (3,3) HWIO kernel flattening used by the wrapper.
    offs = [dy * W + dx for dy in (-1, 0, 1) for dx in (-1, 0, 1)]

    def shift_tap(a, t):
        """a shifted by tap t with zero padding, on the (C, L) flat layout."""
        off = offs[t]
        if off == 0:
            return a                                  # center tap: no shift
        rolled = pltpu.roll(a, shift=(-off) % L, axis=1)   # lane roll (XLU)
        return rolled * masks_ref[t]                        # (C,L)*(1,L) (VPU)

    x = x_ref[0]                                            # (1, L) f32

    # ---- layer 0: conv(1 -> F) + ReLU.  Cin=1 => VPU broadcast MACs, no MXU.
    acc = jnp.zeros((F, L), jnp.float32)
    for t in range(9):
        acc = acc + w0_ref[t] * shift_tap(x, t)             # (F,1)*(1,L) -> (F,L)
    act = jnp.maximum(acc, 0.0)

    # ---- middle layers: conv(F -> F) + ReLU (eval-BN scale already folded
    # into wmid; only the shift remains).  Nine sublane-aligned im2col stores
    # then ONE fat K=9F MXU matmul per layer.
    for l in range(n_mid):
        for t in range(9):
            col_ref[t * F:(t + 1) * F, :] = shift_tap(act, t).astype(col_dtype)
        acc = jnp.dot(wmid_ref[l], col_ref[...],
                      preferred_element_type=jnp.float32)   # (F,9F) x (9F,L)
        act = jnp.maximum(acc + shift_ref[l], 0.0)

    # ---- last layer: conv(F -> 1).  Accumulate all 9 taps on the VPU, then a
    # single cross-sublane reduce (one XLU op instead of nine).
    yacc = jnp.zeros((F, L), jnp.float32)
    for t in range(9):
        yacc = yacc + wlast_ref[t] * shift_tap(act, t)       # (F,1)*(F,L)
    y = jnp.sum(yacc, axis=0, keepdims=True)                 # (1, L)

    # DnCNN residual: return x - dncnn(x).  Lane-dense store.
    o_ref[0] = x - y


def _tap_masks_np(H, W):
    """Host-side constant 0/1 masks implementing zero padding per 3x3 tap."""
    r = np.arange(H)[:, None]
    c = np.arange(W)[None, :]
    masks = []
    for dy in (-1, 0, 1):
        for dx in (-1, 0, 1):
            valid = ((r + dy >= 0) & (r + dy < H) &
                     (c + dx >= 0) & (c + dx < W))
            masks.append(valid.reshape(1, H * W))
    return np.stack(masks).astype(np.float32)                # (9, 1, H*W)


def dncnn_forward(x_nchw, params, eps=1e-5, num_programs=2,
                  col_dtype=jnp.float32):
    """DnCNN forward (eval-mode BN) via one fused Pallas TPU kernel.

    x_nchw: (N, 1, H, W) float32, PyTorch-style layout.
    num_programs: grid size; 2 feeds both v7x TensorCores, images are
      lane-batched N/num_programs per program.
    col_dtype: jnp.float32 (exact) or jnp.bfloat16 (v6e/v7x MXU-rate path,
      f32 accumulation).
    """
    N, C, H, W = x_nchw.shape
    if C != 1:
        # TODO(synk): fused kernel assumes DnCNN default channels=1 (VPU paths
        # for the Cin=1 first / Cout=1 last layer); generalize via im2col there.
        raise NotImplementedError("fused DnCNN kernel supports channels=1 only")
    HW = H * W
    F = params[0]["w"].shape[-1]
    n_mid = len(params) - 2

    # Grid sizing: at most `num_programs` programs (2 => one per v7x TC; on
    # v5e/v6e "parallel" is a no-op so the extra program only costs a prolog);
    # remaining images are lane-batched inside each program.
    G = max(1, min(num_programs, N))
    n_pad = (-N) % G
    B = (N + n_pad) // G
    L = B * HW

    x_flat = x_nchw.reshape(N, 1, HW).astype(jnp.float32)
    if n_pad:
        x_flat = jnp.concatenate(
            [x_flat, jnp.zeros((n_pad, 1, HW), jnp.float32)], axis=0)
    x_flat = x_flat.reshape(G, 1, L)          # B images concatenated on lanes

    # Per-image boundary masks, tiled to the lane-batched layout: also zeroes
    # the roll wrap between adjacent images.
    masks = jnp.asarray(np.tile(_tap_masks_np(H, W), (1, 1, B)))   # (9,1,L)

    # Repack weights for the channel-major, tap-stacked kernel layout.
    w0 = jnp.transpose(params[0]["w"].reshape(9, 1, F), (0, 2, 1))  # (9, F, 1)
    w0 = w0.astype(jnp.float32)
    wmid, shifts = [], []
    for p in params[1:-1]:
        s = p["gamma"] / jnp.sqrt(p["var"] + eps)                   # eval-BN scale
        # Fold the BN scale into the weights: scale*(W @ col) == (scale*W) @ col.
        wmid.append(s[:, None] * jnp.transpose(p["w"].reshape(9 * F, F)))  # (F,9F)
        shifts.append(p["beta"] - p["mean"] * s)
    wmid = jnp.stack(wmid).astype(col_dtype)                        # (n_mid, F, 9F)
    shift = jnp.stack(shifts).reshape(n_mid, F, 1).astype(jnp.float32)
    wlast = params[-1]["w"].reshape(9, F, 1).astype(jnp.float32)    # (9, F, 1)

    kernel = functools.partial(_dncnn_fused_kernel, H, W, col_dtype)
    out_flat = pl.pallas_call(
        kernel,
        out_shape=jax.ShapeDtypeStruct((G, 1, L), jnp.float32),
        grid=(G,),
        in_specs=[
            pl.BlockSpec((1, 1, L), lambda g: (g, 0, 0)),            # x
            pl.BlockSpec((9, 1, L), lambda g: (0, 0, 0)),            # masks
            pl.BlockSpec((9, F, 1), lambda g: (0, 0, 0)),            # w0
            pl.BlockSpec((n_mid, F, 9 * F), lambda g: (0, 0, 0)),    # wmid (BN-folded)
            pl.BlockSpec((n_mid, F, 1), lambda g: (0, 0, 0)),        # BN shift
            pl.BlockSpec((9, F, 1), lambda g: (0, 0, 0)),            # wlast
        ],
        out_specs=pl.BlockSpec((1, 1, L), lambda g: (g, 0, 0)),
        scratch_shapes=[pltpu.VMEM((9 * F, L), col_dtype)],          # im2col
        compiler_params=pltpu.CompilerParams(
            dimension_semantics=("parallel",)),                      # v7x: 2 TCs
    )(x_flat, masks, w0, wmid, shift, wlast)

    out = out_flat.reshape(G * B, 1, H, W)
    return out[:N]                                                   # NCHW


def init_params(key, channels=1, num_of_layers=5, features=32):
    """Deterministic synthetic parameters matching DnCNN.__init__ shapes (HWIO)."""
    params = []
    keys = jax.random.split(key, num_of_layers * 5)
    k = iter(keys)

    # first conv: channels -> features
    params.append({"w": 0.1 * jax.random.normal(next(k), (3, 3, channels, features),
                                                jnp.float32)})
    # middle convs with BatchNorm: features -> features
    for _ in range(num_of_layers - 2):
        params.append({
            "w": 0.1 * jax.random.normal(next(k), (3, 3, features, features), jnp.float32),
            "gamma": 1.0 + 0.1 * jax.random.normal(next(k), (features,), jnp.float32),
            "beta": 0.1 * jax.random.normal(next(k), (features,), jnp.float32),
            "mean": 0.1 * jax.random.normal(next(k), (features,), jnp.float32),
            "var": 1.0 + 0.1 * jax.random.uniform(next(k), (features,), jnp.float32),
        })
    # last conv: features -> channels
    params.append({"w": 0.1 * jax.random.normal(next(k), (3, 3, features, channels),
                                                jnp.float32)})
    return params


def _dncnn_reference(x_nchw, params, eps=1e-5):
    """Pure-JAX reference (lax.conv) for correctness checking."""
    def conv(x, w):
        return lax.conv_general_dilated(
            x, w, (1, 1), "SAME",
            dimension_numbers=("NHWC", "HWIO", "NHWC"))

    x = jnp.transpose(x_nchw, (0, 2, 3, 1)).astype(jnp.float32)
    h = jnp.maximum(conv(x, params[0]["w"]), 0.0)
    for p in params[1:-1]:
        scale = p["gamma"] / jnp.sqrt(p["var"] + eps)
        shift = p["beta"] - p["mean"] * scale
        h = jnp.maximum(conv(h, p["w"]) * scale + shift, 0.0)
    y = conv(h, params[-1]["w"])
    return jnp.transpose(x - y, (0, 3, 1, 2))


if __name__ == "__main__":
    key = jax.random.PRNGKey(0)
    k_x, k_p = jax.random.split(key)

    # DnCNN default channels=1; 4 small 16x16 images so the grid has 2 programs
    # (one per v7x TC) with 2 images lane-batched per program (L = 512 lanes).
    x = jax.random.normal(k_x, (4, 1, 16, 16), jnp.float32)   # NCHW like PyTorch
    params = init_params(k_p, channels=1, num_of_layers=5, features=32)

    ref = _dncnn_reference(x, params)

    # f32 path: exact parity with the f32 reference.
    out = jax.block_until_ready(dncnn_forward(x, params))
    assert out.shape == x.shape
    err = float(jnp.max(jnp.abs(out - ref)))
    assert jnp.allclose(out, ref, atol=1e-4, rtol=1e-4), err

    # bf16 im2col/weight path (f32 accumulation): looser tolerance.
    out_bf16 = jax.block_until_ready(
        dncnn_forward(x, params, col_dtype=jnp.bfloat16))
    err_bf16 = float(jnp.max(jnp.abs(out_bf16 - ref)))
    assert err_bf16 < 0.1, err_bf16

    print("KERNEL_OK")
</pallas_src>

<mosaic_0001>
module attributes {stable_mosaic.version = 11 : i64} {
  func.func @_dncnn_fused_kernel(%arg0: i32, %arg1: memref<1x1x512xf32, #tpu.memory_space<vmem>>, %arg2: memref<9x1x512xf32, #tpu.memory_space<vmem>>, %arg3: memref<9x32x1xf32, #tpu.memory_space<vmem>>, %arg4: memref<3x32x288xf32, #tpu.memory_space<vmem>>, %arg5: memref<3x32x1xf32, #tpu.memory_space<vmem>>, %arg6: memref<9x32x1xf32, #tpu.memory_space<vmem>>, %arg7: memref<1x1x512xf32, #tpu.memory_space<vmem>>, %arg8: memref<288x512xf32, #tpu.memory_space<vmem>>) attributes {dimension_semantics = [#tpu.dimension_semantics<parallel>], iteration_bounds = array<i64: 2>, scalar_prefetch = 0 : i64, scratch_operands = 1 : i64, tpu.core_type = #tpu.core_type<tc>, window_params = [{transform_indices = @transform_0, window_bounds = array<i64: 1, 1, 512>}, {pipeline_mode = #tpu.pipeline_mode<synchronous>, transform_indices = @transform_1, window_bounds = array<i64: 9, 1, 512>}, {pipeline_mode = #tpu.pipeline_mode<synchronous>, transform_indices = @transform_2, window_bounds = array<i64: 9, 32, 1>}, {pipeline_mode = #tpu.pipeline_mode<synchronous>, transform_indices = @transform_3, window_bounds = array<i64: 3, 32, 288>}, {pipeline_mode = #tpu.pipeline_mode<synchronous>, transform_indices = @transform_4, window_bounds = array<i64: 3, 32, 1>}, {pipeline_mode = #tpu.pipeline_mode<synchronous>, transform_indices = @transform_5, window_bounds = array<i64: 9, 32, 1>}, {transform_indices = @transform_6, window_bounds = array<i64: 1, 1, 512>}]} {
    %c0 = arith.constant 0 : index
    %c0_0 = arith.constant 0 : index
    %c0_1 = arith.constant 0 : index
    %0 = vector.load %arg1[%c0, %c0_0, %c0_1] : memref<1x1x512xf32, #tpu.memory_space<vmem>>, vector<1x1x512xf32>
    %1 = vector.shape_cast %0 : vector<1x1x512xf32> to vector<1x512xf32>
    %cst = arith.constant 0.000000e+00 : f32
    %2 = vector.broadcast %cst : f32 to vector<32x512xf32>
    %c0_2 = arith.constant 0 : index
    %c0_3 = arith.constant 0 : index
    %c0_4 = arith.constant 0 : index
    %3 = vector.load %arg3[%c0_2, %c0_3, %c0_4] : memref<9x32x1xf32, #tpu.memory_space<vmem>>, vector<1x32x1xf32>
    %4 = vector.shape_cast %3 : vector<1x32x1xf32> to vector<32x1xf32>
    %c17_i32 = arith.constant 17 : i32
    %5 = tpu.dynamic_rotate %1 by %c17_i32 dim 1 : vector<1x512xf32>, i32 -> vector<1x512xf32>
    %c0_5 = arith.constant 0 : index
    %c0_6 = arith.constant 0 : index
    %c0_7 = arith.constant 0 : index
    %6 = vector.load %arg2[%c0_5, %c0_6, %c0_7] : memref<9x1x512xf32, #tpu.memory_space<vmem>>, vector<1x1x512xf32>
    %7 = vector.shape_cast %6 : vector<1x1x512xf32> to vector<1x512xf32>
    %8 = arith.mulf %5, %7 : vector<1x512xf32>
    %9 = vector.broadcast %4 : vector<32x1xf32> to vector<32x512xf32>
    %10 = vector.broadcast %8 : vector<1x512xf32> to vector<32x512xf32>
    %11 = arith.mulf %9, %10 : vector<32x512xf32>
    %12 = arith.addf %2, %11 : vector<32x512xf32>
    %c1 = arith.constant 1 : index
    %c0_8 = arith.constant 0 : index
    %c0_9 = arith.constant 0 : index
    %13 = vector.load %arg3[%c1, %c0_8, %c0_9] : memref<9x32x1xf32, #tpu.memory_space<vmem>>, vector<1x32x1xf32>
    %14 = vector.shape_cast %13 : vector<1x32x1xf32> to vector<32x1xf32>
    %c16_i32 = arith.constant 16 : i32
    %15 = tpu.dynamic_rotate %1 by %c16_i32 dim 1 : vector<1x512xf32>, i32 -> vector<1x512xf32>
    %c1_10 = arith.constant 1 : index
    %c0_11 = arith.constant 0 : index
    %c0_12 = arith.constant 0 : index
    %16 = vector.load %arg2[%c1_10, %c0_11, %c0_12] : memref<9x1x512xf32, #tpu.memory_space<vmem>>, vector<1x1x512xf32>
    %17 = vector.shape_cast %16 : vector<1x1x512xf32> to vector<1x512xf32>
    %18 = arith.mulf %15, %17 : vector<1x512xf32>
    %19 = vector.broadcast %14 : vector<32x1xf32> to vector<32x512xf32>
    %20 = vector.broadcast %18 : vector<1x512xf32> to vector<32x512xf32>
    %21 = arith.mulf %19, %20 : vector<32x512xf32>
    %22 = arith.addf %12, %21 : vector<32x512xf32>
    %c2 = arith.constant 2 : index
    %c0_13 = arith.constant 0 : index
    %c0_14 = arith.constant 0 : index
    %23 = vector.load %arg3[%c2, %c0_13, %c0_14] : memref<9x32x1xf32, #tpu.memory_space<vmem>>, vector<1x32x1xf32>
    %24 = vector.shape_cast %23 : vector<1x32x1xf32> to vector<32x1xf32>
    %c15_i32 = arith.constant 15 : i32
    %25 = tpu.dynamic_rotate %1 by %c15_i32 dim 1 : vector<1x512xf32>, i32 -> vector<1x512xf32>
    %c2_15 = arith.constant 2 : index
    %c0_16 = arith.constant 0 : index
    %c0_17 = arith.constant 0 : index
    %26 = vector.load %arg2[%c2_15, %c0_16, %c0_17] : memref<9x1x512xf32, #tpu.memory_space<vmem>>, vector<1x1x512xf32>
    %27 = vector.shape_cast %26 : vector<1x1x512xf32> to vector<1x512xf32>
    %28 = arith.mulf %25, %27 : vector<1x512xf32>
    %29 = vector.broadcast %24 : vector<32x1xf32> to vector<32x512xf32>
    %30 = vector.broadcast %28 : vector<1x512xf32> to vector<32x512xf32>
    %31 = arith.mulf %29, %30 : vector<32x512xf32>
    %32 = arith.addf %22, %31 : vector<32x512xf32>
    %c3 = arith.constant 3 : index
    %c0_18 = arith.constant 0 : index
    %c0_19 = arith.constant 0 : index
    %33 = vector.load %arg3[%c3, %c0_18, %c0_19] : memref<9x32x1xf32, #tpu.memory_space<vmem>>, vector<1x32x1xf32>
    %34 = vector.shape_cast %33 : vector<1x32x1xf32> to vector<32x1xf32>
    %c1_i32 = arith.constant 1 : i32
    %35 = tpu.dynamic_rotate %1 by %c1_i32 dim 1 : vector<1x512xf32>, i32 -> vector<1x512xf32>
    %c3_20 = arith.constant 3 : index
    %c0_21 = arith.constant 0 : index
    %c0_22 = arith.constant 0 : index
    %36 = vector.load %arg2[%c3_20, %c0_21, %c0_22] : memref<9x1x512xf32, #tpu.memory_space<vmem>>, vector<1x1x512xf32>
    %37 = vector.shape_cast %36 : vector<1x1x512xf32> to vector<1x512xf32>
    %38 = arith.mulf %35, %37 : vector<1x512xf32>
    %39 = vector.broadcast %34 : vector<32x1xf32> to vector<32x512xf32>
    %40 = vector.broadcast %38 : vector<1x512xf32> to vector<32x512xf32>
    %41 = arith.mulf %39, %40 : vector<32x512xf32>
    %42 = arith.addf %32, %41 : vector<32x512xf32>
    %c4 = arith.constant 4 : index
    %c0_23 = arith.constant 0 : index
    %c0_24 = arith.constant 0 : index
    %43 = vector.load %arg3[%c4, %c0_23, %c0_24] : memref<9x32x1xf32, #tpu.memory_space<vmem>>, vector<1x32x1xf32>
    %44 = vector.shape_cast %43 : vector<1x32x1xf32> to vector<32x1xf32>
    %45 = vector.broadcast %44 : vector<32x1xf32> to vector<32x512xf32>
    %46 = vector.broadcast %1 : vector<1x512xf32> to vector<32x512xf32>
    %47 = arith.mulf %45, %46 : vector<32x512xf32>
    %48 = arith.addf %42, %47 : vector<32x512xf32>
    %c5 = arith.constant 5 : index
    %c0_25 = arith.constant 0 : index
    %c0_26 = arith.constant 0 : index
    %49 = vector.load %arg3[%c5, %c0_25, %c0_26] : memref<9x32x1xf32, #tpu.memory_space<vmem>>, vector<1x32x1xf32>
    %50 = vector.shape_cast %49 : vector<1x32x1xf32> to vector<32x1xf32>
    %c511_i32 = arith.constant 511 : i32
    %51 = tpu.dynamic_rotate %1 by %c511_i32 dim 1 : vector<1x512xf32>, i32 -> vector<1x512xf32>
    %c5_27 = arith.constant 5 : index
    %c0_28 = arith.constant 0 : index
    %c0_29 = arith.constant 0 : index
    %52 = vector.load %arg2[%c5_27, %c0_28, %c0_29] : memref<9x1x512xf32, #tpu.memory_space<vmem>>, vector<1x1x512xf32>
    %53 = vector.shape_cast %52 : vector<1x1x512xf32> to vector<1x512xf32>
    %54 = arith.mulf %51, %53 : vector<1x512xf32>
    %55 = vector.broadcast %50 : vector<32x1xf32> to vector<32x512xf32>
    %56 = vector.broadcast %54 : vector<1x512xf32> to vector<32x512xf32>
    %57 = arith.mulf %55, %56 : vector<32x512xf32>
    %58 = arith.addf %48, %57 : vector<32x512xf32>
    %c6 = arith.constant 6 : index
    %c0_30 = arith.constant 0 : index
    %c0_31 = arith.constant 0 : index
    %59 = vector.load %arg3[%c6, %c0_30, %c0_31] : memref<9x32x1xf32, #tpu.memory_space<vmem>>, vector<1x32x1xf32>
    %60 = vector.shape_cast %59 : vector<1x32x1xf32> to vector<32x1xf32>
    %c497_i32 = arith.constant 497 : i32
    %61 = tpu.dynamic_rotate %1 by %c497_i32 dim 1 : vector<1x512xf32>, i32 -> vector<1x512xf32>
    %c6_32 = arith.constant 6 : index
    %c0_33 = arith.constant 0 : index
    %c0_34 = arith.constant 0 : index
    %62 = vector.load %arg2[%c6_32, %c0_33, %c0_34] : memref<9x1x512xf32, #tpu.memory_space<vmem>>, vector<1x1x512xf32>
    %63 = vector.shape_cast %62 : vector<1x1x512xf32> to vector<1x512xf32>
    %64 = arith.mulf %61, %63 : vector<1x512xf32>
    %65 = vector.broadcast %60 : vector<32x1xf32> to vector<32x512xf32>
    %66 = vector.broadcast %64 : vector<1x512xf32> to vector<32x512xf32>
    %67 = arith.mulf %65, %66 : vector<32x512xf32>
    %68 = arith.addf %58, %67 : vector<32x512xf32>
    %c7 = arith.constant 7 : index
    %c0_35 = arith.constant 0 : index
    %c0_36 = arith.constant 0 : index
    %69 = vector.load %arg3[%c7, %c0_35, %c0_36] : memref<9x32x1xf32, #tpu.memory_space<vmem>>, vector<1x32x1xf32>
    %70 = vector.shape_cast %69 : vector<1x32x1xf32> to vector<32x1xf32>
    %c496_i32 = arith.constant 496 : i32
    %71 = tpu.dynamic_rotate %1 by %c496_i32 dim 1 : vector<1x512xf32>, i32 -> vector<1x512xf32>
    %c7_37 = arith.constant 7 : index
    %c0_38 = arith.constant 0 : index
    %c0_39 = arith.constant 0 : index
    %72 = vector.load %arg2[%c7_37, %c0_38, %c0_39] : memref<9x1x512xf32, #tpu.memory_space<vmem>>, vector<1x1x512xf32>
    %73 = vector.shape_cast %72 : vector<1x1x512xf32> to vector<1x512xf32>
    %74 = arith.mulf %71, %73 : vector<1x512xf32>
    %75 = vector.broadcast %70 : vector<32x1xf32> to vector<32x512xf32>
    %76 = vector.broadcast %74 : vector<1x512xf32> to vector<32x512xf32>
    %77 = arith.mulf %75, %76 : vector<32x512xf32>
    %78 = arith.addf %68, %77 : vector<32x512xf32>
    %c8 = arith.constant 8 : index
    %c0_40 = arith.constant 0 : index
    %c0_41 = arith.constant 0 : index
    %79 = vector.load %arg3[%c8, %c0_40, %c0_41] : memref<9x32x1xf32, #tpu.memory_space<vmem>>, vector<1x32x1xf32>
    %80 = vector.shape_cast %79 : vector<1x32x1xf32> to vector<32x1xf32>
    %c495_i32 = arith.constant 495 : i32
    %81 = tpu.dynamic_rotate %1 by %c495_i32 dim 1 : vector<1x512xf32>, i32 -> vector<1x512xf32>
    %c8_42 = arith.constant 8 : index
    %c0_43 = arith.constant 0 : index
    %c0_44 = arith.constant 0 : index
    %82 = vector.load %arg2[%c8_42, %c0_43, %c0_44] : memref<9x1x512xf32, #tpu.memory_space<vmem>>, vector<1x1x512xf32>
    %83 = vector.shape_cast %82 : vector<1x1x512xf32> to vector<1x512xf32>
    %84 = arith.mulf %81, %83 : vector<1x512xf32>
    %85 = vector.broadcast %80 : vector<32x1xf32> to vector<32x512xf32>
    %86 = vector.broadcast %84 : vector<1x512xf32> to vector<32x512xf32>
    %87 = arith.mulf %85, %86 : vector<32x512xf32>
    %88 = arith.addf %78, %87 : vector<32x512xf32>
    %cst_45 = arith.constant 0.000000e+00 : f32
    %89 = vector.broadcast %cst_45 : f32 to vector<32x512xf32>
    %90 = arith.maximumf %88, %89 : vector<32x512xf32>
    %c17_i32_46 = arith.constant 17 : i32
    %91 = tpu.dynamic_rotate %90 by %c17_i32_46 dim 1 : vector<32x512xf32>, i32 -> vector<32x512xf32>
    %c0_47 = arith.constant 0 : index
    %c0_48 = arith.constant 0 : index
    %c0_49 = arith.constant 0 : index
    %92 = vector.load %arg2[%c0_47, %c0_48, %c0_49] : memref<9x1x512xf32, #tpu.memory_space<vmem>>, vector<1x1x512xf32>
    %93 = vector.shape_cast %92 : vector<1x1x512xf32> to vector<1x512xf32>
    %94 = vector.broadcast %93 : vector<1x512xf32> to vector<32x512xf32>
    %95 = arith.mulf %91, %94 : vector<32x512xf32>
    %c0_50 = arith.constant 0 : index
    %c0_51 = arith.constant 0 : index
    %96 = vector.load %arg8[%c0_50, %c0_51] : memref<288x512xf32, #tpu.memory_space<vmem>>, vector<32x512xf32>
    tpu.vector_store %arg8[%c0_50, %c0_51], %95 {strides = array<i32>} : memref<288x512xf32, #tpu.memory_space<vmem>>, vector<32x512xf32>,
    %c16_i32_52 = arith.constant 16 : i32
    %97 = tpu.dynamic_rotate %90 by %c16_i32_52 dim 1 : vector<32x512xf32>, i32 -> vector<32x512xf32>
    %c1_53 = arith.constant 1 : index
    %c0_54 = arith.constant 0 : index
    %c0_55 = arith.constant 0 : index
    %98 = vector.load %arg2[%c1_53, %c0_54, %c0_55] : memref<9x1x512xf32, #tpu.memory_space<vmem>>, vector<1x1x512xf32>
    %99 = vector.shape_cast %98 : vector<1x1x512xf32> to vector<1x512xf32>
    %100 = vector.broadcast %99 : vector<1x512xf32> to vector<32x512xf32>
    %101 = arith.mulf %97, %100 : vector<32x512xf32>
    %c32 = arith.constant 32 : index
    %c0_56 = arith.constant 0 : index
    %102 = vector.load %arg8[%c32, %c0_56] : memref<288x512xf32, #tpu.memory_space<vmem>>, vector<32x512xf32>
    tpu.vector_store %arg8[%c32, %c0_56], %101 {strides = array<i32>} : memref<288x512xf32, #tpu.memory_space<vmem>>, vector<32x512xf32>,
    %c15_i32_57 = arith.constant 15 : i32
    %103 = tpu.dynamic_rotate %90 by %c15_i32_57 dim 1 : vector<32x512xf32>, i32 -> vector<32x512xf32>
    %c2_58 = arith.constant 2 : index
    %c0_59 = arith.constant 0 : index
    %c0_60 = arith.constant 0 : index
    %104 = vector.load %arg2[%c2_58, %c0_59, %c0_60] : memref<9x1x512xf32, #tpu.memory_space<vmem>>, vector<1x1x512xf32>
    %105 = vector.shape_cast %104 : vector<1x1x512xf32> to vector<1x512xf32>
    %106 = vector.broadcast %105 : vector<1x512xf32> to vector<32x512xf32>
    %107 = arith.mulf %103, %106 : vector<32x512xf32>
    %c64 = arith.constant 64 : index
    %c0_61 = arith.constant 0 : index
    %108 = vector.load %arg8[%c64, %c0_61] : memref<288x512xf32, #tpu.memory_space<vmem>>, vector<32x512xf32>
    tpu.vector_store %arg8[%c64, %c0_61], %107 {strides = array<i32>} : memref<288x512xf32, #tpu.memory_space<vmem>>, vector<32x512xf32>,
    %c1_i32_62 = arith.constant 1 : i32
    %109 = tpu.dynamic_rotate %90 by %c1_i32_62 dim 1 : vector<32x512xf32>, i32 -> vector<32x512xf32>
    %c3_63 = arith.constant 3 : index
    %c0_64 = arith.constant 0 : index
    %c0_65 = arith.constant 0 : index
    %110 = vector.load %arg2[%c3_63, %c0_64, %c0_65] : memref<9x1x512xf32, #tpu.memory_space<vmem>>, vector<1x1x512xf32>
    %111 = vector.shape_cast %110 : vector<1x1x512xf32> to vector<1x512xf32>
    %112 = vector.broadcast %111 : vector<1x512xf32> to vector<32x512xf32>
    %113 = arith.mulf %109, %112 : vector<32x512xf32>
    %c96 = arith.constant 96 : index
    %c0_66 = arith.constant 0 : index
    %114 = vector.load %arg8[%c96, %c0_66] : memref<288x512xf32, #tpu.memory_space<vmem>>, vector<32x512xf32>
    tpu.vector_store %arg8[%c96, %c0_66], %113 {strides = array<i32>} : memref<288x512xf32, #tpu.memory_space<vmem>>, vector<32x512xf32>,
    %c128 = arith.constant 128 : index
    %c0_67 = arith.constant 0 : index
    %115 = vector.load %arg8[%c128, %c0_67] : memref<288x512xf32, #tpu.memory_space<vmem>>, vector<32x512xf32>
    tpu.vector_store %arg8[%c128, %c0_67], %90 {strides = array<i32>} : memref<288x512xf32, #tpu.memory_space<vmem>>, vector<32x512xf32>,
    %c511_i32_68 = arith.constant 511 : i32
    %116 = tpu.dynamic_rotate %90 by %c511_i32_68 dim 1 : vector<32x512xf32>, i32 -> vector<32x512xf32>
    %c5_69 = arith.constant 5 : index
    %c0_70 = arith.constant 0 : index
    %c0_71 = arith.constant 0 : index
    %117 = vector.load %arg2[%c5_69, %c0_70, %c0_71] : memref<9x1x512xf32, #tpu.memory_space<vmem>>, vector<1x1x512xf32>
    %118 = vector.shape_cast %117 : vector<1x1x512xf32> to vector<1x512xf32>
    %119 = vector.broadcast %118 : vector<1x512xf32> to vector<32x512xf32>
    %120 = arith.mulf %116, %119 : vector<32x512xf32>
    %c160 = arith.constant 160 : index
    %c0_72 = arith.constant 0 : index
    %121 = vector.load %arg8[%c160, %c0_72] : memref<288x512xf32, #tpu.memory_space<vmem>>, vector<32x512xf32>
    tpu.vector_store %arg8[%c160, %c0_72], %120 {strides = array<i32>} : memref<288x512xf32, #tpu.memory_space<vmem>>, vector<32x512xf32>,
    %c497_i32_73 = arith.constant 497 : i32
    %122 = tpu.dynamic_rotate %90 by %c497_i32_73 dim 1 : vector<32x512xf32>, i32 -> vector<32x512xf32>
    %c6_74 = arith.constant 6 : index
    %c0_75 = arith.constant 0 : index
    %c0_76 = arith.constant 0 : index
    %123 = vector.load %arg2[%c6_74, %c0_75, %c0_76] : memref<9x1x512xf32, #tpu.memory_space<vmem>>, vector<1x1x512xf32>
    %124 = vector.shape_cast %123 : vector<1x1x512xf32> to vector<1x512xf32>
    %125 = vector.broadcast %124 : vector<1x512xf32> to vector<32x512xf32>
    %126 = arith.mulf %122, %125 : vector<32x512xf32>
    %c192 = arith.constant 192 : index
    %c0_77 = arith.constant 0 : index
    %127 = vector.load %arg8[%c192, %c0_77] : memref<288x512xf32, #tpu.memory_space<vmem>>, vector<32x512xf32>
    tpu.vector_store %arg8[%c192, %c0_77], %126 {strides = array<i32>} : memref<288x512xf32, #tpu.memory_space<vmem>>, vector<32x512xf32>,
    %c496_i32_78 = arith.constant 496 : i32
    %128 = tpu.dynamic_rotate %90 by %c496_i32_78 dim 1 : vector<32x512xf32>, i32 -> vector<32x512xf32>
    %c7_79 = arith.constant 7 : index
    %c0_80 = arith.constant 0 : index
    %c0_81 = arith.constant 0 : index
    %129 = vector.load %arg2[%c7_79, %c0_80, %c0_81] : memref<9x1x512xf32, #tpu.memory_space<vmem>>, vector<1x1x512xf32>
    %130 = vector.shape_cast %129 : vector<1x1x512xf32> to vector<1x512xf32>
    %131 = vector.broadcast %130 : vector<1x512xf32> to vector<32x512xf32>
    %132 = arith.mulf %128, %131 : vector<32x512xf32>
    %c224 = arith.constant 224 : index
    %c0_82 = arith.constant 0 : index
    %133 = vector.load %arg8[%c224, %c0_82] : memref<288x512xf32, #tpu.memory_space<vmem>>, vector<32x512xf32>
    tpu.vector_store %arg8[%c224, %c0_82], %132 {strides = array<i32>} : memref<288x512xf32, #tpu.memory_space<vmem>>, vector<32x512xf32>,
    %c495_i32_83 = arith.constant 495 : i32
    %134 = tpu.dynamic_rotate %90 by %c495_i32_83 dim 1 : vector<32x512xf32>, i32 -> vector<32x512xf32>
    %c8_84 = arith.constant 8 : index
    %c0_85 = arith.constant 0 : index
    %c0_86 = arith.constant 0 : index
    %135 = vector.load %arg2[%c8_84, %c0_85, %c0_86] : memref<9x1x512xf32, #tpu.memory_space<vmem>>, vector<1x1x512xf32>
    %136 = vector.shape_cast %135 : vector<1x1x512xf32> to vector<1x512xf32>
    %137 = vector.broadcast %136 : vector<1x512xf32> to vector<32x512xf32>
    %138 = arith.mulf %134, %137 : vector<32x512xf32>
    %c256 = arith.constant 256 : index
    %c0_87 = arith.constant 0 : index
    %139 = vector.load %arg8[%c256, %c0_87] : memref<288x512xf32, #tpu.memory_space<vmem>>, vector<32x512xf32>
    tpu.vector_store %arg8[%c256, %c0_87], %138 {strides = array<i32>} : memref<288x512xf32, #tpu.memory_space<vmem>>, vector<32x512xf32>,
    %c0_88 = arith.constant 0 : index
    %c0_89 = arith.constant 0 : index
    %c0_90 = arith.constant 0 : index
    %140 = vector.load %arg4[%c0_88, %c0_89, %c0_90] : memref<3x32x288xf32, #tpu.memory_space<vmem>>, vector<1x32x288xf32>
    %141 = vector.shape_cast %140 : vector<1x32x288xf32> to vector<32x288xf32>
    %c0_91 = arith.constant 0 : index
    %c0_92 = arith.constant 0 : index
    %142 = vector.load %arg8[%c0_91, %c0_92] : memref<288x512xf32, #tpu.memory_space<vmem>>, vector<288x512xf32>
    %cst_93 = arith.constant dense<0.000000e+00> : vector<32x512xf32>
    %143 = tpu.matmul %141, %142, %cst_93 {dimension_numbers = #tpu.dot_dimension_numbers<[1], [0], [0], [1], [0, 0, 1, 1], [], []>} : vector<32x288xf32>, vector<288x512xf32>, vector<32x512xf32> -> vector<32x512xf32>
    %c0_94 = arith.constant 0 : index
    %c0_95 = arith.constant 0 : index
    %c0_96 = arith.constant 0 : index
    %144 = vector.load %arg5[%c0_94, %c0_95, %c0_96] : memref<3x32x1xf32, #tpu.memory_space<vmem>>, vector<1x32x1xf32>
    %145 = vector.shape_cast %144 : vector<1x32x1xf32> to vector<32x1xf32>
    %146 = vector.broadcast %145 : vector<32x1xf32> to vector<32x512xf32>
    %147 = arith.addf %143, %146 : vector<32x512xf32>
    %cst_97 = arith.constant 0.000000e+00 : f32
    %148 = vector.broadcast %cst_97 : f32 to vector<32x512xf32>
    %149 = arith.maximumf %147, %148 : vector<32x512xf32>
    %c17_i32_98 = arith.constant 17 : i32
    %150 = tpu.dynamic_rotate %149 by %c17_i32_98 dim 1 : vector<32x512xf32>, i32 -> vector<32x512xf32>
    %c0_99 = arith.constant 0 : index
    %c0_100 = arith.constant 0 : index
    %c0_101 = arith.constant 0 : index
    %151 = vector.load %arg2[%c0_99, %c0_100, %c0_101] : memref<9x1x512xf32, #tpu.memory_space<vmem>>, vector<1x1x512xf32>
    %152 = vector.shape_cast %151 : vector<1x1x512xf32> to vector<1x512xf32>
    %153 = vector.broadcast %152 : vector<1x512xf32> to vector<32x512xf32>
    %154 = arith.mulf %150, %153 : vector<32x512xf32>
    %c0_102 = arith.constant 0 : index
    %c0_103 = arith.constant 0 : index
    %155 = vector.load %arg8[%c0_102, %c0_103] : memref<288x512xf32, #tpu.memory_space<vmem>>, vector<32x512xf32>
    tpu.vector_store %arg8[%c0_102, %c0_103], %154 {strides = array<i32>} : memref<288x512xf32, #tpu.memory_space<vmem>>, vector<32x512xf32>,
    %c16_i32_104 = arith.constant 16 : i32
    %156 = tpu.dynamic_rotate %149 by %c16_i32_104 dim 1 : vector<32x512xf32>, i32 -> vector<32x512xf32>
    %c1_105 = arith.constant 1 : index
    %c0_106 = arith.constant 0 : index
    %c0_107 = arith.constant 0 : index
    %157 = vector.load %arg2[%c1_105, %c0_106, %c0_107] : memref<9x1x512xf32, #tpu.memory_space<vmem>>, vector<1x1x512xf32>
    %158 = vector.shape_cast %157 : vector<1x1x512xf32> to vector<1x512xf32>
    %159 = vector.broadcast %158 : vector<1x512xf32> to vector<32x512xf32>
    %160 = arith.mulf %156, %159 : vector<32x512xf32>
    %c32_108 = arith.constant 32 : index
    %c0_109 = arith.constant 0 : index
    %161 = vector.load %arg8[%c32_108, %c0_109] : memref<288x512xf32, #tpu.memory_space<vmem>>, vector<32x512xf32>
    tpu.vector_store %arg8[%c32_108, %c0_109], %160 {strides = array<i32>} : memref<288x512xf32, #tpu.memory_space<vmem>>, vector<32x512xf32>,
    %c15_i32_110 = arith.constant 15 : i32
    %162 = tpu.dynamic_rotate %149 by %c15_i32_110 dim 1 : vector<32x512xf32>, i32 -> vector<32x512xf32>
    %c2_111 = arith.constant 2 : index
    %c0_112 = arith.constant 0 : index
    %c0_113 = arith.constant 0 : index
    %163 = vector.load %arg2[%c2_111, %c0_112, %c0_113] : memref<9x1x512xf32, #tpu.memory_space<vmem>>, vector<1x1x512xf32>
    %164 = vector.shape_cast %163 : vector<1x1x512xf32> to vector<1x512xf32>
    %165 = vector.broadcast %164 : vector<1x512xf32> to vector<32x512xf32>
    %166 = arith.mulf %162, %165 : vector<32x512xf32>
    %c64_114 = arith.constant 64 : index
    %c0_115 = arith.constant 0 : index
    %167 = vector.load %arg8[%c64_114, %c0_115] : memref<288x512xf32, #tpu.memory_space<vmem>>, vector<32x512xf32>
    tpu.vector_store %arg8[%c64_114, %c0_115], %166 {strides = array<i32>} : memref<288x512xf32, #tpu.memory_space<vmem>>, vector<32x512xf32>,
    %c1_i32_116 = arith.constant 1 : i32
    %168 = tpu.dynamic_rotate %149 by %c1_i32_116 dim 1 : vector<32x512xf32>, i32 -> vector<32x512xf32>
    %c3_117 = arith.constant 3 : index
    %c0_118 = arith.constant 0 : index
    %c0_119 = arith.constant 0 : index
    %169 = vector.load %arg2[%c3_117, %c0_118, %c0_119] : memref<9x1x512xf32, #tpu.memory_space<vmem>>, vector<1x1x512xf32>
    %170 = vector.shape_cast %169 : vector<1x1x512xf32> to vector<1x512xf32>
    %171 = vector.broadcast %170 : vector<1x512xf32> to vector<32x512xf32>
    %172 = arith.mulf %168, %171 : vector<32x512xf32>
    %c96_120 = arith.constant 96 : index
    %c0_121 = arith.constant 0 : index
    %173 = vector.load %arg8[%c96_120, %c0_121] : memref<288x512xf32, #tpu.memory_space<vmem>>, vector<32x512xf32>
    tpu.vector_store %arg8[%c96_120, %c0_121], %172 {strides = array<i32>} : memref<288x512xf32, #tpu.memory_space<vmem>>, vector<32x512xf32>,
    %c128_122 = arith.constant 128 : index
    %c0_123 = arith.constant 0 : index
    %174 = vector.load %arg8[%c128_122, %c0_123] : memref<288x512xf32, #tpu.memory_space<vmem>>, vector<32x512xf32>
    tpu.vector_store %arg8[%c128_122, %c0_123], %149 {strides = array<i32>} : memref<288x512xf32, #tpu.memory_space<vmem>>, vector<32x512xf32>,
    %c511_i32_124 = arith.constant 511 : i32
    %175 = tpu.dynamic_rotate %149 by %c511_i32_124 dim 1 : vector<32x512xf32>, i32 -> vector<32x512xf32>
    %c5_125 = arith.constant 5 : index
    %c0_126 = arith.constant 0 : index
    %c0_127 = arith.constant 0 : index
    %176 = vector.load %arg2[%c5_125, %c0_126, %c0_127] : memref<9x1x512xf32, #tpu.memory_space<vmem>>, vector<1x1x512xf32>
    %177 = vector.shape_cast %176 : vector<1x1x512xf32> to vector<1x512xf32>
    %178 = vector.broadcast %177 : vector<1x512xf32> to vector<32x512xf32>
    %179 = arith.mulf %175, %178 : vector<32x512xf32>
    %c160_128 = arith.constant 160 : index
    %c0_129 = arith.constant 0 : index
    %180 = vector.load %arg8[%c160_128, %c0_129] : memref<288x512xf32, #tpu.memory_space<vmem>>, vector<32x512xf32>
    tpu.vector_store %arg8[%c160_128, %c0_129], %179 {strides = array<i32>} : memref<288x512xf32, #tpu.memory_space<vmem>>, vector<32x512xf32>,
    %c497_i32_130 = arith.constant 497 : i32
    %181 = tpu.dynamic_rotate %149 by %c497_i32_130 dim 1 : vector<32x512xf32>, i32 -> vector<32x512xf32>
    %c6_131 = arith.constant 6 : index
    %c0_132 = arith.constant 0 : index
    %c0_133 = arith.constant 0 : index
    %182 = vector.load %arg2[%c6_131, %c0_132, %c0_133] : memref<9x1x512xf32, #tpu.memory_space<vmem>>, vector<1x1x512xf32>
    %183 = vector.shape_cast %182 : vector<1x1x512xf32> to vector<1x512xf32>
    %184 = vector.broadcast %183 : vector<1x512xf32> to vector<32x512xf32>
    %185 = arith.mulf %181, %184 : vector<32x512xf32>
    %c192_134 = arith.constant 192 : index
    %c0_135 = arith.constant 0 : index
    %186 = vector.load %arg8[%c192_134, %c0_135] : memref<288x512xf32, #tpu.memory_space<vmem>>, vector<32x512xf32>
    tpu.vector_store %arg8[%c192_134, %c0_135], %185 {strides = array<i32>} : memref<288x512xf32, #tpu.memory_space<vmem>>, vector<32x512xf32>,
    %c496_i32_136 = arith.constant 496 : i32
    %187 = tpu.dynamic_rotate %149 by %c496_i32_136 dim 1 : vector<32x512xf32>, i32 -> vector<32x512xf32>
    %c7_137 = arith.constant 7 : index
    %c0_138 = arith.constant 0 : index
    %c0_139 = arith.constant 0 : index
    %188 = vector.load %arg2[%c7_137, %c0_138, %c0_139] : memref<9x1x512xf32, #tpu.memory_space<vmem>>, vector<1x1x512xf32>
    %189 = vector.shape_cast %188 : vector<1x1x512xf32> to vector<1x512xf32>
    %190 = vector.broadcast %189 : vector<1x512xf32> to vector<32x512xf32>
    %191 = arith.mulf %187, %190 : vector<32x512xf32>
    %c224_140 = arith.constant 224 : index
    %c0_141 = arith.constant 0 : index
    %192 = vector.load %arg8[%c224_140, %c0_141] : memref<288x512xf32, #tpu.memory_space<vmem>>, vector<32x512xf32>
    tpu.vector_store %arg8[%c224_140, %c0_141], %191 {strides = array<i32>} : memref<288x512xf32, #tpu.memory_space<vmem>>, vector<32x512xf32>,
    %c495_i32_142 = arith.constant 495 : i32
    %193 = tpu.dynamic_rotate %149 by %c495_i32_142 dim 1 : vector<32x512xf32>, i32 -> vector<32x512xf32>
    %c8_143 = arith.constant 8 : index
    %c0_144 = arith.constant 0 : index
    %c0_145 = arith.constant 0 : index
    %194 = vector.load %arg2[%c8_143, %c0_144, %c0_145] : memref<9x1x512xf32, #tpu.memory_space<vmem>>, vector<1x1x512xf32>
    %195 = vector.shape_cast %194 : vector<1x1x512xf32> to vector<1x512xf32>
    %196 = vector.broadcast %195 : vector<1x512xf32> to vector<32x512xf32>
    %197 = arith.mulf %193, %196 : vector<32x512xf32>
    %c256_146 = arith.constant 256 : index
    %c0_147 = arith.constant 0 : index
    %198 = vector.load %arg8[%c256_146, %c0_147] : memref<288x512xf32, #tpu.memory_space<vmem>>, vector<32x512xf32>
    tpu.vector_store %arg8[%c256_146, %c0_147], %197 {strides = array<i32>} : memref<288x512xf32, #tpu.memory_space<vmem>>, vector<32x512xf32>,
    %c1_148 = arith.constant 1 : index
    %c0_149 = arith.constant 0 : index
    %c0_150 = arith.constant 0 : index
    %199 = vector.load %arg4[%c1_148, %c0_149, %c0_150] : memref<3x32x288xf32, #tpu.memory_space<vmem>>, vector<1x32x288xf32>
    %200 = vector.shape_cast %199 : vector<1x32x288xf32> to vector<32x288xf32>
    %c0_151 = arith.constant 0 : index
    %c0_152 = arith.constant 0 : index
    %201 = vector.load %arg8[%c0_151, %c0_152] : memref<288x512xf32, #tpu.memory_space<vmem>>, vector<288x512xf32>
    %cst_153 = arith.constant dense<0.000000e+00> : vector<32x512xf32>
    %202 = tpu.matmul %200, %201, %cst_153 {dimension_numbers = #tpu.dot_dimension_numbers<[1], [0], [0], [1], [0, 0, 1, 1], [], []>} : vector<32x288xf32>, vector<288x512xf32>, vector<32x512xf32> -> vector<32x512xf32>
    %c1_154 = arith.constant 1 : index
    %c0_155 = arith.constant 0 : index
    %c0_156 = arith.constant 0 : index
    %203 = vector.load %arg5[%c1_154, %c0_155, %c0_156] : memref<3x32x1xf32, #tpu.memory_space<vmem>>, vector<1x32x1xf32>
    %204 = vector.shape_cast %203 : vector<1x32x1xf32> to vector<32x1xf32>
    %205 = vector.broadcast %204 : vector<32x1xf32> to vector<32x512xf32>
    %206 = arith.addf %202, %205 : vector<32x512xf32>
    %cst_157 = arith.constant 0.000000e+00 : f32
    %207 = vector.broadcast %cst_157 : f32 to vector<32x512xf32>
    %208 = arith.maximumf %206, %207 : vector<32x512xf32>
    %c17_i32_158 = arith.constant 17 : i32
    %209 = tpu.dynamic_rotate %208 by %c17_i32_158 dim 1 : vector<32x512xf32>, i32 -> vector<32x512xf32>
    %c0_159 = arith.constant 0 : index
    %c0_160 = arith.constant 0 : index
    %c0_161 = arith.constant 0 : index
    %210 = vector.load %arg2[%c0_159, %c0_160, %c0_161] : memref<9x1x512xf32, #tpu.memory_space<vmem>>, vector<1x1x512xf32>
    %211 = vector.shape_cast %210 : vector<1x1x512xf32> to vector<1x512xf32>
    %212 = vector.broadcast %211 : vector<1x512xf32> to vector<32x512xf32>
    %213 = arith.mulf %209, %212 : vector<32x512xf32>
    %c0_162 = arith.constant 0 : index
    %c0_163 = arith.constant 0 : index
    %214 = vector.load %arg8[%c0_162, %c0_163] : memref<288x512xf32, #tpu.memory_space<vmem>>, vector<32x512xf32>
    tpu.vector_store %arg8[%c0_162, %c0_163], %213 {strides = array<i32>} : memref<288x512xf32, #tpu.memory_space<vmem>>, vector<32x512xf32>,
    %c16_i32_164 = arith.constant 16 : i32
    %215 = tpu.dynamic_rotate %208 by %c16_i32_164 dim 1 : vector<32x512xf32>, i32 -> vector<32x512xf32>
    %c1_165 = arith.constant 1 : index
    %c0_166 = arith.constant 0 : index
    %c0_167 = arith.constant 0 : index
    %216 = vector.load %arg2[%c1_165, %c0_166, %c0_167] : memref<9x1x512xf32, #tpu.memory_space<vmem>>, vector<1x1x512xf32>
    %217 = vector.shape_cast %216 : vector<1x1x512xf32> to vector<1x512xf32>
    %218 = vector.broadcast %217 : vector<1x512xf32> to vector<32x512xf32>
    %219 = arith.mulf %215, %218 : vector<32x512xf32>
    %c32_168 = arith.constant 32 : index
    %c0_169 = arith.constant 0 : index
    %220 = vector.load %arg8[%c32_168, %c0_169] : memref<288x512xf32, #tpu.memory_space<vmem>>, vector<32x512xf32>
    tpu.vector_store %arg8[%c32_168, %c0_169], %219 {strides = array<i32>} : memref<288x512xf32, #tpu.memory_space<vmem>>, vector<32x512xf32>,
    %c15_i32_170 = arith.constant 15 : i32
    %221 = tpu.dynamic_rotate %208 by %c15_i32_170 dim 1 : vector<32x512xf32>, i32 -> vector<32x512xf32>
    %c2_171 = arith.constant 2 : index
    %c0_172 = arith.constant 0 : index
    %c0_173 = arith.constant 0 : index
    %222 = vector.load %arg2[%c2_171, %c0_172, %c0_173] : memref<9x1x512xf32, #tpu.memory_space<vmem>>, vector<1x1x512xf32>
    %223 = vector.shape_cast %222 : vector<1x1x512xf32> to vector<1x512xf32>
    %224 = vector.broadcast %223 : vector<1x512xf32> to vector<32x512xf32>
    %225 = arith.mulf %221, %224 : vector<32x512xf32>
    %c64_174 = arith.constant 64 : index
    %c0_175 = arith.constant 0 : index
    %226 = vector.load %arg8[%c64_174, %c0_175] : memref<288x512xf32, #tpu.memory_space<vmem>>, vector<32x512xf32>
    tpu.vector_store %arg8[%c64_174, %c0_175], %225 {strides = array<i32>} : memref<288x512xf32, #tpu.memory_space<vmem>>, vector<32x512xf32>,
    %c1_i32_176 = arith.constant 1 : i32
    %227 = tpu.dynamic_rotate %208 by %c1_i32_176 dim 1 : vector<32x512xf32>, i32 -> vector<32x512xf32>
    %c3_177 = arith.constant 3 : index
    %c0_178 = arith.constant 0 : index
    %c0_179 = arith.constant 0 : index
    %228 = vector.load %arg2[%c3_177, %c0_178, %c0_179] : memref<9x1x512xf32, #tpu.memory_space<vmem>>, vector<1x1x512xf32>
    %229 = vector.shape_cast %228 : vector<1x1x512xf32> to vector<1x512xf32>
    %230 = vector.broadcast %229 : vector<1x512xf32> to vector<32x512xf32>
    %231 = arith.mulf %227, %230 : vector<32x512xf32>
    %c96_180 = arith.constant 96 : index
    %c0_181 = arith.constant 0 : index
    %232 = vector.load %arg8[%c96_180, %c0_181] : memref<288x512xf32, #tpu.memory_space<vmem>>, vector<32x512xf32>
    tpu.vector_store %arg8[%c96_180, %c0_181], %231 {strides = array<i32>} : memref<288x512xf32, #tpu.memory_space<vmem>>, vector<32x512xf32>,
    %c128_182 = arith.constant 128 : index
    %c0_183 = arith.constant 0 : index
    %233 = vector.load %arg8[%c128_182, %c0_183] : memref<288x512xf32, #tpu.memory_space<vmem>>, vector<32x512xf32>
    tpu.vector_store %arg8[%c128_182, %c0_183], %208 {strides = array<i32>} : memref<288x512xf32, #tpu.memory_space<vmem>>, vector<32x512xf32>,
    %c511_i32_184 = arith.constant 511 : i32
    %234 = tpu.dynamic_rotate %208 by %c511_i32_184 dim 1 : vector<32x512xf32>, i32 -> vector<32x512xf32>
    %c5_185 = arith.constant 5 : index
    %c0_186 = arith.constant 0 : index
    %c0_187 = arith.constant 0 : index
    %235 = vector.load %arg2[%c5_185, %c0_186, %c0_187] : memref<9x1x512xf32, #tpu.memory_space<vmem>>, vector<1x1x512xf32>
    %236 = vector.shape_cast %235 : vector<1x1x512xf32> to vector<1x512xf32>
    %237 = vector.broadcast %236 : vector<1x512xf32> to vector<32x512xf32>
    %238 = arith.mulf %234, %237 : vector<32x512xf32>
    %c160_188 = arith.constant 160 : index
    %c0_189 = arith.constant 0 : index
    %239 = vector.load %arg8[%c160_188, %c0_189] : memref<288x512xf32, #tpu.memory_space<vmem>>, vector<32x512xf32>
    tpu.vector_store %arg8[%c160_188, %c0_189], %238 {strides = array<i32>} : memref<288x512xf32, #tpu.memory_space<vmem>>, vector<32x512xf32>,
    %c497_i32_190 = arith.constant 497 : i32
    %240 = tpu.dynamic_rotate %208 by %c497_i32_190 dim 1 : vector<32x512xf32>, i32 -> vector<32x512xf32>
    %c6_191 = arith.constant 6 : index
    %c0_192 = arith.constant 0 : index
    %c0_193 = arith.constant 0 : index
    %241 = vector.load %arg2[%c6_191, %c0_192, %c0_193] : memref<9x1x512xf32, #tpu.memory_space<vmem>>, vector<1x1x512xf32>
    %242 = vector.shape_cast %241 : vector<1x1x512xf32> to vector<1x512xf32>
    %243 = vector.broadcast %242 : vector<1x512xf32> to vector<32x512xf32>
    %244 = arith.mulf %240, %243 : vector<32x512xf32>
    %c192_194 = arith.constant 192 : index
    %c0_195 = arith.constant 0 : index
    %245 = vector.load %arg8[%c192_194, %c0_195] : memref<288x512xf32, #tpu.memory_space<vmem>>, vector<32x512xf32>
    tpu.vector_store %arg8[%c192_194, %c0_195], %244 {strides = array<i32>} : memref<288x512xf32, #tpu.memory_space<vmem>>, vector<32x512xf32>,
    %c496_i32_196 = arith.constant 496 : i32
    %246 = tpu.dynamic_rotate %208 by %c496_i32_196 dim 1 : vector<32x512xf32>, i32 -> vector<32x512xf32>
    %c7_197 = arith.constant 7 : index
    %c0_198 = arith.constant 0 : index
    %c0_199 = arith.constant 0 : index
    %247 = vector.load %arg2[%c7_197, %c0_198, %c0_199] : memref<9x1x512xf32, #tpu.memory_space<vmem>>, vector<1x1x512xf32>
    %248 = vector.shape_cast %247 : vector<1x1x512xf32> to vector<1x512xf32>
    %249 = vector.broadcast %248 : vector<1x512xf32> to vector<32x512xf32>
    %250 = arith.mulf %246, %249 : vector<32x512xf32>
    %c224_200 = arith.constant 224 : index
    %c0_201 = arith.constant 0 : index
    %251 = vector.load %arg8[%c224_200, %c0_201] : memref<288x512xf32, #tpu.memory_space<vmem>>, vector<32x512xf32>
    tpu.vector_store %arg8[%c224_200, %c0_201], %250 {strides = array<i32>} : memref<288x512xf32, #tpu.memory_space<vmem>>, vector<32x512xf32>,
    %c495_i32_202 = arith.constant 495 : i32
    %252 = tpu.dynamic_rotate %208 by %c495_i32_202 dim 1 : vector<32x512xf32>, i32 -> vector<32x512xf32>
    %c8_203 = arith.constant 8 : index
    %c0_204 = arith.constant 0 : index
    %c0_205 = arith.constant 0 : index
    %253 = vector.load %arg2[%c8_203, %c0_204, %c0_205] : memref<9x1x512xf32, #tpu.memory_space<vmem>>, vector<1x1x512xf32>
    %254 = vector.shape_cast %253 : vector<1x1x512xf32> to vector<1x512xf32>
    %255 = vector.broadcast %254 : vector<1x512xf32> to vector<32x512xf32>
    %256 = arith.mulf %252, %255 : vector<32x512xf32>
    %c256_206 = arith.constant 256 : index
    %c0_207 = arith.constant 0 : index
    %257 = vector.load %arg8[%c256_206, %c0_207] : memref<288x512xf32, #tpu.memory_space<vmem>>, vector<32x512xf32>
    tpu.vector_store %arg8[%c256_206, %c0_207], %256 {strides = array<i32>} : memref<288x512xf32, #tpu.memory_space<vmem>>, vector<32x512xf32>,
    %c2_208 = arith.constant 2 : index
    %c0_209 = arith.constant 0 : index
    %c0_210 = arith.constant 0 : index
    %258 = vector.load %arg4[%c2_208, %c0_209, %c0_210] : memref<3x32x288xf32, #tpu.memory_space<vmem>>, vector<1x32x288xf32>
    %259 = vector.shape_cast %258 : vector<1x32x288xf32> to vector<32x288xf32>
    %c0_211 = arith.constant 0 : index
    %c0_212 = arith.constant 0 : index
    %260 = vector.load %arg8[%c0_211, %c0_212] : memref<288x512xf32, #tpu.memory_space<vmem>>, vector<288x512xf32>
    %cst_213 = arith.constant dense<0.000000e+00> : vector<32x512xf32>
    %261 = tpu.matmul %259, %260, %cst_213 {dimension_numbers = #tpu.dot_dimension_numbers<[1], [0], [0], [1], [0, 0, 1, 1], [], []>} : vector<32x288xf32>, vector<288x512xf32>, vector<32x512xf32> -> vector<32x512xf32>
    %c2_214 = arith.constant 2 : index
    %c0_215 = arith.constant 0 : index
    %c0_216 = arith.constant 0 : index
    %262 = vector.load %arg5[%c2_214, %c0_215, %c0_216] : memref<3x32x1xf32, #tpu.memory_space<vmem>>, vector<1x32x1xf32>
    %263 = vector.shape_cast %262 : vector<1x32x1xf32> to vector<32x1xf32>
    %264 = vector.broadcast %263 : vector<32x1xf32> to vector<32x512xf32>
    %265 = arith.addf %261, %264 : vector<32x512xf32>
    %cst_217 = arith.constant 0.000000e+00 : f32
    %266 = vector.broadcast %cst_217 : f32 to vector<32x512xf32>
    %267 = arith.maximumf %265, %266 : vector<32x512xf32>
    %cst_218 = arith.constant 0.000000e+00 : f32
    %268 = vector.broadcast %cst_218 : f32 to vector<32x512xf32>
    %c0_219 = arith.constant 0 : index
    %c0_220 = arith.constant 0 : index
    %c0_221 = arith.constant 0 : index
    %269 = vector.load %arg6[%c0_219, %c0_220, %c0_221] : memref<9x32x1xf32, #tpu.memory_space<vmem>>, vector<1x32x1xf32>
    %270 = vector.shape_cast %269 : vector<1x32x1xf32> to vector<32x1xf32>
    %c17_i32_222 = arith.constant 17 : i32
    %271 = tpu.dynamic_rotate %267 by %c17_i32_222 dim 1 : vector<32x512xf32>, i32 -> vector<32x512xf32>
    %c0_223 = arith.constant 0 : index
    %c0_224 = arith.constant 0 : index
    %c0_225 = arith.constant 0 : index
    %272 = vector.load %arg2[%c0_223, %c0_224, %c0_225] : memref<9x1x512xf32, #tpu.memory_space<vmem>>, vector<1x1x512xf32>
    %273 = vector.shape_cast %272 : vector<1x1x512xf32> to vector<1x512xf32>
    %274 = vector.broadcast %273 : vector<1x512xf32> to vector<32x512xf32>
    %275 = arith.mulf %271, %274 : vector<32x512xf32>
    %276 = vector.broadcast %270 : vector<32x1xf32> to vector<32x512xf32>
    %277 = arith.mulf %276, %275 : vector<32x512xf32>
    %278 = arith.addf %268, %277 : vector<32x512xf32>
    %c1_226 = arith.constant 1 : index
    %c0_227 = arith.constant 0 : index
    %c0_228 = arith.constant 0 : index
    %279 = vector.load %arg6[%c1_226, %c0_227, %c0_228] : memref<9x32x1xf32, #tpu.memory_space<vmem>>, vector<1x32x1xf32>
    %280 = vector.shape_cast %279 : vector<1x32x1xf32> to vector<32x1xf32>
    %c16_i32_229 = arith.constant 16 : i32
    %281 = tpu.dynamic_rotate %267 by %c16_i32_229 dim 1 : vector<32x512xf32>, i32 -> vector<32x512xf32>
    %c1_230 = arith.constant 1 : index
    %c0_231 = arith.constant 0 : index
    %c0_232 = arith.constant 0 : index
    %282 = vector.load %arg2[%c1_230, %c0_231, %c0_232] : memref<9x1x512xf32, #tpu.memory_space<vmem>>, vector<1x1x512xf32>
    %283 = vector.shape_cast %282 : vector<1x1x512xf32> to vector<1x512xf32>
    %284 = vector.broadcast %283 : vector<1x512xf32> to vector<32x512xf32>
    %285 = arith.mulf %281, %284 : vector<32x512xf32>
    %286 = vector.broadcast %280 : vector<32x1xf32> to vector<32x512xf32>
    %287 = arith.mulf %286, %285 : vector<32x512xf32>
    %288 = arith.addf %278, %287 : vector<32x512xf32>
    %c2_233 = arith.constant 2 : index
    %c0_234 = arith.constant 0 : index
    %c0_235 = arith.constant 0 : index
    %289 = vector.load %arg6[%c2_233, %c0_234, %c0_235] : memref<9x32x1xf32, #tpu.memory_space<vmem>>, vector<1x32x1xf32>
    %290 = vector.shape_cast %289 : vector<1x32x1xf32> to vector<32x1xf32>
    %c15_i32_236 = arith.constant 15 : i32
    %291 = tpu.dynamic_rotate %267 by %c15_i32_236 dim 1 : vector<32x512xf32>, i32 -> vector<32x512xf32>
    %c2_237 = arith.constant 2 : index
    %c0_238 = arith.constant 0 : index
    %c0_239 = arith.constant 0 : index
    %292 = vector.load %arg2[%c2_237, %c0_238, %c0_239] : memref<9x1x512xf32, #tpu.memory_space<vmem>>, vector<1x1x512xf32>
    %293 = vector.shape_cast %292 : vector<1x1x512xf32> to vector<1x512xf32>
    %294 = vector.broadcast %293 : vector<1x512xf32> to vector<32x512xf32>
    %295 = arith.mulf %291, %294 : vector<32x512xf32>
    %296 = vector.broadcast %290 : vector<32x1xf32> to vector<32x512xf32>
    %297 = arith.mulf %296, %295 : vector<32x512xf32>
    %298 = arith.addf %288, %297 : vector<32x512xf32>
    %c3_240 = arith.constant 3 : index
    %c0_241 = arith.constant 0 : index
    %c0_242 = arith.constant 0 : index
    %299 = vector.load %arg6[%c3_240, %c0_241, %c0_242] : memref<9x32x1xf32, #tpu.memory_space<vmem>>, vector<1x32x1xf32>
    %300 = vector.shape_cast %299 : vector<1x32x1xf32> to vector<32x1xf32>
    %c1_i32_243 = arith.constant 1 : i32
    %301 = tpu.dynamic_rotate %267 by %c1_i32_243 dim 1 : vector<32x512xf32>, i32 -> vector<32x512xf32>
    %c3_244 = arith.constant 3 : index
    %c0_245 = arith.constant 0 : index
    %c0_246 = arith.constant 0 : index
    %302 = vector.load %arg2[%c3_244, %c0_245, %c0_246] : memref<9x1x512xf32, #tpu.memory_space<vmem>>, vector<1x1x512xf32>
    %303 = vector.shape_cast %302 : vector<1x1x512xf32> to vector<1x512xf32>
    %304 = vector.broadcast %303 : vector<1x512xf32> to vector<32x512xf32>
    %305 = arith.mulf %301, %304 : vector<32x512xf32>
    %306 = vector.broadcast %300 : vector<32x1xf32> to vector<32x512xf32>
    %307 = arith.mulf %306, %305 : vector<32x512xf32>
    %308 = arith.addf %298, %307 : vector<32x512xf32>
    %c4_247 = arith.constant 4 : index
    %c0_248 = arith.constant 0 : index
    %c0_249 = arith.constant 0 : index
    %309 = vector.load %arg6[%c4_247, %c0_248, %c0_249] : memref<9x32x1xf32, #tpu.memory_space<vmem>>, vector<1x32x1xf32>
    %310 = vector.shape_cast %309 : vector<1x32x1xf32> to vector<32x1xf32>
    %311 = vector.broadcast %310 : vector<32x1xf32> to vector<32x512xf32>
    %312 = arith.mulf %311, %267 : vector<32x512xf32>
    %313 = arith.addf %308, %312 : vector<32x512xf32>
    %c5_250 = arith.constant 5 : index
    %c0_251 = arith.constant 0 : index
    %c0_252 = arith.constant 0 : index
    %314 = vector.load %arg6[%c5_250, %c0_251, %c0_252] : memref<9x32x1xf32, #tpu.memory_space<vmem>>, vector<1x32x1xf32>
    %315 = vector.shape_cast %314 : vector<1x32x1xf32> to vector<32x1xf32>
    %c511_i32_253 = arith.constant 511 : i32
    %316 = tpu.dynamic_rotate %267 by %c511_i32_253 dim 1 : vector<32x512xf32>, i32 -> vector<32x512xf32>
    %c5_254 = arith.constant 5 : index
    %c0_255 = arith.constant 0 : index
    %c0_256 = arith.constant 0 : index
    %317 = vector.load %arg2[%c5_254, %c0_255, %c0_256] : memref<9x1x512xf32, #tpu.memory_space<vmem>>, vector<1x1x512xf32>
    %318 = vector.shape_cast %317 : vector<1x1x512xf32> to vector<1x512xf32>
    %319 = vector.broadcast %318 : vector<1x512xf32> to vector<32x512xf32>
    %320 = arith.mulf %316, %319 : vector<32x512xf32>
    %321 = vector.broadcast %315 : vector<32x1xf32> to vector<32x512xf32>
    %322 = arith.mulf %321, %320 : vector<32x512xf32>
    %323 = arith.addf %313, %322 : vector<32x512xf32>
    %c6_257 = arith.constant 6 : index
    %c0_258 = arith.constant 0 : index
    %c0_259 = arith.constant 0 : index
    %324 = vector.load %arg6[%c6_257, %c0_258, %c0_259] : memref<9x32x1xf32, #tpu.memory_space<vmem>>, vector<1x32x1xf32>
    %325 = vector.shape_cast %324 : vector<1x32x1xf32> to vector<32x1xf32>
    %c497_i32_260 = arith.constant 497 : i32
    %326 = tpu.dynamic_rotate %267 by %c497_i32_260 dim 1 : vector<32x512xf32>, i32 -> vector<32x512xf32>
    %c6_261 = arith.constant 6 : index
    %c0_262 = arith.constant 0 : index
    %c0_263 = arith.constant 0 : index
    %327 = vector.load %arg2[%c6_261, %c0_262, %c0_263] : memref<9x1x512xf32, #tpu.memory_space<vmem>>, vector<1x1x512xf32>
    %328 = vector.shape_cast %327 : vector<1x1x512xf32> to vector<1x512xf32>
    %329 = vector.broadcast %328 : vector<1x512xf32> to vector<32x512xf32>
    %330 = arith.mulf %326, %329 : vector<32x512xf32>
    %331 = vector.broadcast %325 : vector<32x1xf32> to vector<32x512xf32>
    %332 = arith.mulf %331, %330 : vector<32x512xf32>
    %333 = arith.addf %323, %332 : vector<32x512xf32>
    %c7_264 = arith.constant 7 : index
    %c0_265 = arith.constant 0 : index
    %c0_266 = arith.constant 0 : index
    %334 = vector.load %arg6[%c7_264, %c0_265, %c0_266] : memref<9x32x1xf32, #tpu.memory_space<vmem>>, vector<1x32x1xf32>
    %335 = vector.shape_cast %334 : vector<1x32x1xf32> to vector<32x1xf32>
    %c496_i32_267 = arith.constant 496 : i32
    %336 = tpu.dynamic_rotate %267 by %c496_i32_267 dim 1 : vector<32x512xf32>, i32 -> vector<32x512xf32>
    %c7_268 = arith.constant 7 : index
    %c0_269 = arith.constant 0 : index
    %c0_270 = arith.constant 0 : index
    %337 = vector.load %arg2[%c7_268, %c0_269, %c0_270] : memref<9x1x512xf32, #tpu.memory_space<vmem>>, vector<1x1x512xf32>
    %338 = vector.shape_cast %337 : vector<1x1x512xf32> to vector<1x512xf32>
    %339 = vector.broadcast %338 : vector<1x512xf32> to vector<32x512xf32>
    %340 = arith.mulf %336, %339 : vector<32x512xf32>
    %341 = vector.broadcast %335 : vector<32x1xf32> to vector<32x512xf32>
    %342 = arith.mulf %341, %340 : vector<32x512xf32>
    %343 = arith.addf %333, %342 : vector<32x512xf32>
    %c8_271 = arith.constant 8 : index
    %c0_272 = arith.constant 0 : index
    %c0_273 = arith.constant 0 : index
    %344 = vector.load %arg6[%c8_271, %c0_272, %c0_273] : memref<9x32x1xf32, #tpu.memory_space<vmem>>, vector<1x32x1xf32>
    %345 = vector.shape_cast %344 : vector<1x32x1xf32> to vector<32x1xf32>
    %c495_i32_274 = arith.constant 495 : i32
    %346 = tpu.dynamic_rotate %267 by %c495_i32_274 dim 1 : vector<32x512xf32>, i32 -> vector<32x512xf32>
    %c8_275 = arith.constant 8 : index
    %c0_276 = arith.constant 0 : index
    %c0_277 = arith.constant 0 : index
    %347 = vector.load %arg2[%c8_275, %c0_276, %c0_277] : memref<9x1x512xf32, #tpu.memory_space<vmem>>, vector<1x1x512xf32>
    %348 = vector.shape_cast %347 : vector<1x1x512xf32> to vector<1x512xf32>
    %349 = vector.broadcast %348 : vector<1x512xf32> to vector<32x512xf32>
    %350 = arith.mulf %346, %349 : vector<32x512xf32>
    %351 = vector.broadcast %345 : vector<32x1xf32> to vector<32x512xf32>
    %352 = arith.mulf %351, %350 : vector<32x512xf32>
    %353 = arith.addf %343, %352 : vector<32x512xf32>
    %cst_278 = arith.constant dense<0.000000e+00> : vector<512xf32>
    %354 = vector.multi_reduction <add>, %353, %cst_278 [0] : vector<32x512xf32> to vector<512xf32>
    %355 = vector.shape_cast %354 : vector<512xf32> to vector<1x512xf32>
    %356 = arith.subf %1, %355 : vector<1x512xf32>
    %c0_279 = arith.constant 0 : index
    %c0_280 = arith.constant 0 : index
    %c0_281 = arith.constant 0 : index
    %357 = vector.load %arg7[%c0_279, %c0_280, %c0_281] : memref<1x1x512xf32, #tpu.memory_space<vmem>>, vector<1x1x512xf32>
    %358 = vector.shape_cast %357 : vector<1x1x512xf32> to vector<1x512xf32>
    %359 = vector.shape_cast %356 : vector<1x512xf32> to vector<1x1x512xf32>
    tpu.vector_store %arg7[%c0_279, %c0_280, %c0_281], %359 {strides = array<i32>} : memref<1x1x512xf32, #tpu.memory_space<vmem>>, vector<1x1x512xf32>,
    return
  }
  func.func @transform_0(%arg0: i32) -> (i32, i32, i32) {
    %c0_i32 = arith.constant 0 : i32
    %c0_i32_0 = arith.constant 0 : i32
    %c0_i32_1 = arith.constant 0 : i32
    return %arg0, %c0_i32, %c0_i32_0 : i32, i32, i32
  }
  func.func @transform_1(%arg0: i32) -> (i32, i32, i32) {
    %c0_i32 = arith.constant 0 : i32
    %c0_i32_0 = arith.constant 0 : i32
    %c0_i32_1 = arith.constant 0 : i32
    %c0_i32_2 = arith.constant 0 : i32
    return %c0_i32, %c0_i32_0, %c0_i32_1 : i32, i32, i32
  }
  func.func @transform_2(%arg0: i32) -> (i32, i32, i32) {
    %c0_i32 = arith.constant 0 : i32
    %c0_i32_0 = arith.constant 0 : i32
    %c0_i32_1 = arith.constant 0 : i32
    %c0_i32_2 = arith.constant 0 : i32
    return %c0_i32, %c0_i32_0, %c0_i32_1 : i32, i32, i32
  }
  func.func @transform_3(%arg0: i32) -> (i32, i32, i32) {
    %c0_i32 = arith.constant 0 : i32
    %c0_i32_0 = arith.constant 0 : i32
    %c0_i32_1 = arith.constant 0 : i32
    %c0_i32_2 = arith.constant 0 : i32
    return %c0_i32, %c0_i32_0, %c0_i32_1 : i32, i32, i32
  }
  func.func @transform_4(%arg0: i32) -> (i32, i32, i32) {
    %c0_i32 = arith.constant 0 : i32
    %c0_i32_0 = arith.constant 0 : i32
    %c0_i32_1 = arith.constant 0 : i32
    %c0_i32_2 = arith.constant 0 : i32
    return %c0_i32, %c0_i32_0, %c0_i32_1 : i32, i32, i32
  }
  func.func @transform_5(%arg0: i32) -> (i32, i32, i32) {
    %c0_i32 = arith.constant 0 : i32
    %c0_i32_0 = arith.constant 0 : i32
    %c0_i32_1 = arith.constant 0 : i32
    %c0_i32_2 = arith.constant 0 : i32
    return %c0_i32, %c0_i32_0, %c0_i32_1 : i32, i32, i32
  }
  func.func @transform_6(%arg0: i32) -> (i32, i32, i32) {
    %c0_i32 = arith.constant 0 : i32
    %c0_i32_0 = arith.constant 0 : i32
    %c0_i32_1 = arith.constant 0 : i32
    return %arg0, %c0_i32, %c0_i32_0 : i32, i32, i32
  }
}

</mosaic_0001>

<bundles_post_ra>
// kernel: tpu_custom_call.1
= control target key start
LH: loop header
LB: loop body
LE: loop exit
PB: predicated region body
PF: predicated region fallthrough
CT: control target
= control target key end

     0   :  { %11 = vsyncpa [#allocation4], 0  ;;  %s12613_s0 = inlined_call_operand.vmem [shape: f32[2,1,512], index: 0, kind: input, shape index: {}]   ;;  %s12614_s1 = inlined_call_operand.vmem [shape: f32[9,1,512], index: 1, kind: input, shape index: {}]   ;;  %s12615_s2 = inlined_call_operand.vmem [shape: f32[9,32,1], index: 2, kind: input, shape index: {}]   ;;  %s12616_s3 = inlined_call_operand.vmem [shape: f32[3,32,288], index: 3, kind: input, shape index: {}]   ;;  %s12617_s4 = inlined_call_operand.vmem [shape: f32[3,32,1], index: 4, kind: input, shape index: {}]   ;;  %s12618_s5 = inlined_call_operand.vmem [shape: f32[9,32,1], index: 5, kind: input, shape index: {}]   ;;  %s12619_s6 = inlined_call_operand.hbm [shape: f32[2,1,512], index: 6, kind: output, shape index: {}]  }
   0x1   :  { %13 = vsyncpa [#allocation4 + $0x1], 0  ;;  %s6497_s21 = smov 0   ;;  %s6499_s22 = smov 0  }
   0x2   :  { %s6501_s23 = smov 0   ;;  %s6503_s24 = smov 0  }
   0x3 LB: > { %s6518_s25 = sadd.s32 4294967295, %s6451_s24   ;;  %s6148_s26 = sadd.s32 4294967294, %s6451_s24   ;;  %s6451_s24 = sphi %s6503_s24, %s13566_s24   ;;  %s6447_s23 = sphi %s6501_s23, %s13565_s23   ;;  %s6443_s22 = sphi %s6499_s22, %s13564_s22   ;;  %s6439_s21 = sphi %s6497_s21, %s13563_s21  }
   0x4   : > { %s6522_s27 = sadd.s32 1, %s6451_s24   ;;  %s157_s28 = sadd.s32 1, %s6447_s23 }
   0x5   : > { %s154_s29 = ssub.s32 %s6451_s24, %s6522_s27  ;;  %p167_p0 = scmp.ne.s32.totalorder %s6447_s23, %s6443_s22 }
   0x6   : > { %p155_p1 = scmp.eq.s32.totalorder %s154_s29, 0  ;;  %p168_p2 = scmp.eq.s32.totalorder %s6518_s25, 1 }
   0x7   : > { %p173_p3 = scmp.ne.s32.totalorder %s6443_s22, %s6439_s21  ;;  %p174_p4 = scmp.eq.s32.totalorder %s6148_s26, 1 }
   0x8   : > { %s6533_s30 = scalar_select %p155_p1, %s6447_s23, %s157_s28  }
   0x9   : > { %p6535_p5 = por %p168_p2, %p167_p0  ;;  %p6539_p6 = por %p174_p4, %p173_p3 }
   0xa   : > { %p6151_p7 = scmp.ge.s32.totalorder %s6451_s24, 1  ;;  %p214_p8 = scmp.lt.s32.totalorder %s6451_s24, 3 }
   0xc   : > { %p215_p9 = pnand %p6151_p7, %p214_p8 }
   0xe   : > { %218 = sbr.rel (%p215_p9) target bundleno = 2757 (0xac5), region = 44 }
  0x13   : > { %v248_v0 = vld [vmem:[%s12615_s2] sm:$0xff]  ;;  %p243_p10 = scmp.lt.s32.totalorder %s6518_s25, 1  ;;  %v6453_v1 = vmov 0   ;;  %v249_v5 = vld [vmem:[%s12615_s2 + $0x8] sm:$0xff]  ;;  %s6454_s18 = smov 17   ;;  %v251_v8 = vld [vmem:[%s12615_s2 + $0x18] sm:$0xff] }
  0x14   : > { %6385 = vset.pattern.permute.xlu2 %v6453_v1  ;;  %6387 = vset.pattern.permute.xlu1 %v6453_v1  ;;  %s6455_s19 = smov 16   ;;  %v250_v9 = vld [vmem:[%s12615_s2 + $0x10] sm:$0xff]  ;;  %v6155_v10 = vld [vmem:[%s12615_s2 + $0x28] sm:$0xff]  ;;  %v6154_v11 = vld [vmem:[%s12615_s2 + $0x20] sm:$0xff]  ;;  %s6456_s16 = smov 15   ;;  %vm1948_vm8 = vcmask 261120  }
  0x15   : > { %292 = vperm.xlu2 %6385, %v248_v0   ;;  %s244_s11 = scalar_select %p243_p10, %s6518_s25, 1  ;;  %6386 = vset.pattern.permute.xlu0 %v6453_v1  ;;  %v6156_v12 = vld [vmem:[%s12615_s2 + $0x30] sm:$0xff]  ;;  %v6157_v13 = vld [vmem:[%s12615_s2 + $0x38] sm:$0xff]  ;;  %v6159_v14 = vld [vmem:[%s12615_s2 + $0x40] sm:$0xff]  ;;  %vm6060_vm9 = vcmask 1040384   ;;  %vm6062_vm10 = vcmask 1042434  }
  0x16   : > { %v6161_v15 = vld [vmem:[%s12615_s2 + $0x50] sm:$0xff]  ;;  %v6160_v16 = vld [vmem:[%s12615_s2 + $0x48] sm:$0xff]  ;;  %v6162_v17 = vld [vmem:[%s12615_s2 + $0x58] sm:$0xff]  ;;  %s6457_s14 = smov 1   ;;  %s6458_s10 = smov 127   ;;  %vm6064_vm11 = vcmask 1041408  }
  0x17   : > { %s6153_s12 = sshll.u32 %s244_s11, 2  ;;  %v6164_v18 = vld [vmem:[%s12615_s2 + $0x60] sm:$0xff]  ;;  %v6165_v19 = vld [vmem:[%s12615_s2 + $0x68] sm:$0xff]  ;;  %v6167_v20 = vld [vmem:[%s12615_s2 + $0x78] sm:$0xff]  ;;  %s6459_s9 = smov 113  }
  0x18   : > { %s6553_s15 = scalar_lea.vmem %s12613_s0, %s6153_s12  ;;  %v6166_v21 = vld [vmem:[%s12615_s2 + $0x70] sm:$0xff]  ;;  %v6169_v22 = vld [vmem:[%s12615_s2 + $0x80] sm:$0xff]  ;;  %v6170_v25 = vld [vmem:[%s12615_s2 + $0x88] sm:$0xff]  ;;  %s6460_s28 = smov 112  }
  0x19   : > { %v247_v2 = vld [vmem:[%s6553_s15] sm:$0xf]  ;;  %v6171_v23 = vld [vmem:[%s12615_s2 + $0x90] sm:$0xff]  ;;  %v6172_v26 = vld [vmem:[%s12615_s2 + $0x98] sm:$0xff]  ;;  %s6461_s13 = smov 111   ;;  %s240_s29 = sand.u32 1, %s6443_s22  }
  0x1a   : > { %v6556_v3 = vperm.slane %v247_v2, 2  ;;  %v6558_v4 = vperm.slane %v247_v2, 0  ;;  %v6567_v6 = vperm.slane %v247_v2, 3  ;;  %v6569_v7 = vperm.slane %v247_v2, 1  ;;  %v6173_v28 = vld [vmem:[%s12615_s2 + $0xa0] sm:$0xff]  ;;  %v6174_v30 = vld [vmem:[%s12615_s2 + $0xa8] sm:$0xff] }
  0x1b   : > { %v6176_v31 = vld [vmem:[%s12615_s2 + $0xb8] sm:$0xff]  ;;  %v6175_v33 = vld [vmem:[%s12615_s2 + $0xb0] sm:$0xff]  ;;  %v6179_v37 = vld [vmem:[%s12615_s2 + $0xc8] sm:$0xff]  ;;  %s6152_s11 = sshll.u32 %s240_s29, 2  ;;  %s6334_s12 = sshll.u32 %s6518_s25, 2 }
  0x1c   : > { %12950 = vst [vmem:[#allocation6_spill] sm:$0xff] %v6556_v3  ;;  %265 = vrot.lane.b32.xlu1 %v6556_v3, %s6454_s18  ;;  %261 = vrot.lane.b32.xlu0 %v6558_v4, %s6454_s18  ;;  %v6178_v41 = vld [vmem:[%s12615_s2 + $0xc0] sm:$0xff]  ;;  %v6180_v42 = vld [vmem:[%s12615_s2 + $0xd0] sm:$0xff]  ;;  %s242_s25 = scalar_lea.vmem [#allocation3], %s6152_s11  ;;  %s6409_s26 = scalar_lea.hbm %s12619_s6, 8 }
  0x1d   : > { %12951 = vst [vmem:[#allocation7_spill] sm:$0xff] %v6558_v4  ;;  %297 = vperm.xlu2 %6385, %v249_v5   ;;  %v6181_v46 = vld [vmem:[%s12615_s2 + $0xd8] sm:$0xff]  ;;  %v6183_v50 = vld [vmem:[%s12615_s2 + $0xe0] sm:$0xff]  ;;  %v6185_v51 = vld [vmem:[%s12615_s2 + $0xf0] sm:$0xff] }
  0x1e   : > { %12952 = vst [vmem:[#allocation8_spill] sm:$0xff] %v6567_v6  ;;  %v6184_v55 = vld [vmem:[%s12615_s2 + $0xe8] sm:$0xff]  ;;  %v6186_v56 = vld [vmem:[%s12615_s2 + $0xf8] sm:$0xff]  ;;  %v6188_v60 = vld [vmem:[%s12615_s2 + $0x100] sm:$0xff] }
  0x1f   : > { %12953 = vst [vmem:[#allocation9_spill] sm:$0xff] %v6569_v7  ;;  %v6189_v0 = vld [vmem:[%s12615_s2 + $0x108] sm:$0xff]  ;;  %v6191_v1 = vld [vmem:[%s12615_s2 + $0x118] sm:$0xff] }
  0x24   : > { %267 = vrot.lane.b32.xlu1 %v6567_v6, %s6454_s18  ;;  %263 = vrot.lane.b32.xlu0 %v6569_v7, %s6454_s18 }
  0x25   : > { %351 = vrot.lane.b32.xlu2 %v6558_v4, %s6455_s19 }
  0x2c   : > { %307 = vperm.xlu1 %6387, %v251_v8   ;;  %302 = vperm.xlu0 %6386, %v250_v9   ;;  %v6190_v9 = vld [vmem:[%s12615_s2 + $0x110] sm:$0xff] }
  0x2d   : > { %355 = vrot.lane.b32.xlu2 %v6556_v3, %s6455_s19 }
  0x34   : > { %353 = vrot.lane.b32.xlu1 %v6569_v7, %s6455_s19  ;;  %357 = vrot.lane.b32.xlu0 %v6567_v6, %s6455_s19 }
  0x35   : > { %386 = vperm.xlu2 %6385, %v6155_v10  }
  0x3c   : > { %381 = vperm.xlu1 %6387, %v6154_v11   ;;  %391 = vperm.xlu0 %6386, %v6156_v12  }
  0x3d   : > { %440 = vrot.lane.b32.xlu2 %v6558_v4, %s6456_s16 }
  0x44   : > { %396 = vperm.xlu1 %6387, %v6157_v13   ;;  %442 = vrot.lane.b32.xlu0 %v6569_v7, %s6456_s16 }
  0x45   : > { %446 = vrot.lane.b32.xlu2 %v6567_v6, %s6456_s16 }
  0x4c   : > { %444 = vrot.lane.b32.xlu1 %v6556_v3, %s6456_s16  ;;  %470 = vperm.xlu0 %6386, %v6159_v14  }
  0x4d   : > { %480 = vperm.xlu2 %6385, %v6161_v15  }
  0x54   : > { %475 = vperm.xlu1 %6387, %v6160_v16   ;;  %485 = vperm.xlu0 %6386, %v6162_v17  }
  0x55   : > { %531 = vrot.lane.b32.xlu2 %v6569_v7, %s6457_s14 }
  0x5c   : > { %529 = vrot.lane.b32.xlu1 %v6558_v4, %s6457_s14  ;;  %533 = vrot.lane.b32.xlu0 %v6556_v3, %s6457_s14 }
  0x5d   : > { %559 = vperm.xlu2 %6385, %v6164_v18   ;;  %v12620_v18 = vlaneseq }
  0x64   : > { %535 = vrot.lane.b32.xlu1 %v6567_v6, %s6457_s14  ;;  %564 = vperm.xlu0 %6386, %v6165_v19  }
  0x65   : > { %574 = vperm.xlu2 %6385, %v6167_v20  }
  0x6c   : > { %569 = vperm.xlu1 %6387, %v6166_v21   ;;  %620 = vperm.xlu0 %6386, %v6169_v22   ;;  %v6810_v21 = vand.u32 127, %v12620_v18 }
  0x6d   : > { %630 = vperm.xlu2 %6385, %v6171_v23   ;;  %v276_v23 = vld [vmem:[%s12614_s1] sm:$0xf] }
  0x6e   : > { %vm271_vm0 = vcmp.lt.s32.totalorder %v6810_v21, 17  ;;  %vm448_vm1 = vcmp.lt.s32.totalorder %v6810_v21, 15  ;;  %vm359_vm2 = vcmp.lt.s32.totalorder %v6810_v21, 16  ;;  %vm537_vm3 = vcmp.lt.s32.totalorder %v6810_v21, 1 }
  0x6f   : > { %v6647_v24 = vpop.permute.xlu2 %292  ;;  %vm683_vm4 = vcmp.lt.s32.totalorder %v6810_v21, 127  ;;  %vm772_vm5 = vcmp.lt.s32.totalorder %v6810_v21, 113  ;;  %vm861_vm6 = vcmp.lt.s32.totalorder %v6810_v21, 112  ;;  %vm950_vm7 = vcmp.lt.s32.totalorder %v6810_v21, 111 }
  0x74   : > { %625 = vperm.xlu1 %6387, %v6170_v25   ;;  %635 = vperm.xlu0 %6386, %v6172_v26   ;;  %v6818_v25 = vperm.slane %v276_v23, 0  ;;  %v6820_v26 = vperm.slane %v276_v23, 3 }
  0x75   : > { %677 = vrot.lane.b32.xlu2 %v6569_v7, %s6458_s10 }
  0x76   : > { %12966 = vst [vmem:[#allocation22_spill] sm:$0xff] %v6818_v25 }
  0x77   : > { %v6657_v27 = vpop.permute.xlu2 %297  ;;  %12967 = vst [vmem:[#allocation23_spill] sm:$0xff] %v6820_v26 }
  0x7c   : > { %675 = vrot.lane.b32.xlu1 %v6558_v4, %s6458_s10  ;;  %679 = vrot.lane.b32.xlu0 %v6556_v3, %s6458_s10 }
  0x7d   : > { %705 = vperm.xlu2 %6385, %v6173_v28  }
  0x7f   : > { %v6666_v29 = vpop.permute.xlu2 %351 }
  0x84   : > { %681 = vrot.lane.b32.xlu1 %v6567_v6, %s6458_s10  ;;  %710 = vperm.xlu0 %6386, %v6174_v30   ;;  %v6826_v30 = vperm.slane %v276_v23, 1 }
  0x85   : > { %720 = vperm.xlu2 %6385, %v6176_v31  }
  0x86   : > { %12968 = vst [vmem:[#allocation24_spill] sm:$0xff] %v6826_v30 }
  0x87   : > { %v6676_v32 = vpop.permute.xlu2 %355 }
  0x8c   : > { %715 = vperm.xlu1 %6387, %v6175_v33   ;;  %764 = vrot.lane.b32.xlu0 %v6558_v4, %s6459_s9 }
  0x8d   : > { %768 = vrot.lane.b32.xlu2 %v6556_v3, %s6459_s9 }
  0x8e   : > { %v6685_v34 = vpop.permute.xlu1 %265  ;;  %v6687_v35 = vpop.permute.xlu0 %261 }
  0x8f   : > { %v6689_v36 = vpop.permute.xlu2 %386 }
  0x94   : > { %766 = vrot.lane.b32.xlu1 %v6569_v7, %s6459_s9  ;;  %770 = vrot.lane.b32.xlu0 %v6567_v6, %s6459_s9 }
  0x95   : > { %799 = vperm.xlu2 %6385, %v6179_v37  }
  0x96   : > { %v6698_v38 = vpop.permute.xlu1 %267  ;;  %v6700_v39 = vpop.permute.xlu0 %263 }
  0x97   : > { %v6702_v40 = vpop.permute.xlu2 %440  ;;  %v275_v28 = vsel %vm271_vm0, %v6698_v38, %v6687_v35  ;;  %v272_v37 = vsel %vm271_vm0, %v6685_v34, %v6698_v38  ;;  %v6158_v38 = vld [vmem:[%s12614_s1 + $0x4] sm:$0xf] }
  0x9c   : > { %794 = vperm.xlu1 %6387, %v6178_v41   ;;  %804 = vperm.xlu0 %6386, %v6180_v42   ;;  %v6836_v41 = vperm.slane %v276_v23, 2  ;;  %v274_v42 = vsel %vm271_vm0, %v6687_v35, %v6700_v39  ;;  %v289_v35 = vmul.f32 %v6820_v26, %v272_v37 }
  0x9d   : > { %853 = vrot.lane.b32.xlu2 %v6558_v4, %s6460_s28 }
  0x9e   : > { %v6712_v43 = vpop.permute.xlu1 %307  ;;  %v6714_v44 = vpop.permute.xlu0 %302  ;;  %12971 = vst [vmem:[#allocation27_spill] sm:$0xff] %v6836_v41 }
  0x9f   : > { %v6716_v45 = vpop.permute.xlu2 %446 }
  0xa4   : > { %809 = vperm.xlu1 %6387, %v6181_v46   ;;  %855 = vrot.lane.b32.xlu0 %v6569_v7, %s6460_s28  ;;  %v273_v46 = vsel %vm271_vm0, %v6700_v39, %v6685_v34 }
  0xa5   : > { %859 = vrot.lane.b32.xlu2 %v6567_v6, %s6460_s28  ;;  %v288_v34 = vmul.f32 %v6836_v41, %v273_v46  ;;  %v313_v46 = vperm.slane %v289_v35, 0 }
  0xa6   : > { %v6725_v47 = vpop.permute.xlu1 %353  ;;  %v6727_v48 = vpop.permute.xlu0 %357 }
  0xa7   : > { %v6729_v49 = vpop.permute.xlu2 %480  ;;  %v362_v37 = vsel %vm359_vm2, %v6666_v29, %v6725_v47 }
  0xac   : > { %857 = vrot.lane.b32.xlu1 %v6556_v3, %s6460_s28  ;;  %883 = vperm.xlu0 %6386, %v6183_v50   ;;  %v6849_v50 = vld [vmem:[%s12614_s1 + $0x8] sm:$0xf] }
  0xad   : > { %893 = vperm.xlu2 %6385, %v6185_v51   ;;  %v286_v51 = vmul.f32 %v6818_v25, %v275_v28  ;;  %v456_v39 = vperm.slane %v6849_v50, 0  ;;  %v452_v28 = vsel %vm448_vm1, %v6716_v45, %v6702_v40  ;;  %v312_v25 = vperm.slane %v288_v34, 0 }
  0xae   : > { %v6739_v52 = vpop.permute.xlu1 %381  ;;  %v6741_v53 = vpop.permute.xlu0 %391 }
  0xaf   : > { %v6743_v54 = vpop.permute.xlu2 %531  ;;  %v310_v23 = vperm.slane %v286_v51, 0  ;;  %v361_v51 = vsel %vm359_vm2, %v6725_v47, %v6676_v32 }
  0xb4   : > { %888 = vperm.xlu1 %6387, %v6184_v55   ;;  %898 = vperm.xlu0 %6386, %v6186_v56   ;;  %v287_v56 = vmul.f32 %v6826_v30, %v274_v42  ;;  %v363_v42 = vsel %vm359_vm2, %v6727_v48, %v6666_v29  ;;  %v464_v30 = vmul.f32 %v456_v39, %v452_v28 }
  0xb5   : > { %944 = vrot.lane.b32.xlu2 %v6569_v7, %s6461_s13 }
  0xb6   : > { %v6753_v57 = vpop.permute.xlu1 %396  ;;  %v6755_v58 = vpop.permute.xlu0 %442  ;;  %v311_v18 = vperm.slane %v287_v56, 0 }
  0xb7   : > { %v6757_v59 = vpop.permute.xlu2 %559 }
  0xb8   : > { %12954 = vst [vmem:[#allocation10_spill] sm:$0xff] %v6757_v59  ;;  %v319_v47 = vmul.f32 %v311_v18, %v6657_v27  ;;  %v315_v34 = vmul.f32 %v311_v18, %v6647_v24 }
  0xbc   : > { %942 = vrot.lane.b32.xlu1 %v6558_v4, %s6461_s13  ;;  %946 = vrot.lane.b32.xlu0 %v6556_v3, %s6461_s13 }
  0xbd   : > { %972 = vperm.xlu2 %6385, %v6188_v60   ;;  %v368_v60 = vperm.slane %v6158_v38, 1 }
  0xbe   : > { %v6766_v61 = vpop.permute.xlu1 %444  ;;  %v6768_v62 = vpop.permute.xlu0 %470 }
  0xbf   : > { %v6770_v63 = vpop.permute.xlu2 %574 }
  0xc0   : > { %12955 = vst [vmem:[#allocation11_spill] sm:$0xff] %v6770_v63 }
  0xc4   : > { %948 = vrot.lane.b32.xlu1 %v6567_v6, %s6461_s13  ;;  %977 = vperm.xlu0 %6386, %v6189_v0   ;;  %v369_v0 = vperm.slane %v6158_v38, 2 }
  0xc5   : > { %987 = vperm.xlu2 %6385, %v6191_v1   ;;  %v367_v1 = vperm.slane %v6158_v38, 0 }
  0xc6   : > { %v6780_v2 = vpop.permute.xlu1 %475  ;;  %v6782_v5 = vpop.permute.xlu0 %485  ;;  %v377_v35 = vmul.f32 %v369_v0, %v361_v51  ;;  %v326_v51 = vmul.f32 %v310_v23, %v6712_v43 }
  0xc7   : > { %12956 = vst [vmem:[#allocation12_spill] sm:$0xff] %v6782_v5  ;;  %v6784_v8 = vpop.permute.xlu2 %630  ;;  %v375_v29 = vmul.f32 %v367_v1, %v363_v42  ;;  %v458_v42 = vperm.slane %v6849_v50, 2 }
  0xc8   : > { %12957 = vst [vmem:[#allocation13_spill] sm:$0xff] %v6784_v8  ;;  %v401_v28 = vperm.slane %v377_v35, 0  ;;  %v322_v35 = vmul.f32 %v310_v23, %v6714_v44 }
  0xc9   : > { %v399_v1 = vperm.slane %v375_v29, 0  ;;  %v329_v29 = vmul.f32 %v313_v46, %v6712_v43 }
  0xcc   : > { %982 = vperm.xlu1 %6387, %v6190_v9   ;;  %v370_v9 = vperm.slane %v6158_v38, 3  ;;  %v360_v38 = vsel %vm359_vm2, %v6676_v32, %v6727_v48  ;;  %v320_v32 = vmul.f32 %v312_v25, %v6657_v27  ;;  %v317_v48 = vmul.f32 %v313_v46, %v6647_v24 }
  0xce   : > { %v6789_v10 = vpop.permute.xlu1 %529  ;;  %v6791_v11 = vpop.permute.xlu0 %533  ;;  %v378_v56 = vmul.f32 %v370_v9, %v360_v38  ;;  %v316_v9 = vmul.f32 %v312_v25, %v6647_v24  ;;  %v327_v38 = vmul.f32 %v311_v18, %v6712_v43 }
  0xcf   : > { %v6793_v12 = vpop.permute.xlu2 %677 }
  0xd0   : > { %12958 = vst [vmem:[#allocation14_spill] sm:$0xff] %v6793_v12  ;;  %v411_v12 = vmul.f32 %v399_v1, %v6741_v53 }
  0xd6   : > { %v6795_v13 = vpop.permute.xlu1 %535  ;;  %v6797_v14 = vpop.permute.xlu0 %564 }
  0xd7   : > { %12959 = vst [vmem:[#allocation15_spill] sm:$0xff] %v6797_v14  ;;  %v6799_v15 = vpop.permute.xlu2 %705 }
  0xd8   : > { %12960 = vst [vmem:[#allocation16_spill] sm:$0xff] %v6799_v15  ;;  %v321_v15 = vmul.f32 %v313_v46, %v6657_v27 }
  0xde   : > { %v6801_v16 = vpop.permute.xlu1 %569  ;;  %v6803_v17 = vpop.permute.xlu0 %620 }
  0xdf   : > { %12961 = vst [vmem:[#allocation17_spill] sm:$0xff] %v6801_v16  ;;  %v6812_v22 = vpop.permute.xlu2 %720 }
  0xe0   : > { %12962 = vst [vmem:[#allocation18_spill] sm:$0xff] %v6803_v17 }
  0xe1   : > { %12965 = vst [vmem:[#allocation21_spill] sm:$0xff] %v6812_v22  ;;  %v318_v22 = vmul.f32 %v310_v23, %v6657_v27  ;;  %v459_v27 = vperm.slane %v6849_v50, 3 }
  0xe6   : > { %v6805_v19 = vpop.permute.xlu1 %625  ;;  %v6807_v20 = vpop.permute.xlu0 %635 }
  0xe7   : > { %12963 = vst [vmem:[#allocation19_spill] sm:$0xff] %v6805_v19  ;;  %v6855_v55 = vpop.permute.xlu2 %768  ;;  %v325_v19 = vmul.f32 %v313_v46, %v6714_v44 }
  0xe8   : > { %12964 = vst [vmem:[#allocation20_spill] sm:$0xff] %v6807_v20  ;;  %v457_v20 = vperm.slane %v6849_v50, 1  ;;  %v323_v50 = vmul.f32 %v311_v18, %v6714_v44 }
  0xe9   : > { %12972 = vst [vmem:[#allocation28_spill] sm:$0xff] %v6855_v55  ;;  %v376_v55 = vmul.f32 %v368_v60, %v362_v37  ;;  %v6897_v60 = vperm.slane %v464_v30, 0  ;;  %v402_v37 = vperm.slane %v378_v56, 0  ;;  %v451_v30 = vsel %vm448_vm1, %v6702_v40, %v6755_v58 }
  0xea   : > { %v324_v56 = vmul.f32 %v312_v25, %v6714_v44  ;;  %v405_v44 = vmul.f32 %v401_v28, %v6739_v52 }
  0xeb   : > { %v400_v0 = vperm.slane %v376_v55, 0  ;;  %v410_v18 = vmul.f32 %v402_v37, %v6689_v36 }
  0xec   : > { %v421_v4 = vadd.f32 %v405_v44, %v316_v9 }
  0xed   : > { %v408_v40 = vmul.f32 %v400_v0, %v6689_v36  ;;  %v412_v17 = vmul.f32 %v400_v0, %v6741_v53  ;;  %v6953_v63 = vadd.f32 %v410_v18, %v321_v15  ;;  %v416_v15 = vmul.f32 %v400_v0, %v6753_v57 }
  0xee   : > { %v6828_v31 = vpop.permute.xlu1 %675  ;;  %v6830_v33 = vpop.permute.xlu0 %679 }
  0xef   : > { %12969 = vst [vmem:[#allocation25_spill] sm:$0xff] %v6828_v31  ;;  %v6895_v39 = vpop.permute.xlu2 %799  ;;  %v406_v31 = vmul.f32 %v402_v37, %v6739_v52  ;;  %v6948_v14 = vadd.f32 %v408_v40, %v319_v47  ;;  %v428_v47 = vadd.f32 %v412_v17, %v323_v50 }
  0xf0   : > { %12970 = vst [vmem:[#allocation26_spill] sm:$0xff] %v6830_v33  ;;  %v404_v33 = vmul.f32 %v400_v0, %v6739_v52  ;;  %v540_v0 = vsel %vm537_vm3, %v6789_v10, %v6743_v54 }
  0xf1   : > { %12975 = vst [vmem:[#allocation31_spill] sm:$0xff] %v6895_v39  ;;  %v6920_v39 = vld [vmem:[%s12614_s1 + $0xc] sm:$0xf] }
  0xf2   : > { %v546_v46 = vperm.slane %v6920_v39, 1  ;;  %v420_v8 = vadd.f32 %v404_v33, %v315_v34  ;;  %v492_v34 = vmul.f32 %v6897_v60, %v6768_v62  ;;  %v547_v17 = vperm.slane %v6920_v39, 2 }
  0xf6   : > { %v6883_v26 = vpop.permute.xlu1 %681  ;;  %v6885_v41 = vpop.permute.xlu0 %710 }
  0xf7   : > { %12973 = vst [vmem:[#allocation29_spill] sm:$0xff] %v6883_v26  ;;  %v328_v26 = vmul.f32 %v312_v25, %v6712_v43  ;;  %v500_v43 = vmul.f32 %v6897_v60, %v6729_v49  ;;  %v403_v25 = vmul.f32 %v399_v1, %v6739_v52  ;;  %v414_v52 = vmul.f32 %v402_v37, %v6741_v53  ;;  %v6955_v7 = vpop.permute.xlu2 %853 }
  0xf8   : > { %12974 = vst [vmem:[#allocation30_spill] sm:$0xff] %v6885_v41  ;;  %v314_v41 = vmul.f32 %v310_v23, %v6647_v24  ;;  %v409_v23 = vmul.f32 %v401_v28, %v6689_v36 }
  0xfa   : > { %v6951_v3 = vadd.f32 %v409_v23, %v320_v32  ;;  %v415_v32 = vmul.f32 %v399_v1, %v6753_v57  ;;  %v554_v23 = vmul.f32 %v546_v46, %v540_v0  ;;  %v12978_v46 = vld [vmem:[#allocation12_spill] sm:$0xff] }
  0xfe   : > { %v6909_v55 = vpop.permute.xlu1 %715  ;;  %v6911_v24 = vpop.permute.xlu0 %764 }
  0xff   : > { %12976 = vst [vmem:[#allocation32_spill] sm:$0xff] %v6909_v55  ;;  %v407_v55 = vmul.f32 %v399_v1, %v6689_v36  ;;  %v450_v36 = vsel %vm448_vm1, %v6755_v58, %v6766_v61  ;;  %v419_v58 = vadd.f32 %v403_v25, %v314_v41  ;;  %v418_v41 = vmul.f32 %v402_v37, %v6753_v57 }
 0x100   : > { %12977 = vst [vmem:[#allocation33_spill] sm:$0xff] %v6911_v24  ;;  %v465_v24 = vmul.f32 %v457_v20, %v451_v30  ;;  %v413_v20 = vmul.f32 %v401_v28, %v6741_v53  ;;  %v449_v30 = vsel %vm448_vm1, %v6766_v61, %v6716_v45  ;;  %v466_v59 = vmul.f32 %v458_v42, %v450_v36 }
 0x101   : > { %v6946_v16 = vadd.f32 %v407_v55, %v318_v22  ;;  %v422_v61 = vadd.f32 %v406_v31, %v317_v48  ;;  %v427_v22 = vadd.f32 %v411_v12, %v322_v35  ;;  %v467_v55 = vmul.f32 %v459_v27, %v449_v30 }
 0x102   : > { %v489_v6 = vperm.slane %v465_v24, 0  ;;  %v429_v53 = vadd.f32 %v413_v20, %v324_v56  ;;  %v417_v24 = vmul.f32 %v401_v28, %v6753_v57  ;;  %v430_v31 = vadd.f32 %v414_v52, %v325_v19 }
 0x103   : > { %v490_v12 = vperm.slane %v466_v59, 0  ;;  %v545_v48 = vperm.slane %v6920_v39, 0  ;;  %v491_v1 = vperm.slane %v467_v55, 0  ;;  %v539_v57 = vsel %vm537_vm3, %v6743_v54, %v6791_v11 }
 0x104   : > { %v501_v33 = vmul.f32 %v489_v6, %v6729_v49  ;;  %v493_v9 = vmul.f32 %v489_v6, %v6768_v62  ;;  %v548_v28 = vperm.slane %v6920_v39, 3  ;;  %v431_v37 = vadd.f32 %v415_v32, %v326_v51 }
 0x105   : > { %v432_v19 = vadd.f32 %v416_v15, %v327_v38  ;;  %v433_v59 = vadd.f32 %v417_v24, %v328_v26  ;;  %v6980_v42 = vadd.f32 %v500_v43, %v427_v22  ;;  %v434_v27 = vadd.f32 %v418_v41, %v329_v29  ;;  %v7000_v29 = vpop.permute.xlu2 %859 }
 0x106   : > { %v6957_v5 = vpop.permute.xlu1 %766  ;;  %v6959_v45 = vpop.permute.xlu0 %770  ;;  %v6982_v35 = vadd.f32 %v492_v34, %v419_v58  ;;  %v509_v50 = vadd.f32 %v493_v9, %v420_v8  ;;  %v6984_v56 = vadd.f32 %v501_v33, %v428_v47  ;;  %v502_v40 = vmul.f32 %v490_v12, %v6729_v49 }
 0x107   : > { %v555_v18 = vmul.f32 %v547_v17, %v539_v57  ;;  %v541_v54 = vsel %vm537_vm3, %v6795_v13, %v6789_v10  ;;  %v503_v26 = vmul.f32 %v491_v1, %v6729_v49  ;;  %v494_v51 = vmul.f32 %v490_v12, %v6768_v62 }
 0x108   : > { %v495_v38 = vmul.f32 %v491_v1, %v6768_v62  ;;  %v538_v8 = vsel %vm537_vm3, %v6791_v11, %v6795_v13  ;;  %v496_v10 = vmul.f32 %v6897_v60, %v6780_v2  ;;  %v497_v25 = vmul.f32 %v489_v6, %v6780_v2 }
 0x109   : > { %v498_v49 = vmul.f32 %v490_v12, %v6780_v2  ;;  %v499_v44 = vmul.f32 %v491_v1, %v6780_v2  ;;  %v504_v62 = vmul.f32 %v6897_v60, %v12978_v46  ;;  %v505_v36 = vmul.f32 %v489_v6, %v12978_v46 }
 0x10a   : > { %v506_v11 = vmul.f32 %v490_v12, %v12978_v46  ;;  %v553_v13 = vmul.f32 %v545_v48, %v541_v54  ;;  %v507_v20 = vmul.f32 %v491_v1, %v12978_v46  ;;  %v578_v30 = vperm.slane %v554_v23, 0  ;;  %v12980_v12 = vld [vmem:[#allocation10_spill] sm:$0xff]  ;;  %v12984_v1 = vld [vmem:[#allocation11_spill] sm:$0xff]  ;;  %v12989_v46 = vld [vmem:[#allocation17_spill] sm:$0xff] }
 0x10b   : > { %v579_v52 = vperm.slane %v555_v18, 0  ;;  %v556_v58 = vmul.f32 %v548_v28, %v538_v8  ;;  %v510_v22 = vadd.f32 %v494_v51, %v421_v4  ;;  %v511_v47 = vadd.f32 %v495_v38, %v422_v61 }
 0x10c   : > { %v518_v55 = vadd.f32 %v502_v40, %v429_v53  ;;  %v7014_v32 = vadd.f32 %v503_v26, %v430_v31  ;;  %v512_v2 = vadd.f32 %v496_v10, %v6946_v16  ;;  %v513_v15 = vadd.f32 %v497_v25, %v6948_v14  ;;  %v7025_v16 = vld [vmem:[%s12614_s1 + $0x14] sm:$0xf]  ;;  %v12982_v53 = vld [vmem:[#allocation13_spill] sm:$0xff] }
 0x10d   : > { %v514_v60 = vadd.f32 %v498_v49, %v6951_v3  ;;  %v515_v6 = vadd.f32 %v499_v44, %v6953_v63  ;;  %v520_v24 = vadd.f32 %v504_v62, %v431_v37  ;;  %v521_v41 = vadd.f32 %v505_v36, %v432_v19  ;;  %v12981_v3 = vld [vmem:[#allocation7_spill] sm:$0xff]  ;;  %v12983_v31 = vld [vmem:[#allocation9_spill] sm:$0xff]  ;;  %v12985_v37 = vld [vmem:[#allocation6_spill] sm:$0xff]  ;;  %v7049_v38 = vpop.permute.xlu2 %893 }
 0x10e   : > { %v6991_v39 = vpop.permute.xlu1 %794  ;;  %v7002_v43 = vpop.permute.xlu0 %804  ;;  %12979 = vst [vmem:[#allocation12_spill] sm:$0xff] %v7014_v32  ;;  %v522_v33 = vadd.f32 %v506_v11, %v433_v59  ;;  %v577_v34 = vperm.slane %v553_v13, 0  ;;  %v523_v9 = vadd.f32 %v507_v20, %v434_v27  ;;  %v582_v17 = vmul.f32 %v578_v30, %v12980_v12  ;;  %v12986_v59 = vld [vmem:[#allocation8_spill] sm:$0xff]  ;;  %v12988_v40 = vld [vmem:[#allocation15_spill] sm:$0xff] }
 0x10f   : > { %v583_v4 = vmul.f32 %v579_v52, %v12980_v12  ;;  %v580_v61 = vperm.slane %v556_v58, 0  ;;  %v646_v63 = vmul.f32 %v12982_v53, %v12981_v3  ;;  %v647_v48 = vmul.f32 %v12982_v53, %v12983_v31 }
 0x110   : > { %v594_v0 = vmul.f32 %v578_v30, %v12984_v1  ;;  %v595_v57 = vmul.f32 %v579_v52, %v12984_v1  ;;  %v648_v19 = vmul.f32 %v12982_v53, %v12985_v37  ;;  %v7041_v27 = vmul.f32 %v12982_v53, %v12986_v59 }
 0x111   : > { %v586_v23 = vmul.f32 %v578_v30, %v12988_v40  ;;  %v581_v18 = vmul.f32 %v577_v34, %v12980_v12  ;;  %v691_v54 = vperm.slane %v7025_v16, 0  ;;  %v692_v26 = vperm.slane %v7025_v16, 1 }
 0x112   : > { %12987 = vst [vmem:[#allocation10_spill] sm:$0xff] %v7041_v27  ;;  %v584_v8 = vmul.f32 %v580_v61, %v12980_v12  ;;  %v598_v10 = vadd.f32 %v582_v17, %v509_v50  ;;  %v599_v25 = vadd.f32 %v583_v4, %v510_v22  ;;  %v587_v44 = vmul.f32 %v579_v52, %v12988_v40 }
 0x113   : > { %v589_v62 = vmul.f32 %v577_v34, %v12989_v46  ;;  %v7055_v36 = vadd.f32 %v594_v0, %v521_v41  ;;  %v7057_v11 = vadd.f32 %v595_v57, %v522_v33  ;;  %v593_v13 = vmul.f32 %v577_v34, %v12984_v1  ;;  %v12991_v33 = vld [vmem:[#allocation18_spill] sm:$0xff]  ;;  %v12993_v57 = vld [vmem:[#allocation25_spill] sm:$0xff] }
 0x114   : > { %v7060_v20 = vadd.f32 %v586_v23, %v513_v15  ;;  %v590_v58 = vmul.f32 %v578_v30, %v12989_v46  ;;  %v591_v12 = vmul.f32 %v579_v52, %v12989_v46  ;;  %v596_v50 = vmul.f32 %v580_v61, %v12984_v1  ;;  %v12992_v0 = vld [vmem:[#allocation14_spill] sm:$0xff] }
 0x115   : > { %12990 = vst [vmem:[#allocation7_spill] sm:$0xff] %v7057_v11  ;;  %v585_v22 = vmul.f32 %v577_v34, %v12988_v40  ;;  %v588_v17 = vmul.f32 %v580_v61, %v12988_v40  ;;  %v597_v4 = vadd.f32 %v581_v18, %v6982_v35  ;;  %v600_v41 = vadd.f32 %v584_v8, %v511_v47  ;;  %v12994_v30 = vld [vmem:[#allocation26_spill] sm:$0xff]  ;;  %v7095_v11 = vld [vmem:[%s12614_s1 + $0x18] sm:$0xf] }
 0x116   : > { %v7027_v14 = vpop.permute.xlu1 %809  ;;  %v7035_v28 = vpop.permute.xlu0 %855  ;;  %v638_v53 = vmul.f32 %v12991_v33, %v12981_v3  ;;  %v686_v15 = vsel %vm683_vm4, %v12993_v57, %v12992_v0  ;;  %v685_v52 = vsel %vm683_vm4, %v12992_v0, %v12994_v30  ;;  %v605_v34 = vadd.f32 %v589_v62, %v6980_v42 }
 0x117   : > { %v639_v35 = vmul.f32 %v12991_v33, %v12983_v31  ;;  %v640_v47 = vmul.f32 %v12991_v33, %v12985_v37  ;;  %v641_v40 = vmul.f32 %v12991_v33, %v12986_v59  ;;  %v603_v18 = vadd.f32 %v587_v44, %v514_v60 }
 0x118   : > { %v606_v8 = vadd.f32 %v590_v58, %v6984_v56  ;;  %v607_v49 = vadd.f32 %v591_v12, %v518_v55  ;;  %v609_v0 = vadd.f32 %v593_v13, %v520_v24  ;;  %v601_v51 = vadd.f32 %v585_v22, %v512_v2  ;;  %v13002_v13 = vld [vmem:[#allocation29_spill] sm:$0xff]  ;;  %v13003_v22 = vld [vmem:[#allocation20_spill] sm:$0xff] }
 0x119   : > { %v7090_v27 = vadd.f32 %v596_v50, %v523_v9  ;;  %v699_v42 = vmul.f32 %v691_v54, %v686_v15  ;;  %v700_v62 = vmul.f32 %v692_v26, %v685_v52  ;;  %v7097_v32 = vadd.f32 %v588_v17, %v515_v6  ;;  %v7109_v9 = vpop.permute.xlu2 %944  ;;  %v7119_v6 = vld [vmem:[%s12614_s1 + $0x1c] sm:$0xf] }
 0x11a   : > { %v7100_v33 = vmul.f32 %v580_v61, %v12989_v46  ;;  %v654_v60 = vadd.f32 %v638_v53, %v597_v4  ;;  %v655_v56 = vadd.f32 %v639_v35, %v598_v10  ;;  %v7103_v55 = vadd.f32 %v640_v47, %v599_v25  ;;  %v13000_v10 = vld [vmem:[#allocation19_spill] sm:$0xff]  ;;  %v13006_v35 = vld [vmem:[#allocation16_spill] sm:$0xff] }
 0x11b   : > { %12995 = vst [vmem:[#allocation13_spill] sm:$0xff] %v7090_v27  ;;  %v7105_v2 = vadd.f32 %v641_v40, %v600_v41  ;;  %v7107_v24 = vadd.f32 %v646_v63, %v605_v34  ;;  %v7111_v54 = vadd.f32 %v647_v48, %v606_v8  ;;  %v7113_v26 = vadd.f32 %v648_v19, %v607_v49  ;;  %v13001_v48 = vld [vmem:[#allocation33_spill] sm:$0xff] }
 0x11c   : > { %12996 = vst [vmem:[#allocation9_spill] sm:$0xff] %v7097_v32  ;;  %v780_v61 = vperm.slane %v7095_v11, 0  ;;  %v642_v25 = vmul.f32 %v13000_v10, %v12981_v3  ;;  %v723_v63 = vperm.slane %v699_v42, 0  ;;  %v7124_v44 = vperm.slane %v700_v62, 0  ;;  %v7169_v62 = vld [vmem:[%s12614_s1 + $0x20] sm:$0xf] }
 0x11d   : > { %12997 = vst [vmem:[#allocation11_spill] sm:$0xff] %v7100_v33  ;;  %v775_v19 = vsel %vm772_vm5, %v13001_v48, %v6957_v5  ;;  %v643_v49 = vmul.f32 %v13000_v10, %v12983_v31  ;;  %v644_v46 = vmul.f32 %v13000_v10, %v12985_v37  ;;  %v684_v58 = vsel %vm683_vm4, %v12994_v30, %v13002_v13  ;;  %v13008_v41 = vld [vmem:[#allocation21_spill] sm:$0xff] }
 0x11e   : > { %v7078_v1 = vpop.permute.xlu1 %857  ;;  %v7087_v23 = vpop.permute.xlu0 %883  ;;  %12998 = vst [vmem:[#allocation6_spill] sm:$0xff] %v7105_v2  ;;  %v869_v12 = vperm.slane %v7119_v6, 0  ;;  %v650_v17 = vmul.f32 %v13003_v22, %v12981_v3  ;;  %v651_v4 = vmul.f32 %v13003_v22, %v12983_v31  ;;  %v864_v53 = vsel %vm861_vm6, %v6955_v7, %v7035_v28 }
 0x11f   : > { %12999 = vst [vmem:[#allocation8_spill] sm:$0xff] %v7113_v26  ;;  %v7154_v30 = vmul.f32 %v13000_v10, %v12986_v59  ;;  %v7158_v52 = vmul.f32 %v13003_v22, %v12985_v37  ;;  %v781_v3 = vperm.slane %v7095_v11, 1  ;;  %v788_v31 = vmul.f32 %v780_v61, %v775_v19 }
 0x120   : > { %v658_v34 = vadd.f32 %v642_v25, %v601_v51  ;;  %v727_v47 = vmul.f32 %v723_v63, %v13006_v35  ;;  %v728_v40 = vmul.f32 %v7124_v44, %v13006_v35  ;;  %v13007_v8 = vperm.slane %v7025_v16, 2 }
 0x121   : > { %13004 = vst [vmem:[#allocation15_spill] sm:$0xff] %v7154_v30  ;;  %v659_v37 = vadd.f32 %v643_v49, %v7060_v20  ;;  %v660_v10 = vadd.f32 %v644_v46, %v603_v18  ;;  %v739_v27 = vmul.f32 %v723_v63, %v13008_v41  ;;  %v877_v61 = vmul.f32 %v869_v12, %v864_v53  ;;  %v13009_v49 = vld [vmem:[#allocation30_spill] sm:$0xff] }
 0x122   : > { %13005 = vst [vmem:[#allocation17_spill] sm:$0xff] %v7158_v52  ;;  %v701_v42 = vmul.f32 %v13007_v8, %v684_v58  ;;  %v666_v51 = vadd.f32 %v650_v17, %v609_v0  ;;  %v667_v25 = vadd.f32 %v651_v4, %v7055_v36  ;;  %v740_v19 = vmul.f32 %v7124_v44, %v13008_v41  ;;  %v7187_v36 = vpop.permute.xlu2 %972  ;;  %v13012_v41 = vld [vmem:[#allocation32_spill] sm:$0xff] }
 0x123   : > { %v7177_v58 = vperm.slane %v788_v31, 0  ;;  %v958_v20 = vperm.slane %v7169_v62, 0  ;;  %v731_v46 = vmul.f32 %v723_v63, %v13009_v49  ;;  %v743_v0 = vadd.f32 %v727_v47, %v654_v60 }
 0x124   : > { %v7182_v18 = vperm.slane %v701_v42, 0  ;;  %v7185_v12 = vadd.f32 %v728_v40, %v655_v56  ;;  %v687_v17 = vsel %vm683_vm4, %v13002_v13, %v12993_v57  ;;  %v755_v53 = vadd.f32 %v739_v27, %v666_v51  ;;  %v13010_v13 = vld [vmem:[#allocation28_spill] sm:$0xff] }
 0x125   : > { %v816_v4 = vmul.f32 %v7177_v58, %v6991_v39  ;;  %v901_v31 = vperm.slane %v877_v61, 0  ;;  %v732_v42 = vmul.f32 %v7124_v44, %v13009_v49  ;;  %v7199_v60 = vadd.f32 %v740_v19, %v667_v25 }
 0x126   : > { %v7139_v50 = vpop.permute.xlu1 %888  ;;  %v7150_v15 = vpop.permute.xlu0 %898  ;;  %v870_v56 = vperm.slane %v7119_v6, 1  ;;  %v774_v27 = vsel %vm772_vm5, %v6957_v5, %v13010_v13  ;;  %v863_v40 = vsel %vm861_vm6, %v7035_v28, %v7078_v1  ;;  %v13011_v25 = vperm.slane %v7025_v16, 3 }
 0x127   : > { %v905_v61 = vmul.f32 %v901_v31, %v7087_v23  ;;  %v733_v30 = vmul.f32 %v7182_v18, %v13009_v49  ;;  %v747_v32 = vadd.f32 %v731_v46, %v658_v34  ;;  %v959_v52 = vperm.slane %v7169_v62, 1 }
 0x128   : > { %v702_v19 = vmul.f32 %v13011_v25, %v687_v17  ;;  %v735_v33 = vmul.f32 %v723_v63, %v13012_v41  ;;  %v832_v5 = vadd.f32 %v816_v4, %v743_v0  ;;  %v7224_v26 = vadd.f32 %v732_v42, %v659_v37 }
 0x129   : > { %v878_v17 = vmul.f32 %v870_v56, %v863_v40  ;;  %v736_v34 = vmul.f32 %v7124_v44, %v13012_v41  ;;  %v828_v46 = vmul.f32 %v7177_v58, %v7027_v14  ;;  %v7240_v42 = vadd.f32 %v733_v30, %v660_v10 }
 0x12a   : > { %v921_v63 = vadd.f32 %v905_v61, %v832_v5  ;;  %v7233_v4 = vperm.slane %v702_v19, 0  ;;  %v751_v56 = vadd.f32 %v735_v33, %v7107_v24  ;;  %v917_v44 = vmul.f32 %v901_v31, %v7150_v15  ;;  %v7250_v19 = vpop.permute.xlu2 %987 }
 0x12b   : > { %v902_v25 = vperm.slane %v878_v17, 0  ;;  %v752_v30 = vadd.f32 %v736_v34, %v7111_v54  ;;  %v844_v33 = vadd.f32 %v828_v46, %v755_v53  ;;  %v776_v53 = vsel %vm772_vm5, %v6959_v45, %v13001_v48 }
 0x12d   : > { %v933_v54 = vadd.f32 %v917_v44, %v844_v33  ;;  %v906_v46 = vmul.f32 %v902_v25, %v7087_v23 }
 0x12e   : > { %v7195_v8 = vpop.permute.xlu1 %942  ;;  %v947_v57 = vpop.permute.xlu0 %946 }
 0x12f   : > { %v953_v47 = vsel %vm950_vm7, %v7195_v8, %v7109_v9  ;;  %v952_v28 = vsel %vm950_vm7, %v7109_v9, %v947_v57  ;;  %v7237_v9 = vmul.f32 %v7182_v18, %v13006_v35 }
 0x130   : > { %v966_v51 = vmul.f32 %v958_v20, %v953_v47  ;;  %v789_v20 = vmul.f32 %v781_v3, %v774_v27  ;;  %v13013_v47 = vld [vmem:[#allocation31_spill] sm:$0xff]  ;;  %v909_v3 = vmul.f32 %v901_v31, %v7139_v50  ;;  %v967_v37 = vmul.f32 %v959_v52, %v952_v28 }
 0x131   : > { %v820_v16 = vmul.f32 %v7177_v58, %v13013_v47 }
 0x132   : > { %v990_v2 = vperm.slane %v966_v51, 0  ;;  %v813_v61 = vperm.slane %v789_v20, 0  ;;  %v773_v51 = vsel %vm772_vm5, %v13010_v13, %v6959_v45  ;;  %v13014_v13 = vperm.slane %v7095_v11, 2 }
 0x133   : > { %v836_v5 = vadd.f32 %v820_v16, %v747_v32  ;;  %v824_v32 = vmul.f32 %v7177_v58, %v7002_v43  ;;  %v871_v16 = vperm.slane %v7119_v6, 2  ;;  %v862_v58 = vsel %vm861_vm6, %v7078_v1, %v7000_v29 }
 0x134   : > { %v994_v0 = vmul.f32 %v990_v2, %v7187_v36  ;;  %v1006_v24 = vmul.f32 %v990_v2, %v7250_v19  ;;  %v817_v28 = vmul.f32 %v813_v61, %v6991_v39  ;;  %v790_v17 = vmul.f32 %v13014_v13, %v773_v51 }
 0x135   : > { %v925_v20 = vadd.f32 %v909_v3, %v836_v5  ;;  %v825_v34 = vmul.f32 %v813_v61, %v7002_v43  ;;  %v914_v1 = vmul.f32 %v902_v25, %v7049_v38  ;;  %v879_v13 = vmul.f32 %v871_v16, %v862_v58 }
 0x136   : > { %v1010_v27 = vadd.f32 %v994_v0, %v921_v63  ;;  %v7244_v40 = vpop.permute.xlu1 %948  ;;  %v7252_v52 = vpop.permute.xlu0 %977  ;;  %v991_v63 = vperm.slane %v967_v37, 0  ;;  %v913_v37 = vmul.f32 %v901_v31, %v7049_v38  ;;  %v1022_v44 = vadd.f32 %v1006_v24, %v933_v54 }
 0x137   : > { %v998_v0 = vmul.f32 %v990_v2, %v7252_v52  ;;  %v833_v51 = vadd.f32 %v817_v28, %v7185_v12  ;;  %v951_v45 = vsel %vm950_vm7, %v947_v57, %v7244_v40  ;;  %v821_v31 = vmul.f32 %v813_v61, %v13013_v47 }
 0x138   : > { %v7256_v10 = vmax.f32 %v1010_v27, 0.0  ;;  %v960_v27 = vperm.slane %v7169_v62, 2  ;;  %v995_v5 = vmul.f32 %v991_v63, %v7187_v36  ;;  %v7287_v33 = vperm.slane %v790_v17, 0 }
 0x139   : > { %v1014_v3 = vadd.f32 %v998_v0, %v925_v20  ;;  %v840_v20 = vadd.f32 %v824_v32, %v751_v56  ;;  %v841_v0 = vadd.f32 %v825_v34, %v752_v30  ;;  %v922_v12 = vadd.f32 %v906_v46, %v833_v51 }
 0x13a   : > { %1042 = vrot.lane.b32.xlu0 %v7256_v10, %s6454_s18  ;;  %v7295_v57 = vmax.f32 %v1022_v44, 0.0  ;;  %v968_v54 = vmul.f32 %v960_v27, %v951_v45  ;;  %v865_v56 = vsel %vm861_vm6, %v7000_v29, %v6955_v7  ;;  %v13017_v30 = vperm.slane %v7095_v11, 3 }
 0x13b   : > { %v7284_v48 = vmax.f32 %v1014_v3, 0.0  ;;  %v929_v3 = vadd.f32 %v913_v37, %v840_v20  ;;  %v829_v16 = vmul.f32 %v813_v61, %v7027_v14  ;;  %v1011_v34 = vadd.f32 %v995_v5, %v922_v12 }
 0x13c   : > { %13016 = vst [vmem:[#allocation14_spill] sm:$0xff] %v7295_v57  ;;  %v791_v32 = vmul.f32 %v13017_v30, %v776_v53  ;;  %v910_v46 = vmul.f32 %v902_v25, %v7139_v50  ;;  %v930_v58 = vadd.f32 %v914_v1, %v841_v0  ;;  %v7310_v44 = vperm.slane %v879_v13, 0 }
 0x13d   : > { %13015 = vst [vmem:[#allocation18_spill] sm:$0xff] %v7284_v48  ;;  %1044 = vrot.lane.b32.xlu1 %v7284_v48, %s6454_s18  ;;  %v837_v7 = vadd.f32 %v821_v31, %v7224_v26  ;;  %v918_v29 = vmul.f32 %v902_v25, %v7150_v15  ;;  %v961_v11 = vperm.slane %v7169_v62, 3  ;;  %v7315_v61 = vperm.slane %v968_v54, 0 }
 0x13e   : > { %v7290_v24 = vpop.permute.xlu1 %982  ;;  %v999_v53 = vmul.f32 %v991_v63, %v7252_v52  ;;  %v845_v5 = vadd.f32 %v829_v16, %v7199_v60  ;;  %v1007_v45 = vmul.f32 %v991_v63, %v7250_v19  ;;  %v7322_v20 = vmax.f32 %v1011_v34, 0.0 }
 0x13f   : > { %v1002_v28 = vmul.f32 %v990_v2, %v7290_v24  ;;  %v1003_v17 = vmul.f32 %v991_v63, %v7290_v24  ;;  %v822_v2 = vmul.f32 %v7287_v33, %v13013_v47  ;;  %v954_v26 = vsel %vm950_vm7, %v7244_v40, %v7195_v8 }
 0x140   : > { %13018 = vst [vmem:[#allocation25_spill] sm:$0xff] %v7322_v20  ;;  %v730_v62 = vmul.f32 %v7233_v4, %v13006_v35  ;;  %v737_v25 = vmul.f32 %v7182_v18, %v13012_v41  ;;  %v911_v31 = vmul.f32 %v7310_v44, %v7139_v50  ;;  %v926_v1 = vadd.f32 %v910_v46, %v837_v7 }
 0x141   : > { %v1018_v37 = vadd.f32 %v1002_v28, %v929_v3  ;;  %v1019_v27 = vadd.f32 %v1003_v17, %v930_v58  ;;  %v13019_v60 = vperm.slane %v7119_v6, 3  ;;  %v818_v0 = vmul.f32 %v7287_v33, %v6991_v39 }
 0x142   : > { %1048 = vrot.lane.b32.xlu0 %v7295_v57, %s6454_s18  ;;  %v838_v8 = vadd.f32 %v822_v2, %v7240_v42  ;;  %v934_v40 = vadd.f32 %v918_v29, %v845_v5  ;;  %v969_v35 = vmul.f32 %v961_v11, %v954_v26  ;;  %v1000_v13 = vmul.f32 %v7315_v61, %v7252_v52 }
 0x143   : > { %v7318_v51 = vmax.f32 %v1018_v37, 0.0  ;;  %v880_v63 = vmul.f32 %v13019_v60, %v865_v56  ;;  %v1015_v12 = vadd.f32 %v999_v53, %v926_v1  ;;  %v7345_v28 = vmax.f32 %v1019_v27, 0.0  ;;  %v13021_v56 = vld [vmem:[#allocation8_spill] sm:$0xff]  ;;  %v13023_v37 = vld [vmem:[#allocation6_spill] sm:$0xff]  ;;  %v13026_v27 = vld [vmem:[#allocation11_spill] sm:$0xff] }
 0x144   : > { %v815_v54 = vperm.slane %v791_v32, 0  ;;  %v745_v6 = vadd.f32 %v7237_v9, %v7103_v55  ;;  %v826_v3 = vmul.f32 %v7287_v33, %v7002_v43  ;;  %v1023_v17 = vadd.f32 %v1007_v45, %v934_v40  ;;  %v13027_v45 = vld [vmem:[#allocation21_spill] sm:$0xff] }
 0x145   : > { %1046 = vrot.lane.b32.xlu2 %v7318_v51, %s6454_s18  ;;  %1050 = vrot.lane.b32.xlu1 %v7322_v20, %s6454_s18  ;;  %13020 = vst [vmem:[#allocation26_spill] sm:$0xff] %v7345_v28  ;;  %v653_v42 = vmul.f32 %v13003_v22, %v12986_v59  ;;  %v753_v30 = vadd.f32 %v737_v25, %v13021_v56  ;;  %v7358_v32 = vperm.slane %v880_v63, 0  ;;  %v993_v46 = vperm.slane %v969_v35, 0  ;;  %v13029_v1 = vld [vmem:[#allocation17_spill] sm:$0xff] }
 0x146   : > { %v907_v16 = vmul.f32 %v7310_v44, %v7087_v23  ;;  %v927_v34 = vadd.f32 %v911_v31, %v838_v8  ;;  %v819_v55 = vmul.f32 %v815_v54, %v6991_v39  ;;  %v834_v9 = vadd.f32 %v818_v0, %v745_v6  ;;  %v13025_v39 = vld [vmem:[#allocation12_spill] sm:$0xff] }
 0x147   : > { %v915_v2 = vmul.f32 %v7310_v44, %v7049_v38  ;;  %v996_v59 = vmul.f32 %v7315_v61, %v7187_v36  ;;  %v7365_v58 = vmax.f32 %v1015_v12, 0.0  ;;  %v746_v7 = vadd.f32 %v730_v62, %v13023_v37  ;;  %v13028_v62 = vld [vmem:[#allocation7_spill] sm:$0xff] }
 0x148   : > { %v1016_v22 = vadd.f32 %v1000_v13, %v927_v34  ;;  %v842_v29 = vadd.f32 %v826_v3, %v753_v30  ;;  %v7368_v11 = vmax.f32 %v1023_v17, 0.0  ;;  %v1004_v53 = vmul.f32 %v7315_v61, %v7290_v24  ;;  %v13030_v13 = vld [vmem:[#allocation9_spill] sm:$0xff]  ;;  %v13031_v12 = vld [vmem:[#allocation15_spill] sm:$0xff] }
 0x149   : > { %13022 = vst [vmem:[#allocation19_spill] sm:$0xff] %v7365_v58  ;;  %v608_v5 = vadd.f32 %v13026_v27, %v13025_v39  ;;  %v741_v26 = vmul.f32 %v7182_v18, %v13027_v45  ;;  %v908_v25 = vmul.f32 %v7358_v32, %v7087_v23  ;;  %v923_v31 = vadd.f32 %v907_v16, %v834_v9  ;;  %v13032_v3 = vld [vmem:[#allocation13_spill] sm:$0xff] }
 0x14a   : > { %1054 = vrot.lane.b32.xlu0 %v7345_v28, %s6454_s18  ;;  %13024 = vst [vmem:[#allocation33_spill] sm:$0xff] %v7368_v11  ;;  %v668_v60 = vadd.f32 %v13029_v1, %v13028_v62  ;;  %v734_v63 = vmul.f32 %v7233_v4, %v13009_v49  ;;  %v835_v0 = vadd.f32 %v819_v55, %v746_v7  ;;  %v7389_v35 = vmax.f32 %v1016_v22, 0.0 }
 0x14b   : > { %v931_v8 = vadd.f32 %v915_v2, %v842_v29  ;;  %v830_v18 = vmul.f32 %v7287_v33, %v7027_v14  ;;  %v997_v23 = vmul.f32 %v993_v46, %v7187_v36  ;;  %v1012_v40 = vadd.f32 %v996_v59, %v923_v31 }
 0x14c   : > { %v661_v6 = vadd.f32 %v13031_v12, %v13030_v13  ;;  %v669_v17 = vadd.f32 %v653_v42, %v13032_v3  ;;  %v823_v49 = vmul.f32 %v815_v54, %v13013_v47  ;;  %v742_v30 = vmul.f32 %v7233_v4, %v13027_v45 }
 0x14d   : > { %1052 = vrot.lane.b32.xlu2 %v7365_v58, %s6454_s18  ;;  %1056 = vrot.lane.b32.xlu1 %v7368_v11, %s6454_s18  ;;  %v1020_v56 = vadd.f32 %v1004_v53, %v931_v8  ;;  %v757_v16 = vadd.f32 %v741_v26, %v668_v60  ;;  %v924_v34 = vadd.f32 %v908_v25, %v835_v0  ;;  %v7408_v22 = vmax.f32 %v1012_v40, 0.0 }
 0x14e   : > { %v919_v33 = vmul.f32 %v7310_v44, %v7150_v15  ;;  %v750_v36 = vadd.f32 %v734_v63, %v661_v6  ;;  %v738_v55 = vmul.f32 %v7233_v4, %v13012_v41  ;;  %v831_v42 = vmul.f32 %v815_v54, %v7027_v14  ;;  %v13034_v44 = vld [vmem:[#allocation10_spill] sm:$0xff] }
 0x14f   : > { %v912_v47 = vmul.f32 %v7358_v32, %v7139_v50  ;;  %v846_v9 = vadd.f32 %v830_v18, %v757_v16  ;;  %v1008_v2 = vmul.f32 %v7315_v61, %v7250_v19  ;;  %v1013_v59 = vadd.f32 %v997_v23, %v924_v34  ;;  %13033 = vst [vmem:[#allocation29_spill] sm:$0xff] %v7408_v22 }
 0x150   : > { %v665_v37 = vadd.f32 %v13034_v44, %v608_v5  ;;  %v839_v7 = vadd.f32 %v823_v49, %v750_v36  ;;  %v1001_v29 = vmul.f32 %v993_v46, %v7252_v52  ;;  %v7412_v53 = vmax.f32 %v1020_v56, 0.0 }
 0x151   : > { %v827_v41 = vmul.f32 %v815_v54, %v7002_v43  ;;  %v758_v14 = vadd.f32 %v742_v30, %v669_v17  ;;  %v920_v50 = vmul.f32 %v7358_v32, %v7150_v15  ;;  %v935_v4 = vadd.f32 %v919_v33, %v846_v9 }
 0x152   : > { %1060 = vrot.lane.b32.xlu0 %v7389_v35, %s6454_s18  ;;  %v754_v61 = vadd.f32 %v738_v55, %v665_v37  ;;  %v928_v39 = vadd.f32 %v912_v47, %v839_v7  ;;  %v1009_v52 = vmul.f32 %v993_v46, %v7250_v19  ;;  %v7422_v45 = vmax.f32 %v1013_v59, 0.0 }
 0x153   : > { %v847_v27 = vadd.f32 %v831_v42, %v758_v14  ;;  %v1024_v5 = vadd.f32 %v1008_v2, %v935_v4  ;;  %v916_v15 = vmul.f32 %v7358_v32, %v7049_v38  ;;  %v1005_v62 = vmul.f32 %v993_v46, %v7290_v24 }
 0x154   : > { %13035 = vst [vmem:[#allocation20_spill] sm:$0xff] %v7422_v45  ;;  %v1017_v43 = vadd.f32 %v1001_v29, %v928_v39  ;;  %v843_v54 = vadd.f32 %v827_v41, %v754_v61 }
 0x155   : > { %1058 = vrot.lane.b32.xlu2 %v7408_v22, %s6454_s18  ;;  %1062 = vrot.lane.b32.xlu1 %v7412_v53, %s6454_s18  ;;  %v936_v26 = vadd.f32 %v920_v50, %v847_v27  ;;  %v7428_v31 = vmax.f32 %v1024_v5, 0.0 }
 0x156   : > { %v7431_v1 = vmax.f32 %v1017_v43, 0.0  ;;  %v932_v19 = vadd.f32 %v916_v15, %v843_v54 }
 0x157   : > { %v1025_v25 = vadd.f32 %v1009_v52, %v936_v26 }
 0x158   : > { %13036 = vst [vmem:[#allocation16_spill] sm:$0xff] %v7431_v1  ;;  %v1021_v63 = vadd.f32 %v1005_v62, %v932_v19 }
 0x159   : > { %v7437_v60 = vmax.f32 %v1025_v25, 0.0 }
 0x15a   : > { %1066 = vrot.lane.b32.xlu0 %v7422_v45, %s6454_s18  ;;  %v7441_v38 = vmax.f32 %v1021_v63, 0.0 }
 0x15b   : > { %13037 = vst [vmem:[#allocation30_spill] sm:$0xff] %v7437_v60 }
 0x15c   : > { %13038 = vst [vmem:[#allocation28_spill] sm:$0xff] %v7441_v38 }
 0x15d   : > { %1064 = vrot.lane.b32.xlu2 %v7428_v31, %s6454_s18  ;;  %1068 = vrot.lane.b32.xlu1 %v7431_v1, %s6454_s18 }
 0x162   : > { %1072 = vrot.lane.b32.xlu0 %v7437_v60, %s6454_s18 }
 0x165   : > { %1070 = vrot.lane.b32.xlu2 %v7441_v38, %s6454_s18  ;;  %1122 = vrot.lane.b32.xlu1 %v7256_v10, %s6455_s19 }
 0x16a   : > { %1126 = vrot.lane.b32.xlu0 %v7318_v51, %s6455_s19 }
 0x16d   : > { %1124 = vrot.lane.b32.xlu2 %v7284_v48, %s6455_s19  ;;  %1128 = vrot.lane.b32.xlu1 %v7295_v57, %s6455_s19 }
 0x172   : > { %1132 = vrot.lane.b32.xlu0 %v7365_v58, %s6455_s19 }
 0x175   : > { %1130 = vrot.lane.b32.xlu2 %v7322_v20, %s6455_s19  ;;  %1134 = vrot.lane.b32.xlu1 %v7345_v28, %s6455_s19 }
 0x17a   : > { %1138 = vrot.lane.b32.xlu0 %v7408_v22, %s6455_s19 }
 0x17d   : > { %1136 = vrot.lane.b32.xlu2 %v7368_v11, %s6455_s19  ;;  %1140 = vrot.lane.b32.xlu1 %v7389_v35, %s6455_s19 }
 0x182   : > { %1144 = vrot.lane.b32.xlu0 %v7428_v31, %s6455_s19 }
 0x185   : > { %1142 = vrot.lane.b32.xlu2 %v7412_v53, %s6455_s19  ;;  %1146 = vrot.lane.b32.xlu1 %v7422_v45, %s6455_s19 }
 0x18a   : > { %1150 = vrot.lane.b32.xlu0 %v7441_v38, %s6455_s19 }
 0x18d   : > { %1148 = vrot.lane.b32.xlu2 %v7431_v1, %s6455_s19  ;;  %1152 = vrot.lane.b32.xlu1 %v7437_v60, %s6455_s19 }
 0x192   : > { %1214 = vrot.lane.b32.xlu0 %v7284_v48, %s6456_s16 }
 0x195   : > { %1212 = vrot.lane.b32.xlu2 %v7256_v10, %s6456_s16  ;;  %1216 = vrot.lane.b32.xlu1 %v7318_v51, %s6456_s16 }
 0x19a   : > { %1220 = vrot.lane.b32.xlu0 %v7322_v20, %s6456_s16 }
 0x19d   : > { %1218 = vrot.lane.b32.xlu2 %v7295_v57, %s6456_s16  ;;  %1222 = vrot.lane.b32.xlu1 %v7365_v58, %s6456_s16 }
 0x19f   : > { %v7489_v24 = vpop.permute.xlu2 %1046 }
 0x1a2   : > { %1226 = vrot.lane.b32.xlu0 %v7368_v11, %s6456_s16 }
 0x1a5   : > { %1224 = vrot.lane.b32.xlu2 %v7345_v28, %s6456_s16  ;;  %1228 = vrot.lane.b32.xlu1 %v7408_v22, %s6456_s16 }
 0x1a7   : > { %v7497_v32 = vpop.permute.xlu2 %1052 }
 0x1a8   : > { %13039 = vst [vmem:[#allocation32_spill] sm:$0xff] %v7497_v32 }
 0x1aa   : > { %1232 = vrot.lane.b32.xlu0 %v7412_v53, %s6456_s16 }
 0x1ac   : > { %v7501_v46 = vpop.permute.xlu0 %1042 }
 0x1ad   : > { %1230 = vrot.lane.b32.xlu2 %v7389_v35, %s6456_s16  ;;  %1234 = vrot.lane.b32.xlu1 %v7428_v31, %s6456_s16 }
 0x1af   : > { %v7507_v0 = vpop.permute.xlu2 %1058  ;;  %v7509_v8 = vpop.permute.xlu1 %1044 }
 0x1b0   : > { %13040 = vst [vmem:[#allocation31_spill] sm:$0xff] %v7507_v0 }
 0x1b2   : > { %1238 = vrot.lane.b32.xlu0 %v7431_v1, %s6456_s16 }
 0x1b4   : > { %v7513_v18 = vpop.permute.xlu0 %1048 }
 0x1b5   : > { %1236 = vrot.lane.b32.xlu2 %v7422_v45, %s6456_s16  ;;  %1240 = vrot.lane.b32.xlu1 %v7441_v38, %s6456_s16 }
 0x1b7   : > { %v7519_v23 = vpop.permute.xlu2 %1064  ;;  %v7521_v40 = vpop.permute.xlu1 %1050 }
 0x1b8   : > { %13041 = vst [vmem:[#allocation8_spill] sm:$0xff] %v7519_v23 }
 0x1b9   : > { %13042 = vst [vmem:[#allocation6_spill] sm:$0xff] %v7521_v40 }
 0x1ba   : > { %1302 = vrot.lane.b32.xlu0 %v7256_v10, %s6457_s14 }
 0x1bc   : > { %v7525_v13 = vpop.permute.xlu0 %1054 }
 0x1bd   : > { %13043 = vst [vmem:[#allocation12_spill] sm:$0xff] %v7525_v13  ;;  %1242 = vrot.lane.b32.xlu2 %v7437_v60, %s6456_s16  ;;  %1304 = vrot.lane.b32.xlu1 %v7284_v48, %s6457_s14 }
 0x1bf   : > { %v7531_v12 = vpop.permute.xlu2 %1070  ;;  %v7533_v6 = vpop.permute.xlu1 %1056 }
 0x1c0   : > { %13044 = vst [vmem:[#allocation11_spill] sm:$0xff] %v7531_v12 }
 0x1c1   : > { %13045 = vst [vmem:[#allocation21_spill] sm:$0xff] %v7533_v6 }
 0x1c2   : > { %1308 = vrot.lane.b32.xlu0 %v7295_v57, %s6457_s14 }
 0x1c4   : > { %v7537_v3 = vpop.permute.xlu0 %1060 }
 0x1c5   : > { %13046 = vst [vmem:[#allocation7_spill] sm:$0xff] %v7537_v3  ;;  %1306 = vrot.lane.b32.xlu2 %v7318_v51, %s6457_s14  ;;  %1310 = vrot.lane.b32.xlu1 %v7322_v20, %s6457_s14 }
 0x1c7   : > { %v7543_v17 = vpop.permute.xlu2 %1124  ;;  %v7545_v49 = vpop.permute.xlu1 %1062 }
 0x1c8   : > { %13047 = vst [vmem:[#allocation17_spill] sm:$0xff] %v7545_v49 }
 0x1ca   : > { %1314 = vrot.lane.b32.xlu0 %v7345_v28, %s6457_s14 }
 0x1cc   : > { %v7549_v56 = vpop.permute.xlu0 %1066 }
 0x1cd   : > { %13048 = vst [vmem:[#allocation9_spill] sm:$0xff] %v7549_v56  ;;  %1312 = vrot.lane.b32.xlu2 %v7365_v58, %s6457_s14  ;;  %1316 = vrot.lane.b32.xlu1 %v7368_v11, %s6457_s14 }
 0x1cf   : > { %v7555_v30 = vpop.permute.xlu2 %1130  ;;  %v7557_v16 = vpop.permute.xlu1 %1068 }
 0x1d0   : > { %13049 = vst [vmem:[#allocation15_spill] sm:$0xff] %v7555_v30 }
 0x1d1   : > { %13050 = vst [vmem:[#allocation13_spill] sm:$0xff] %v7557_v16 }
 0x1d2   : > { %1320 = vrot.lane.b32.xlu0 %v7389_v35, %s6457_s14 }
 0x1d4   : > { %v7561_v34 = vpop.permute.xlu0 %1072 }
 0x1d5   : > { %13051 = vst [vmem:[#allocation10_spill] sm:$0xff] %v7561_v34  ;;  %1318 = vrot.lane.b32.xlu2 %v7408_v22, %s6457_s14  ;;  %1322 = vrot.lane.b32.xlu1 %v7412_v53, %s6457_s14 }
 0x1d7   : > { %v7567_v33 = vpop.permute.xlu2 %1136  ;;  %v7569_v36 = vpop.permute.xlu1 %1122 }
 0x1d8   : > { %13052 = vst [vmem:[#allocation34_spill] sm:$0xff] %v7567_v33 }
 0x1da   : > { %1326 = vrot.lane.b32.xlu0 %v7422_v45, %s6457_s14 }
 0x1dc   : > { %v7573_v55 = vpop.permute.xlu0 %1126 }
 0x1dd   : > { %1324 = vrot.lane.b32.xlu2 %v7428_v31, %s6457_s14  ;;  %1328 = vrot.lane.b32.xlu1 %v7431_v1, %s6457_s14 }
 0x1df   : > { %v7579_v42 = vpop.permute.xlu2 %1142  ;;  %v7581_v47 = vpop.permute.xlu1 %1128 }
 0x1e0   : > { %13053 = vst [vmem:[#allocation35_spill] sm:$0xff] %v7579_v42 }
 0x1e2   : > { %1332 = vrot.lane.b32.xlu0 %v7437_v60, %s6457_s14 }
 0x1e4   : > { %v7585_v9 = vpop.permute.xlu0 %1132 }
 0x1e5   : > { %13054 = vst [vmem:[#allocation36_spill] sm:$0xff] %v7585_v9  ;;  %1330 = vrot.lane.b32.xlu2 %v7441_v38, %s6457_s14  ;;  %1408 = vrot.lane.b32.xlu1 %v7256_v10, %s6458_s10 }
 0x1e7   : > { %v7591_v2 = vpop.permute.xlu2 %1148  ;;  %v7593_v59 = vpop.permute.xlu1 %1134 }
 0x1e8   : > { %13055 = vst [vmem:[#allocation37_spill] sm:$0xff] %v7591_v2 }
 0x1ea   : > { %1412 = vrot.lane.b32.xlu0 %v7318_v51, %s6458_s10 }
 0x1ec   : > { %v7597_v44 = vpop.permute.xlu0 %1138 }
 0x1ed   : > { %13056 = vst [vmem:[#allocation38_spill] sm:$0xff] %v7597_v44  ;;  %1410 = vrot.lane.b32.xlu2 %v7284_v48, %s6458_s10  ;;  %1414 = vrot.lane.b32.xlu1 %v7295_v57, %s6458_s10 }
 0x1ef   : > { %v7603_v37 = vpop.permute.xlu2 %1212  ;;  %v7605_v7 = vpop.permute.xlu1 %1140 }
 0x1f0   : > { %13057 = vst [vmem:[#allocation39_spill] sm:$0xff] %v7605_v7 }
 0x1f2   : > { %1418 = vrot.lane.b32.xlu0 %v7365_v58, %s6458_s10 }
 0x1f4   : > { %v7609_v29 = vpop.permute.xlu0 %1144 }
 0x1f5   : > { %13058 = vst [vmem:[#allocation40_spill] sm:$0xff] %v7609_v29  ;;  %1416 = vrot.lane.b32.xlu2 %v7322_v20, %s6458_s10  ;;  %1420 = vrot.lane.b32.xlu1 %v7345_v28, %s6458_s10 }
 0x1f7   : > { %v7615_v41 = vpop.permute.xlu2 %1218  ;;  %v7617_v14 = vpop.permute.xlu1 %1146 }
 0x1f8   : > { %13059 = vst [vmem:[#allocation41_spill] sm:$0xff] %v7617_v14 }
 0x1fa   : > { %1424 = vrot.lane.b32.xlu0 %v7408_v22, %s6458_s10 }
 0x1fc   : > { %v7621_v50 = vpop.permute.xlu0 %1150 }
 0x1fd   : > { %13060 = vst [vmem:[#allocation42_spill] sm:$0xff] %v7621_v50  ;;  %1422 = vrot.lane.b32.xlu2 %v7368_v11, %s6458_s10  ;;  %1426 = vrot.lane.b32.xlu1 %v7389_v35, %s6458_s10 }
 0x1ff   : > { %v7627_v4 = vpop.permute.xlu2 %1224  ;;  %v7629_v61 = vpop.permute.xlu1 %1152 }
 0x200   : > { %13061 = vst [vmem:[#allocation43_spill] sm:$0xff] %v7627_v4 }
 0x201   : > { %13062 = vst [vmem:[#allocation44_spill] sm:$0xff] %v7629_v61 }
 0x202   : > { %1430 = vrot.lane.b32.xlu0 %v7428_v31, %s6458_s10 }
 0x204   : > { %v7633_v39 = vpop.permute.xlu0 %1214 }
 0x205   : > { %1428 = vrot.lane.b32.xlu2 %v7412_v53, %s6458_s10  ;;  %1432 = vrot.lane.b32.xlu1 %v7422_v45, %s6458_s10 }
 0x207   : > { %v7639_v27 = vpop.permute.xlu2 %1230  ;;  %v7641_v52 = vpop.permute.xlu1 %1216 }
 0x208   : > { %13063 = vst [vmem:[#allocation45_spill] sm:$0xff] %v7639_v27 }
 0x20a   : > { %1436 = vrot.lane.b32.xlu0 %v7441_v38, %s6458_s10 }
 0x20c   : > { %v7645_v5 = vpop.permute.xlu0 %1220 }
 0x20d   : > { %13064 = vst [vmem:[#allocation46_spill] sm:$0xff] %v7645_v5  ;;  %1434 = vrot.lane.b32.xlu2 %v7431_v1, %s6458_s10  ;;  %1438 = vrot.lane.b32.xlu1 %v7437_v60, %s6458_s10 }
 0x20f   : > { %v7651_v43 = vpop.permute.xlu2 %1236  ;;  %v7653_v54 = vpop.permute.xlu1 %1222 }
 0x210   : > { %13065 = vst [vmem:[#allocation47_spill] sm:$0xff] %v7651_v43 }
 0x211   : > { %13066 = vst [vmem:[#allocation48_spill] sm:$0xff] %v7653_v54 }
 0x212   : > { %1500 = vrot.lane.b32.xlu0 %v7284_v48, %s6459_s9 }
 0x214   : > { %v7657_v26 = vpop.permute.xlu0 %1226 }
 0x215   : > { %13067 = vst [vmem:[#allocation49_spill] sm:$0xff] %v7657_v26  ;;  %1498 = vrot.lane.b32.xlu2 %v7256_v10, %s6459_s9  ;;  %1502 = vrot.lane.b32.xlu1 %v7318_v51, %s6459_s9 }
 0x217   : > { %v7663_v15 = vpop.permute.xlu2 %1242  ;;  %v7665_v25 = vpop.permute.xlu1 %1228 }
 0x218   : > { %13068 = vst [vmem:[#allocation50_spill] sm:$0xff] %v7663_v15 }
 0x219   : > { %13069 = vst [vmem:[#allocation51_spill] sm:$0xff] %v7665_v25 }
 0x21a   : > { %1506 = vrot.lane.b32.xlu0 %v7322_v20, %s6459_s9 }
 0x21c   : > { %v7669_v62 = vpop.permute.xlu0 %1232 }
 0x21d   : > { %13070 = vst [vmem:[#allocation52_spill] sm:$0xff] %v7669_v62  ;;  %1504 = vrot.lane.b32.xlu2 %v7295_v57, %s6459_s9  ;;  %1508 = vrot.lane.b32.xlu1 %v7365_v58, %s6459_s9  ;;  %v7724_v62 = vld [vmem:[%s12614_s1 + $0xc] sm:$0xf] }
 0x21f   : > { %v7675_v19 = vpop.permute.xlu2 %1306  ;;  %v7677_v63 = vpop.permute.xlu1 %1234 }
 0x220   : > { %13071 = vst [vmem:[#allocation53_spill] sm:$0xff] %v7677_v63 }
 0x222   : > { %1512 = vrot.lane.b32.xlu0 %v7368_v11, %s6459_s9 }
 0x224   : > { %v7681_v3 = vpop.permute.xlu0 %1238 }
 0x225   : > { %13072 = vst [vmem:[#allocation54_spill] sm:$0xff] %v7681_v3  ;;  %1510 = vrot.lane.b32.xlu2 %v7345_v28, %s6459_s9  ;;  %1514 = vrot.lane.b32.xlu1 %v7408_v22, %s6459_s9 }
 0x227   : > { %v7687_v49 = vpop.permute.xlu2 %1312  ;;  %v7689_v23 = vpop.permute.xlu1 %1240 }
 0x228   : > { %13073 = vst [vmem:[#allocation55_spill] sm:$0xff] %v7687_v49 }
 0x229   : > { %13074 = vst [vmem:[#allocation56_spill] sm:$0xff] %v7689_v23 }
 0x22a   : > { %1518 = vrot.lane.b32.xlu0 %v7412_v53, %s6459_s9 }
 0x22c   : > { %v7693_v0 = vpop.permute.xlu0 %1302 }
 0x22d   : > { %1516 = vrot.lane.b32.xlu2 %v7389_v35, %s6459_s9  ;;  %1520 = vrot.lane.b32.xlu1 %v7428_v31, %s6459_s9 }
 0x22f   : > { %v7699_v44 = vpop.permute.xlu2 %1318  ;;  %v7701_v7 = vpop.permute.xlu1 %1304 }
 0x230   : > { %13075 = vst [vmem:[#allocation57_spill] sm:$0xff] %v7699_v44  ;;  %v1343_v34 = vsel %vm537_vm3, %v7701_v7, %v7687_v49 }
 0x232   : > { %1524 = vrot.lane.b32.xlu0 %v7431_v1, %s6459_s9 }
 0x234   : > { %v7705_v42 = vpop.permute.xlu0 %1308 }
 0x235   : > { %1522 = vrot.lane.b32.xlu2 %v7422_v45, %s6459_s9  ;;  %1526 = vrot.lane.b32.xlu1 %v7441_v38, %s6459_s9 }
 0x237   : > { %v7711_v29 = vpop.permute.xlu2 %1324  ;;  %v7713_v25 = vpop.permute.xlu1 %1310 }
 0x238   : > { %13076 = vst [vmem:[#allocation58_spill] sm:$0xff] %v7711_v29  ;;  %v1353_v29 = vperm.slane %v7724_v62, 1 }
 0x239   : > { %13077 = vst [vmem:[#allocation59_spill] sm:$0xff] %v7713_v25 }
 0x23a   : > { %1588 = vrot.lane.b32.xlu0 %v7256_v10, %s6460_s28  ;;  %v1365_v49 = vmul.f32 %v1353_v29, %v1343_v34 }
 0x23c   : > { %v7717_v27 = vpop.permute.xlu0 %1314 }
 0x23d   : > { %13078 = vst [vmem:[#allocation60_spill] sm:$0xff] %v7717_v27  ;;  %1528 = vrot.lane.b32.xlu2 %v7437_v60, %s6459_s9  ;;  %1590 = vrot.lane.b32.xlu1 %v7284_v48, %s6460_s28  ;;  %v1344_v16 = vsel %vm537_vm3, %v7675_v19, %v7717_v27 }
 0x23f   : > { %v7728_v63 = vpop.permute.xlu2 %1330  ;;  %v7730_v44 = vpop.permute.xlu1 %1316 }
 0x240   : > { %13079 = vst [vmem:[#allocation61_spill] sm:$0xff] %v7728_v63  ;;  %v1345_v56 = vsel %vm537_vm3, %v7705_v42, %v7730_v44 }
 0x241   : > { %13080 = vst [vmem:[#allocation62_spill] sm:$0xff] %v7730_v44  ;;  %v1373_v48 = vmul.f32 %v1353_v29, %v1345_v56  ;;  %v1342_v44 = vsel %vm537_vm3, %v7693_v0, %v7713_v25  ;;  %v7758_v56 = vld [vmem:[%s12614_s1 + $0x8] sm:$0xf] }
 0x242   : > { %1594 = vrot.lane.b32.xlu0 %v7295_v57, %s6460_s28  ;;  %v1369_v57 = vmul.f32 %v1353_v29, %v1344_v16  ;;  %13082 = vst [vmem:[#allocation64_spill] sm:$0xff] %v7758_v56  ;;  %v1255_v16 = vsel %vm448_vm1, %v7615_v41, %v7657_v26  ;;  %v1361_v25 = vmul.f32 %v1353_v29, %v1342_v44  ;;  %v1263_v27 = vperm.slane %v7758_v56, 1 }
 0x243   : > { %2048 = vmatpush.msra.mxu3 %v1373_v48  ;;  %v1252_v29 = vsel %vm448_vm1, %v7603_v37, %v7645_v5 }
 0x244   : > { %v7743_v12 = vpop.permute.xlu0 %1320  ;;  %v1283_v34 = vmul.f32 %v1263_v27, %v1255_v16  ;;  %v1271_v5 = vmul.f32 %v1263_v27, %v1252_v29 }
 0x245   : > { %13081 = vst [vmem:[#allocation63_spill] sm:$0xff] %v7743_v12  ;;  %1592 = vrot.lane.b32.xlu2 %v7318_v51, %s6460_s28  ;;  %1596 = vrot.lane.b32.xlu1 %v7322_v20, %s6460_s28 }
 0x246   : > { %2049 = vmatpush.msra.mxu3 %v1369_v57  ;;  %v1254_v57 = vsel %vm448_vm1, %v7641_v52, %v7627_v4 }
 0x247   : > { %v7762_v48 = vpop.permute.xlu2 %1410  ;;  %v7768_v12 = vpop.permute.xlu1 %1322  ;;  %v1279_v44 = vmul.f32 %v1263_v27, %v1254_v57  ;;  %v1165_v57 = vsel %vm359_vm2, %v7581_v47, %v7567_v33 }
 0x248   : > { %13083 = vst [vmem:[#allocation65_spill] sm:$0xff] %v7762_v48  ;;  %2050 = vmatpush.msra.mxu3 %v1365_v49  ;;  %v1253_v49 = vsel %vm448_vm1, %v7633_v39, %v7653_v54 }
 0x249   : > { %v1275_v16 = vmul.f32 %v1263_v27, %v1253_v49  ;;  %v1164_v49 = vsel %vm359_vm2, %v7573_v55, %v7593_v59  ;;  %v1352_v27 = vperm.slane %v7724_v62, 0 }
 0x24a   : > { %1600 = vrot.lane.b32.xlu0 %v7345_v28, %s6460_s28  ;;  %2051 = vmatpush.msra.mxu3 %v1361_v25  ;;  %v7792_v25 = vld [vmem:[%s12614_s1 + $0x4] sm:$0xf] }
 0x24b   : > { %v1173_v4 = vperm.slane %v7792_v25, 1 }
 0x24c   : > { %v7777_v48 = vpop.permute.xlu0 %1326  ;;  %2052 = vmatpush.msra.mxu3 %v1283_v34 }
 0x24d   : > { %13084 = vst [vmem:[#allocation66_spill] sm:$0xff] %v7777_v48  ;;  %1598 = vrot.lane.b32.xlu2 %v7365_v58, %s6460_s28  ;;  %1602 = vrot.lane.b32.xlu1 %v7368_v11, %s6460_s28  ;;  %v1189_v29 = vmul.f32 %v1173_v4, %v1164_v49 }
 0x24e   : > { %2053 = vmatpush.msra.mxu3 %v1279_v44  ;;  %v1193_v44 = vmul.f32 %v1173_v4, %v1165_v57 }
 0x24f   : > { %v7796_v34 = vpop.permute.xlu2 %1416  ;;  %v7802_v54 = vpop.permute.xlu1 %1328 }
 0x250   : > { %13085 = vst [vmem:[#allocation67_spill] sm:$0xff] %v7796_v34  ;;  %2054 = vmatpush.msra.mxu3 %v1275_v16  ;;  %v1163_v16 = vsel %vm359_vm2, %v7543_v17, %v7585_v9 }
 0x251   : > { %13086 = vst [vmem:[#allocation68_spill] sm:$0xff] %v7802_v54  ;;  %v1185_v49 = vmul.f32 %v1173_v4, %v1163_v16  ;;  %v1346_v16 = vsel %vm537_vm3, %v7777_v48, %v7693_v0 }
 0x252   : > { %1606 = vrot.lane.b32.xlu0 %v7389_v35, %s6460_s28  ;;  %2055 = vmatpush.msra.mxu3 %v1271_v5  ;;  %v1348_v5 = vsel %vm537_vm3, %v7728_v63, %v7675_v19 }
 0x254   : > { %v7811_v26 = vpop.permute.xlu0 %1332  ;;  %2056 = vmatpush.msra.mxu3 %v1193_v44  ;;  %v1162_v44 = vsel %vm359_vm2, %v7569_v36, %v7555_v30 }
 0x255   : > { %13087 = vst [vmem:[#allocation69_spill] sm:$0xff] %v7811_v26  ;;  %v1349_v33 = vsel %vm537_vm3, %v7811_v26, %v7705_v42  ;;  %1604 = vrot.lane.b32.xlu2 %v7408_v22, %s6460_s28  ;;  %1608 = vrot.lane.b32.xlu1 %v7412_v53, %s6460_s28  ;;  %v1347_v42 = vsel %vm537_vm3, %v7802_v54, %v7701_v7 }
 0x256   : > { %v1372_v57 = vmul.f32 %v1352_v27, %v1349_v33  ;;  %2057 = vmatpush.msra.mxu3 %v1189_v29  ;;  %v1368_v26 = vmul.f32 %v1352_v27, %v1348_v5  ;;  %v1085_v33 = vsel %vm271_vm0, %v7513_v18, %v7533_v6  ;;  %v1181_v30 = vmul.f32 %v1173_v4, %v1162_v44  ;;  %v13090_v5 = vld [vmem:[#allocation24_spill] sm:$0xff] }
 0x257   : > { %v7838_v19 = vpop.permute.xlu2 %1422  ;;  %v7844_v63 = vpop.permute.xlu1 %1408  ;;  %v1364_v7 = vmul.f32 %v1352_v27, %v1347_v42  ;;  %v1084_v29 = vsel %vm271_vm0, %v7489_v24, %v7525_v13  ;;  %v1259_v4 = vsel %vm448_vm1, %v7663_v15, %v7615_v41  ;;  %v1360_v44 = vmul.f32 %v1352_v27, %v1346_v16 }
 0x258   : > { %13088 = vst [vmem:[#allocation70_spill] sm:$0xff] %v7838_v19  ;;  %1961 = vmatpush.msra.mxu0 %v1372_v57  ;;  %2058 = vmatpush.msra.mxu3 %v1185_v49  ;;  %v1103_v57 = vmul.f32 %v1085_v33, %v13090_v5  ;;  %v1262_v49 = vperm.slane %v7758_v56, 0  ;;  %v1258_v42 = vsel %vm448_vm1, %v7689_v23, %v7641_v52  ;;  %v8079_v23 = vld [vmem:[%s12614_s1 + $0x1c] sm:$0xf] }
 0x259   : > { %13089 = vst [vmem:[#allocation71_spill] sm:$0xff] %v7844_v63  ;;  %v1082_v27 = vsel %vm271_vm0, %v7501_v46, %v7521_v40  ;;  %v1257_v52 = vsel %vm448_vm1, %v7681_v3, %v7633_v39  ;;  %v1638_v15 = vperm.slane %v8079_v23, 0 }
 0x25a   : > { %1612 = vrot.lane.b32.xlu0 %v7422_v45, %s6460_s28  ;;  %1962 = vmatpush.msra.mxu0 %v1368_v26  ;;  %v1083_v26 = vsel %vm271_vm0, %v7509_v8, %v7497_v32  ;;  %v1282_v41 = vmul.f32 %v1262_v49, %v1259_v4  ;;  %v7894_v4 = vld [vmem:[%s12616_s3] sm:$0xff]  ;;  %v1274_v39 = vmul.f32 %v1262_v49, %v1257_v52 }
 0x25b   : > { %2059 = vmatpush.msra.mxu3 %v1181_v30  ;;  %v1099_v30 = vmul.f32 %v1084_v29, %v13090_v5  ;;  %v1095_v33 = vmul.f32 %v1083_v26, %v13090_v5  ;;  %13093 = vst [vmem:[#allocation73_spill] sm:$0xff] %v7894_v4  ;;  %v1166_v52 = vsel %vm359_vm2, %v7617_v14, %v7569_v36 }
 0x25c   : > { %1963 = vmatpush.msra.mxu0 %v1364_v7  ;;  %v7861_v0 = vpop.permute.xlu0 %1412  ;;  %v1278_v7 = vmul.f32 %v1262_v49, %v1258_v42  ;;  %v1172_v42 = vperm.slane %v7792_v25, 0 }
 0x25d   : > { %13091 = vst [vmem:[#allocation24_spill] sm:$0xff] %v7861_v0  ;;  %2060 = vmatpush.msra.mxu3 %v1103_v57  ;;  %1610 = vrot.lane.b32.xlu2 %v7428_v31, %s6460_s28  ;;  %v1091_v57 = vmul.f32 %v1082_v27, %v13090_v5  ;;  %v1169_v5 = vsel %vm359_vm2, %v7629_v61, %v7581_v47 }
 0x25e   : > { %1964 = vmatpush.msra.mxu0 %v1360_v44  ;;  %1614 = vrot.lane.b32.xlu1 %v7431_v1, %s6460_s28  ;;  %v1256_v44 = vsel %vm448_vm1, %v7651_v43, %v7603_v37  ;;  %v1168_v37 = vsel %vm359_vm2, %v7621_v50, %v7573_v55  ;;  %v1167_v47 = vsel %vm359_vm2, %v7591_v2, %v7543_v17  ;;  %v7929_v55 = vld [vmem:[%s12616_s3 + $0x18] sm:$0xff] }
 0x25f   : > { %2061 = vmatpush.msra.mxu3 %v1099_v30  ;;  %v7886_v16 = vpop.permute.xlu2 %1428  ;;  %v7888_v29 = vpop.permute.xlu1 %1414  ;;  %v1270_v30 = vmul.f32 %v1262_v49, %v1256_v44  ;;  %v1188_v27 = vmul.f32 %v1172_v42, %v1168_v37  ;;  %13096 = vst [vmem:[#allocation76_spill] sm:$0xff] %v7929_v55  ;;  %v1184_v17 = vmul.f32 %v1172_v42, %v1167_v47  ;;  %v13100_v37 = vld [vmem:[#allocation22_spill] sm:$0xff] }
 0x260   : > { %1965 = vmatpush.msra.mxu0 %v1282_v41  ;;  %13092 = vst [vmem:[#allocation72_spill] sm:$0xff] %v7888_v29  ;;  %v1192_v41 = vmul.f32 %v1172_v42, %v1169_v5  ;;  %v13098_v5 = vld [vmem:[#allocation11_spill] sm:$0xff]  ;;  %v13101_v47 = vld [vmem:[#allocation14_spill] sm:$0xff] }
 0x261   : > { %2062 = vmatpush.msra.mxu3 %v1095_v33  ;;  %v1088_v36 = vsel %vm271_vm0, %v13098_v5, %v7489_v24 }
 0x262   : > { %1618 = vrot.lane.b32.xlu0 %v7437_v60, %s6460_s28  ;;  %1966 = vmatpush.msra.mxu0 %v1278_v7  ;;  %v13097_v7 = vld [vmem:[#allocation10_spill] sm:$0xff] }
 0x263   : > { %2063 = vmatpush.msra.mxu3 %v1091_v57  ;;  %v1089_v57 = vsel %vm271_vm0, %v13097_v7, %v7513_v18  ;;  %v13102_v18 = vld [vmem:[#allocation13_spill] sm:$0xff] }
 0x264   : > { %2064 = vmatmul.f32.vlgmr.msra.gmra.mxu3 %v7894_v4  ;;  %1967 = vmatpush.msra.mxu0 %v1274_v39  ;;  %v7907_v26 = vpop.permute.xlu0 %1418  ;;  %v1180_v39 = vmul.f32 %v1172_v42, %v1166_v52  ;;  %v1098_v52 = vmul.f32 %v1088_v36, %v13100_v37 }
 0x265   : > { %13094 = vst [vmem:[#allocation74_spill] sm:$0xff] %v7907_v26  ;;  %1616 = vrot.lane.b32.xlu2 %v7441_v38, %s6460_s28 }
 0x266   : > { %1968 = vmatpush.msra.mxu0 %v1270_v30  ;;  %1678 = vrot.lane.b32.xlu1 %v7256_v10, %s6461_s13  ;;  %v13099_v30 = vld [vmem:[#allocation18_spill] sm:$0xff] }
 0x267   : > { %v7922_v49 = vpop.permute.xlu2 %1434  ;;  %v7924_v33 = vpop.permute.xlu1 %1420 }
 0x268   : > { %13095 = vst [vmem:[#allocation75_spill] sm:$0xff] %v7922_v49  ;;  %1969 = vmatpush.msra.mxu0 %v1192_v41  ;;  %v1102_v41 = vmul.f32 %v1089_v57, %v13100_v37  ;;  %v13105_v57 = vld [vmem:[#allocation9_spill] sm:$0xff] }
 0x26a   : > { %1682 = vrot.lane.b32.xlu0 %v7318_v51, %s6461_s13  ;;  %1970 = vmatpush.msra.mxu0 %v1188_v27  ;;  %v1087_v27 = vsel %vm271_vm0, %v13102_v18, %v7509_v8 }
 0x26b   : > { %v1094_v8 = vmul.f32 %v1087_v27, %v13100_v37  ;;  %v7990_v27 = vld [vmem:[%s12616_s3 + $0x48] sm:$0xff] }
 0x26c   : > { %2067 = vmatmul.f32.gmra.mxu3 %v7929_v55  ;;  %1971 = vmatpush.msra.mxu0 %v1184_v17  ;;  %v7942_v44 = vpop.permute.xlu0 %1424  ;;  %v7965_v17 = vld [vmem:[%s12616_s3 + $0x30] sm:$0xff]  ;;  %13108 = vst [vmem:[#allocation78_spill] sm:$0xff] %v7990_v27 }
 0x26d   : > { %1680 = vrot.lane.b32.xlu2 %v13099_v30, %s6461_s13  ;;  %13104 = vst [vmem:[#allocation22_spill] sm:$0xff] %v7965_v17 }
 0x26e   : > { %1972 = vmatpush.msra.mxu0 %v1180_v39  ;;  %1684 = vrot.lane.b32.xlu1 %v13101_v47, %s6461_s13  ;;  %v1086_v39 = vsel %vm271_vm0, %v13105_v57, %v7501_v46 }
 0x26f   : > { %v7957_v42 = vpop.permute.xlu2 %1498  ;;  %v7960_v24 = vpop.permute.xlu1 %1426 }
 0x270   : > { %13103 = vst [vmem:[#allocation18_spill] sm:$0xff] %v7957_v42  ;;  %1973 = vmatpush.msra.mxu0 %v1102_v41  ;;  %v1090_v41 = vmul.f32 %v1086_v39, %v13100_v37 }
 0x272   : > { %1688 = vrot.lane.b32.xlu0 %v7365_v58, %s6461_s13  ;;  %1974 = vmatpush.msra.mxu0 %v1098_v52 }
 0x274   : > { %2070 = vmatmul.f32.gmra.mxu3 %v7965_v17  ;;  %1975 = vmatpush.msra.mxu0 %v1094_v8  ;;  %v7975_v36 = vpop.permute.xlu0 %1430 }
 0x275   : > { %1686 = vrot.lane.b32.xlu2 %v7322_v20, %s6461_s13 }
 0x276   : > { %1976 = vmatpush.msra.mxu0 %v1090_v41  ;;  %1690 = vrot.lane.b32.xlu1 %v7345_v28, %s6461_s13 }
 0x277   : > { %1977 = vmatmul.f32.vlgmr.msra.gmra.mxu0 %v7894_v4  ;;  %v7983_v46 = vpop.permute.xlu2 %1504  ;;  %v7985_v52 = vpop.permute.xlu1 %1432 }
 0x278   : > { %13106 = vst [vmem:[#allocation14_spill] sm:$0xff] %v7983_v46 }
 0x279   : > { %13107 = vst [vmem:[#allocation77_spill] sm:$0xff] %v7985_v52 }
 0x27a   : > { %1694 = vrot.lane.b32.xlu0 %v7408_v22, %s6461_s13 }
 0x27c   : > { %2073 = vmatmul.f32.gmra.mxu3 %v7990_v27  ;;  %v7995_v37 = vpop.permute.xlu0 %1436 }
 0x27d   : > { %13109 = vst [vmem:[#allocation79_spill] sm:$0xff] %v7995_v37  ;;  %1692 = vrot.lane.b32.xlu2 %v7368_v11, %s6461_s13 }
 0x27e   : > { %1696 = vrot.lane.b32.xlu1 %v7389_v35, %s6461_s13 }
 0x27f   : > { %1980 = vmatmul.f32.gmra.mxu0 %v7929_v55  ;;  %v8002_v39 = vpop.permute.xlu2 %1510  ;;  %v8004_v8 = vpop.permute.xlu1 %1438 }
 0x280   : > { %13110 = vst [vmem:[#allocation80_spill] sm:$0xff] %v8004_v8 }
 0x282   : > { %1700 = vrot.lane.b32.xlu0 %v7428_v31, %s6461_s13 }
 0x284   : > { %v8008_v41 = vpop.permute.xlu0 %1500 }
 0x285   : > { %13111 = vst [vmem:[#allocation81_spill] sm:$0xff] %v8008_v41  ;;  %1698 = vrot.lane.b32.xlu2 %v7412_v53, %s6461_s13 }
 0x286   : > { %1702 = vrot.lane.b32.xlu1 %v7422_v45, %s6461_s13  ;;  %v1925_v45 = vld [vmem:[%s12617_s4 + $0x8] sm:$0xff] }
 0x287   : > { %1983 = vmatmul.f32.gmra.mxu0 %v7965_v17  ;;  %v8015_v57 = vpop.permute.xlu2 %1516  ;;  %v8017_v18 = vpop.permute.xlu1 %1502 }
 0x288   : > { %13112 = vst [vmem:[#allocation82_spill] sm:$0xff] %v8017_v18 }
 0x28a   : > { %1706 = vrot.lane.b32.xlu0 %v7441_v38, %s6461_s13  ;;  %v1924_v38 = vld [vmem:[%s12617_s4] sm:$0xff] }
 0x28c   : > { %v8021_v5 = vpop.permute.xlu0 %1506 }
 0x28d   : > { %1704 = vrot.lane.b32.xlu2 %v7431_v1, %s6461_s13  ;;  %v1926_v1 = vld [vmem:[%s12617_s4 + $0x10] sm:$0xff] }
 0x28e   : > { %1708 = vrot.lane.b32.xlu1 %v7437_v60, %s6461_s13 }
 0x28f   : > { %1986 = vmatmul.f32.gmra.mxu0 %v7990_v27  ;;  %v8031_v17 = vpop.permute.xlu2 %1522  ;;  %v8033_v7 = vpop.permute.xlu1 %1508 }
 0x290   : > { %13113 = vst [vmem:[#allocation83_spill] sm:$0xff] %v8031_v17 }
 0x292   : > { %1935 = vperm.xlu0 %6386, %v1925_v45   ;;  %v1927_v45 = vld [vmem:[%s12617_s4 + $0x18] sm:$0xff] }
 0x294   : > { %v8038_v14 = vpop.permute.xlu0 %1512 }
 0x295   : > { %1930 = vperm.xlu2 %6385, %v1924_v38   ;;  %v1541_v9 = vsel %vm772_vm5, %v7983_v46, %v8038_v14 }
 0x296   : > { %1940 = vperm.xlu1 %6387, %v1926_v1  }
 0x297   : > { %v8043_v27 = vpop.permute.xlu2 %1528  ;;  %v8045_v60 = vpop.permute.xlu1 %1514 }
 0x298   : > { %13114 = vst [vmem:[#allocation84_spill] sm:$0xff] %v8043_v27 }
 0x29c   : > { %v8050_v20 = vpop.permute.xlu0 %1518 }
 0x29d   : > { %1945 = vperm.xlu2 %6385, %v1927_v45  }
 0x29f   : > { %v8052_v2 = vpop.permute.xlu2 %1592  ;;  %v8054_v58 = vpop.permute.xlu1 %1520 }
 0x2a0   : > { %13115 = vst [vmem:[#allocation85_spill] sm:$0xff] %v8052_v2 }
 0x2a4   : > { %v8056_v50 = vpop.permute.xlu0 %1524 }
 0x2a5   : > { %13116 = vst [vmem:[#allocation86_spill] sm:$0xff] %v8056_v50 }
 0x2a7   : > { %v8058_v28 = vpop.permute.xlu2 %1598  ;;  %v8060_v1 = vpop.permute.xlu1 %1526 }
 0x2a8   : > { %13117 = vst [vmem:[#allocation87_spill] sm:$0xff] %v8060_v1 }
 0x2ac   : > { %v8062_v38 = vpop.permute.xlu0 %1588 }
 0x2ad   : > { %13118 = vst [vmem:[#allocation88_spill] sm:$0xff] %v8062_v38 }
 0x2af   : > { %v8064_v55 = vpop.permute.xlu2 %1604  ;;  %v8066_v61 = vpop.permute.xlu1 %1590 }
 0x2b0   : > { %13119 = vst [vmem:[#allocation89_spill] sm:$0xff] %v8066_v61  ;;  %v1629_v40 = vsel %vm861_vm6, %v8066_v61, %v8058_v28 }
 0x2b4   : > { %v8068_v11 = vpop.permute.xlu0 %1594 }
 0x2b5   : > { %13120 = vst [vmem:[#allocation90_spill] sm:$0xff] %v8068_v11 }
 0x2b7   : > { %v8070_v43 = vpop.permute.xlu2 %1610  ;;  %v8072_v45 = vpop.permute.xlu1 %1596 }
 0x2b8   : > { %13121 = vst [vmem:[#allocation91_spill] sm:$0xff] %v8072_v45 }
 0x2bc   : > { %v8074_v3 = vpop.permute.xlu0 %1600 }
 0x2bd   : > { %v1630_v54 = vsel %vm861_vm6, %v8052_v2, %v8074_v3  ;;  %v8107_v2 = vld [vmem:[%s12614_s1 + $0x18] sm:$0xf] }
 0x2be   : > { %v1654_v22 = vmul.f32 %v1638_v15, %v1630_v54  ;;  %v1548_v54 = vperm.slane %v8107_v2, 0 }
 0x2bf   : > { %v8081_v4 = vpop.permute.xlu1 %1602  ;;  %v8092_v32 = vpop.permute.xlu2 %1616 }
 0x2c0   : > { %v1631_v48 = vsel %vm861_vm6, %v8068_v11, %v8081_v4  ;;  %13122 = vst [vmem:[#allocation92_spill] sm:$0xff] %v8092_v32  ;;  %v1628_v11 = vsel %vm861_vm6, %v8062_v38, %v8072_v45  ;;  %v1540_v38 = vsel %vm772_vm5, %v8017_v18, %v8002_v39  ;;  %v1568_v45 = vmul.f32 %v1548_v54, %v1541_v9  ;;  %v8135_v9 = vld [vmem:[%s12614_s1 + $0x14] sm:$0xf] }
 0x2c1   : > { %v1658_v13 = vmul.f32 %v1638_v15, %v1631_v48  ;;  %v1650_v48 = vmul.f32 %v1638_v15, %v1629_v40  ;;  %v1539_v40 = vsel %vm772_vm5, %v8008_v41, %v8033_v7 }
 0x2c3   : > { %1990 = vmatpush.msra.mxu1 %v1658_v13  ;;  %v1646_v13 = vmul.f32 %v1638_v15, %v1628_v11  ;;  %v1564_v11 = vmul.f32 %v1548_v54, %v1540_v38  ;;  %v1538_v15 = vsel %vm772_vm5, %v7957_v42, %v8021_v5  ;;  %v1450_v42 = vsel %vm683_vm4, %v7861_v0, %v7924_v33 }
 0x2c4   : > { %v8094_v6 = vpop.permute.xlu0 %1606  ;;  %v1556_v38 = vmul.f32 %v1548_v54, %v1538_v15 }
 0x2c5   : > { %1991 = vmatpush.msra.mxu1 %v1654_v22 }
 0x2c7   : > { %v8113_v61 = vpop.permute.xlu1 %1608  ;;  %1992 = vmatpush.msra.mxu1 %v1650_v48  ;;  %v8126_v46 = vpop.permute.xlu2 %1680  ;;  %v1560_v48 = vmul.f32 %v1548_v54, %v1539_v40  ;;  %v13125_v40 = vld [vmem:[#allocation65_spill] sm:$0xff] }
 0x2c9   : > { %1993 = vmatpush.msra.mxu1 %v1646_v13  ;;  %v1451_v13 = vsel %vm683_vm4, %v7888_v29, %v7838_v19  ;;  %v1449_v29 = vsel %vm683_vm4, %v13125_v40, %v7907_v26  ;;  %v1640_v19 = vperm.slane %v8079_v23, 2 }
 0x2cb   : > { %1994 = vmatpush.msra.mxu1 %v1568_v45  ;;  %v1458_v45 = vperm.slane %v8135_v9, 0 }
 0x2cc   : > { %v8120_v22 = vpop.permute.xlu0 %1612 }
 0x2cd   : > { %13123 = vst [vmem:[#allocation93_spill] sm:$0xff] %v8120_v22  ;;  %1995 = vmatpush.msra.mxu1 %v1564_v11  ;;  %v1478_v18 = vmul.f32 %v1458_v45, %v1451_v13  ;;  %v1474_v54 = vmul.f32 %v1458_v45, %v1450_v42 }
 0x2cf   : > { %1996 = vmatpush.msra.mxu1 %v1560_v48  ;;  %v1622_v48 = vsel %vm861_vm6, %v8113_v61, %v8092_v32  ;;  %v8167_v40 = vpop.permute.xlu2 %1686 }
 0x2d0   : > { %v8141_v41 = vpop.permute.xlu1 %1614  ;;  %v1656_v0 = vmul.f32 %v1640_v19, %v1622_v48 }
 0x2d1   : > { %13124 = vst [vmem:[#allocation94_spill] sm:$0xff] %v8141_v41  ;;  %1997 = vmatpush.msra.mxu1 %v1556_v38  ;;  %v1448_v38 = vsel %vm683_vm4, %v7844_v63, %v7796_v34  ;;  %v1621_v42 = vsel %vm861_vm6, %v8094_v6, %v8141_v41  ;;  %v1620_v63 = vsel %vm861_vm6, %v8064_v55, %v8120_v22  ;;  %v13130_v22 = vld [vmem:[#allocation63_spill] sm:$0xff] }
 0x2d2   : > { %v1652_v34 = vmul.f32 %v1640_v19, %v1621_v42  ;;  %v1648_v48 = vmul.f32 %v1640_v19, %v1620_v63  ;;  %v1531_v63 = vsel %vm772_vm5, %v8015_v57, %v8056_v50  ;;  %v13131_v41 = vld [vmem:[#allocation55_spill] sm:$0xff] }
 0x2d3   : > { %1998 = vmatpush.msra.mxu1 %v1478_v18  ;;  %v1470_v18 = vmul.f32 %v1458_v45, %v1449_v29  ;;  %v1533_v29 = vsel %vm772_vm5, %v8054_v58, %v8043_v27 }
 0x2d4   : > { %v8148_v11 = vpop.permute.xlu0 %1618 }
 0x2d5   : > { %v1623_v15 = vsel %vm861_vm6, %v8070_v43, %v8148_v11  ;;  %1999 = vmatpush.msra.mxu1 %v1474_v54 }
 0x2d6   : > { %v1660_v13 = vmul.f32 %v1640_v19, %v1623_v15  ;;  %v1466_v15 = vmul.f32 %v1458_v45, %v1448_v38  ;;  %v8194_v38 = vld [vmem:[%s12614_s1 + $0x20] sm:$0xf]  ;;  %v13127_v19 = vld [vmem:[#allocation62_spill] sm:$0xff] }
 0x2d7   : > { %2000 = vmatpush.msra.mxu1 %v1470_v18  ;;  %v8205_v42 = vpop.permute.xlu2 %1692 }
 0x2d8   : > { %2164 = vmatpush.msrb.mxu3 %v1660_v13  ;;  %v8173_v26 = vpop.permute.xlu1 %1678  ;;  %v1550_v13 = vperm.slane %v8107_v2, 2 }
 0x2d9   : > { %2001 = vmatpush.msra.mxu1 %v1466_v15 }
 0x2da   : > { %2165 = vmatpush.msrb.mxu3 %v1656_v0  ;;  %v1532_v0 = vsel %vm772_vm5, %v8050_v20, %v8060_v1  ;;  %v1570_v45 = vmul.f32 %v1550_v13, %v1533_v29  ;;  %v1354_v29 = vperm.slane %v7724_v62, 2  ;;  %v1562_v50 = vmul.f32 %v1550_v13, %v1531_v63 }
 0x2db   : > { %2002 = vmatpush.msra.mxu1 %v13101_v47  ;;  %v1566_v18 = vmul.f32 %v1550_v13, %v1532_v0  ;;  %v1530_v0 = vsel %vm772_vm5, %v8045_v60, %v8031_v17 }
 0x2dc   : > { %2166 = vmatpush.msrb.mxu3 %v1652_v34  ;;  %v8183_v54 = vpop.permute.xlu0 %1682  ;;  %v13126_v34 = vld [vmem:[#allocation58_spill] sm:$0xff]  ;;  %v1558_v63 = vmul.f32 %v1550_v13, %v1530_v0  ;;  %v13135_v13 = vld [vmem:[#allocation49_spill] sm:$0xff] }
 0x2dd   : > { %2003 = vmatpush.msra.mxu1 %v7318_v51  ;;  %v1341_v47 = vsel %vm537_vm3, %v13127_v19, %v13126_v34  ;;  %v8213_v51 = vld [vmem:[%s12616_s3 + $0x8] sm:$0xff] }
 0x2de   : > { %2167 = vmatpush.msrb.mxu3 %v1648_v48  ;;  %v1728_v48 = vperm.slane %v8194_v38, 0  ;;  %v1374_v1 = vmul.f32 %v1354_v29, %v1341_v47 }
 0x2df   : > { %2004 = vmatpush.msra.mxu1 %v13099_v30 }
 0x2e0   : > { %2168 = vmatpush.msrb.mxu3 %v1570_v45  ;;  %v8207_v15 = vpop.permute.xlu1 %1684  ;;  %v13129_v45 = vld [vmem:[#allocation60_spill] sm:$0xff] }
 0x2e1   : > { %13128 = vst [vmem:[#allocation58_spill] sm:$0xff] %v8207_v15  ;;  %v1721_v30 = vsel %vm950_vm7, %v8207_v15, %v8205_v42  ;;  %v1340_v19 = vsel %vm537_vm3, %v13129_v45, %v7768_v12  ;;  %2005 = vmatpush.msra.mxu1 %v7256_v10  ;;  %v1339_v45 = vsel %vm537_vm3, %v13131_v41, %v13130_v22  ;;  %v1460_v10 = vperm.slane %v8135_v9, 2 }
 0x2e2   : > { %2169 = vmatpush.msrb.mxu3 %v1566_v18  ;;  %v1748_v27 = vmul.f32 %v1728_v48, %v1721_v30  ;;  %v1443_v18 = vsel %vm683_vm4, %v7975_v36, %v8004_v8  ;;  %2006 = vmatmul.f32.vlgmr.msra.gmra.mxu1 %v8213_v51  ;;  %v1370_v47 = vmul.f32 %v1354_v29, %v1340_v19  ;;  %v13133_v8 = vld [vmem:[#allocation59_spill] sm:$0xff] }
 0x2e3   : > { %2135 = vmatpush.msrb.mxu1 %v1374_v1  ;;  %v1442_v30 = vsel %vm683_vm4, %v7886_v16, %v7995_v37  ;;  %v1480_v32 = vmul.f32 %v1460_v10, %v1443_v18  ;;  %v1366_v41 = vmul.f32 %v1354_v29, %v1339_v45  ;;  %v13134_v1 = vld [vmem:[#allocation53_spill] sm:$0xff]  ;;  %v1264_v18 = vperm.slane %v7758_v56, 2  ;;  %v13139_v56 = vld [vmem:[#allocation48_spill] sm:$0xff] }
 0x2e4   : > { %2170 = vmatpush.msrb.mxu3 %v1562_v50  ;;  %v8235_v17 = vpop.permute.xlu0 %1688  ;;  %2031 = vmatpush.msra.mxu2 %v1748_v27  ;;  %v13132_v50 = vld [vmem:[#allocation57_spill] sm:$0xff]  ;;  %v1441_v27 = vsel %vm683_vm4, %v7960_v24, %v7922_v49  ;;  %v1251_v0 = vsel %vm448_vm1, %v13135_v13, %v13134_v1  ;;  %v1476_v19 = vmul.f32 %v1460_v10, %v1442_v30 }
 0x2e5   : > { %v1338_v15 = vsel %vm537_vm3, %v13133_v8, %v13132_v50  ;;  %2136 = vmatpush.msrb.mxu1 %v1370_v47  ;;  %v8263_v8 = vld [vmem:[%s12616_s3 + $0x20] sm:$0xff]  ;;  %v13136_v47 = vld [vmem:[#allocation52_spill] sm:$0xff]  ;;  %v1472_v30 = vmul.f32 %v1460_v10, %v1441_v27  ;;  %v1284_v13 = vmul.f32 %v1264_v18, %v1251_v0  ;;  %v1718_v27 = vsel %vm950_vm7, %v8173_v26, %v8167_v40 }
 0x2e6   : > { %2171 = vmatpush.msrb.mxu3 %v1558_v63  ;;  %v1362_v37 = vmul.f32 %v1354_v29, %v1338_v15  ;;  %v13137_v15 = vld [vmem:[#allocation43_spill] sm:$0xff]  ;;  %v13138_v49 = vld [vmem:[#allocation45_spill] sm:$0xff] }
 0x2e7   : > { %2137 = vmatpush.msrb.mxu1 %v1366_v41  ;;  %v1250_v29 = vsel %vm448_vm1, %v13137_v15, %v13136_v47  ;;  %v1719_v41 = vsel %vm950_vm7, %v8126_v46, %v8235_v17  ;;  %v1249_v1 = vsel %vm448_vm1, %v13139_v56, %v13138_v49  ;;  %v13141_v47 = vld [vmem:[#allocation46_spill] sm:$0xff] }
 0x2e8   : > { %2172 = vmatpush.msrb.mxu3 %v1480_v32  ;;  %v8258_v63 = vpop.permute.xlu1 %1690  ;;  %v1440_v32 = vsel %vm683_vm4, %v7942_v44, %v7985_v52  ;;  %v1740_v0 = vmul.f32 %v1728_v48, %v1719_v41 }
 0x2e9   : > { %v1720_v45 = vsel %vm950_vm7, %v8183_v54, %v8258_v63  ;;  %2138 = vmatpush.msrb.mxu1 %v1362_v37  ;;  %v1468_v15 = vmul.f32 %v1460_v10, %v1440_v32  ;;  %v1280_v37 = vmul.f32 %v1264_v18, %v1250_v29  ;;  %v1276_v10 = vmul.f32 %v1264_v18, %v1249_v1 }
 0x2ea   : > { %2173 = vmatpush.msrb.mxu3 %v1476_v19  ;;  %v1744_v52 = vmul.f32 %v1728_v48, %v1720_v45  ;;  %2009 = vmatmul.f32.gmra.mxu1 %v8263_v8  ;;  %v1627_v45 = vsel %vm861_vm6, %v8081_v4, %v8070_v43  ;;  %v1736_v32 = vmul.f32 %v1728_v48, %v1718_v27  ;;  %v1639_v29 = vperm.slane %v8079_v23, 1  ;;  %v13142_v4 = vld [vmem:[#allocation40_spill] sm:$0xff]  ;;  %v13144_v27 = vld [vmem:[#allocation35_spill] sm:$0xff] }
 0x2eb   : > { %2139 = vmatpush.msrb.mxu1 %v1284_v13  ;;  %v1626_v43 = vsel %vm861_vm6, %v8074_v3, %v8113_v61  ;;  %v1174_v1 = vperm.slane %v7792_v25, 2  ;;  %v1160_v3 = vsel %vm359_vm2, %v7593_v59, %v13144_v27  ;;  %v1625_v61 = vsel %vm861_vm6, %v8058_v28, %v8094_v6  ;;  %v13147_v28 = vld [vmem:[#allocation36_spill] sm:$0xff] }
 0x2ec   : > { %2174 = vmatpush.msrb.mxu3 %v1472_v30  ;;  %v8283_v19 = vpop.permute.xlu0 %1694  ;;  %2032 = vmatpush.msra.mxu2 %v1744_v52  ;;  %v13140_v30 = vld [vmem:[#allocation51_spill] sm:$0xff]  ;;  %v1659_v13 = vmul.f32 %v1639_v29, %v1627_v45 }
 0x2ed   : > { %v1248_v56 = vsel %vm448_vm1, %v13141_v47, %v13140_v30  ;;  %2140 = vmatpush.msrb.mxu1 %v1280_v37  ;;  %v8304_v52 = vld [vmem:[%s12616_s3 + $0x10] sm:$0xff]  ;;  %v13143_v47 = vld [vmem:[#allocation34_spill] sm:$0xff]  ;;  %v1190_v45 = vmul.f32 %v1174_v1, %v1160_v3 }
 0x2ee   : > { %2175 = vmatpush.msrb.mxu3 %v1468_v15  ;;  %2033 = vmatpush.msra.mxu2 %v1740_v0  ;;  %v1161_v48 = vsel %vm359_vm2, %v13143_v47, %v13142_v4  ;;  %v1272_v15 = vmul.f32 %v1264_v18, %v1248_v56  ;;  %v1655_v18 = vmul.f32 %v1639_v29, %v1626_v43  ;;  %v8335_v0 = vpop.permute.xlu2 %1698  ;;  %v13148_v47 = vld [vmem:[#allocation29_spill] sm:$0xff]  ;;  %v13150_v3 = vld [vmem:[#allocation15_spill] sm:$0xff] }
 0x2ef   : > { %2141 = vmatpush.msrb.mxu1 %v1276_v10  ;;  %v1194_v37 = vmul.f32 %v1174_v1, %v1161_v48  ;;  %v13146_v10 = vld [vmem:[#allocation39_spill] sm:$0xff]  ;;  %v1651_v43 = vmul.f32 %v1639_v29, %v1625_v61  ;;  %v1537_v48 = vsel %vm772_vm5, %v8038_v14, %v8054_v58  ;;  %v1549_v58 = vperm.slane %v8107_v2, 1 }
 0x2f0   : > { %2176 = vmatpush.msrb.mxu3 %v7428_v31  ;;  %v8317_v41 = vpop.permute.xlu1 %1696  ;;  %2034 = vmatpush.msra.mxu2 %v1736_v32  ;;  %v8322_v31 = vld [vmem:[%s12616_s3 + $0x38] sm:$0xff]  ;;  %v1159_v6 = vsel %vm359_vm2, %v13147_v28, %v13146_v10  ;;  %v1729_v32 = vperm.slane %v8194_v38, 1  ;;  %v8374_v28 = vld [vmem:[%s12616_s3 + $0x28] sm:$0xff] }
 0x2f1   : > { %6200 = vmatmul.msk.f32.vlgmr.msra.gmra.mxu2 %vm1948_vm8, %v8304_v52  ;;  %2142 = vmatpush.msrb.mxu1 %v1272_v15  ;;  %v13149_v15 = vld [vmem:[#allocation38_spill] sm:$0xff]  ;;  %v1715_v14 = vsel %vm950_vm7, %v8235_v17, %v8317_v41 }
 0x2f2   : > { %2177 = vmatpush.msrb.mxu3 %v7412_v53  ;;  %2077 = vmatpush.msrb.mxu2 %v1659_v13  ;;  %v13145_v53 = vld [vmem:[#allocation91_spill] sm:$0xff]  ;;  %v1158_v61 = vsel %vm359_vm2, %v13150_v3, %v13149_v15 }
 0x2f3   : > { %2012 = vmatmul.f32.gmra.mxu1 %v8322_v31  ;;  %v1624_v56 = vsel %vm861_vm6, %v13145_v53, %v8064_v55  ;;  %v1716_v55 = vsel %vm950_vm7, %v8258_v63, %v8335_v0  ;;  %v1186_v53 = vmul.f32 %v1174_v1, %v1159_v6  ;;  %v13154_v6 = vld [vmem:[#allocation21_spill] sm:$0xff]  ;;  %v1182_v17 = vmul.f32 %v1174_v1, %v1158_v61 }
 0x2f4   : > { %2178 = vmatpush.msrb.mxu3 %v7389_v35  ;;  %v8339_v59 = vpop.permute.xlu0 %1700  ;;  %2078 = vmatpush.msrb.mxu2 %v1655_v18  ;;  %v13151_v18 = vld [vmem:[#allocation31_spill] sm:$0xff]  ;;  %v1647_v63 = vmul.f32 %v1639_v29, %v1624_v56  ;;  %v1745_v29 = vmul.f32 %v1729_v32, %v1716_v55  ;;  %v13153_v56 = vld [vmem:[#allocation8_spill] sm:$0xff]  ;;  %v1741_v1 = vmul.f32 %v1729_v32, %v1715_v14  ;;  %v13155_v55 = vld [vmem:[#allocation17_spill] sm:$0xff]  ;;  %v8412_v61 = vperm.slane %v7724_v62, 3 }
 0x2f5   : > { %2143 = vmatpush.msrb.mxu1 %v1194_v37  ;;  %v1717_v35 = vsel %vm950_vm7, %v8205_v42, %v8339_v59  ;;  %v13152_v42 = vld [vmem:[#allocation6_spill] sm:$0xff]  ;;  %v1534_v62 = vsel %vm772_vm5, %v8021_v5, %v8045_v60 }
 0x2f6   : > { %2179 = vmatpush.msrb.mxu3 %v13148_v47  ;;  %v1749_v13 = vmul.f32 %v1729_v32, %v1717_v35  ;;  %v1078_v37 = vsel %vm271_vm0, %v13152_v42, %v13151_v18  ;;  %2079 = vmatpush.msrb.mxu2 %v1651_v43  ;;  %v1081_v43 = vsel %vm271_vm0, %v13154_v6, %v13153_v56  ;;  %v13157_v42 = vld [vmem:[#allocation27_spill] sm:$0xff]  ;;  %v13163_v60 = vld [vmem:[#allocation70_spill] sm:$0xff] }
 0x2f7   : > { %2144 = vmatpush.msrb.mxu1 %v1190_v45  ;;  %v1536_v45 = vsel %vm772_vm5, %v8002_v39, %v8050_v20  ;;  %2180 = vmatmul.f32.vlgmr.msrb.gmra.mxu3 %v8213_v51  ;;  %v1569_v47 = vmul.f32 %v1549_v58, %v1537_v48  ;;  %v1714_v20 = vsel %vm950_vm7, %v8167_v40, %v8283_v19  ;;  %v13156_v48 = vld [vmem:[#allocation12_spill] sm:$0xff] }
 0x2f8   : > { %2118 = vmatpush.msrb.mxu0 %v1749_v13  ;;  %2080 = vmatpush.msrb.mxu2 %v1647_v63  ;;  %v8390_v35 = vpop.permute.xlu1 %1702  ;;  %v8395_v13 = vld [vmem:[%s12616_s3 + $0x50] sm:$0xff]  ;;  %v1535_v39 = vsel %vm772_vm5, %v8033_v7, %v8015_v57  ;;  %v1080_v3 = vsel %vm271_vm0, %v13156_v48, %v13155_v55  ;;  %v1565_v40 = vmul.f32 %v1549_v58, %v1536_v45  ;;  %v13160_v7 = vld [vmem:[#allocation61_spill] sm:$0xff] }
 0x2f9   : > { %2145 = vmatpush.msrb.mxu1 %v1186_v53  ;;  %6201 = vmatmul.msk.f32.gmra.mxu2 %vm1948_vm8, %v8374_v28  ;;  %v1104_v63 = vmul.f32 %v1081_v43, %v13157_v42  ;;  %v13158_v53 = vld [vmem:[#allocation7_spill] sm:$0xff]  ;;  %v1336_v57 = vsel %vm537_vm3, %v7768_v12, %v13160_v7  ;;  %v1737_v14 = vmul.f32 %v1729_v32, %v1714_v20  ;;  %v13161_v45 = vld [vmem:[#allocation69_spill] sm:$0xff]  ;;  %v13162_v12 = vld [vmem:[#allocation68_spill] sm:$0xff] }
 0x2fa   : > { %2119 = vmatpush.msrb.mxu0 %v1745_v29  ;;  %2081 = vmatpush.msrb.mxu2 %v1569_v47  ;;  %v13159_v29 = vld [vmem:[#allocation32_spill] sm:$0xff]  ;;  %v1337_v43 = vsel %vm537_vm3, %v13126_v34, %v13161_v45  ;;  %v1561_v47 = vmul.f32 %v1549_v58, %v1535_v39  ;;  %v1447_v5 = vsel %vm683_vm4, %v13163_v60, %v7975_v36  ;;  %v13164_v32 = vld [vmem:[#allocation90_spill] sm:$0xff] }
 0x2fb   : > { %2146 = vmatpush.msrb.mxu1 %v1182_v17  ;;  %v1079_v6 = vsel %vm271_vm0, %v13159_v29, %v13158_v53  ;;  %v1100_v17 = vmul.f32 %v1080_v3, %v13157_v42  ;;  %v1092_v34 = vmul.f32 %v1078_v37, %v13157_v42  ;;  %v1635_v20 = vsel %vm861_vm6, %v8148_v11, %v13164_v32  ;;  %v13165_v36 = vld [vmem:[#allocation66_spill] sm:$0xff]  ;;  %v13167_v29 = vld [vmem:[#allocation92_spill] sm:$0xff] }
 0x2fc   : > { %2015 = vmatmul.f32.gmra.mxu1 %v8395_v13  ;;  %2120 = vmatpush.msrb.mxu0 %v1741_v1  ;;  %v1335_v1 = vsel %vm537_vm3, %v13130_v22, %v13162_v12  ;;  %v1096_v48 = vmul.f32 %v1079_v6, %v13157_v42  ;;  %v1557_v39 = vmul.f32 %v1549_v58, %v1534_v62  ;;  %v8450_v22 = vld [vmem:[%s12616_s3 + $0x40] sm:$0xff]  ;;  %v1459_v3 = vperm.slane %v8135_v9, 1  ;;  %v13169_v45 = vld [vmem:[#allocation74_spill] sm:$0xff] }
 0x2fd   : > { %2082 = vmatpush.msrb.mxu2 %v1565_v40  ;;  %2147 = vmatpush.msrb.mxu1 %v1104_v63  ;;  %v1371_v40 = vmul.f32 %v8412_v61, %v1336_v57  ;;  %v1334_v37 = vsel %vm537_vm3, %v13132_v50, %v13165_v36  ;;  %v1375_v42 = vmul.f32 %v8412_v61, %v1337_v43  ;;  %v1641_v11 = vperm.slane %v8079_v23, 3  ;;  %v13166_v63 = vld [vmem:[#allocation85_spill] sm:$0xff]  ;;  %v8471_v50 = vpop.permute.xlu0 %1706 }
 0x2fe   : > { %2121 = vmatpush.msrb.mxu0 %v1737_v14  ;;  %v1446_v58 = vsel %vm683_vm4, %v7924_v33, %v7886_v16  ;;  %v1634_v6 = vsel %vm861_vm6, %v13167_v29, %v13166_v63  ;;  %v1731_v23 = vperm.slane %v8194_v38, 3  ;;  %v1479_v57 = vmul.f32 %v1459_v3, %v1447_v5  ;;  %v13168_v16 = vld [vmem:[#allocation58_spill] sm:$0xff]  ;;  %v13174_v36 = vld [vmem:[#allocation53_spill] sm:$0xff] }
 0x2ff   : > { %2083 = vmatpush.msrb.mxu2 %v1561_v47  ;;  %2148 = vmatpush.msrb.mxu1 %v1100_v17  ;;  %v1367_v62 = vmul.f32 %v8412_v61, %v1335_v1  ;;  %v1661_v14 = vmul.f32 %v1641_v11, %v1635_v20  ;;  %v1445_v43 = vsel %vm683_vm4, %v13169_v45, %v7960_v24  ;;  %v13170_v47 = vld [vmem:[#allocation89_spill] sm:$0xff]  ;;  %v13171_v17 = vld [vmem:[#allocation94_spill] sm:$0xff]  ;;  %v8491_v1 = vpop.permute.xlu2 %1704  ;;  %v13172_v24 = vld [vmem:[#allocation67_spill] sm:$0xff] }
 0x300   : > { %6204 = vmatmul.msk.f32.vlgmr.msrb.gmra.mxu0 %vm1948_vm8, %v8304_v52  ;;  %2183 = vmatmul.f32.gmra.mxu3 %v8263_v8  ;;  %v8474_v7 = vpop.permute.xlu1 %1708  ;;  %v1633_v12 = vsel %vm861_vm6, %v13171_v17, %v13170_v47  ;;  %v1475_v60 = vmul.f32 %v1459_v3, %v1446_v58  ;;  %v1724_v5 = vsel %vm950_vm7, %v8471_v50, %v8183_v54  ;;  %v13176_v58 = vld [vmem:[#allocation93_spill] sm:$0xff]  ;;  %v13181_v17 = vld [vmem:[#allocation56_spill] sm:$0xff] }
 0x301   : > { %2084 = vmatpush.msrb.mxu2 %v1557_v39  ;;  %2149 = vmatpush.msrb.mxu1 %v1096_v48  ;;  %v1725_v33 = vsel %vm950_vm7, %v8474_v7, %v13168_v16  ;;  %v1657_v32 = vmul.f32 %v1641_v11, %v1634_v6  ;;  %v1444_v20 = vsel %vm683_vm4, %v13172_v24, %v7942_v44  ;;  %v13173_v39 = vld [vmem:[#allocation50_spill] sm:$0xff]  ;;  %v13177_v54 = vld [vmem:[#allocation73_spill] sm:$0xff] }
 0x302   : > { %2222 = vmatpush.msra.mxu0 %v1375_v42  ;;  %6202 = vmatmul.msk.f32.gmra.mxu2 %vm1948_vm8, %v8450_v22  ;;  %v1751_v48 = vmul.f32 %v1731_v23, %v1725_v33  ;;  %v1247_v42 = vsel %vm448_vm1, %v13174_v36, %v13173_v39  ;;  %v1723_v29 = vsel %vm950_vm7, %v8491_v1, %v8126_v46  ;;  %v13186_v39 = vld [vmem:[#allocation47_spill] sm:$0xff] }
 0x303   : > { %2085 = vmatpush.msrb.mxu2 %v1479_v57  ;;  %2150 = vmatpush.msrb.mxu1 %v1092_v34  ;;  %v13175_v34 = vld [vmem:[#allocation88_spill] sm:$0xff]  ;;  %v1363_v44 = vmul.f32 %v8412_v61, %v1334_v37  ;;  %v1653_v6 = vmul.f32 %v1641_v11, %v1633_v12  ;;  %v13178_v57 = vld [vmem:[#allocation14_spill] sm:$0xff]  ;;  %v1747_v33 = vmul.f32 %v1731_v23, %v1724_v5  ;;  %v1551_v37 = vperm.slane %v8107_v2, 3 }
 0x304   : > { %2223 = vmatpush.msra.mxu0 %v1371_v40  ;;  %v1632_v63 = vsel %vm861_vm6, %v13176_v58, %v13175_v34  ;;  %2151 = vmatmul.f32.vlgmr.msrb.gmra.mxu1 %v13177_v54  ;;  %v1471_v40 = vmul.f32 %v1459_v3, %v1445_v43  ;;  %v1467_v45 = vmul.f32 %v1459_v3, %v1444_v20  ;;  %v13180_v43 = vld [vmem:[#allocation64_spill] sm:$0xff]  ;;  %v13183_v5 = vld [vmem:[#allocation54_spill] sm:$0xff] }
 0x305   : > { %2251 = vmatpush.msra.mxu1 %v1661_v14  ;;  %2086 = vmatpush.msrb.mxu2 %v1475_v60  ;;  %v13179_v14 = vld [vmem:[#allocation84_spill] sm:$0xff]  ;;  %v1265_v47 = vperm.slane %v13180_v43, 3  ;;  %v1649_v61 = vmul.f32 %v1641_v11, %v1632_v63  ;;  %v1743_v12 = vmul.f32 %v1731_v23, %v1723_v29  ;;  %v1245_v11 = vsel %vm448_vm1, %v13138_v49, %v13183_v5  ;;  %v13188_v34 = vld [vmem:[#allocation86_spill] sm:$0xff]  ;;  %v13189_v63 = vld [vmem:[#allocation33_spill] sm:$0xff] }
 0x306   : > { %2224 = vmatpush.msra.mxu0 %v1367_v62  ;;  %v1545_v16 = vsel %vm772_vm5, %v13179_v14, %v13178_v57  ;;  %2292 = vmatpush.msra.mxu3 %v1751_v48  ;;  %v13182_v60 = vld [vmem:[#allocation52_spill] sm:$0xff]  ;;  %v1722_v62 = vsel %vm950_vm7, %v8390_v35, %v8173_v26  ;;  %v13184_v26 = vld [vmem:[#allocation82_spill] sm:$0xff]  ;;  %v1244_v36 = vsel %vm448_vm1, %v13140_v30, %v13186_v39  ;;  %v1461_v5 = vperm.slane %v8135_v9, 3  ;;  %v13205_v39 = vld [vmem:[#allocation75_spill] sm:$0xff] }
 0x307   : > { %2252 = vmatpush.msra.mxu1 %v1657_v32  ;;  %2087 = vmatpush.msrb.mxu2 %v1471_v40  ;;  %v1246_v46 = vsel %vm448_vm1, %v13182_v60, %v13181_v17  ;;  %v1285_v3 = vmul.f32 %v1265_v47, %v1247_v42  ;;  %v8532_v48 = vld [vmem:[%s12616_s3 + $0x58] sm:$0xff]  ;;  %v1571_v2 = vmul.f32 %v1551_v37, %v1545_v16  ;;  %v13185_v32 = vld [vmem:[#allocation87_spill] sm:$0xff]  ;;  %v13187_v42 = vld [vmem:[#allocation81_spill] sm:$0xff]  ;;  %v1730_v60 = vperm.slane %v8194_v38, 2 }
 0x308   : > { %2225 = vmatpush.msra.mxu0 %v1363_v44  ;;  %2293 = vmatpush.msra.mxu3 %v1747_v33  ;;  %v1544_v24 = vsel %vm772_vm5, %v13185_v32, %v13184_v26  ;;  %v1281_v20 = vmul.f32 %v1265_v47, %v1246_v46  ;;  %v1739_v49 = vmul.f32 %v1731_v23, %v1722_v62  ;;  %v13190_v29 = vld [vmem:[#allocation44_spill] sm:$0xff]  ;;  %v13192_v57 = vld [vmem:[#allocation18_spill] sm:$0xff]  ;;  %v13193_v23 = vld [vmem:[#allocation83_spill] sm:$0xff] }
 0x309   : > { %2253 = vmatpush.msra.mxu1 %v1653_v6  ;;  %2088 = vmatpush.msrb.mxu2 %v1467_v45  ;;  %v1543_v58 = vsel %vm772_vm5, %v13188_v34, %v13187_v42  ;;  %v1277_v40 = vmul.f32 %v1265_v47, %v1245_v11  ;;  %v1157_v44 = vsel %vm359_vm2, %v13142_v4, %v13190_v29  ;;  %v13191_v30 = vld [vmem:[#allocation76_spill] sm:$0xff]  ;;  %v13194_v33 = vld [vmem:[#allocation26_spill] sm:$0xff]  ;;  %v1175_v4 = vperm.slane %v7792_v25, 3  ;;  %v13202_v26 = vld [vmem:[#allocation25_spill] sm:$0xff] }
 0x30a   : > { %6205 = vmatmul.msk.f32.gmra.mxu0 %vm1948_vm8, %v8374_v28  ;;  %2294 = vmatpush.msra.mxu3 %v1743_v12  ;;  %v1567_v6 = vmul.f32 %v1551_v37, %v1544_v24  ;;  %v1542_v14 = vsel %vm772_vm5, %v13193_v23, %v13192_v57  ;;  %v1713_v16 = vsel %vm950_vm7, %v8339_v59, %v8474_v7  ;;  %v13195_v43 = vld [vmem:[#allocation42_spill] sm:$0xff]  ;;  %v13197_v62 = vld [vmem:[#allocation80_spill] sm:$0xff]  ;;  %v13198_v7 = vld [vmem:[#allocation19_spill] sm:$0xff] }
 0x30b   : > { %2254 = vmatpush.msra.mxu1 %v1649_v61  ;;  %2226 = vmatpush.msra.mxu0 %v1285_v3  ;;  %v1273_v45 = vmul.f32 %v1265_v47, %v1244_v36  ;;  %v1156_v17 = vsel %vm359_vm2, %v13144_v27, %v13195_v43  ;;  %v1563_v46 = vmul.f32 %v1551_v37, %v1543_v58  ;;  %v13196_v61 = vld [vmem:[#allocation72_spill] sm:$0xff]  ;;  %v13199_v47 = vld [vmem:[#allocation37_spill] sm:$0xff]  ;;  %v13206_v42 = vld [vmem:[#allocation10_spill] sm:$0xff] }
 0x30c   : > { %6203 = vmatmul.msk.f32.gmra.mxu2 %vm1948_vm8, %v8532_v48  ;;  %2295 = vmatpush.msra.mxu3 %v1739_v49  ;;  %v1455_v59 = vsel %vm683_vm4, %v13197_v62, %v13196_v61  ;;  %v1712_v25 = vsel %vm950_vm7, %v8335_v0, %v8471_v50  ;;  %v1195_v27 = vmul.f32 %v1175_v4, %v1157_v44  ;;  %v13200_v11 = vld [vmem:[#allocation24_spill] sm:$0xff]  ;;  %v13203_v32 = vld [vmem:[#allocation41_spill] sm:$0xff]  ;;  %v13207_v58 = vld [vmem:[#allocation71_spill] sm:$0xff] }
 0x30d   : > { %2255 = vmatpush.msra.mxu1 %v1571_v2  ;;  %2089 = vmatpush.msrb.mxu2 %v13189_v63  ;;  %v1155_v38 = vsel %vm359_vm2, %v13146_v10, %v13199_v47  ;;  %v1750_v3 = vmul.f32 %v1730_v60, %v1713_v16  ;;  %v1559_v12 = vmul.f32 %v1551_v37, %v1542_v14  ;;  %v13201_v2 = vld [vmem:[#allocation79_spill] sm:$0xff]  ;;  %v13208_v63 = vld [vmem:[#allocation77_spill] sm:$0xff]  ;;  %v13209_v29 = vld [vmem:[#allocation22_spill] sm:$0xff] }
 0x30e   : > { %2227 = vmatpush.msra.mxu0 %v1281_v20  ;;  %2154 = vmatmul.f32.gmra.mxu1 %v13191_v30  ;;  %v1454_v0 = vsel %vm683_vm4, %v13201_v2, %v13200_v11  ;;  %v1711_v50 = vsel %vm950_vm7, %v8317_v41, %v8491_v1  ;;  %v1191_v10 = vmul.f32 %v1175_v4, %v1156_v17  ;;  %v13204_v20 = vld [vmem:[#allocation65_spill] sm:$0xff]  ;;  %v13214_v43 = vld [vmem:[#allocation30_spill] sm:$0xff]  ;;  %v13217_v61 = vld [vmem:[#allocation16_spill] sm:$0xff] }
 0x30f   : > { %2090 = vmatpush.msrb.mxu2 %v13194_v33  ;;  %2256 = vmatpush.msra.mxu1 %v1567_v6  ;;  %v1154_v37 = vsel %vm359_vm2, %v13149_v15, %v13203_v32  ;;  %v1746_v9 = vmul.f32 %v1730_v60, %v1712_v25  ;;  %v1481_v24 = vmul.f32 %v1461_v5, %v1455_v59  ;;  %v13210_v6 = vld [vmem:[#allocation11_spill] sm:$0xff]  ;;  %v13212_v16 = vld [vmem:[#allocation13_spill] sm:$0xff]  ;;  %v8674_v59 = vpop.permute.xlu2 %1930 }
 0x310   : > { %2228 = vmatpush.msra.mxu0 %v1277_v40  ;;  %2186 = vmatmul.f32.gmra.mxu3 %v8322_v31  ;;  %v1453_v36 = vsel %vm683_vm4, %v13205_v39, %v13204_v20  ;;  %v1710_v41 = vsel %vm950_vm7, %v8283_v19, %v8390_v35  ;;  %v1187_v1 = vmul.f32 %v1175_v4, %v1155_v38  ;;  %v8677_v38 = vpop.permute.xlu0 %1935 }
 0x311   : > { %2091 = vmatpush.msrb.mxu2 %v13198_v7  ;;  %2257 = vmatpush.msra.mxu1 %v1563_v46  ;;  %v1742_v15 = vmul.f32 %v1730_v60, %v1711_v50  ;;  %v1477_v49 = vmul.f32 %v1461_v5, %v1454_v0  ;;  %v1077_v34 = vsel %vm271_vm0, %v13153_v56, %v13206_v42  ;;  %v13211_v56 = vld [vmem:[#allocation23_spill] sm:$0xff] }
 0x312   : > { %2229 = vmatpush.msra.mxu0 %v1273_v45  ;;  %v1452_v40 = vsel %vm683_vm4, %v13208_v63, %v13207_v58  ;;  %v1183_v19 = vmul.f32 %v1175_v4, %v1154_v37  ;;  %v1738_v35 = vmul.f32 %v1730_v60, %v1710_v41  ;;  %v1473_v44 = vmul.f32 %v1461_v5, %v1453_v36  ;;  %v13213_v45 = vld [vmem:[#allocation9_spill] sm:$0xff]  ;;  %v13216_v60 = vld [vmem:[#allocation28_spill] sm:$0xff] }
 0x313   : > { %6206 = vmatmul.msk.f32.gmra.mxu0 %vm1948_vm8, %v8450_v22  ;;  %2092 = vmatpush.msrb.mxu2 %v13202_v26  ;;  %v1076_v57 = vsel %vm271_vm0, %v13155_v55, %v13210_v6  ;;  %v1105_v23 = vmul.f32 %v1077_v34, %v13211_v56  ;;  %v1469_v14 = vmul.f32 %v1461_v5, %v1452_v40  ;;  %v8684_v26 = vpop.permute.xlu1 %1940 }
 0x314   : > { %2230 = vmatpush.msra.mxu0 %v1195_v27  ;;  %2258 = vmatpush.msra.mxu1 %v1559_v12  ;;  %v1075_v33 = vsel %vm271_vm0, %v13158_v53, %v13212_v16  ;;  %v1101_v55 = vmul.f32 %v1076_v57, %v13211_v56  ;;  %v1074_v4 = vsel %vm271_vm0, %v13151_v18, %v13213_v45  ;;  %v13215_v53 = vld [vmem:[#allocation78_spill] sm:$0xff]  ;;  %v13218_v18 = vld [vmem:[#allocation20_spill] sm:$0xff] }
 0x315   : > { %2205 = vmatpush.msra.mxu2 %v1750_v3  ;;  %v1097_v17 = vmul.f32 %v1075_v33, %v13211_v56  ;;  %v1093_v46 = vmul.f32 %v1074_v4, %v13211_v56 }
 0x316   : > { %2093 = vmatmul.f32.vlgmr.msrb.gmra.mxu2 %v8213_v51  ;;  %2231 = vmatpush.msra.mxu0 %v1191_v10 }
 0x317   : > { %2206 = vmatpush.msra.mxu2 %v1746_v9  ;;  %2259 = vmatpush.msra.mxu1 %v1481_v24 }
 0x318   : > { %2157 = vmatmul.f32.gmra.mxu1 %v13209_v29  ;;  %2232 = vmatpush.msra.mxu0 %v1187_v1  ;;  %v8695_v1 = vpop.permute.xlu2 %1945 }
 0x319   : > { %2207 = vmatpush.msra.mxu2 %v1742_v15  ;;  %2260 = vmatpush.msra.mxu1 %v1477_v49 }
 0x31a   : > { %2233 = vmatpush.msra.mxu0 %v1183_v19  ;;  %2189 = vmatmul.f32.gmra.mxu3 %v8395_v13 }
 0x31b   : > { %2208 = vmatpush.msra.mxu2 %v1738_v35  ;;  %2261 = vmatpush.msra.mxu1 %v1473_v44 }
 0x31c   : > { %6207 = vmatmul.msk.f32.gmra.mxu0 %vm1948_vm8, %v8532_v48 }
 0x31d   : > { %2234 = vmatpush.msra.mxu0 %v1105_v23  ;;  %2262 = vmatpush.msra.mxu1 %v1469_v14 }
 0x31e   : > { %2096 = vmatmul.f32.gmra.mxu2 %v8263_v8 }
 0x31f   : > { %2235 = vmatpush.msra.mxu0 %v1101_v55  ;;  %2263 = vmatpush.msra.mxu1 %v13214_v43 }
 0x320   : > { %2160 = vmatmul.f32.gmra.mxu1 %v13215_v53 }
 0x321   : > { %2236 = vmatpush.msra.mxu0 %v1097_v17  ;;  %2264 = vmatpush.msra.mxu1 %v13216_v60 }
 0x322   : > { %6212 = vmatmul.msk.f32.vlgmr.msra.gmra.mxu3 %vm1948_vm8, %v8304_v52 }
 0x323   : > { %2237 = vmatpush.msra.mxu0 %v1093_v46  ;;  %2265 = vmatpush.msra.mxu1 %v13217_v61 }
 0x324   : > { %2238 = vmatmul.f32.vlgmr.msra.gmra.mxu0 %v13177_v54 }
 0x325   : > { %2266 = vmatpush.msra.mxu1 %v13218_v18 }
 0x326   : > { %2099 = vmatmul.f32.gmra.mxu2 %v8322_v31 }
 0x328   : > { %2267 = vmatmul.f32.vlgmr.msra.gmra.mxu1 %v8213_v51  ;;  %v1978_v51 = vpop.f32.mrf.mxu0 }
 0x32a   : > { %6213 = vmatmul.msk.f32.gmra.mxu3 %vm1948_vm8, %v8374_v28 }
 0x32c   : > { %2241 = vmatmul.f32.gmra.mxu0 %v13191_v30 }
 0x32e   : > { %2102 = vmatmul.f32.gmra.mxu2 %v8395_v13 }
 0x330   : > { %2270 = vmatmul.f32.gmra.mxu1 %v8263_v8  ;;  %v2065_v8 = vpop.f32.mrf.mxu3 }
 0x331   : > { %v2066_v35 = vadd.f32 %v2065_v8, %v8674_v59 }
 0x332   : > { %6214 = vmatmul.msk.f32.gmra.mxu3 %vm1948_vm8, %v8450_v22 }
 0x334   : > { %2244 = vmatmul.f32.gmra.mxu0 %v13209_v29 }
 0x336   : > { %6208 = vmatmul.msk.f32.vlgmr.msra.gmra.mxu2 %vm1948_vm8, %v8304_v52 }
 0x338   : > { %2273 = vmatmul.f32.gmra.mxu1 %v8322_v31  ;;  %v1981_v31 = vpop.f32.mrf.mxu0  ;;  %v2068_v30 = vpop.f32.mrf.mxu3 }
 0x339   : > { %v1982_v12 = vadd.f32 %v1981_v31, %v8677_v38  ;;  %v2069_v16 = vadd.f32 %v2068_v30, %v8677_v38 }
 0x33a   : > { %6215 = vmatmul.msk.f32.gmra.mxu3 %vm1948_vm8, %v8532_v48 }
 0x33c   : > { %2247 = vmatmul.f32.gmra.mxu0 %v13215_v53 }
 0x33e   : > { %6209 = vmatmul.msk.f32.gmra.mxu2 %vm1948_vm8, %v8374_v28  ;;  %v1979_v28 = vadd.f32 %v1978_v51, %v8674_v59 }
 0x340   : > { %2276 = vmatmul.f32.gmra.mxu1 %v8395_v13  ;;  %v1984_v62 = vpop.f32.mrf.mxu0  ;;  %v2071_v7 = vpop.f32.mrf.mxu3 }
 0x341   : > { %v1985_v32 = vadd.f32 %v1984_v62, %v8684_v26  ;;  %v2072_v60 = vadd.f32 %v2071_v7, %v8684_v26 }
 0x346   : > { %6210 = vmatmul.msk.f32.gmra.mxu2 %vm1948_vm8, %v8450_v22 }
 0x348   : > { %v1987_v47 = vpop.f32.mrf.mxu0  ;;  %v2074_v2 = vpop.f32.mrf.mxu3 }
 0x349   : > { %v1988_v15 = vadd.f32 %v1987_v47, %v8695_v1  ;;  %v2075_v31 = vadd.f32 %v2074_v2, %v8695_v1 }
 0x34e   : > { %6211 = vmatmul.msk.f32.gmra.mxu2 %vm1948_vm8, %v8532_v48 }
 0x35f   : > { %v2007_v52 = vpop.f32.mrf.mxu1 }
 0x360   : > { %v2008_v13 = vadd.f32 %v2007_v52, %v1979_v28 }
 0x367   : > { %v2010_v54 = vpop.f32.mrf.mxu1 }
 0x368   : > { %v2011_v5 = vadd.f32 %v2010_v54, %v1982_v12 }
 0x370   : > { %v2013_v25 = vpop.f32.mrf.mxu1 }
 0x371   : > { %v2014_v9 = vadd.f32 %v2013_v25, %v1985_v32 }
 0x374   : > { %v2036_v27 = vpop.f32.mrf.mxu2 }
 0x375   : > { %v2037_v22 = vadd.f32 %v2036_v27, %v2008_v13 }
 0x377   : > { %v8679_v48 = vmax.f32 %v2037_v22, 0.0 }
 0x379   : > { %v2016_v3 = vpop.f32.mrf.mxu1  ;;  %2325 = vrot.lane.b32.xlu0 %v8679_v48, %s6454_s18 }
 0x37a   : > { %v2181_v20 = vpop.f32.mrf.mxu3  ;;  %v2017_v42 = vadd.f32 %v2016_v3, %v1988_v15 }
 0x37c   : > { %v2039_v11 = vpop.f32.mrf.mxu2 }
 0x37d   : > { %v2040_v0 = vadd.f32 %v2039_v11, %v2011_v5  ;;  %v2123_v50 = vpop.f32.mrf.mxu0 }
 0x37f   : > { %v8686_v10 = vmax.f32 %v2040_v0, 0.0 }
 0x381   : > { %13219 = vst [vmem:[#allocation62_spill] sm:$0xff] %v8686_v10  ;;  %v2152_v37 = vpop.f32.mrf.mxu1  ;;  %2327 = vrot.lane.b32.xlu1 %v8686_v10, %s6454_s18 }
 0x382   : > { %v2153_v25 = vadd.f32 %v2152_v37, %v8674_v59 }
 0x383   : > { %v2184_v58 = vpop.f32.mrf.mxu3 }
 0x384   : > { %v2182_v27 = vadd.f32 %v2181_v20, %v2153_v25 }
 0x385   : > { %v2042_v24 = vpop.f32.mrf.mxu2 }
 0x386   : > { %v2043_v39 = vadd.f32 %v2042_v24, %v2014_v9 }
 0x387   : > { %v2126_v41 = vpop.f32.mrf.mxu0 }
 0x388   : > { %v8691_v36 = vmax.f32 %v2043_v39, 0.0 }
 0x38a   : > { %2329 = vrot.lane.b32.xlu2 %v8691_v36, %s6454_s18 }
 0x38b   : > { %v2155_v49 = vpop.f32.mrf.mxu1 }
 0x38c   : > { %v2156_v5 = vadd.f32 %v2155_v49, %v8677_v38 }
 0x38e   : > { %v2185_v0 = vadd.f32 %v2184_v58, %v2156_v5 }
 0x38f   : > { %v2045_v34 = vpop.f32.mrf.mxu2 }
 0x390   : > { %v2046_v63 = vadd.f32 %v2045_v34, %v2017_v42  ;;  %v2129_v29 = vpop.f32.mrf.mxu0 }
 0x392   : > { %v8698_v40 = vmax.f32 %v2046_v63, 0.0 }
 0x393   : > { %v2187_v57 = vpop.f32.mrf.mxu3 }
 0x394   : > { %13220 = vst [vmem:[#allocation60_spill] sm:$0xff] %v8698_v40  ;;  %2331 = vrot.lane.b32.xlu0 %v8698_v40, %s6454_s18 }
 0x395   : > { %v2158_v19 = vpop.f32.mrf.mxu1 }
 0x396   : > { %v2159_v24 = vadd.f32 %v2158_v19, %v8684_v26 }
 0x398   : > { %v2188_v15 = vadd.f32 %v2187_v57, %v2159_v24 }
 0x399   : > { %v2094_v44 = vpop.f32.mrf.mxu2  ;;  %v2132_v23 = vpop.f32.mrf.mxu0 }
 0x39a   : > { %v2095_v6 = vadd.f32 %v2094_v44, %v2066_v35 }
 0x39c   : > { %v2124_v56 = vadd.f32 %v2123_v50, %v2095_v6 }
 0x39d   : > { %v2161_v33 = vpop.f32.mrf.mxu1  ;;  %v2190_v43 = vpop.f32.mrf.mxu3 }
 0x39e   : > { %v8703_v14 = vmax.f32 %v2124_v56, 0.0 }
 0x3a0   : > { %2333 = vrot.lane.b32.xlu1 %v8703_v14, %s6454_s18 }
 0x3a1   : > { %v2097_v55 = vpop.f32.mrf.mxu2  ;;  %v2239_v53 = vpop.f32.mrf.mxu0 }
 0x3a2   : > { %v2098_v45 = vadd.f32 %v2097_v55, %v2069_v16  ;;  %v2240_v50 = vadd.f32 %v2239_v53, %v8674_v59 }
 0x3a4   : > { %v2127_v4 = vadd.f32 %v2126_v41, %v2098_v45 }
 0x3a5   : > { %v2268_v18 = vpop.f32.mrf.mxu1  ;;  %v2297_v52 = vpop.f32.mrf.mxu3 }
 0x3a6   : > { %v8708_v17 = vmax.f32 %v2127_v4, 0.0  ;;  %v2269_v20 = vadd.f32 %v2268_v18, %v2240_v50 }
 0x3a8   : > { %2335 = vrot.lane.b32.xlu2 %v8708_v17, %s6454_s18  ;;  %v2298_v49 = vadd.f32 %v2297_v52, %v2269_v20 }
 0x3a9   : > { %v2100_v46 = vpop.f32.mrf.mxu2  ;;  %v2242_v54 = vpop.f32.mrf.mxu0 }
 0x3aa   : > { %v2101_v61 = vadd.f32 %v2100_v46, %v2072_v60  ;;  %v2243_v34 = vadd.f32 %v2242_v54, %v8677_v38  ;;  %v8737_v35 = vmax.f32 %v2298_v49, 0.0 }
 0x3ac   : > { %v2130_v51 = vadd.f32 %v2129_v29, %v2101_v61  ;;  %v2162_v29 = vadd.f32 %v2161_v33, %v8695_v1  ;;  %13224 = vst [vmem:[#allocation59_spill] sm:$0xff] %v8737_v35 }
 0x3ad   : > { %v2271_v13 = vpop.f32.mrf.mxu1  ;;  %v2300_v47 = vpop.f32.mrf.mxu3 }
 0x3ae   : > { %v8713_v8 = vmax.f32 %v2130_v51, 0.0  ;;  %v2272_v6 = vadd.f32 %v2271_v13, %v2243_v34  ;;  %v2191_v57 = vadd.f32 %v2190_v43, %v2162_v29 }
 0x3b0   : > { %13221 = vst [vmem:[#allocation63_spill] sm:$0xff] %v8713_v8  ;;  %2337 = vrot.lane.b32.xlu0 %v8713_v8, %s6454_s18  ;;  %v2301_v16 = vadd.f32 %v2300_v47, %v2272_v6 }
 0x3b1   : > { %v2103_v30 = vpop.f32.mrf.mxu2  ;;  %v2245_v12 = vpop.f32.mrf.mxu0 }
 0x3b2   : > { %v2104_v62 = vadd.f32 %v2103_v30, %v2075_v31  ;;  %v2246_v38 = vadd.f32 %v2245_v12, %v8684_v26  ;;  %v8750_v53 = vmax.f32 %v2301_v16, 0.0 }
 0x3b4   : > { %v2133_v28 = vadd.f32 %v2132_v23, %v2104_v62  ;;  %13227 = vst [vmem:[#allocation45_spill] sm:$0xff] %v8750_v53 }
 0x3b5   : > { %v2274_v2 = vpop.f32.mrf.mxu1  ;;  %v2303_v9 = vpop.f32.mrf.mxu3 }
 0x3b6   : > { %v8719_v7 = vmax.f32 %v2133_v28, 0.0  ;;  %v2275_v33 = vadd.f32 %v2274_v2, %v2246_v38 }
 0x3b8   : > { %2339 = vrot.lane.b32.xlu1 %v8719_v7, %s6454_s18  ;;  %v2304_v26 = vadd.f32 %v2303_v9, %v2275_v33 }
 0x3b9   : > { %v2210_v22 = vpop.f32.mrf.mxu2  ;;  %v2248_v41 = vpop.f32.mrf.mxu0 }
 0x3ba   : > { %v2211_v3 = vadd.f32 %v2210_v22, %v2182_v27  ;;  %v2249_v42 = vadd.f32 %v2248_v41, %v8695_v1  ;;  %v8758_v43 = vmax.f32 %v2304_v26, 0.0 }
 0x3bc   : > { %v8724_v11 = vmax.f32 %v2211_v3, 0.0  ;;  %13228 = vst [vmem:[#allocation48_spill] sm:$0xff] %v8758_v43 }
 0x3bd   : > { %v2277_v58 = vpop.f32.mrf.mxu1  ;;  %v2306_v56 = vpop.f32.mrf.mxu3 }
 0x3be   : > { %13222 = vst [vmem:[#allocation55_spill] sm:$0xff] %v8724_v11  ;;  %2341 = vrot.lane.b32.xlu2 %v8724_v11, %s6454_s18  ;;  %v2278_v19 = vadd.f32 %v2277_v58, %v2249_v42 }
 0x3c0   : > { %v2307_v23 = vadd.f32 %v2306_v56, %v2278_v19 }
 0x3c1   : > { %v2213_v32 = vpop.f32.mrf.mxu2 }
 0x3c2   : > { %v2214_v37 = vadd.f32 %v2213_v32, %v2185_v0  ;;  %v8746_v45 = vmax.f32 %v2307_v23, 0.0 }
 0x3c4   : > { %v8730_v39 = vmax.f32 %v2214_v37, 0.0  ;;  %13226 = vst [vmem:[#allocation43_spill] sm:$0xff] %v8746_v45 }
 0x3c6   : > { %13223 = vst [vmem:[#allocation57_spill] sm:$0xff] %v8730_v39  ;;  %2343 = vrot.lane.b32.xlu0 %v8730_v39, %s6454_s18 }
 0x3c9   : > { %v2216_v59 = vpop.f32.mrf.mxu2 }
 0x3ca   : > { %v2217_v63 = vadd.f32 %v2216_v59, %v2188_v15 }
 0x3cc   : > { %v8739_v44 = vmax.f32 %v2217_v63, 0.0 }
 0x3ce   : > { %13225 = vst [vmem:[#allocation49_spill] sm:$0xff] %v8739_v44  ;;  %2349 = vrot.lane.b32.xlu0 %v8737_v35, %s6454_s18  ;;  %2345 = vrot.lane.b32.xlu1 %v8739_v44, %s6454_s18 }
 0x3d1   : > { %v2219_v55 = vpop.f32.mrf.mxu2 }
 0x3d2   : > { %v2220_v1 = vadd.f32 %v2219_v55, %v2191_v57 }
 0x3d4   : > { %v8748_v4 = vmax.f32 %v2220_v1, 0.0 }
 0x3d6   : > { %2355 = vrot.lane.b32.xlu0 %v8746_v45, %s6454_s18  ;;  %2347 = vrot.lane.b32.xlu2 %v8748_v4, %s6454_s18 }
 0x3d7   : > { %2351 = vrot.lane.b32.xlu1 %v8750_v53, %s6454_s18 }
 0x3de   : > { %2419 = vrot.lane.b32.xlu0 %v8691_v36, %s6455_s19  ;;  %2353 = vrot.lane.b32.xlu2 %v8758_v43, %s6454_s18 }
 0x3df   : > { %2415 = vrot.lane.b32.xlu1 %v8679_v48, %s6455_s19 }
 0x3e4   : > { %v8808_v60 = vpop.permute.xlu2 %2329 }
 0x3e6   : > { %2425 = vrot.lane.b32.xlu0 %v8708_v17, %s6455_s19  ;;  %2417 = vrot.lane.b32.xlu2 %v8686_v10, %s6455_s19 }
 0x3e7   : > { %2421 = vrot.lane.b32.xlu1 %v8698_v40, %s6455_s19 }
 0x3eb   : > { %v8816_v46 = vpop.permute.xlu0 %2325 }
 0x3ee   : > { %2431 = vrot.lane.b32.xlu0 %v8724_v11, %s6455_s19  ;;  %2423 = vrot.lane.b32.xlu2 %v8703_v14, %s6455_s19 }
 0x3ef   : > { %2427 = vrot.lane.b32.xlu1 %v8713_v8, %s6455_s19 }
 0x3f3   : > { %v8824_v18 = vpop.permute.xlu1 %2327 }
 0x3f6   : > { %2437 = vrot.lane.b32.xlu0 %v8748_v4, %s6455_s19  ;;  %2429 = vrot.lane.b32.xlu2 %v8719_v7, %s6455_s19 }
 0x3f7   : > { %2433 = vrot.lane.b32.xlu1 %v8730_v39, %s6455_s19 }
 0x3fe   : > { %2443 = vrot.lane.b32.xlu0 %v8758_v43, %s6455_s19  ;;  %2435 = vrot.lane.b32.xlu2 %v8739_v44, %s6455_s19 }
 0x3ff   : > { %2439 = vrot.lane.b32.xlu1 %v8737_v35, %s6455_s19 }
 0x402   : > { %v8818_v61 = vpop.permute.xlu2 %2335 }
 0x403   : > { %13229 = vst [vmem:[#allocation51_spill] sm:$0xff] %v8818_v61 }
 0x406   : > { %2507 = vrot.lane.b32.xlu0 %v8686_v10, %s6456_s16  ;;  %2441 = vrot.lane.b32.xlu2 %v8750_v53, %s6455_s19  ;;  %v8828_v51 = vpop.permute.xlu0 %2331 }
 0x407   : > { %2445 = vrot.lane.b32.xlu1 %v8746_v45, %s6455_s19 }
 0x40e   : > { %2513 = vrot.lane.b32.xlu0 %v8703_v14, %s6456_s16  ;;  %2505 = vrot.lane.b32.xlu2 %v8679_v48, %s6456_s16 }
 0x40f   : > { %2509 = vrot.lane.b32.xlu1 %v8691_v36, %s6456_s16 }
 0x412   : > { %v8836_v31 = vpop.permute.xlu1 %2333 }
 0x413   : > { %13231 = vst [vmem:[#allocation40_spill] sm:$0xff] %v8836_v31 }
 0x416   : > { %2519 = vrot.lane.b32.xlu0 %v8719_v7, %s6456_s16  ;;  %2511 = vrot.lane.b32.xlu2 %v8698_v40, %s6456_s16 }
 0x417   : > { %2515 = vrot.lane.b32.xlu1 %v8708_v17, %s6456_s16 }
 0x418   : > { %v8830_v52 = vpop.permute.xlu2 %2341 }
 0x419   : > { %13230 = vst [vmem:[#allocation46_spill] sm:$0xff] %v8830_v52 }
 0x41e   : > { %2525 = vrot.lane.b32.xlu0 %v8739_v44, %s6456_s16  ;;  %2517 = vrot.lane.b32.xlu2 %v8713_v8, %s6456_s16 }
 0x41f   : > { %2521 = vrot.lane.b32.xlu1 %v8724_v11, %s6456_s16 }
 0x422   : > { %v8840_v54 = vpop.permute.xlu0 %2337 }
 0x423   : > { %13232 = vst [vmem:[#allocation34_spill] sm:$0xff] %v8840_v54 }
 0x426   : > { %2531 = vrot.lane.b32.xlu0 %v8750_v53, %s6456_s16  ;;  %2523 = vrot.lane.b32.xlu2 %v8730_v39, %s6456_s16 }
 0x427   : > { %2527 = vrot.lane.b32.xlu1 %v8748_v4, %s6456_s16 }
 0x42a   : > { %v8848_v62 = vpop.permute.xlu1 %2339 }
 0x42b   : > { %13234 = vst [vmem:[#allocation91_spill] sm:$0xff] %v8848_v62 }
 0x42e   : > { %2595 = vrot.lane.b32.xlu0 %v8679_v48, %s6457_s14  ;;  %2529 = vrot.lane.b32.xlu2 %v8737_v35, %s6456_s16 }
 0x42f   : > { %2533 = vrot.lane.b32.xlu1 %v8758_v43, %s6456_s16 }
 0x430   : > { %v8842_v30 = vpop.permute.xlu2 %2347 }
 0x431   : > { %13233 = vst [vmem:[#allocation35_spill] sm:$0xff] %v8842_v30 }
 0x436   : > { %2601 = vrot.lane.b32.xlu0 %v8698_v40, %s6457_s14  ;;  %2535 = vrot.lane.b32.xlu2 %v8746_v45, %s6456_s16 }
 0x437   : > { %2597 = vrot.lane.b32.xlu1 %v8686_v10, %s6457_s14 }
 0x438   : > { %v8852_v25 = vpop.permute.xlu2 %2353  ;;  %v8854_v28 = vpop.permute.xlu0 %2343 }
 0x439   : > { %13235 = vst [vmem:[#allocation39_spill] sm:$0xff] %v8852_v25 }
 0x43a   : > { %13236 = vst [vmem:[#allocation36_spill] sm:$0xff] %v8854_v28 }
 0x43e   : > { %2607 = vrot.lane.b32.xlu0 %v8713_v8, %s6457_s14  ;;  %2599 = vrot.lane.b32.xlu2 %v8691_v36, %s6457_s14 }
 0x43f   : > { %2603 = vrot.lane.b32.xlu1 %v8703_v14, %s6457_s14 }
 0x440   : > { %v8862_v13 = vpop.permute.xlu2 %2417  ;;  %v8864_v27 = vpop.permute.xlu1 %2345 }
 0x441   : > { %13237 = vst [vmem:[#allocation29_spill] sm:$0xff] %v8864_v27  ;;  %v8866_v47 = vpop.permute.xlu0 %2349 }
 0x442   : > { %13238 = vst [vmem:[#allocation38_spill] sm:$0xff] %v8866_v47 }
 0x446   : > { %2613 = vrot.lane.b32.xlu0 %v8730_v39, %s6457_s14  ;;  %2605 = vrot.lane.b32.xlu2 %v8708_v17, %s6457_s14 }
 0x447   : > { %2609 = vrot.lane.b32.xlu1 %v8719_v7, %s6457_s14 }
 0x448   : > { %v8874_v22 = vpop.permute.xlu2 %2423 }
 0x449   : > { %13239 = vst [vmem:[#allocation15_spill] sm:$0xff] %v8874_v22  ;;  %v8876_v3 = vpop.permute.xlu1 %2351  ;;  %v8878_v12 = vpop.permute.xlu0 %2355 }
 0x44a   : > { %13240 = vst [vmem:[#allocation31_spill] sm:$0xff] %v8876_v3 }
 0x44b   : > { %13241 = vst [vmem:[#allocation6_spill] sm:$0xff] %v8878_v12 }
 0x44e   : > { %2619 = vrot.lane.b32.xlu0 %v8737_v35, %s6457_s14  ;;  %2611 = vrot.lane.b32.xlu2 %v8724_v11, %s6457_s14 }
 0x44f   : > { %2615 = vrot.lane.b32.xlu1 %v8739_v44, %s6457_s14 }
 0x450   : > { %v8886_v5 = vpop.permute.xlu2 %2429 }
 0x451   : > { %13242 = vst [vmem:[#allocation8_spill] sm:$0xff] %v8886_v5  ;;  %v8888_v2 = vpop.permute.xlu1 %2415  ;;  %v8890_v0 = vpop.permute.xlu0 %2419 }
 0x456   : > { %2625 = vrot.lane.b32.xlu0 %v8746_v45, %s6457_s14  ;;  %2617 = vrot.lane.b32.xlu2 %v8748_v4, %s6457_s14 }
 0x457   : > { %2621 = vrot.lane.b32.xlu1 %v8750_v53, %s6457_s14 }
 0x458   : > { %v8898_v50 = vpop.permute.xlu2 %2435 }
 0x459   : > { %13243 = vst [vmem:[#allocation21_spill] sm:$0xff] %v8898_v50  ;;  %v8900_v32 = vpop.permute.xlu1 %2421  ;;  %v8902_v37 = vpop.permute.xlu0 %2425 }
 0x45a   : > { %13244 = vst [vmem:[#allocation17_spill] sm:$0xff] %v8902_v37 }
 0x45e   : > { %2705 = vrot.lane.b32.xlu0 %v8691_v36, %s6458_s10  ;;  %2623 = vrot.lane.b32.xlu2 %v8758_v43, %s6457_s14 }
 0x45f   : > { %2701 = vrot.lane.b32.xlu1 %v8679_v48, %s6458_s10 }
 0x460   : > { %v8910_v9 = vpop.permute.xlu2 %2441 }
 0x461   : > { %13245 = vst [vmem:[#allocation12_spill] sm:$0xff] %v8910_v9  ;;  %v8912_v24 = vpop.permute.xlu1 %2427  ;;  %v8914_v20 = vpop.permute.xlu0 %2431 }
 0x462   : > { %13246 = vst [vmem:[#allocation27_spill] sm:$0xff] %v8912_v24 }
 0x463   : > { %13247 = vst [vmem:[#allocation7_spill] sm:$0xff] %v8914_v20 }
 0x466   : > { %2711 = vrot.lane.b32.xlu0 %v8708_v17, %s6458_s10  ;;  %2703 = vrot.lane.b32.xlu2 %v8686_v10, %s6458_s10 }
 0x467   : > { %2707 = vrot.lane.b32.xlu1 %v8698_v40, %s6458_s10 }
 0x468   : > { %v8922_v41 = vpop.permute.xlu2 %2505 }
 0x469   : > { %v8924_v15 = vpop.permute.xlu1 %2433  ;;  %v8926_v49 = vpop.permute.xlu0 %2437 }
 0x46a   : > { %13248 = vst [vmem:[#allocation32_spill] sm:$0xff] %v8924_v15 }
 0x46b   : > { %13249 = vst [vmem:[#allocation61_spill] sm:$0xff] %v8926_v49 }
 0x46e   : > { %2717 = vrot.lane.b32.xlu0 %v8724_v11, %s6458_s10  ;;  %2709 = vrot.lane.b32.xlu2 %v8703_v14, %s6458_s10 }
 0x46f   : > { %2713 = vrot.lane.b32.xlu1 %v8713_v8, %s6458_s10 }
 0x470   : > { %v8934_v42 = vpop.permute.xlu2 %2511 }
 0x471   : > { %v8936_v34 = vpop.permute.xlu1 %2439  ;;  %v8938_v58 = vpop.permute.xlu0 %2443 }
 0x472   : > { %13250 = vst [vmem:[#allocation69_spill] sm:$0xff] %v8936_v34 }
 0x473   : > { %13251 = vst [vmem:[#allocation68_spill] sm:$0xff] %v8938_v58 }
 0x476   : > { %2723 = vrot.lane.b32.xlu0 %v8748_v4, %s6458_s10  ;;  %2715 = vrot.lane.b32.xlu2 %v8719_v7, %s6458_s10 }
 0x477   : > { %2719 = vrot.lane.b32.xlu1 %v8730_v39, %s6458_s10 }
 0x478   : > { %v8946_v59 = vpop.permute.xlu2 %2517 }
 0x479   : > { %13252 = vst [vmem:[#allocation70_spill] sm:$0xff] %v8946_v59  ;;  %v8948_v63 = vpop.permute.xlu1 %2445  ;;  %v8950_v29 = vpop.permute.xlu0 %2507 }
 0x47a   : > { %13253 = vst [vmem:[#allocation90_spill] sm:$0xff] %v8948_v63 }
 0x47e   : > { %2729 = vrot.lane.b32.xlu0 %v8758_v43, %s6458_s10  ;;  %2721 = vrot.lane.b32.xlu2 %v8739_v44, %s6458_s10 }
 0x47f   : > { %2725 = vrot.lane.b32.xlu1 %v8737_v35, %s6458_s10 }
 0x480   : > { %v8958_v19 = vpop.permute.xlu2 %2523 }
 0x481   : > { %13254 = vst [vmem:[#allocation66_spill] sm:$0xff] %v8958_v19  ;;  %v8960_v6 = vpop.permute.xlu1 %2509  ;;  %v8962_v56 = vpop.permute.xlu0 %2513 }
 0x482   : > { %13255 = vst [vmem:[#allocation85_spill] sm:$0xff] %v8962_v56 }
 0x486   : > { %2793 = vrot.lane.b32.xlu0 %v8686_v10, %s6459_s9  ;;  %2727 = vrot.lane.b32.xlu2 %v8750_v53, %s6458_s10 }
 0x487   : > { %2731 = vrot.lane.b32.xlu1 %v8746_v45, %s6458_s10 }
 0x488   : > { %v8970_v57 = vpop.permute.xlu2 %2529 }
 0x489   : > { %13256 = vst [vmem:[#allocation92_spill] sm:$0xff] %v8970_v57  ;;  %v8972_v38 = vpop.permute.xlu1 %2515  ;;  %v8974_v23 = vpop.permute.xlu0 %2519 }
 0x48a   : > { %13257 = vst [vmem:[#allocation58_spill] sm:$0xff] %v8972_v38 }
 0x48b   : > { %13258 = vst [vmem:[#allocation74_spill] sm:$0xff] %v8974_v23 }
 0x48e   : > { %2799 = vrot.lane.b32.xlu0 %v8703_v14, %s6459_s9  ;;  %2791 = vrot.lane.b32.xlu2 %v8679_v48, %s6459_s9 }
 0x48f   : > { %2795 = vrot.lane.b32.xlu1 %v8691_v36, %s6459_s9 }
 0x490   : > { %v8982_v16 = vpop.permute.xlu2 %2535 }
 0x491   : > { %13259 = vst [vmem:[#allocation89_spill] sm:$0xff] %v8982_v16  ;;  %v8984_v55 = vpop.permute.xlu1 %2521  ;;  %v8986_v1 = vpop.permute.xlu0 %2525 }
 0x492   : > { %13260 = vst [vmem:[#allocation94_spill] sm:$0xff] %v8984_v55 }
 0x493   : > { %13261 = vst [vmem:[#allocation67_spill] sm:$0xff] %v8986_v1  ;;  %v9041_v1 = vld [vmem:[%s12614_s1 + $0xc] sm:$0xf] }
 0x494   : > { %13270 = vst [vmem:[#allocation56_spill] sm:$0xff] %v9041_v1 }
 0x496   : > { %2805 = vrot.lane.b32.xlu0 %v8719_v7, %s6459_s9  ;;  %2797 = vrot.lane.b32.xlu2 %v8698_v40, %s6459_s9 }
 0x497   : > { %2801 = vrot.lane.b32.xlu1 %v8708_v17, %s6459_s9 }
 0x498   : > { %v8994_v33 = vpop.permute.xlu2 %2599 }
 0x499   : > { %v8996_v26 = vpop.permute.xlu1 %2527  ;;  %v8998_v52 = vpop.permute.xlu0 %2531 }
 0x49a   : > { %13262 = vst [vmem:[#allocation50_spill] sm:$0xff] %v8996_v26 }
 0x49b   : > { %13263 = vst [vmem:[#allocation53_spill] sm:$0xff] %v8998_v52 }
 0x49e   : > { %2811 = vrot.lane.b32.xlu0 %v8739_v44, %s6459_s9  ;;  %2803 = vrot.lane.b32.xlu2 %v8713_v8, %s6459_s9 }
 0x49f   : > { %2807 = vrot.lane.b32.xlu1 %v8724_v11, %s6459_s9 }
 0x4a0   : > { %v9006_v28 = vpop.permute.xlu2 %2605 }
 0x4a1   : > { %13264 = vst [vmem:[#allocation88_spill] sm:$0xff] %v9006_v28  ;;  %v9008_v27 = vpop.permute.xlu1 %2533  ;;  %v9010_v30 = vpop.permute.xlu0 %2595 }
 0x4a2   : > { %13265 = vst [vmem:[#allocation93_spill] sm:$0xff] %v9008_v27 }
 0x4a6   : > { %2817 = vrot.lane.b32.xlu0 %v8750_v53, %s6459_s9  ;;  %2809 = vrot.lane.b32.xlu2 %v8730_v39, %s6459_s9 }
 0x4a7   : > { %2813 = vrot.lane.b32.xlu1 %v8748_v4, %s6459_s9 }
 0x4a8   : > { %v9018_v15 = vpop.permute.xlu2 %2611 }
 0x4a9   : > { %13266 = vst [vmem:[#allocation73_spill] sm:$0xff] %v9018_v15  ;;  %v9020_v20 = vpop.permute.xlu1 %2597  ;;  %v2602_v49 = vpop.permute.xlu0 %2601  ;;  %v2646_v15 = vperm.slane %v9041_v1, 1 }
 0x4ae   : > { %2881 = vrot.lane.b32.xlu0 %v8679_v48, %s6460_s28  ;;  %2815 = vrot.lane.b32.xlu2 %v8737_v35, %s6459_s9 }
 0x4af   : > { %2819 = vrot.lane.b32.xlu1 %v8758_v43, %s6459_s9 }
 0x4b0   : > { %v9028_v55 = vpop.permute.xlu2 %2617 }
 0x4b1   : > { %13267 = vst [vmem:[#allocation14_spill] sm:$0xff] %v9028_v55  ;;  %v9030_v50 = vpop.permute.xlu1 %2603  ;;  %v9032_v19 = vpop.permute.xlu0 %2607 }
 0x4b2   : > { %13268 = vst [vmem:[#allocation84_spill] sm:$0xff] %v9030_v50 }
 0x4b3   : > { %13269 = vst [vmem:[#allocation64_spill] sm:$0xff] %v9032_v19 }
 0x4b6   : > { %2887 = vrot.lane.b32.xlu0 %v8698_v40, %s6460_s28  ;;  %2821 = vrot.lane.b32.xlu2 %v8746_v45, %s6459_s9  ;;  %v2637_v40 = vsel %vm537_vm3, %v8994_v33, %v9032_v19 }
 0x4b7   : > { %2883 = vrot.lane.b32.xlu1 %v8686_v10, %s6460_s28  ;;  %v2636_v10 = vsel %vm537_vm3, %v9020_v20, %v9006_v28  ;;  %v2662_v12 = vmul.f32 %v2646_v15, %v2637_v40 }
 0x4b8   : > { %v9045_v26 = vpop.permute.xlu2 %2623  ;;  %v2658_v40 = vmul.f32 %v2646_v15, %v2636_v10  ;;  %v2547_v10 = vsel %vm448_vm1, %v8960_v6, %v8946_v59 }
 0x4b9   : > { %13271 = vst [vmem:[#allocation52_spill] sm:$0xff] %v9045_v26  ;;  %v9048_v55 = vpop.permute.xlu1 %2609  ;;  %v9050_v47 = vpop.permute.xlu0 %2613 }
 0x4ba   : > { %13272 = vst [vmem:[#allocation54_spill] sm:$0xff] %v9048_v55  ;;  %v2638_v3 = vsel %vm537_vm3, %v2602_v49, %v9048_v55 }
 0x4bb   : > { %13273 = vst [vmem:[#allocation82_spill] sm:$0xff] %v9050_v47  ;;  %v2666_v25 = vmul.f32 %v2646_v15, %v2638_v3  ;;  %v2635_v47 = vsel %vm537_vm3, %v9010_v30, %v9030_v50  ;;  %v9074_v3 = vld [vmem:[%s12614_s1 + $0x8] sm:$0xf] }
 0x4bc   : > { %13274 = vst [vmem:[#allocation87_spill] sm:$0xff] %v9074_v3  ;;  %v2654_v55 = vmul.f32 %v2646_v15, %v2635_v47  ;;  %v2545_v47 = vsel %vm448_vm1, %v8922_v41, %v8962_v56  ;;  %v9108_v15 = vld [vmem:[%s12614_s1 + $0x4] sm:$0xf] }
 0x4bd   : > { %3342 = vmatpush.msrb.mxu3 %v2666_v25  ;;  %v2548_v25 = vsel %vm448_vm1, %v8934_v42, %v8974_v23  ;;  %v2546_v23 = vsel %vm448_vm1, %v8950_v29, %v8972_v38  ;;  %13277 = vst [vmem:[#allocation86_spill] sm:$0xff] %v9108_v15  ;;  %v2466_v59 = vperm.slane %v9108_v15, 1 }
 0x4be   : > { %2893 = vrot.lane.b32.xlu0 %v8713_v8, %s6460_s28  ;;  %2885 = vrot.lane.b32.xlu2 %v8691_v36, %s6460_s28  ;;  %v2556_v8 = vperm.slane %v9074_v3, 1 }
 0x4bf   : > { %2889 = vrot.lane.b32.xlu1 %v8703_v14, %s6460_s28  ;;  %3343 = vmatpush.msrb.mxu3 %v2662_v12 }
 0x4c0   : > { %v9082_v50 = vpop.permute.xlu2 %2703  ;;  %v2576_v12 = vmul.f32 %v2556_v8, %v2548_v25  ;;  %v2564_v38 = vmul.f32 %v2556_v8, %v2545_v47 }
 0x4c1   : > { %v9084_v28 = vpop.permute.xlu1 %2615  ;;  %3344 = vmatpush.msrb.mxu3 %v2658_v40  ;;  %v9086_v19 = vpop.permute.xlu0 %2619  ;;  %v2458_v40 = vsel %vm359_vm2, %v8900_v32, %v8886_v5 }
 0x4c2   : > { %13275 = vst [vmem:[#allocation47_spill] sm:$0xff] %v9084_v28  ;;  %v2572_v28 = vmul.f32 %v2556_v8, %v2547_v10  ;;  %v2639_v47 = vsel %vm537_vm3, %v9086_v19, %v9010_v30  ;;  %v9160_v30 = vld [vmem:[%s12614_s1] sm:$0xf] }
 0x4c3   : > { %13276 = vst [vmem:[#allocation81_spill] sm:$0xff] %v9086_v19  ;;  %3345 = vmatpush.msrb.mxu3 %v2654_v55  ;;  %v2568_v55 = vmul.f32 %v2556_v8, %v2546_v23 }
 0x4c4   : > { %13280 = vst [vmem:[#allocation76_spill] sm:$0xff] %v9160_v30 }
 0x4c5   : > { %3346 = vmatpush.msrb.mxu3 %v2576_v12  ;;  %v2645_v12 = vperm.slane %v9041_v1, 0  ;;  %v2486_v1 = vmul.f32 %v2466_v59, %v2458_v40 }
 0x4c6   : > { %2899 = vrot.lane.b32.xlu0 %v8730_v39, %s6460_s28  ;;  %2891 = vrot.lane.b32.xlu2 %v8708_v17, %s6460_s28 }
 0x4c7   : > { %2895 = vrot.lane.b32.xlu1 %v8719_v7, %s6460_s28  ;;  %3347 = vmatpush.msrb.mxu3 %v2572_v28  ;;  %v2641_v28 = vsel %vm537_vm3, %v9045_v26, %v8994_v33  ;;  %v2456_v33 = vsel %vm359_vm2, %v8862_v13, %v8902_v37  ;;  %v2555_v37 = vperm.slane %v9074_v3, 0 }
 0x4c8   : > { %v9116_v25 = vpop.permute.xlu2 %2709 }
 0x4c9   : > { %v9118_v10 = vpop.permute.xlu1 %2621  ;;  %3348 = vmatpush.msrb.mxu3 %v2568_v55  ;;  %v9121_v56 = vpop.permute.xlu0 %2625  ;;  %v2457_v55 = vsel %vm359_vm2, %v8890_v0, %v8912_v24 }
 0x4ca   : > { %13278 = vst [vmem:[#allocation33_spill] sm:$0xff] %v9118_v10  ;;  %v2642_v23 = vsel %vm537_vm3, %v9121_v56, %v2602_v49  ;;  %v2640_v8 = vsel %vm537_vm3, %v9118_v10, %v9020_v20  ;;  %v2661_v49 = vmul.f32 %v2645_v12, %v2641_v28  ;;  %v2482_v20 = vmul.f32 %v2466_v59, %v2457_v55 }
 0x4cb   : > { %13279 = vst [vmem:[#allocation44_spill] sm:$0xff] %v9121_v56  ;;  %v2665_v5 = vmul.f32 %v2645_v12, %v2642_v23  ;;  %3349 = vmatpush.msrb.mxu3 %v2564_v38  ;;  %v2455_v38 = vsel %vm359_vm2, %v8888_v2, %v8874_v22  ;;  %v2478_v28 = vmul.f32 %v2466_v59, %v2456_v33 }
 0x4cc   : > { %v2368_v23 = vsel %vm271_vm0, %v8828_v51, %v8848_v62  ;;  %v2474_v19 = vmul.f32 %v2466_v59, %v2455_v38  ;;  %v2367_v33 = vsel %vm271_vm0, %v8808_v60, %v8840_v54  ;;  %v2366_v59 = vsel %vm271_vm0, %v8824_v18, %v8818_v61  ;;  %v9385_v62 = vld [vmem:[%s12614_s1 + $0x1c] sm:$0xf] }
 0x4cd   : > { %3255 = vmatpush.msrb.mxu2 %v2665_v5  ;;  %3350 = vmatpush.msrb.mxu3 %v2486_v1  ;;  %v2657_v5 = vmul.f32 %v2645_v12, %v2640_v8  ;;  %v2552_v1 = vsel %vm448_vm1, %v8982_v16, %v8934_v42  ;;  %v2376_v42 = vperm.slane %v9160_v30, 1  ;;  %v2932_v16 = vperm.slane %v9385_v62, 1 }
 0x4ce   : > { %2905 = vrot.lane.b32.xlu0 %v8737_v35, %s6460_s28  ;;  %2897 = vrot.lane.b32.xlu2 %v8724_v11, %s6460_s28 }
 0x4cf   : > { %2901 = vrot.lane.b32.xlu1 %v8739_v44, %s6460_s28  ;;  %3256 = vmatpush.msrb.mxu2 %v2661_v49  ;;  %v2653_v49 = vmul.f32 %v2645_v12, %v2639_v47  ;;  %v2396_v12 = vmul.f32 %v2376_v42, %v2368_v23  ;;  %v2550_v47 = vsel %vm448_vm1, %v8998_v52, %v8950_v29 }
 0x4d0   : > { %3351 = vmatpush.msrb.mxu3 %v2482_v20  ;;  %v9166_v40 = vpop.permute.xlu2 %2715  ;;  %v2551_v20 = vsel %vm448_vm1, %v9008_v27, %v8960_v6  ;;  %v2392_v38 = vmul.f32 %v2376_v42, %v2367_v33  ;;  %v2388_v23 = vmul.f32 %v2376_v42, %v2366_v59  ;;  %v2465_v59 = vperm.slane %v9108_v15, 0 }
 0x4d1   : > { %v9172_v55 = vpop.permute.xlu1 %2701  ;;  %3257 = vmatpush.msrb.mxu2 %v2657_v5  ;;  %v9174_v8 = vpop.permute.xlu0 %2705  ;;  %v2575_v5 = vmul.f32 %v2555_v37, %v2552_v1  ;;  %v2571_v6 = vmul.f32 %v2555_v37, %v2551_v20  ;;  %v2549_v1 = vsel %vm448_vm1, %v8970_v57, %v8922_v41  ;;  %v2931_v27 = vperm.slane %v9385_v62, 0 }
 0x4d2   : > { %13281 = vst [vmem:[#allocation18_spill] sm:$0xff] %v9172_v55  ;;  %3352 = vmatpush.msrb.mxu3 %v2478_v28  ;;  %v2567_v28 = vmul.f32 %v2555_v37, %v2550_v47  ;;  %v2563_v20 = vmul.f32 %v2555_v37, %v2549_v1  ;;  %v2460_v37 = vsel %vm359_vm2, %v8910_v9, %v8862_v13 }
 0x4d3   : > { %3258 = vmatpush.msrb.mxu2 %v2653_v49  ;;  %v2462_v49 = vsel %vm359_vm2, %v8948_v63, %v8900_v32  ;;  %v2461_v32 = vsel %vm359_vm2, %v8938_v58, %v8890_v0  ;;  %v2459_v0 = vsel %vm359_vm2, %v8936_v34, %v8888_v2  ;;  %v6238_v34 = vld [vmem:[%s12617_s4 + $0x38] sm:$0xff] }
 0x4d4   : > { %3353 = vmatpush.msrb.mxu3 %v2474_v19  ;;  %v2365_v19 = vsel %vm271_vm0, %v8816_v46, %v8836_v31  ;;  %v2485_v47 = vmul.f32 %v2465_v59, %v2462_v49  ;;  %v2473_v2 = vmul.f32 %v2465_v59, %v2459_v0  ;;  %v2375_v49 = vperm.slane %v9160_v30, 0  ;;  %v13289_v0 = vld [vmem:[#allocation60_spill] sm:$0xff] }
 0x4d5   : > { %3259 = vmatpush.msrb.mxu2 %v2575_v5  ;;  %v2384_v5 = vmul.f32 %v2376_v42, %v2365_v19  ;;  %v2481_v42 = vmul.f32 %v2465_v59, %v2461_v32  ;;  %v13286_v32 = vld [vmem:[#allocation31_spill] sm:$0xff] }
 0x4d6   : > { %3354 = vmatpush.msrb.mxu3 %v2396_v12  ;;  %2911 = vrot.lane.b32.xlu0 %v8746_v45, %s6460_s28  ;;  %v9221_v12 = vld [vmem:[%s12616_s3 + $0x60] sm:$0xff] }
 0x4d7   : > { %2903 = vrot.lane.b32.xlu2 %v8748_v4, %s6460_s28  ;;  %2907 = vrot.lane.b32.xlu1 %v8750_v53, %s6460_s28  ;;  %13282 = vst [vmem:[#allocation83_spill] sm:$0xff] %v9221_v12 }
 0x4d8   : > { %3260 = vmatpush.msrb.mxu2 %v2571_v6  ;;  %3355 = vmatpush.msrb.mxu3 %v2392_v38  ;;  %v9208_v29 = vpop.permute.xlu2 %2721  ;;  %v2477_v6 = vmul.f32 %v2465_v59, %v2460_v37  ;;  %v13283_v38 = vld [vmem:[#allocation6_spill] sm:$0xff] }
 0x4d9   : > { %v9214_v33 = vpop.permute.xlu1 %2707  ;;  %v9216_v41 = vpop.permute.xlu0 %2711  ;;  %v2372_v19 = vsel %vm271_vm0, %v13283_v38, %v8828_v51  ;;  %v13287_v37 = vld [vmem:[#allocation38_spill] sm:$0xff]  ;;  %v6235_v38 = vld [vmem:[%s12617_s4 + $0x20] sm:$0xff] }
 0x4da   : > { %3261 = vmatpush.msrb.mxu2 %v2567_v28  ;;  %3356 = vmatpush.msrb.mxu3 %v2388_v23  ;;  %v9256_v23 = vld [vmem:[%s12616_s3 + $0x78] sm:$0xff]  ;;  %v2395_v51 = vmul.f32 %v2375_v49, %v2372_v19 }
 0x4db   : > { %13284 = vst [vmem:[#allocation26_spill] sm:$0xff] %v9256_v23 }
 0x4dc   : > { %3262 = vmatpush.msrb.mxu2 %v2563_v20  ;;  %3357 = vmatpush.msrb.mxu3 %v2384_v5  ;;  %v13285_v20 = vld [vmem:[#allocation39_spill] sm:$0xff] }
 0x4dd   : > { %3358 = vmatmul.f32.vlgmr.msrb.gmra.mxu3 %v9221_v12  ;;  %v2371_v5 = vsel %vm271_vm0, %v13285_v20, %v8808_v60  ;;  %v13288_v60 = vld [vmem:[#allocation62_spill] sm:$0xff] }
 0x4de   : > { %3263 = vmatpush.msrb.mxu2 %v2485_v47  ;;  %2975 = vrot.lane.b32.xlu0 %v8691_v36, %s6461_s13  ;;  %v2370_v47 = vsel %vm271_vm0, %v13286_v32, %v8824_v18  ;;  %v2391_v59 = vmul.f32 %v2375_v49, %v2371_v5  ;;  %v6236_v20 = vld [vmem:[%s12617_s4 + $0x28] sm:$0xff] }
 0x4df   : > { %2909 = vrot.lane.b32.xlu2 %v8758_v43, %s6460_s28  ;;  %2971 = vrot.lane.b32.xlu1 %v8679_v48, %s6461_s13 }
 0x4e0   : > { %3264 = vmatpush.msrb.mxu2 %v2481_v42  ;;  %v9243_v13 = vpop.permute.xlu2 %2727  ;;  %v2369_v42 = vsel %vm271_vm0, %v13287_v37, %v8816_v46  ;;  %v9287_v46 = vld [vmem:[%s12616_s3 + $0x90] sm:$0xff] }
 0x4e1   : > { %v9249_v1 = vpop.permute.xlu1 %2713  ;;  %v9251_v28 = vpop.permute.xlu0 %2717  ;;  %v2383_v5 = vmul.f32 %v2375_v49, %v2369_v42  ;;  %13291 = vst [vmem:[#allocation72_spill] sm:$0xff] %v9287_v46  ;;  %v9306_v42 = vld [vmem:[%s12616_s3 + $0xa8] sm:$0xff] }
 0x4e2   : > { %3265 = vmatpush.msrb.mxu2 %v2477_v6  ;;  %v2387_v6 = vmul.f32 %v2375_v49, %v2370_v47  ;;  %13295 = vst [vmem:[#allocation37_spill] sm:$0xff] %v9306_v42 }
 0x4e4   : > { %3266 = vmatpush.msrb.mxu2 %v2473_v2 }
 0x4e5   : > { %3361 = vmatmul.f32.gmra.mxu3 %v9256_v23 }
 0x4e6   : > { %3267 = vmatpush.msrb.mxu2 %v2395_v51  ;;  %2981 = vrot.lane.b32.xlu0 %v8708_v17, %s6461_s13  ;;  %v13292_v51 = vld [vmem:[#allocation63_spill] sm:$0xff] }
 0x4e7   : > { %2973 = vrot.lane.b32.xlu2 %v13288_v60, %s6461_s13  ;;  %2977 = vrot.lane.b32.xlu1 %v13289_v0, %s6461_s13 }
 0x4e8   : > { %3268 = vmatpush.msrb.mxu2 %v2391_v59  ;;  %v9278_v18 = vpop.permute.xlu2 %2791 }
 0x4e9   : > { %13290 = vst [vmem:[#allocation42_spill] sm:$0xff] %v9278_v18  ;;  %v9280_v19 = vpop.permute.xlu1 %2719  ;;  %v9282_v2 = vpop.permute.xlu0 %2723 }
 0x4ea   : > { %3269 = vmatpush.msrb.mxu2 %v2387_v6 }
 0x4ec   : > { %3270 = vmatpush.msrb.mxu2 %v2383_v5 }
 0x4ed   : > { %3271 = vmatmul.f32.vlgmr.msrb.gmra.mxu2 %v9221_v12  ;;  %3364 = vmatmul.f32.gmra.mxu3 %v9287_v46 }
 0x4ee   : > { %2987 = vrot.lane.b32.xlu0 %v8724_v11, %s6461_s13 }
 0x4ef   : > { %2979 = vrot.lane.b32.xlu2 %v8703_v14, %s6461_s13  ;;  %2983 = vrot.lane.b32.xlu1 %v13292_v51, %s6461_s13 }
 0x4f0   : > { %v9297_v49 = vpop.permute.xlu2 %2797 }
 0x4f1   : > { %13293 = vst [vmem:[#allocation80_spill] sm:$0xff] %v9297_v49  ;;  %v9299_v47 = vpop.permute.xlu1 %2725  ;;  %v9301_v59 = vpop.permute.xlu0 %2729 }
 0x4f2   : > { %13294 = vst [vmem:[#allocation19_spill] sm:$0xff] %v9299_v47 }
 0x4f5   : > { %3274 = vmatmul.f32.gmra.mxu2 %v9256_v23  ;;  %3367 = vmatmul.f32.gmra.mxu3 %v9306_v42 }
 0x4f6   : > { %2993 = vrot.lane.b32.xlu0 %v8748_v4, %s6461_s13 }
 0x4f7   : > { %2985 = vrot.lane.b32.xlu2 %v8719_v7, %s6461_s13  ;;  %2989 = vrot.lane.b32.xlu1 %v8730_v39, %s6461_s13 }
 0x4f8   : > { %v9316_v6 = vpop.permute.xlu2 %2803 }
 0x4f9   : > { %v9318_v5 = vpop.permute.xlu1 %2731  ;;  %v9320_v37 = vpop.permute.xlu0 %2793 }
 0x4fa   : > { %13296 = vst [vmem:[#allocation24_spill] sm:$0xff] %v9320_v37 }
 0x4fd   : > { %3277 = vmatmul.f32.gmra.mxu2 %v9287_v46 }
 0x4fe   : > { %2999 = vrot.lane.b32.xlu0 %v8758_v43, %s6461_s13 }
 0x4ff   : > { %2991 = vrot.lane.b32.xlu2 %v8739_v44, %s6461_s13  ;;  %2995 = vrot.lane.b32.xlu1 %v8737_v35, %s6461_s13 }
 0x500   : > { %v9329_v23 = vpop.permute.xlu2 %2809 }
 0x501   : > { %v9331_v32 = vpop.permute.xlu1 %2795  ;;  %v9333_v12 = vpop.permute.xlu0 %2799 }
 0x502   : > { %13297 = vst [vmem:[#allocation79_spill] sm:$0xff] %v9331_v32 }
 0x505   : > { %3280 = vmatmul.f32.gmra.mxu2 %v9306_v42 }
 0x506   : > { %3230 = vperm.xlu0 %6386, %v6236_v20   ;;  %v6237_v20 = vld [vmem:[%s12617_s4 + $0x30] sm:$0xff] }
 0x507   : > { %2997 = vrot.lane.b32.xlu2 %v8750_v53, %s6461_s13  ;;  %3001 = vrot.lane.b32.xlu1 %v8746_v45, %s6461_s13 }
 0x508   : > { %v9343_v35 = vpop.permute.xlu2 %2815 }
 0x509   : > { %v9345_v43 = vpop.permute.xlu1 %2801  ;;  %v9347_v46 = vpop.permute.xlu0 %2805 }
 0x50f   : > { %3225 = vperm.xlu2 %6385, %v6235_v38   ;;  %3235 = vperm.xlu1 %6387, %v6237_v20  }
 0x510   : > { %v9355_v53 = vpop.permute.xlu2 %2821 }
 0x511   : > { %v9357_v42 = vpop.permute.xlu1 %2807  ;;  %v9359_v45 = vpop.permute.xlu0 %2811 }
 0x517   : > { %3240 = vperm.xlu2 %6385, %v6238_v34  }
 0x518   : > { %v9364_v9 = vpop.permute.xlu2 %2885 }
 0x519   : > { %13298 = vst [vmem:[#allocation25_spill] sm:$0xff] %v9364_v9  ;;  %v9366_v31 = vpop.permute.xlu1 %2813  ;;  %v9368_v58 = vpop.permute.xlu0 %2817 }
 0x520   : > { %v2892_v61 = vpop.permute.xlu2 %2891 }
 0x521   : > { %v9370_v38 = vpop.permute.xlu1 %2819  ;;  %v9372_v20 = vpop.permute.xlu0 %2881 }
 0x522   : > { %13299 = vst [vmem:[#allocation41_spill] sm:$0xff] %v9372_v20 }
 0x528   : > { %v9374_v63 = vpop.permute.xlu2 %2897 }
 0x529   : > { %v9376_v54 = vpop.permute.xlu1 %2883  ;;  %v9378_v30 = vpop.permute.xlu0 %2887 }
 0x52a   : > { %13300 = vst [vmem:[#allocation65_spill] sm:$0xff] %v9376_v54  ;;  %v2922_v39 = vsel %vm861_vm6, %v9376_v54, %v2892_v61 }
 0x52b   : > { %13301 = vst [vmem:[#allocation75_spill] sm:$0xff] %v9378_v30 }
 0x531   : > { %v9380_v57 = vpop.permute.xlu2 %2903  ;;  %v2890_v34 = vpop.permute.xlu1 %2889 }
 0x532   : > { %v2894_v52 = vpop.permute.xlu0 %2893  ;;  %v2921_v44 = vsel %vm861_vm6, %v9372_v20, %v2890_v34 }
 0x533   : > { %v2923_v10 = vsel %vm861_vm6, %v9364_v9, %v2894_v52 }
 0x534   : > { %v2947_v9 = vmul.f32 %v2931_v27, %v2923_v10  ;;  %v2833_v10 = vsel %vm772_vm5, %v9331_v32, %v9316_v6 }
 0x539   : > { %v2896_v22 = vpop.permute.xlu1 %2895  ;;  %v9398_v56 = vpop.permute.xlu2 %2909 }
 0x53a   : > { %v2920_v15 = vsel %vm861_vm6, %v2896_v22, %v9380_v57  ;;  %v2924_v24 = vsel %vm861_vm6, %v9378_v30, %v2896_v22  ;;  %v2900_v26 = vpop.permute.xlu0 %2899  ;;  %v9409_v22 = vld [vmem:[%s12614_s1 + $0x18] sm:$0xf]  ;;  %v2943_v30 = vmul.f32 %v2931_v27, %v2922_v39 }
 0x53b   : > { %v2951_v3 = vmul.f32 %v2931_v27, %v2924_v24  ;;  %v2952_v11 = vmul.f32 %v2932_v16, %v2920_v15  ;;  %v2834_v24 = vsel %vm772_vm5, %v9297_v49, %v9347_v46  ;;  %v2918_v20 = vsel %vm861_vm6, %v2892_v61, %v2900_v26 }
 0x53d   : > { %3284 = vmatpush.msrb.mxu0 %v2951_v3  ;;  %3371 = vmatpush.msra.mxu2 %v2952_v11  ;;  %v2939_v11 = vmul.f32 %v2931_v27, %v2921_v44  ;;  %v2841_v3 = vperm.slane %v9409_v22, 0  ;;  %v2832_v44 = vsel %vm772_vm5, %v9320_v37, %v9345_v43  ;;  %v2917_v27 = vsel %vm861_vm6, %v2890_v34, %v9374_v63 }
 0x53e   : > { %v2830_v34 = vsel %vm772_vm5, %v9347_v46, %v9366_v31 }
 0x53f   : > { %3285 = vmatpush.msrb.mxu0 %v2947_v9  ;;  %v2861_v49 = vmul.f32 %v2841_v3, %v2834_v24  ;;  %v2857_v61 = vmul.f32 %v2841_v3, %v2833_v10  ;;  %v9438_v24 = vld [vmem:[%s12614_s1 + $0x14] sm:$0xf]  ;;  %v2842_v10 = vperm.slane %v9409_v22, 1 }
 0x541   : > { %v2902_v15 = vpop.permute.xlu1 %2901  ;;  %3286 = vmatpush.msrb.mxu0 %v2943_v30  ;;  %v9433_v30 = vpop.permute.xlu2 %2973  ;;  %v2862_v32 = vmul.f32 %v2842_v10, %v2830_v34  ;;  %v2827_v34 = vsel %vm772_vm5, %v9333_v12, %v9357_v42 }
 0x542   : > { %v2919_v39 = vsel %vm861_vm6, %v2894_v52, %v2902_v15  ;;  %v9424_v9 = vpop.permute.xlu0 %2905  ;;  %v2944_v52 = vmul.f32 %v2932_v16, %v2918_v20  ;;  %v2940_v20 = vmul.f32 %v2932_v16, %v2917_v27 }
 0x543   : > { %3287 = vmatpush.msrb.mxu0 %v2939_v11  ;;  %v2948_v54 = vmul.f32 %v2932_v16, %v2919_v39  ;;  %v2831_v11 = vsel %vm772_vm5, %v9278_v18, %v9333_v12  ;;  %v2829_v39 = vsel %vm772_vm5, %v9316_v6, %v9359_v45  ;;  %v2751_v18 = vperm.slane %v9438_v24, 0 }
 0x544   : > { %v2849_v46 = vmul.f32 %v2841_v3, %v2831_v11  ;;  %v2743_v16 = vsel %vm683_vm4, %v9174_v8, %v9249_v1  ;;  %v2933_v6 = vperm.slane %v9385_v62, 2  ;;  %v2858_v11 = vmul.f32 %v2842_v10, %v2829_v39 }
 0x545   : > { %3288 = vmatpush.msrb.mxu0 %v2861_v49  ;;  %3372 = vmatpush.msra.mxu2 %v2948_v54  ;;  %v2744_v54 = vsel %vm683_vm4, %v9214_v33, %v9166_v40  ;;  %v2853_v49 = vmul.f32 %v2841_v3, %v2832_v44  ;;  %v2828_v44 = vsel %vm772_vm5, %v9345_v43, %v9329_v23 }
 0x546   : > { %v2915_v3 = vsel %vm861_vm6, %v2902_v15, %v9398_v56  ;;  %v2742_v43 = vsel %vm683_vm4, %v9082_v50, %v9216_v41 }
 0x547   : > { %3289 = vmatpush.msrb.mxu0 %v2857_v61  ;;  %3373 = vmatpush.msra.mxu2 %v2944_v52  ;;  %v2771_v61 = vmul.f32 %v2751_v18, %v2744_v54  ;;  %v2949_v12 = vmul.f32 %v2933_v6, %v2915_v3 }
 0x549   : > { %v9458_v37 = vpop.permute.xlu1 %2907  ;;  %3290 = vmatpush.msrb.mxu0 %v2853_v49  ;;  %3374 = vmatpush.msra.mxu2 %v2940_v20  ;;  %v2741_v49 = vsel %vm683_vm4, %v9172_v55, %v9116_v25  ;;  %v2740_v20 = vsel %vm683_vm4, %v9166_v40, %v9282_v2  ;;  %v9501_v39 = vpop.permute.xlu2 %2979  ;;  %v2739_v40 = vsel %vm683_vm4, %v9249_v1, %v9208_v29  ;;  %v13338_v55 = vld [vmem:[#allocation89_spill] sm:$0xff] }
 0x54a   : > { %v9469_v27 = vpop.permute.xlu0 %2911  ;;  %v2914_v15 = vsel %vm861_vm6, %v2900_v26, %v9458_v37  ;;  %v2913_v26 = vsel %vm861_vm6, %v9374_v63, %v9424_v9  ;;  %v2826_v63 = vsel %vm772_vm5, %v9366_v31, %v9355_v53  ;;  %v2825_v31 = vsel %vm772_vm5, %v9359_v45, %v9370_v38 }
 0x54b   : > { %v2916_v52 = vsel %vm861_vm6, %v9380_v57, %v9469_v27  ;;  %3291 = vmatpush.msrb.mxu0 %v2849_v46  ;;  %3375 = vmatpush.msra.mxu2 %v2862_v32  ;;  %v2767_v57 = vmul.f32 %v2751_v18, %v2743_v16  ;;  %v2854_v32 = vmul.f32 %v2842_v10, %v2828_v44  ;;  %v2752_v44 = vperm.slane %v9438_v24, 1 }
 0x54c   : > { %v2953_v54 = vmul.f32 %v2933_v6, %v2916_v52  ;;  %v2763_v46 = vmul.f32 %v2751_v18, %v2742_v43  ;;  %v2850_v16 = vmul.f32 %v2842_v10, %v2827_v34  ;;  %v2759_v52 = vmul.f32 %v2751_v18, %v2741_v49 }
 0x54d   : > { %3292 = vmatpush.msrb.mxu0 %v2771_v61  ;;  %3376 = vmatpush.msra.mxu2 %v2858_v11  ;;  %v2945_v61 = vmul.f32 %v2933_v6, %v2914_v15  ;;  %v2772_v10 = vmul.f32 %v2752_v44, %v2740_v20  ;;  %v2738_v11 = vsel %vm683_vm4, %v9216_v41, %v9280_v19  ;;  %v2843_v34 = vperm.slane %v9409_v22, 2 }
 0x54e   : > { %3458 = vmatpush.msra.mxu3 %v2953_v54  ;;  %v2941_v43 = vmul.f32 %v2933_v6, %v2913_v26  ;;  %v2768_v18 = vmul.f32 %v2752_v44, %v2739_v40  ;;  %v2737_v54 = vsel %vm683_vm4, %v9116_v25, %v9251_v28  ;;  %v2824_v6 = vsel %vm772_vm5, %v9329_v23, %v9368_v58 }
 0x54f   : > { %3293 = vmatpush.msrb.mxu0 %v2767_v57  ;;  %3377 = vmatpush.msra.mxu2 %v2854_v32  ;;  %v2863_v41 = vmul.f32 %v2843_v34, %v2826_v63  ;;  %v2764_v15 = vmul.f32 %v2752_v44, %v2738_v11  ;;  %v2859_v45 = vmul.f32 %v2843_v34, %v2825_v31  ;;  %v9537_v57 = vld [vmem:[%s12614_s1 + $0x20] sm:$0xf]  ;;  %v13304_v11 = vld [vmem:[#allocation14_spill] sm:$0xff]  ;;  %v13306_v31 = vld [vmem:[#allocation56_spill] sm:$0xff] }
 0x550   : > { %3459 = vmatpush.msra.mxu3 %v2949_v12  ;;  %v2823_v25 = vsel %vm772_vm5, %v9357_v42, %v9343_v35  ;;  %v2760_v23 = vmul.f32 %v2752_v44, %v2737_v54  ;;  %v2736_v32 = vsel %vm683_vm4, %v9282_v2, %v9318_v5  ;;  %v3021_v20 = vperm.slane %v9537_v57, 0 }
 0x551   : > { %v9512_v3 = vpop.permute.xlu1 %2971  ;;  %3294 = vmatpush.msrb.mxu0 %v2763_v46  ;;  %3378 = vmatpush.msra.mxu2 %v2850_v16  ;;  %v2986_v49 = vpop.permute.xlu2 %2985  ;;  %v2851_v2 = vmul.f32 %v2843_v34, %v2823_v25  ;;  %v2753_v46 = vperm.slane %v9438_v24, 2  ;;  %v2734_v40 = vsel %vm683_vm4, %v9280_v19, %v9243_v13  ;;  %v9582_v19 = vld [vmem:[%s12616_s3 + $0x80] sm:$0xff] }
 0x552   : > { %3460 = vmatpush.msra.mxu3 %v2945_v61  ;;  %v9518_v1 = vpop.permute.xlu0 %2975  ;;  %13303 = vst [vmem:[#allocation71_spill] sm:$0xff] %v9582_v19  ;;  %v13309_v25 = vld [vmem:[#allocation49_spill] sm:$0xff] }
 0x553   : > { %3295 = vmatpush.msrb.mxu0 %v2759_v52  ;;  %3379 = vmatpush.msra.mxu2 %v2772_v10  ;;  %v2773_v44 = vmul.f32 %v2753_v46, %v2736_v32  ;;  %v3011_v52 = vsel %vm950_vm7, %v9512_v3, %v9501_v39  ;;  %v13310_v32 = vld [vmem:[#allocation82_spill] sm:$0xff] }
 0x554   : > { %3461 = vmatpush.msra.mxu3 %v2941_v43  ;;  %v13305_v43 = vld [vmem:[#allocation54_spill] sm:$0xff]  ;;  %v3029_v54 = vmul.f32 %v3021_v20, %v3011_v52 }
 0x555   : > { %3296 = vmatpush.msrb.mxu0 %v13289_v0  ;;  %3380 = vmatpush.msra.mxu2 %v2768_v18  ;;  %v2855_v0 = vmul.f32 %v2843_v34, %v2824_v6  ;;  %v2634_v34 = vsel %vm537_vm3, %v13305_v43, %v13304_v11  ;;  %v2647_v18 = vperm.slane %v13306_v31, 2  ;;  %v13307_v6 = vld [vmem:[#allocation47_spill] sm:$0xff]  ;;  %v13317_v52 = vld [vmem:[#allocation74_spill] sm:$0xff] }
 0x556   : > { %3462 = vmatpush.msra.mxu3 %v2863_v41  ;;  %v9607_v41 = vld [vmem:[%s12616_s3 + $0x70] sm:$0xff] }
 0x557   : > { %3297 = vmatpush.msrb.mxu0 %v8691_v36  ;;  %3381 = vmatpush.msra.mxu2 %v2764_v15  ;;  %v9555_v36 = vld [vmem:[%s12616_s3 + $0x68] sm:$0xff]  ;;  %v13308_v15 = vld [vmem:[#allocation64_spill] sm:$0xff] }
 0x558   : > { %3463 = vmatpush.msra.mxu3 %v2859_v45  ;;  %13302 = vst [vmem:[#allocation10_spill] sm:$0xff] %v9555_v36  ;;  %v2633_v45 = vsel %vm537_vm3, %v13308_v15, %v13307_v6  ;;  %v13318_v15 = vld [vmem:[#allocation87_spill] sm:$0xff] }
 0x559   : > { %v9549_v12 = vpop.permute.xlu1 %2977  ;;  %3298 = vmatpush.msrb.mxu0 %v13288_v60  ;;  %3382 = vmatpush.msra.mxu2 %v2760_v23  ;;  %v2735_v60 = vsel %vm683_vm4, %v9208_v29, %v9301_v59  ;;  %v2667_v23 = vmul.f32 %v2647_v18, %v2634_v34 }
 0x55a   : > { %v3014_v42 = vsel %vm950_vm7, %v9549_v12, %v2986_v49  ;;  %3464 = vmatpush.msra.mxu3 %v2855_v0  ;;  %v2982_v26 = vpop.permute.xlu0 %2981  ;;  %v2769_v61 = vmul.f32 %v2753_v46, %v2735_v60  ;;  %v3022_v60 = vperm.slane %v9537_v57, 1 }
 0x55b   : > { %v3041_v16 = vmul.f32 %v3021_v20, %v3014_v42  ;;  %3299 = vmatpush.msrb.mxu0 %v8679_v48  ;;  %3383 = vmatpush.msra.mxu2 %v8719_v7  ;;  %v2733_v48 = vsel %vm683_vm4, %v9251_v28, %v9299_v47  ;;  %v2765_v7 = vmul.f32 %v2753_v46, %v2734_v40 }
 0x55c   : > { %3465 = vmatpush.msra.mxu3 %v2851_v2  ;;  %3300 = vmatmul.f32.vlgmr.msrb.gmra.mxu0 %v9555_v36  ;;  %v2761_v63 = vmul.f32 %v2753_v46, %v2733_v48  ;;  %v9625_v2 = vpop.permute.xlu2 %2991  ;;  %v13312_v46 = vld [vmem:[#allocation57_spill] sm:$0xff] }
 0x55d   : > { %3325 = vmatpush.msrb.mxu1 %v3041_v16  ;;  %3384 = vmatpush.msra.mxu2 %v13292_v51  ;;  %v3012_v51 = vsel %vm950_vm7, %v9433_v30, %v2982_v26  ;;  %v13313_v48 = vld [vmem:[#allocation73_spill] sm:$0xff] }
 0x55e   : > { %3466 = vmatpush.msra.mxu3 %v2773_v44  ;;  %v3033_v10 = vmul.f32 %v3021_v20, %v3012_v51 }
 0x55f   : > { %3385 = vmatpush.msra.mxu2 %v8708_v17 }
 0x560   : > { %3467 = vmatpush.msra.mxu3 %v2769_v61  ;;  %v2663_v61 = vmul.f32 %v2647_v18, %v2633_v45  ;;  %v2557_v45 = vperm.slane %v13318_v15, 2 }
 0x561   : > { %v2984_v29 = vpop.permute.xlu1 %2983  ;;  %3386 = vmatpush.msra.mxu2 %v8703_v14 }
 0x562   : > { %v3013_v28 = vsel %vm950_vm7, %v9518_v1, %v2984_v29  ;;  %3468 = vmatpush.msra.mxu3 %v2765_v7  ;;  %v9590_v17 = vpop.permute.xlu0 %2987  ;;  %3387 = vmatmul.f32.vlgmr.msra.gmra.mxu2 %v9555_v36  ;;  %v3009_v44 = vsel %vm950_vm7, %v2984_v29, %v9625_v2  ;;  %v13314_v7 = vld [vmem:[#allocation84_spill] sm:$0xff] }
 0x563   : > { %v3037_v14 = vmul.f32 %v3021_v20, %v3013_v28  ;;  %v13311_v20 = vld [vmem:[#allocation88_spill] sm:$0xff]  ;;  %v2631_v51 = vsel %vm537_vm3, %v13314_v7, %v13313_v48  ;;  %v3038_v43 = vmul.f32 %v3022_v60, %v3009_v44  ;;  %v3007_v34 = vsel %vm950_vm7, %v9501_v39, %v9590_v17 }
 0x564   : > { %3469 = vmatpush.msra.mxu3 %v2761_v63  ;;  %3303 = vmatmul.f32.gmra.mxu0 %v9582_v19  ;;  %v2632_v42 = vsel %vm537_vm3, %v13311_v20, %v13310_v32  ;;  %v13315_v63 = vld [vmem:[#allocation55_spill] sm:$0xff] }
 0x565   : > { %3326 = vmatpush.msrb.mxu1 %v3037_v14  ;;  %v13316_v14 = vld [vmem:[#allocation50_spill] sm:$0xff] }
 0x566   : > { %3470 = vmatpush.msra.mxu3 %v8748_v4  ;;  %v9619_v4 = vld [vmem:[%s12616_s3 + $0x98] sm:$0xff] }
 0x567   : > { %3327 = vmatpush.msrb.mxu1 %v3033_v10  ;;  %v2544_v10 = vsel %vm448_vm1, %v13317_v52, %v13316_v14  ;;  %v13326_v52 = vld [vmem:[#allocation27_spill] sm:$0xff] }
 0x568   : > { %3471 = vmatpush.msra.mxu3 %v13309_v25  ;;  %v13319_v25 = vld [vmem:[#allocation67_spill] sm:$0xff]  ;;  %v2577_v44 = vmul.f32 %v2557_v45, %v2544_v10 }
 0x569   : > { %v9614_v0 = vpop.permute.xlu1 %2989  ;;  %3328 = vmatpush.msrb.mxu1 %v3029_v54  ;;  %v2655_v54 = vmul.f32 %v2647_v18, %v2631_v51  ;;  %v2648_v51 = vperm.slane %v13306_v31, 3  ;;  %v13325_v31 = vld [vmem:[#allocation21_spill] sm:$0xff] }
 0x56a   : > { %3472 = vmatpush.msra.mxu3 %v13312_v46  ;;  %v9629_v16 = vpop.permute.xlu0 %2993  ;;  %6239 = vmatmul.msk.f32.vlgmr.msrb.gmra.mxu1 %vm1948_vm8, %v9607_v41  ;;  %v3008_v29 = vsel %vm950_vm7, %v2982_v26, %v9614_v0  ;;  %v9661_v26 = vld [vmem:[%s12616_s3 + $0x88] sm:$0xff]  ;;  %v13321_v46 = vld [vmem:[#allocation44_spill] sm:$0xff]  ;;  %v2453_v10 = vsel %vm359_vm2, %v13326_v52, %v13325_v31 }
 0x56b   : > { %v3010_v40 = vsel %vm950_vm7, %v2986_v49, %v9629_v16  ;;  %3390 = vmatmul.f32.gmra.mxu2 %v9582_v19  ;;  %3429 = vmatpush.msra.mxu1 %v2667_v23  ;;  %v2659_v49 = vmul.f32 %v2647_v18, %v2632_v42  ;;  %v13320_v23 = vld [vmem:[#allocation70_spill] sm:$0xff]  ;;  %v3034_v42 = vmul.f32 %v3022_v60, %v3008_v29 }
 0x56c   : > { %v3042_v28 = vmul.f32 %v3022_v60, %v3010_v40  ;;  %3473 = vmatpush.msra.mxu3 %v13315_v63  ;;  %3306 = vmatmul.f32.gmra.mxu0 %v9619_v4  ;;  %v2543_v20 = vsel %vm448_vm1, %v13320_v23, %v13319_v25  ;;  %v2630_v39 = vsel %vm537_vm3, %v13304_v11, %v13321_v46  ;;  %v13322_v40 = vld [vmem:[#allocation66_spill] sm:$0xff]  ;;  %v9684_v11 = vld [vmem:[%s12616_s3 + $0xb0] sm:$0xff]  ;;  %v13324_v63 = vld [vmem:[#allocation52_spill] sm:$0xff] }
 0x56d   : > { %3430 = vmatpush.msra.mxu1 %v2663_v61  ;;  %3474 = vmatmul.f32.vlgmr.msra.gmra.mxu3 %v9555_v36  ;;  %v13323_v61 = vld [vmem:[#allocation58_spill] sm:$0xff]  ;;  %v2629_v29 = vsel %vm537_vm3, %v13307_v6, %v13324_v63  ;;  %v13330_v46 = vld [vmem:[#allocation61_spill] sm:$0xff]  ;;  %v13331_v6 = vld [vmem:[#allocation8_spill] sm:$0xff] }
 0x56e   : > { %3412 = vmatpush.msra.mxu0 %v3042_v28  ;;  %v2542_v7 = vsel %vm448_vm1, %v13323_v61, %v13322_v40  ;;  %v3030_v28 = vmul.f32 %v3022_v60, %v3007_v34  ;;  %v13327_v60 = vld [vmem:[#allocation94_spill] sm:$0xff]  ;;  %v2664_v52 = vmul.f32 %v2648_v51, %v2629_v29  ;;  %v13335_v36 = vld [vmem:[#allocation81_spill] sm:$0xff]  ;;  %v13336_v29 = vld [vmem:[#allocation32_spill] sm:$0xff] }
 0x56f   : > { %3431 = vmatpush.msra.mxu1 %v2659_v49  ;;  %v2573_v49 = vmul.f32 %v2557_v45, %v2543_v20  ;;  %v13329_v23 = vld [vmem:[#allocation86_spill] sm:$0xff]  ;;  %v13332_v20 = vld [vmem:[#allocation33_spill] sm:$0xff]  ;;  %v2569_v63 = vmul.f32 %v2557_v45, %v2542_v7 }
 0x570   : > { %3413 = vmatpush.msra.mxu0 %v3038_v43  ;;  %v13328_v43 = vld [vmem:[#allocation85_spill] sm:$0xff]  ;;  %v2628_v61 = vsel %vm537_vm3, %v13310_v32, %v13332_v20 }
 0x571   : > { %3432 = vmatpush.msra.mxu1 %v2655_v54  ;;  %v9672_v18 = vpop.permute.xlu1 %2995  ;;  %v2541_v34 = vsel %vm448_vm1, %v13328_v43, %v13327_v60  ;;  %v2668_v54 = vmul.f32 %v2648_v51, %v2630_v39  ;;  %v13333_v39 = vld [vmem:[#allocation7_spill] sm:$0xff]  ;;  %v9721_v7 = vld [vmem:[%s12616_s3 + $0xa0] sm:$0xff] }
 0x572   : > { %3414 = vmatpush.msra.mxu0 %v3034_v42  ;;  %6240 = vmatmul.msk.f32.gmra.mxu1 %vm1948_vm8, %v9661_v26  ;;  %v2467_v42 = vperm.slane %v13329_v23, 2  ;;  %v2565_v32 = vmul.f32 %v2557_v45, %v2541_v34  ;;  %v3000_v20 = vpop.permute.xlu0 %2999  ;;  %v3023_v34 = vperm.slane %v9537_v57, 2 }
 0x573   : > { %3393 = vmatmul.f32.gmra.mxu2 %v9619_v4  ;;  %3433 = vmatpush.msra.mxu1 %v2577_v44  ;;  %v2454_v44 = vsel %vm359_vm2, %v13331_v6, %v13330_v46  ;;  %v2627_v6 = vsel %vm537_vm3, %v13313_v48, %v13335_v36  ;;  %v2540_v36 = vsel %vm448_vm1, %v13316_v14, %v13338_v55  ;;  %v13339_v48 = vld [vmem:[#allocation93_spill] sm:$0xff] }
 0x574   : > { %3415 = vmatpush.msra.mxu0 %v3030_v28  ;;  %v13334_v28 = vld [vmem:[#allocation15_spill] sm:$0xff]  ;;  %v2483_v47 = vmul.f32 %v2467_v42, %v2453_v10  ;;  %v2539_v45 = vsel %vm448_vm1, %v13319_v25, %v13339_v48  ;;  %v2656_v14 = vmul.f32 %v2648_v51, %v2627_v6  ;;  %v2558_v25 = vperm.slane %v13318_v15, 3 }
 0x575   : > { %3309 = vmatmul.f32.gmra.mxu0 %v9684_v11  ;;  %3434 = vmatpush.msra.mxu1 %v2573_v49  ;;  %v2451_v43 = vsel %vm359_vm2, %v13334_v28, %v13333_v39  ;;  %v13337_v49 = vld [vmem:[#allocation17_spill] sm:$0xff]  ;;  %v2660_v28 = vmul.f32 %v2648_v51, %v2628_v61  ;;  %v3017_v51 = vsel %vm950_vm7, %v3000_v20, %v9518_v1 }
 0x576   : > { %3516 = vmatpush.msrb.mxu0 %v2668_v54  ;;  %3477 = vmatmul.f32.gmra.mxu3 %v9582_v19  ;;  %v2452_v54 = vsel %vm359_vm2, %v13337_v49, %v13336_v29  ;;  %v2487_v19 = vmul.f32 %v2467_v42, %v2454_v44  ;;  %v2998_v44 = vpop.permute.xlu2 %2997  ;;  %v2475_v48 = vmul.f32 %v2467_v42, %v2451_v43  ;;  %v13344_v43 = vld [vmem:[#allocation76_spill] sm:$0xff] }
 0x577   : > { %3435 = vmatpush.msra.mxu1 %v2569_v63  ;;  %v3024_v63 = vperm.slane %v9537_v57, 3  ;;  %v3005_v57 = vsel %vm950_vm7, %v9625_v2, %v3000_v20  ;;  %v2578_v2 = vmul.f32 %v2558_v25, %v2540_v36  ;;  %v2479_v6 = vmul.f32 %v2467_v42, %v2452_v54  ;;  %v13343_v20 = vld [vmem:[#allocation92_spill] sm:$0xff] }
 0x578   : > { %3517 = vmatpush.msrb.mxu0 %v2664_v52  ;;  %v3039_v1 = vmul.f32 %v3023_v34, %v3005_v57  ;;  %v2537_v36 = vsel %vm448_vm1, %v13327_v60, %v13343_v20  ;;  %v9784_v60 = vld [vmem:[%s12616_s3 + $0xb8] sm:$0xff]  ;;  %v2377_v54 = vperm.slane %v13344_v43, 2  ;;  %v13355_v20 = vld [vmem:[#allocation69_spill] sm:$0xff] }
 0x579   : > { %3436 = vmatpush.msra.mxu1 %v2565_v32  ;;  %v3002_v49 = vpop.permute.xlu1 %3001  ;;  %v13341_v32 = vld [vmem:[#allocation91_spill] sm:$0xff]  ;;  %v2566_v57 = vmul.f32 %v2558_v25, %v2537_v36  ;;  %v13356_v36 = vld [vmem:[#allocation25_spill] sm:$0xff] }
 0x57a   : > { %3518 = vmatpush.msrb.mxu0 %v2660_v28  ;;  %v3006_v10 = vsel %vm950_vm7, %v9629_v16, %v3002_v49  ;;  %v3018_v55 = vsel %vm950_vm7, %v3002_v49, %v9549_v12  ;;  %6241 = vmatmul.msk.f32.gmra.mxu1 %vm1948_vm8, %v9721_v7  ;;  %v13340_v16 = vld [vmem:[#allocation35_spill] sm:$0xff]  ;;  %v13342_v28 = vld [vmem:[#allocation53_spill] sm:$0xff]  ;;  %v2574_v49 = vmul.f32 %v2558_v25, %v2539_v45 }
 0x57b   : > { %v3043_v61 = vmul.f32 %v3023_v34, %v3006_v10  ;;  %v3044_v52 = vmul.f32 %v3024_v63, %v3018_v55  ;;  %3396 = vmatmul.f32.gmra.mxu2 %v9684_v11  ;;  %3437 = vmatpush.msra.mxu1 %v2487_v19  ;;  %v2364_v12 = vsel %vm271_vm0, %v13341_v32, %v13340_v16  ;;  %v13345_v45 = vld [vmem:[#allocation29_spill] sm:$0xff]  ;;  %v13346_v55 = vld [vmem:[#allocation34_spill] sm:$0xff] }
 0x57c   : > { %v2538_v15 = vsel %vm448_vm1, %v13322_v40, %v13342_v28  ;;  %3519 = vmatpush.msrb.mxu0 %v2656_v14  ;;  %v3004_v19 = vsel %vm950_vm7, %v9614_v0, %v2998_v44  ;;  %v3016_v40 = vsel %vm950_vm7, %v2998_v44, %v9433_v30  ;;  %v3040_v0 = vmul.f32 %v3024_v63, %v3017_v51  ;;  %v13347_v44 = vld [vmem:[#allocation90_spill] sm:$0xff] }
 0x57d   : > { %6243 = vmatmul.msk.f32.vlgmr.msra.gmra.mxu0 %vm1948_vm8, %v9607_v41  ;;  %3438 = vmatpush.msra.mxu1 %v2483_v47  ;;  %v2570_v10 = vmul.f32 %v2558_v25, %v2538_v15  ;;  %v3003_v47 = vsel %vm950_vm7, %v9590_v17, %v9672_v18  ;;  %v3015_v30 = vsel %vm950_vm7, %v9672_v18, %v9512_v3  ;;  %v2468_v51 = vperm.slane %v13329_v23, 3 }
 0x57e   : > { %3520 = vmatpush.msrb.mxu0 %v2578_v2  ;;  %3499 = vmatpush.msrb.mxu2 %v3043_v61  ;;  %v3035_v42 = vmul.f32 %v3023_v34, %v3004_v19  ;;  %v2363_v17 = vsel %vm271_vm0, %v13346_v55, %v13345_v45  ;;  %v3036_v14 = vmul.f32 %v3024_v63, %v3016_v40  ;;  %v13348_v61 = vld [vmem:[#allocation36_spill] sm:$0xff]  ;;  %v2378_v55 = vperm.slane %v13344_v43, 3 }
 0x57f   : > { %3586 = vmatpush.msrb.mxu3 %v3044_v52  ;;  %3439 = vmatpush.msra.mxu1 %v2479_v6  ;;  %v2450_v3 = vsel %vm359_vm2, %v13330_v46, %v13347_v44  ;;  %v2397_v18 = vmul.f32 %v2377_v54, %v2364_v12  ;;  %v13349_v52 = vld [vmem:[#allocation51_spill] sm:$0xff]  ;;  %v3031_v28 = vmul.f32 %v3023_v34, %v3003_v47  ;;  %v13350_v2 = vld [vmem:[#allocation68_spill] sm:$0xff]  ;;  %v13351_v12 = vld [vmem:[#allocation46_spill] sm:$0xff] }
 0x580   : > { %3521 = vmatpush.msrb.mxu0 %v2574_v49  ;;  %3500 = vmatpush.msrb.mxu2 %v3039_v1  ;;  %v2362_v32 = vsel %vm271_vm0, %v13349_v52, %v13348_v61  ;;  %v3032_v15 = vmul.f32 %v3024_v63, %v3015_v30  ;;  %v2449_v46 = vsel %vm359_vm2, %v13325_v31, %v13350_v2  ;;  %v13352_v19 = vld [vmem:[#allocation40_spill] sm:$0xff]  ;;  %v13354_v63 = vld [vmem:[#allocation75_spill] sm:$0xff]  ;;  %v2934_v49 = vperm.slane %v9385_v62, 3  ;;  %v13357_v47 = vld [vmem:[#allocation6_spill] sm:$0xff] }
 0x581   : > { %3587 = vmatpush.msrb.mxu3 %v3040_v0  ;;  %3440 = vmatpush.msra.mxu1 %v2475_v48  ;;  %v2393_v25 = vmul.f32 %v2377_v54, %v2363_v17  ;;  %v2361_v6 = vsel %vm271_vm0, %v13352_v19, %v13351_v12  ;;  %v2488_v48 = vmul.f32 %v2468_v51, %v2450_v3  ;;  %v13353_v34 = vld [vmem:[#allocation12_spill] sm:$0xff]  ;;  %v13359_v17 = vld [vmem:[#allocation39_spill] sm:$0xff]  ;;  %v13360_v44 = vld [vmem:[#allocation41_spill] sm:$0xff] }
 0x582   : > { %3522 = vmatpush.msrb.mxu0 %v2570_v10  ;;  %3501 = vmatpush.msrb.mxu2 %v3035_v42  ;;  %v2448_v23 = vsel %vm359_vm2, %v13336_v29, %v13353_v34  ;;  %v2928_v31 = vsel %vm861_vm6, %v9469_v27, %v13354_v63  ;;  %v2389_v40 = vmul.f32 %v2377_v54, %v2362_v32  ;;  %v13358_v42 = vld [vmem:[#allocation65_spill] sm:$0xff]  ;;  %v13361_v3 = vld [vmem:[#allocation83_spill] sm:$0xff]  ;;  %v13363_v52 = vld [vmem:[#allocation80_spill] sm:$0xff]  ;;  %v2754_v63 = vperm.slane %v9438_v24, 3 }
 0x583   : > { %3588 = vmatpush.msrb.mxu3 %v3036_v14  ;;  %6242 = vmatmul.msk.f32.gmra.mxu1 %vm1948_vm8, %v9784_v60  ;;  %v2484_v1 = vmul.f32 %v2468_v51, %v2449_v46  ;;  %v2447_v29 = vsel %vm359_vm2, %v13333_v39, %v13355_v20  ;;  %v2927_v27 = vsel %vm861_vm6, %v9398_v56, %v13356_v36  ;;  %v13375_v20 = vld [vmem:[#allocation45_spill] sm:$0xff]  ;;  %v13377_v36 = vld [vmem:[#allocation10_spill] sm:$0xff] }
 0x584   : > { %3441 = vmatpush.msra.mxu1 %v2397_v18  ;;  %3523 = vmatpush.msrb.mxu0 %v2566_v57  ;;  %v2385_v0 = vmul.f32 %v2377_v54, %v2361_v6  ;;  %v2954_v62 = vmul.f32 %v2934_v49, %v2928_v31  ;;  %v2480_v10 = vmul.f32 %v2468_v51, %v2448_v23  ;;  %v13362_v57 = vld [vmem:[#allocation31_spill] sm:$0xff]  ;;  %v13367_v6 = vld [vmem:[#allocation42_spill] sm:$0xff] }
 0x585   : > { %3502 = vmatpush.msrb.mxu2 %v3031_v28  ;;  %3589 = vmatpush.msrb.mxu3 %v3032_v15  ;;  %v2360_v30 = vsel %vm271_vm0, %v13340_v16, %v13357_v47  ;;  %v2926_v39 = vsel %vm861_vm6, %v9458_v37, %v13358_v42  ;;  %v2476_v56 = vmul.f32 %v2468_v51, %v2447_v29  ;;  %v2844_v28 = vperm.slane %v9409_v22, 3  ;;  %v13364_v15 = vld [vmem:[#allocation38_spill] sm:$0xff]  ;;  %v13366_v22 = vld [vmem:[#allocation24_spill] sm:$0xff]  ;;  %v13376_v29 = vld [vmem:[#allocation59_spill] sm:$0xff] }
 0x586   : > { %6244 = vmatmul.msk.f32.gmra.mxu0 %vm1948_vm8, %v9661_v26  ;;  %3442 = vmatpush.msra.mxu1 %v2393_v25  ;;  %v2950_v54 = vmul.f32 %v2934_v49, %v2927_v27  ;;  %v2359_v14 = vsel %vm271_vm0, %v13345_v45, %v13359_v17  ;;  %v2925_v16 = vsel %vm861_vm6, %v9424_v9, %v13360_v44  ;;  %v13369_v31 = vld [vmem:[#allocation18_spill] sm:$0xff]  ;;  %v3272_v27 = vpop.f32.mrf.mxu2 }
 0x587   : > { %3524 = vmatpush.msrb.mxu0 %v2488_v48  ;;  %6247 = vmatmul.msk.f32.vlgmr.msrb.gmra.mxu2 %vm1948_vm8, %v9607_v41  ;;  %v2398_v37 = vmul.f32 %v2378_v55, %v2360_v30  ;;  %v2946_v18 = vmul.f32 %v2934_v49, %v2926_v39  ;;  %v2358_v43 = vsel %vm271_vm0, %v13348_v61, %v13362_v57  ;;  %v13365_v61 = vld [vmem:[#allocation79_spill] sm:$0xff]  ;;  %v13368_v48 = vld [vmem:[#allocation26_spill] sm:$0xff]  ;;  %v9926_v39 = vpop.permute.xlu2 %3225 }
 0x588   : > { %3443 = vmatpush.msra.mxu1 %v2389_v40  ;;  %3480 = vmatmul.f32.gmra.mxu3 %v9619_v4  ;;  %v2838_v45 = vsel %vm772_vm5, %v9355_v53, %v13363_v52  ;;  %v2394_v9 = vmul.f32 %v2378_v55, %v2359_v14  ;;  %v2942_v32 = vmul.f32 %v2934_v49, %v2925_v16  ;;  %v13370_v40 = vld [vmem:[#allocation19_spill] sm:$0xff] }
 0x589   : > { %3525 = vmatpush.msrb.mxu0 %v2484_v1  ;;  %v2357_v51 = vsel %vm271_vm0, %v13351_v12, %v13364_v15  ;;  %v2837_v2 = vsel %vm772_vm5, %v9370_v38, %v13365_v61  ;;  %v2390_v53 = vmul.f32 %v2378_v55, %v2358_v43  ;;  %v2864_v46 = vmul.f32 %v2844_v28, %v2838_v45  ;;  %v13374_v1 = vld [vmem:[#allocation48_spill] sm:$0xff]  ;;  %v9936_v43 = vpop.permute.xlu1 %3235 }
 0x58a   : > { %3444 = vmatpush.msra.mxu1 %v2385_v0  ;;  %v2836_v25 = vsel %vm772_vm5, %v9368_v58, %v13366_v22  ;;  %v2386_v12 = vmul.f32 %v2378_v55, %v2357_v51  ;;  %v2860_v19 = vmul.f32 %v2844_v28, %v2837_v2  ;;  %v2835_v38 = vsel %vm772_vm5, %v9343_v35, %v13367_v6 }
 0x58b   : > { %3526 = vmatpush.msrb.mxu0 %v2480_v10  ;;  %3445 = vmatmul.f32.vlgmr.msra.gmra.mxu1 %v13361_v3  ;;  %v2856_v34 = vmul.f32 %v2844_v28, %v2836_v25  ;;  %v2748_v23 = vsel %vm683_vm4, %v9318_v5, %v9214_v33  ;;  %v2852_v58 = vmul.f32 %v2844_v28, %v2835_v38 }
 0x58c   : > { %3545 = vmatpush.msrb.mxu1 %v2954_v62  ;;  %v2747_v35 = vsel %vm683_vm4, %v9301_v59, %v9174_v8  ;;  %v2774_v33 = vmul.f32 %v2754_v63, %v2748_v23  ;;  %v2746_v5 = vsel %vm683_vm4, %v9243_v13, %v9082_v50  ;;  %v2745_v8 = vsel %vm683_vm4, %v13370_v40, %v13369_v31  ;;  %v13371_v59 = vld [vmem:[#allocation72_spill] sm:$0xff]  ;;  %v13372_v50 = vld [vmem:[#allocation43_spill] sm:$0xff]  ;;  %v13373_v13 = vld [vmem:[#allocation37_spill] sm:$0xff]  ;;  %v3359_v62 = vpop.f32.mrf.mxu3 }
 0x58d   : > { %3527 = vmatpush.msrb.mxu0 %v2476_v56  ;;  %v2770_v24 = vmul.f32 %v2754_v63, %v2747_v35  ;;  %v2766_v49 = vmul.f32 %v2754_v63, %v2746_v5  ;;  %v3360_v15 = vadd.f32 %v3359_v62, %v9926_v39 }
 0x58e   : > { %3546 = vmatpush.msrb.mxu1 %v2950_v54  ;;  %6245 = vmatmul.msk.f32.gmra.mxu0 %vm1948_vm8, %v9721_v7  ;;  %v3275_v0 = vpop.f32.mrf.mxu2 }
 0x58f   : > { %3528 = vmatpush.msrb.mxu0 %v2398_v37  ;;  %6248 = vmatmul.msk.f32.gmra.mxu2 %vm1948_vm8, %v9661_v26 }
 0x590   : > { %3547 = vmatpush.msrb.mxu1 %v2946_v18  ;;  %3483 = vmatmul.f32.gmra.mxu3 %v9684_v11 }
 0x591   : > { %3529 = vmatpush.msrb.mxu0 %v2394_v9 }
 0x592   : > { %3548 = vmatpush.msrb.mxu1 %v2942_v32 }
 0x593   : > { %3530 = vmatpush.msrb.mxu0 %v2390_v53  ;;  %3448 = vmatmul.f32.gmra.mxu1 %v13368_v48 }
 0x594   : > { %3549 = vmatpush.msrb.mxu1 %v2864_v46  ;;  %v3362_v30 = vpop.f32.mrf.mxu3 }
 0x595   : > { %3531 = vmatpush.msrb.mxu0 %v2386_v12 }
 0x596   : > { %3550 = vmatpush.msrb.mxu1 %v2860_v19  ;;  %6246 = vmatmul.msk.f32.gmra.mxu0 %vm1948_vm8, %v9784_v60  ;;  %v9946_v19 = vpop.permute.xlu2 %3240 }
 0x597   : > { %6249 = vmatmul.msk.f32.gmra.mxu2 %vm1948_vm8, %v9721_v7 }
 0x598   : > { %3551 = vmatpush.msrb.mxu1 %v2856_v34  ;;  %6251 = vmatmul.msk.f32.vlgmr.msrb.gmra.mxu3 %vm1948_vm8, %v9607_v41  ;;  %v2762_v41 = vmul.f32 %v2754_v63, %v2745_v8 }
 0x59a   : > { %3552 = vmatpush.msrb.mxu1 %v2852_v58 }
 0x59b   : > { %3451 = vmatmul.f32.gmra.mxu1 %v13371_v59 }
 0x59c   : > { %3553 = vmatpush.msrb.mxu1 %v2774_v33  ;;  %v3365_v17 = vpop.f32.mrf.mxu3 }
 0x59d   : > { %v3366_v8 = vadd.f32 %v3365_v17, %v9936_v43 }
 0x59e   : > { %3554 = vmatpush.msrb.mxu1 %v2770_v24  ;;  %3532 = vmatmul.f32.vlgmr.msrb.gmra.mxu0 %v13361_v3 }
 0x59f   : > { %6250 = vmatmul.msk.f32.gmra.mxu2 %vm1948_vm8, %v9784_v60 }
 0x5a0   : > { %3555 = vmatpush.msrb.mxu1 %v2766_v49  ;;  %6252 = vmatmul.msk.f32.gmra.mxu3 %vm1948_vm8, %v9661_v26  ;;  %v13378_v26 = vld [vmem:[#allocation71_spill] sm:$0xff] }
 0x5a2   : > { %3556 = vmatpush.msrb.mxu1 %v2762_v41 }
 0x5a3   : > { %3454 = vmatmul.f32.gmra.mxu1 %v13373_v13 }
 0x5a4   : > { %3557 = vmatpush.msrb.mxu1 %v13372_v50  ;;  %v3368_v9 = vpop.f32.mrf.mxu3 }
 0x5a6   : > { %3558 = vmatpush.msrb.mxu1 %v13374_v1  ;;  %3535 = vmatmul.f32.gmra.mxu0 %v13368_v48 }
 0x5a8   : > { %3559 = vmatpush.msrb.mxu1 %v13375_v20  ;;  %6253 = vmatmul.msk.f32.gmra.mxu3 %vm1948_vm8, %v9721_v7  ;;  %v3278_v7 = vpop.f32.mrf.mxu2 }
 0x5a9   : > { %v3279_v32 = vadd.f32 %v3278_v7, %v9936_v43 }
 0x5aa   : > { %3560 = vmatpush.msrb.mxu1 %v13376_v29 }
 0x5ab   : > { %3561 = vmatmul.f32.vlgmr.msrb.gmra.mxu1 %v13377_v36 }
 0x5ae   : > { %3538 = vmatmul.f32.gmra.mxu0 %v13371_v59 }
 0x5b0   : > { %6254 = vmatmul.msk.f32.gmra.mxu3 %vm1948_vm8, %v9784_v60  ;;  %v3281_v47 = vpop.f32.mrf.mxu2  ;;  %v3273_v60 = vadd.f32 %v3272_v27, %v9926_v39  ;;  %v3369_v27 = vadd.f32 %v3368_v9, %v9946_v19 }
 0x5b1   : > { %v3282_v6 = vadd.f32 %v3281_v47, %v9946_v19 }
 0x5b3   : > { %3564 = vmatmul.f32.gmra.mxu1 %v13378_v26 }
 0x5b6   : > { %3541 = vmatmul.f32.gmra.mxu0 %v13373_v13 }
 0x5bb   : > { %3567 = vmatmul.f32.gmra.mxu1 %v9619_v4  ;;  %v9929_v4 = vpop.permute.xlu0 %3230 }
 0x5bc   : > { %v3276_v16 = vadd.f32 %v3275_v0, %v9929_v4  ;;  %v3363_v34 = vadd.f32 %v3362_v30, %v9929_v4 }
 0x5c3   : > { %3570 = vmatmul.f32.gmra.mxu1 %v9684_v11 }
 0x5d9   : > { %v3301_v10 = vpop.f32.mrf.mxu0 }
 0x5da   : > { %v3302_v54 = vadd.f32 %v3301_v10, %v3273_v60 }
 0x5e1   : > { %v3304_v42 = vpop.f32.mrf.mxu0 }
 0x5e2   : > { %v3305_v3 = vadd.f32 %v3304_v42, %v3276_v16 }
 0x5e5   : > { %v3388_v56 = vpop.f32.mrf.mxu2 }
 0x5e6   : > { %v3389_v53 = vadd.f32 %v3388_v56, %v3360_v15 }
 0x5e7   : > { %v3330_v55 = vpop.f32.mrf.mxu1 }
 0x5e8   : > { %v3331_v14 = vadd.f32 %v3330_v55, %v3302_v54 }
 0x5e9   : > { %v3307_v44 = vpop.f32.mrf.mxu0 }
 0x5ea   : > { %v9931_v11 = vmax.f32 %v3331_v14, 0.0  ;;  %v3308_v28 = vadd.f32 %v3307_v44, %v3279_v32 }
 0x5ec   : > { %3619 = vrot.lane.b32.xlu0 %v9931_v11, %s6454_s18 }
 0x5ee   : > { %v3391_v37 = vpop.f32.mrf.mxu2 }
 0x5ef   : > { %v3333_v18 = vpop.f32.mrf.mxu1  ;;  %v3392_v63 = vadd.f32 %v3391_v37, %v3363_v34 }
 0x5f0   : > { %v3334_v57 = vadd.f32 %v3333_v18, %v3305_v3  ;;  %v3475_v12 = vpop.f32.mrf.mxu3 }
 0x5f2   : > { %v9938_v52 = vmax.f32 %v3334_v57, 0.0  ;;  %v3310_v45 = vpop.f32.mrf.mxu0 }
 0x5f3   : > { %v3311_v48 = vadd.f32 %v3310_v45, %v3282_v6 }
 0x5f4   : > { %3621 = vrot.lane.b32.xlu1 %v9938_v52, %s6454_s18 }
 0x5f6   : > { %v3394_v61 = vpop.f32.mrf.mxu2 }
 0x5f7   : > { %v3336_v51 = vpop.f32.mrf.mxu1  ;;  %v3395_v49 = vadd.f32 %v3394_v61, %v3366_v8 }
 0x5f8   : > { %v3337_v2 = vadd.f32 %v3336_v51, %v3308_v28 }
 0x5f9   : > { %v3478_v31 = vpop.f32.mrf.mxu3 }
 0x5fa   : > { %v9944_v46 = vmax.f32 %v3337_v2, 0.0  ;;  %v3417_v22 = vpop.f32.mrf.mxu0 }
 0x5fb   : > { %v3418_v25 = vadd.f32 %v3417_v22, %v3389_v53 }
 0x5fc   : > { %3623 = vrot.lane.b32.xlu2 %v9944_v46, %s6454_s18 }
 0x5fd   : > { %v9951_v38 = vmax.f32 %v3418_v25, 0.0 }
 0x5fe   : > { %v3397_v35 = vpop.f32.mrf.mxu2 }
 0x5ff   : > { %13379 = vst [vmem:[#allocation77_spill] sm:$0xff] %v9951_v38  ;;  %3627 = vrot.lane.b32.xlu1 %v9951_v38, %s6454_s18  ;;  %v3398_v62 = vadd.f32 %v3397_v35, %v3369_v27 }
 0x600   : > { %v3339_v23 = vpop.f32.mrf.mxu1 }
 0x601   : > { %v3340_v58 = vadd.f32 %v3339_v23, %v3311_v48 }
 0x603   : > { %v9956_v33 = vmax.f32 %v3340_v58, 0.0  ;;  %v3420_v5 = vpop.f32.mrf.mxu0 }
 0x604   : > { %v3421_v24 = vadd.f32 %v3420_v5, %v3392_v63 }
 0x605   : > { %3625 = vrot.lane.b32.xlu0 %v9956_v33, %s6454_s18 }
 0x606   : > { %v9960_v40 = vmax.f32 %v3421_v24, 0.0 }
 0x608   : > { %13380 = vst [vmem:[#allocation22_spill] sm:$0xff] %v9960_v40  ;;  %3629 = vrot.lane.b32.xlu2 %v9960_v40, %s6454_s18  ;;  %v3446_v59 = vpop.f32.mrf.mxu1 }
 0x609   : > { %v3447_v41 = vadd.f32 %v3446_v59, %v9926_v39 }
 0x60a   : > { %v3504_v50 = vpop.f32.mrf.mxu2 }
 0x60b   : > { %v3423_v13 = vpop.f32.mrf.mxu0  ;;  %v3476_v20 = vadd.f32 %v3475_v12, %v3447_v41  ;;  %v3481_v26 = vpop.f32.mrf.mxu3 }
 0x60c   : > { %v3424_v1 = vadd.f32 %v3423_v13, %v3395_v49 }
 0x60d   : > { %v3505_v36 = vadd.f32 %v3504_v50, %v3476_v20 }
 0x60e   : > { %v9966_v29 = vmax.f32 %v3424_v1, 0.0 }
 0x60f   : > { %v9969_v0 = vmax.f32 %v3505_v36, 0.0 }
 0x610   : > { %3631 = vrot.lane.b32.xlu0 %v9966_v29, %s6454_s18  ;;  %v3449_v7 = vpop.f32.mrf.mxu1 }
 0x611   : > { %13381 = vst [vmem:[#allocation11_spill] sm:$0xff] %v9969_v0  ;;  %v3450_v10 = vadd.f32 %v3449_v7, %v9929_v4  ;;  %3635 = vrot.lane.b32.xlu2 %v9969_v0, %s6454_s18 }
 0x612   : > { %v3507_v30 = vpop.f32.mrf.mxu2 }
 0x613   : > { %v3426_v47 = vpop.f32.mrf.mxu0  ;;  %v3479_v60 = vadd.f32 %v3478_v31, %v3450_v10  ;;  %v3484_v14 = vpop.f32.mrf.mxu3 }
 0x614   : > { %v3427_v42 = vadd.f32 %v3426_v47, %v3398_v62 }
 0x615   : > { %v3508_v54 = vadd.f32 %v3507_v30, %v3479_v60 }
 0x616   : > { %v9976_v56 = vmax.f32 %v3427_v42, 0.0 }
 0x617   : > { %v9978_v55 = vmax.f32 %v3508_v54, 0.0 }
 0x618   : > { %3633 = vrot.lane.b32.xlu1 %v9976_v56, %s6454_s18  ;;  %v3452_v17 = vpop.f32.mrf.mxu1 }
 0x619   : > { %13382 = vst [vmem:[#allocation23_spill] sm:$0xff] %v9978_v55  ;;  %v3453_v44 = vadd.f32 %v3452_v17, %v9936_v43  ;;  %3637 = vrot.lane.b32.xlu0 %v9978_v55, %s6454_s18 }
 0x61a   : > { %v3510_v16 = vpop.f32.mrf.mxu2 }
 0x61b   : > { %v3482_v3 = vadd.f32 %v3481_v26, %v3453_v44  ;;  %v3533_v18 = vpop.f32.mrf.mxu0  ;;  %v3591_v28 = vpop.f32.mrf.mxu3 }
 0x61c   : > { %v3534_v61 = vadd.f32 %v3533_v18, %v9926_v39 }
 0x61d   : > { %v3511_v37 = vadd.f32 %v3510_v16, %v3482_v3 }
 0x61f   : > { %v9985_v57 = vmax.f32 %v3511_v37, 0.0 }
 0x620   : > { %v3455_v45 = vpop.f32.mrf.mxu1 }
 0x621   : > { %v3456_v9 = vadd.f32 %v3455_v45, %v9946_v19  ;;  %3639 = vrot.lane.b32.xlu1 %v9985_v57, %s6454_s18 }
 0x622   : > { %v3513_v32 = vpop.f32.mrf.mxu2 }
 0x623   : > { %v3485_v15 = vadd.f32 %v3484_v14, %v3456_v9  ;;  %v3536_v53 = vpop.f32.mrf.mxu0  ;;  %v3594_v6 = vpop.f32.mrf.mxu3 }
 0x624   : > { %v3537_v34 = vadd.f32 %v3536_v53, %v9929_v4 }
 0x625   : > { %v3514_v51 = vadd.f32 %v3513_v32, %v3485_v15 }
 0x627   : > { %v9991_v2 = vmax.f32 %v3514_v51, 0.0 }
 0x628   : > { %v3562_v22 = vpop.f32.mrf.mxu1 }
 0x629   : > { %v3563_v25 = vadd.f32 %v3562_v22, %v3534_v61  ;;  %3641 = vrot.lane.b32.xlu2 %v9991_v2, %s6454_s18 }
 0x62b   : > { %v3592_v12 = vadd.f32 %v3591_v28, %v3563_v25  ;;  %v3539_v39 = vpop.f32.mrf.mxu0  ;;  %v3597_v5 = vpop.f32.mrf.mxu3 }
 0x62c   : > { %v3540_v24 = vadd.f32 %v3539_v39, %v9936_v43 }
 0x62d   : > { %v9995_v48 = vmax.f32 %v3592_v12, 0.0 }
 0x62f   : > { %13383 = vst [vmem:[#allocation13_spill] sm:$0xff] %v9995_v48  ;;  %3643 = vrot.lane.b32.xlu0 %v9995_v48, %s6454_s18 }
 0x630   : > { %v3565_v23 = vpop.f32.mrf.mxu1 }
 0x631   : > { %v3566_v58 = vadd.f32 %v3565_v23, %v3537_v34 }
 0x633   : > { %v3595_v63 = vadd.f32 %v3594_v6, %v3566_v58  ;;  %v3542_v49 = vpop.f32.mrf.mxu0  ;;  %v3600_v13 = vpop.f32.mrf.mxu3 }
 0x634   : > { %v3543_v41 = vadd.f32 %v3542_v49, %v9946_v19 }
 0x635   : > { %v10000_v35 = vmax.f32 %v3595_v63, 0.0 }
 0x637   : > { %13384 = vst [vmem:[#allocation9_spill] sm:$0xff] %v10000_v35  ;;  %3645 = vrot.lane.b32.xlu1 %v10000_v35, %s6454_s18 }
 0x638   : > { %v3568_v31 = vpop.f32.mrf.mxu1 }
 0x639   : > { %v3569_v8 = vadd.f32 %v3568_v31, %v3540_v24 }
 0x63b   : > { %v3598_v59 = vadd.f32 %v3597_v5, %v3569_v8 }
 0x63d   : > { %v10005_v4 = vmax.f32 %v3598_v59, 0.0 }
 0x63f   : > { %13385 = vst [vmem:[#allocation30_spill] sm:$0xff] %v10005_v4  ;;  %3647 = vrot.lane.b32.xlu2 %v10005_v4, %s6454_s18  ;;  %3709 = vrot.lane.b32.xlu1 %v9931_v11, %s6455_s19 }
 0x640   : > { %v3571_v50 = vpop.f32.mrf.mxu1 }
 0x641   : > { %v3572_v43 = vadd.f32 %v3571_v50, %v3543_v41 }
 0x643   : > { %v3601_v1 = vadd.f32 %v3600_v13, %v3572_v43 }
 0x645   : > { %v10012_v20 = vmax.f32 %v3601_v1, 0.0 }
 0x647   : > { %13386 = vst [vmem:[#allocation78_spill] sm:$0xff] %v10012_v20  ;;  %3649 = vrot.lane.b32.xlu0 %v10012_v20, %s6454_s18  ;;  %3711 = vrot.lane.b32.xlu2 %v9938_v52, %s6455_s19 }
 0x648   : > { %3715 = vrot.lane.b32.xlu1 %v9956_v33, %s6455_s19 }
 0x64f   : > { %3713 = vrot.lane.b32.xlu0 %v9944_v46, %s6455_s19  ;;  %3717 = vrot.lane.b32.xlu2 %v9951_v38, %s6455_s19 }
 0x650   : > { %3721 = vrot.lane.b32.xlu1 %v9966_v29, %s6455_s19 }
 0x656   : > { %v10056_v19 = vpop.permute.xlu2 %3623 }
 0x657   : > { %3719 = vrot.lane.b32.xlu0 %v9960_v40, %s6455_s19  ;;  %3723 = vrot.lane.b32.xlu2 %v9976_v56, %s6455_s19 }
 0x658   : > { %3727 = vrot.lane.b32.xlu1 %v9978_v55, %s6455_s19 }
 0x65e   : > { %v10080_v7 = vpop.permute.xlu0 %3619 }
 0x65f   : > { %3725 = vrot.lane.b32.xlu0 %v9969_v0, %s6455_s19  ;;  %3729 = vrot.lane.b32.xlu2 %v9985_v57, %s6455_s19 }
 0x660   : > { %3733 = vrot.lane.b32.xlu1 %v9995_v48, %s6455_s19 }
 0x662   : > { %v10064_v36 = vpop.permute.xlu2 %3629 }
 0x663   : > { %13387 = vst [vmem:[#allocation28_spill] sm:$0xff] %v10064_v36 }
 0x666   : > { %v10072_v26 = vpop.permute.xlu1 %3621 }
 0x667   : > { %3731 = vrot.lane.b32.xlu0 %v9991_v2, %s6455_s19  ;;  %3735 = vrot.lane.b32.xlu2 %v10000_v35, %s6455_s19 }
 0x668   : > { %3739 = vrot.lane.b32.xlu1 %v10012_v20, %s6455_s19 }
 0x66b   : > { %v10074_v27 = vpop.permute.xlu2 %3635 }
 0x66c   : > { %13388 = vst [vmem:[#allocation16_spill] sm:$0xff] %v10074_v27 }
 0x66f   : > { %3737 = vrot.lane.b32.xlu0 %v10005_v4, %s6455_s19  ;;  %3799 = vrot.lane.b32.xlu2 %v9931_v11, %s6456_s16 }
 0x670   : > { %3803 = vrot.lane.b32.xlu1 %v9944_v46, %s6456_s16 }
 0x671   : > { %v10084_v62 = vpop.permute.xlu1 %3627 }
 0x672   : > { %13389 = vst [vmem:[#allocation20_spill] sm:$0xff] %v10084_v62 }
 0x677   : > { %3801 = vrot.lane.b32.xlu0 %v9938_v52, %s6456_s16  ;;  %3805 = vrot.lane.b32.xlu2 %v9956_v33, %s6456_s16  ;;  %v10092_v47 = vpop.permute.xlu0 %3625 }
 0x678   : > { %3809 = vrot.lane.b32.xlu1 %v9960_v40, %s6456_s16 }
 0x67f   : > { %3807 = vrot.lane.b32.xlu0 %v9951_v38, %s6456_s16  ;;  %3811 = vrot.lane.b32.xlu2 %v9966_v29, %s6456_s16 }
 0x680   : > { %3815 = vrot.lane.b32.xlu1 %v9969_v0, %s6456_s16 }
 0x682   : > { %v10104_v60 = vpop.permute.xlu0 %3631 }
 0x683   : > { %v10086_v10 = vpop.permute.xlu2 %3641  ;;  %13393 = vst [vmem:[#allocation14_spill] sm:$0xff] %v10104_v60 }
 0x684   : > { %13390 = vst [vmem:[#allocation62_spill] sm:$0xff] %v10086_v10 }
 0x687   : > { %3813 = vrot.lane.b32.xlu0 %v9976_v56, %s6456_s16  ;;  %3817 = vrot.lane.b32.xlu2 %v9978_v55, %s6456_s16 }
 0x688   : > { %3821 = vrot.lane.b32.xlu1 %v9991_v2, %s6456_s16 }
 0x68a   : > { %v10096_v30 = vpop.permute.xlu1 %3633 }
 0x68b   : > { %13391 = vst [vmem:[#allocation60_spill] sm:$0xff] %v10096_v30  ;;  %v10116_v14 = vpop.permute.xlu0 %3637 }
 0x68c   : > { %13395 = vst [vmem:[#allocation56_spill] sm:$0xff] %v10116_v14 }
 0x68f   : > { %3819 = vrot.lane.b32.xlu0 %v9985_v57, %s6456_s16  ;;  %3823 = vrot.lane.b32.xlu2 %v9995_v48, %s6456_s16 }
 0x690   : > { %3827 = vrot.lane.b32.xlu1 %v10005_v4, %s6456_s16 }
 0x693   : > { %v10108_v54 = vpop.permute.xlu1 %3639 }
 0x694   : > { %13394 = vst [vmem:[#allocation54_spill] sm:$0xff] %v10108_v54 }
 0x697   : > { %3825 = vrot.lane.b32.xlu0 %v10000_v35, %s6456_s16  ;;  %3829 = vrot.lane.b32.xlu2 %v10012_v20, %s6456_s16 }
 0x698   : > { %3891 = vrot.lane.b32.xlu1 %v9938_v52, %s6457_s14 }
 0x699   : > { %v10098_v42 = vpop.permute.xlu2 %3647 }
 0x69a   : > { %13392 = vst [vmem:[#allocation63_spill] sm:$0xff] %v10098_v42 }
 0x69f   : > { %3889 = vrot.lane.b32.xlu0 %v9931_v11, %s6457_s14  ;;  %3893 = vrot.lane.b32.xlu2 %v9944_v46, %s6457_s14 }
 0x6a0   : > { %3897 = vrot.lane.b32.xlu1 %v9951_v38, %s6457_s14 }
 0x6a1   : > { %v10110_v17 = vpop.permute.xlu2 %3711  ;;  %v10128_v3 = vpop.permute.xlu0 %3643 }
 0x6a2   : > { %13398 = vst [vmem:[#allocation49_spill] sm:$0xff] %v10128_v3 }
 0x6a7   : > { %3895 = vrot.lane.b32.xlu0 %v9956_v33, %s6457_s14  ;;  %3899 = vrot.lane.b32.xlu2 %v9960_v40, %s6457_s14 }
 0x6a8   : > { %3903 = vrot.lane.b32.xlu1 %v9976_v56, %s6457_s14 }
 0x6a9   : > { %v10120_v44 = vpop.permute.xlu2 %3717  ;;  %v10122_v16 = vpop.permute.xlu1 %3645 }
 0x6aa   : > { %13396 = vst [vmem:[#allocation47_spill] sm:$0xff] %v10120_v44 }
 0x6ab   : > { %13397 = vst [vmem:[#allocation64_spill] sm:$0xff] %v10122_v16 }
 0x6af   : > { %3901 = vrot.lane.b32.xlu0 %v9966_v29, %s6457_s14  ;;  %3905 = vrot.lane.b32.xlu2 %v9969_v0, %s6457_s14 }
 0x6b0   : > { %3909 = vrot.lane.b32.xlu1 %v9985_v57, %s6457_s14 }
 0x6b1   : > { %v10132_v37 = vpop.permute.xlu2 %3723  ;;  %v10134_v18 = vpop.permute.xlu1 %3709 }
 0x6b2   : > { %13399 = vst [vmem:[#allocation82_spill] sm:$0xff] %v10132_v37 }
 0x6b7   : > { %3907 = vrot.lane.b32.xlu0 %v9978_v55, %s6457_s14  ;;  %3911 = vrot.lane.b32.xlu2 %v9991_v2, %s6457_s14 }
 0x6b8   : > { %3915 = vrot.lane.b32.xlu1 %v10000_v35, %s6457_s14 }
 0x6b9   : > { %v10142_v45 = vpop.permute.xlu2 %3729  ;;  %v10144_v9 = vpop.permute.xlu0 %3649 }
 0x6ba   : > { %13400 = vst [vmem:[#allocation88_spill] sm:$0xff] %v10142_v45  ;;  %v10146_v32 = vpop.permute.xlu1 %3715 }
 0x6bb   : > { %13401 = vst [vmem:[#allocation57_spill] sm:$0xff] %v10144_v9 }
 0x6bf   : > { %3913 = vrot.lane.b32.xlu0 %v9995_v48, %s6457_s14  ;;  %3917 = vrot.lane.b32.xlu2 %v10005_v4, %s6457_s14 }
 0x6c0   : > { %3995 = vrot.lane.b32.xlu1 %v9931_v11, %s6458_s10 }
 0x6c1   : > { %v10154_v28 = vpop.permute.xlu2 %3735  ;;  %v10156_v15 = vpop.permute.xlu0 %3713 }
 0x6c2   : > { %13402 = vst [vmem:[#allocation73_spill] sm:$0xff] %v10154_v28  ;;  %v10158_v51 = vpop.permute.xlu1 %3721 }
 0x6c3   : > { %13403 = vst [vmem:[#allocation84_spill] sm:$0xff] %v10158_v51 }
 0x6c7   : > { %3919 = vrot.lane.b32.xlu0 %v10012_v20, %s6457_s14  ;;  %3997 = vrot.lane.b32.xlu2 %v9938_v52, %s6458_s10 }
 0x6c8   : > { %4001 = vrot.lane.b32.xlu1 %v9956_v33, %s6458_s10 }
 0x6c9   : > { %v10166_v61 = vpop.permute.xlu2 %3799  ;;  %v10168_v53 = vpop.permute.xlu0 %3719 }
 0x6ca   : > { %13404 = vst [vmem:[#allocation55_spill] sm:$0xff] %v10168_v53  ;;  %v10170_v22 = vpop.permute.xlu1 %3727 }
 0x6cb   : > { %13405 = vst [vmem:[#allocation50_spill] sm:$0xff] %v10170_v22 }
 0x6cf   : > { %3999 = vrot.lane.b32.xlu0 %v9944_v46, %s6458_s10  ;;  %4003 = vrot.lane.b32.xlu2 %v9951_v38, %s6458_s10 }
 0x6d0   : > { %4007 = vrot.lane.b32.xlu1 %v9966_v29, %s6458_s10 }
 0x6d1   : > { %v10178_v25 = vpop.permute.xlu2 %3805  ;;  %v10180_v12 = vpop.permute.xlu0 %3725 }
 0x6d2   : > { %13406 = vst [vmem:[#allocation74_spill] sm:$0xff] %v10180_v12  ;;  %v10182_v6 = vpop.permute.xlu1 %3733 }
 0x6d3   : > { %13407 = vst [vmem:[#allocation87_spill] sm:$0xff] %v10182_v6 }
 0x6d7   : > { %4005 = vrot.lane.b32.xlu0 %v9960_v40, %s6458_s10  ;;  %4009 = vrot.lane.b32.xlu2 %v9976_v56, %s6458_s10 }
 0x6d8   : > { %4013 = vrot.lane.b32.xlu1 %v9978_v55, %s6458_s10 }
 0x6d9   : > { %v10190_v34 = vpop.permute.xlu2 %3811  ;;  %v10192_v23 = vpop.permute.xlu0 %3731 }
 0x6da   : > { %13408 = vst [vmem:[#allocation67_spill] sm:$0xff] %v10190_v34  ;;  %v10194_v58 = vpop.permute.xlu1 %3739 }
 0x6db   : > { %13409 = vst [vmem:[#allocation70_spill] sm:$0xff] %v10192_v23 }
 0x6dc   : > { %13410 = vst [vmem:[#allocation44_spill] sm:$0xff] %v10194_v58 }
 0x6df   : > { %4011 = vrot.lane.b32.xlu0 %v9969_v0, %s6458_s10  ;;  %4015 = vrot.lane.b32.xlu2 %v9985_v57, %s6458_s10 }
 0x6e0   : > { %4019 = vrot.lane.b32.xlu1 %v9995_v48, %s6458_s10 }
 0x6e1   : > { %v10202_v39 = vpop.permute.xlu2 %3817  ;;  %v10204_v63 = vpop.permute.xlu0 %3737 }
 0x6e2   : > { %13411 = vst [vmem:[#allocation66_spill] sm:$0xff] %v10202_v39  ;;  %v10206_v5 = vpop.permute.xlu1 %3803 }
 0x6e3   : > { %13412 = vst [vmem:[#allocation58_spill] sm:$0xff] %v10204_v63 }
 0x6e7   : > { %4017 = vrot.lane.b32.xlu0 %v9991_v2, %s6458_s10  ;;  %4021 = vrot.lane.b32.xlu2 %v10000_v35, %s6458_s10 }
 0x6e8   : > { %4025 = vrot.lane.b32.xlu1 %v10012_v20, %s6458_s10 }
 0x6e9   : > { %v10214_v24 = vpop.permute.xlu2 %3823  ;;  %v10216_v31 = vpop.permute.xlu0 %3801 }
 0x6ea   : > { %13413 = vst [vmem:[#allocation52_spill] sm:$0xff] %v10214_v24  ;;  %v10218_v8 = vpop.permute.xlu1 %3809 }
 0x6eb   : > { %13414 = vst [vmem:[#allocation21_spill] sm:$0xff] %v10218_v8 }
 0x6ef   : > { %4023 = vrot.lane.b32.xlu0 %v10005_v4, %s6458_s10  ;;  %4085 = vrot.lane.b32.xlu2 %v9931_v11, %s6459_s9 }
 0x6f0   : > { %4089 = vrot.lane.b32.xlu1 %v9944_v46, %s6459_s9 }
 0x6f1   : > { %v10226_v59 = vpop.permute.xlu2 %3829  ;;  %v10228_v49 = vpop.permute.xlu0 %3807 }
 0x6f2   : > { %13415 = vst [vmem:[#allocation27_spill] sm:$0xff] %v10226_v59  ;;  %v10230_v41 = vpop.permute.xlu1 %3815 }
 0x6f3   : > { %13416 = vst [vmem:[#allocation94_spill] sm:$0xff] %v10228_v49 }
 0x6f4   : > { %13417 = vst [vmem:[#allocation85_spill] sm:$0xff] %v10230_v41  ;;  %v10287_v41 = vld [vmem:[%s12614_s1 + $0xc] sm:$0xf] }
 0x6f5   : > { %13427 = vst [vmem:[#allocation89_spill] sm:$0xff] %v10287_v41 }
 0x6f7   : > { %4087 = vrot.lane.b32.xlu0 %v9938_v52, %s6459_s9  ;;  %4091 = vrot.lane.b32.xlu2 %v9956_v33, %s6459_s9 }
 0x6f8   : > { %4095 = vrot.lane.b32.xlu1 %v9960_v40, %s6459_s9 }
 0x6f9   : > { %v10238_v50 = vpop.permute.xlu2 %3893  ;;  %v10240_v13 = vpop.permute.xlu0 %3813 }
 0x6fa   : > { %13418 = vst [vmem:[#allocation86_spill] sm:$0xff] %v10240_v13  ;;  %v10242_v43 = vpop.permute.xlu1 %3821 }
 0x6fb   : > { %13419 = vst [vmem:[#allocation61_spill] sm:$0xff] %v10242_v43 }
 0x6ff   : > { %4093 = vrot.lane.b32.xlu0 %v9951_v38, %s6459_s9  ;;  %4097 = vrot.lane.b32.xlu2 %v9966_v29, %s6459_s9 }
 0x700   : > { %4101 = vrot.lane.b32.xlu1 %v9969_v0, %s6459_s9 }
 0x701   : > { %v10250_v1 = vpop.permute.xlu2 %3899  ;;  %v10252_v27 = vpop.permute.xlu0 %3819 }
 0x702   : > { %13420 = vst [vmem:[#allocation8_spill] sm:$0xff] %v10250_v1  ;;  %v10254_v14 = vpop.permute.xlu1 %3827 }
 0x703   : > { %13421 = vst [vmem:[#allocation33_spill] sm:$0xff] %v10252_v27 }
 0x704   : > { %13422 = vst [vmem:[#allocation7_spill] sm:$0xff] %v10254_v14 }
 0x707   : > { %4099 = vrot.lane.b32.xlu0 %v9976_v56, %s6459_s9  ;;  %4103 = vrot.lane.b32.xlu2 %v9978_v55, %s6459_s9 }
 0x708   : > { %4107 = vrot.lane.b32.xlu1 %v9991_v2, %s6459_s9 }
 0x709   : > { %v10262_v54 = vpop.permute.xlu2 %3905  ;;  %v10264_v10 = vpop.permute.xlu0 %3825 }
 0x70a   : > { %13423 = vst [vmem:[#allocation15_spill] sm:$0xff] %v10262_v54  ;;  %v10266_v12 = vpop.permute.xlu1 %3891  ;;  %v3940_v54 = vperm.slane %v10287_v41, 1 }
 0x70b   : > { %13424 = vst [vmem:[#allocation81_spill] sm:$0xff] %v10264_v10 }
 0x70f   : > { %4105 = vrot.lane.b32.xlu0 %v9985_v57, %s6459_s9  ;;  %4109 = vrot.lane.b32.xlu2 %v9995_v48, %s6459_s9 }
 0x710   : > { %4113 = vrot.lane.b32.xlu1 %v10005_v4, %s6459_s9 }
 0x711   : > { %v10274_v22 = vpop.permute.xlu2 %3911  ;;  %v10276_v45 = vpop.permute.xlu0 %3889 }
 0x712   : > { %13425 = vst [vmem:[#allocation32_spill] sm:$0xff] %v10274_v22  ;;  %v10278_v23 = vpop.permute.xlu1 %3897 }
 0x713   : > { %13426 = vst [vmem:[#allocation17_spill] sm:$0xff] %v10278_v23 }
 0x717   : > { %4111 = vrot.lane.b32.xlu0 %v10000_v35, %s6459_s9  ;;  %4115 = vrot.lane.b32.xlu2 %v10012_v20, %s6459_s9 }
 0x718   : > { %4177 = vrot.lane.b32.xlu1 %v9938_v52, %s6460_s28 }
 0x719   : > { %v10291_v39 = vpop.permute.xlu2 %3917  ;;  %v10293_v27 = vpop.permute.xlu0 %3895 }
 0x71a   : > { %13428 = vst [vmem:[#allocation93_spill] sm:$0xff] %v10291_v39  ;;  %v10295_v43 = vpop.permute.xlu1 %3903 }
 0x71b   : > { %13429 = vst [vmem:[#allocation35_spill] sm:$0xff] %v10295_v43  ;;  %v3932_v22 = vsel %vm537_vm3, %v10293_v27, %v10295_v43 }
 0x71c   : > { %v3960_v3 = vmul.f32 %v3940_v54, %v3932_v22  ;;  %v3930_v22 = vsel %vm537_vm3, %v10266_v12, %v10250_v1 }
 0x71e   : > { %4636 = vmatpush.msra.mxu3 %v3960_v3 }
 0x71f   : > { %4175 = vrot.lane.b32.xlu0 %v9931_v11, %s6460_s28  ;;  %4179 = vrot.lane.b32.xlu2 %v9944_v46, %s6460_s28 }
 0x720   : > { %4183 = vrot.lane.b32.xlu1 %v9951_v38, %s6460_s28  ;;  %v3952_v38 = vmul.f32 %v3940_v54, %v3930_v22  ;;  %v3841_v22 = vsel %vm448_vm1, %v10206_v5, %v10190_v34  ;;  %v10363_v34 = vld [vmem:[%s12614_s1 + $0x4] sm:$0xf] }
 0x721   : > { %v10308_v16 = vpop.permute.xlu2 %3997  ;;  %v10310_v42 = vpop.permute.xlu0 %3901  ;;  %13435 = vst [vmem:[#allocation34_spill] sm:$0xff] %v10363_v34 }
 0x722   : > { %13430 = vst [vmem:[#allocation91_spill] sm:$0xff] %v10308_v16  ;;  %v10312_v9 = vpop.permute.xlu1 %3909  ;;  %v3931_v3 = vsel %vm537_vm3, %v10238_v50, %v10310_v42  ;;  %v3929_v16 = vsel %vm537_vm3, %v10276_v45, %v10278_v23 }
 0x723   : > { %13431 = vst [vmem:[#allocation53_spill] sm:$0xff] %v10310_v42  ;;  %v3956_v43 = vmul.f32 %v3940_v54, %v3931_v3  ;;  %v3842_v42 = vsel %vm448_vm1, %v10178_v25, %v10240_v13 }
 0x724   : > { %13432 = vst [vmem:[#allocation92_spill] sm:$0xff] %v10312_v9  ;;  %v10329_v9 = vld [vmem:[%s12614_s1 + $0x8] sm:$0xf] }
 0x725   : > { %4637 = vmatpush.msra.mxu3 %v3956_v43  ;;  %v3948_v43 = vmul.f32 %v3940_v54, %v3929_v16  ;;  %v3850_v3 = vperm.slane %v10329_v9, 1  ;;  %v3839_v16 = vsel %vm448_vm1, %v10166_v61, %v10228_v49 }
 0x727   : > { %4181 = vrot.lane.b32.xlu0 %v9956_v33, %s6460_s28  ;;  %4185 = vrot.lane.b32.xlu2 %v9960_v40, %s6460_s28  ;;  %v3870_v40 = vmul.f32 %v3850_v3, %v3842_v42  ;;  %v3866_v54 = vmul.f32 %v3850_v3, %v3841_v22  ;;  %v3752_v42 = vsel %vm359_vm2, %v10146_v32, %v10132_v37  ;;  %v3760_v22 = vperm.slane %v10363_v34, 1 }
 0x728   : > { %4189 = vrot.lane.b32.xlu1 %v9976_v56, %s6460_s28  ;;  %4638 = vmatpush.msra.mxu3 %v3952_v38  ;;  %v3840_v38 = vsel %vm448_vm1, %v10216_v31, %v10218_v8 }
 0x729   : > { %v10346_v23 = vpop.permute.xlu2 %4003  ;;  %v10348_v13 = vpop.permute.xlu0 %3907  ;;  %v3780_v8 = vmul.f32 %v3760_v22, %v3752_v42  ;;  %v3662_v42 = vsel %vm271_vm0, %v10092_v47, %v10096_v30  ;;  %v3939_v30 = vperm.slane %v10287_v41, 0 }
 0x72a   : > { %13433 = vst [vmem:[#allocation76_spill] sm:$0xff] %v10348_v13  ;;  %v10350_v1 = vpop.permute.xlu1 %3915  ;;  %4639 = vmatpush.msra.mxu3 %v3948_v43  ;;  %v3862_v43 = vmul.f32 %v3850_v3, %v3840_v38  ;;  %v3751_v38 = vsel %vm359_vm2, %v10156_v15, %v10158_v51  ;;  %v10397_v51 = vld [vmem:[%s12614_s1] sm:$0xf]  ;;  %v3660_v13 = vsel %vm271_vm0, %v10072_v26, %v10064_v36 }
 0x72b   : > { %13434 = vst [vmem:[#allocation29_spill] sm:$0xff] %v10350_v1 }
 0x72c   : > { %4640 = vmatpush.msra.mxu3 %v3870_v40  ;;  %v3858_v40 = vmul.f32 %v3850_v3, %v3839_v16  ;;  %v3750_v3 = vsel %vm359_vm2, %v10110_v17, %v10168_v53  ;;  %v3776_v16 = vmul.f32 %v3760_v22, %v3751_v38  ;;  %13438 = vst [vmem:[#allocation51_spill] sm:$0xff] %v10397_v51  ;;  %v3670_v38 = vperm.slane %v10397_v51, 1 }
 0x72e   : > { %4641 = vmatpush.msra.mxu3 %v3866_v54 }
 0x72f   : > { %4187 = vrot.lane.b32.xlu0 %v9966_v29, %s6460_s28  ;;  %4191 = vrot.lane.b32.xlu2 %v9969_v0, %s6460_s28 }
 0x730   : > { %4195 = vrot.lane.b32.xlu1 %v9985_v57, %s6460_s28  ;;  %4642 = vmatpush.msra.mxu3 %v3862_v43  ;;  %v3749_v43 = vsel %vm359_vm2, %v10134_v18, %v10120_v44 }
 0x731   : > { %v10380_v54 = vpop.permute.xlu2 %4009  ;;  %v10382_v37 = vpop.permute.xlu0 %3913 }
 0x732   : > { %13436 = vst [vmem:[#allocation90_spill] sm:$0xff] %v10382_v37  ;;  %v10384_v49 = vpop.permute.xlu1 %3995  ;;  %4643 = vmatpush.msra.mxu3 %v3858_v40  ;;  %v3772_v40 = vmul.f32 %v3760_v22, %v3750_v3  ;;  %v3661_v3 = vsel %vm271_vm0, %v10056_v19, %v10104_v60 }
 0x733   : > { %13437 = vst [vmem:[#allocation36_spill] sm:$0xff] %v10384_v49  ;;  %v3686_v41 = vmul.f32 %v3670_v38, %v3661_v3 }
 0x734   : > { %4644 = vmatpush.msra.mxu3 %v3780_v8  ;;  %v3768_v8 = vmul.f32 %v3760_v22, %v3749_v43  ;;  %v3690_v43 = vmul.f32 %v3670_v38, %v3662_v42  ;;  %v3933_v42 = vsel %vm537_vm3, %v10382_v37, %v10276_v45 }
 0x736   : > { %4645 = vmatpush.msra.mxu3 %v3776_v16 }
 0x737   : > { %4193 = vrot.lane.b32.xlu0 %v9978_v55, %s6460_s28  ;;  %4197 = vrot.lane.b32.xlu2 %v9991_v2, %s6460_s28 }
 0x738   : > { %4201 = vrot.lane.b32.xlu1 %v10000_v35, %s6460_s28  ;;  %4646 = vmatpush.msra.mxu3 %v3772_v40  ;;  %v3935_v40 = vsel %vm537_vm3, %v10291_v39, %v10238_v50 }
 0x739   : > { %v10414_v16 = vpop.permute.xlu2 %4015  ;;  %v10417_v44 = vpop.permute.xlu0 %3919  ;;  %v3955_v50 = vmul.f32 %v3939_v30, %v3935_v40  ;;  %v3947_v40 = vmul.f32 %v3939_v30, %v3933_v42 }
 0x73a   : > { %13439 = vst [vmem:[#allocation68_spill] sm:$0xff] %v10417_v44  ;;  %v10419_v53 = vpop.permute.xlu1 %4001  ;;  %4647 = vmatpush.msra.mxu3 %v3768_v8  ;;  %v3936_v22 = vsel %vm537_vm3, %v10417_v44, %v10293_v27  ;;  %v3934_v8 = vsel %vm537_vm3, %v10350_v1, %v10266_v12  ;;  %v3659_v27 = vsel %vm271_vm0, %v10080_v7, %v10084_v62 }
 0x73b   : > { %v3959_v60 = vmul.f32 %v3939_v30, %v3936_v22  ;;  %v3682_v12 = vmul.f32 %v3670_v38, %v3660_v13  ;;  %v3678_v45 = vmul.f32 %v3670_v38, %v3659_v27  ;;  %v10462_v13 = vld [vmem:[%s12616_s3 + $0xc0] sm:$0xff]  ;;  %v3844_v27 = vsel %vm448_vm1, %v10264_v10, %v10216_v31 }
 0x73c   : > { %4648 = vmatpush.msra.mxu3 %v3690_v43  ;;  %13441 = vst [vmem:[#allocation40_spill] sm:$0xff] %v10462_v13  ;;  %v3756_v31 = vsel %vm359_vm2, %v10194_v58, %v10146_v32  ;;  %v3755_v32 = vsel %vm359_vm2, %v10204_v63, %v10156_v15  ;;  %v13444_v15 = vld [vmem:[#allocation77_spill] sm:$0xff] }
 0x73d   : > { %4549 = vmatpush.msra.mxu2 %v3959_v60  ;;  %v3951_v60 = vmul.f32 %v3939_v30, %v3934_v8  ;;  %v3849_v8 = vperm.slane %v10329_v9, 0  ;;  %v3843_v30 = vsel %vm448_vm1, %v10214_v24, %v10166_v61  ;;  %v10497_v61 = vld [vmem:[%s12616_s3 + $0xd8] sm:$0xff] }
 0x73e   : > { %4649 = vmatpush.msra.mxu3 %v3686_v41  ;;  %v3846_v41 = vsel %vm448_vm1, %v10226_v59, %v10178_v25  ;;  %v3845_v25 = vsel %vm448_vm1, %v10254_v14, %v10206_v5  ;;  %13443 = vst [vmem:[#allocation75_spill] sm:$0xff] %v10497_v61 }
 0x73f   : > { %4199 = vrot.lane.b32.xlu0 %v9995_v48, %s6460_s28  ;;  %4203 = vrot.lane.b32.xlu2 %v10005_v4, %s6460_s28  ;;  %v3869_v38 = vmul.f32 %v3849_v8, %v3846_v41  ;;  %v3861_v5 = vmul.f32 %v3849_v8, %v3844_v27  ;;  %v3857_v41 = vmul.f32 %v3849_v8, %v3843_v30 }
 0x740   : > { %4265 = vrot.lane.b32.xlu1 %v9931_v11, %s6461_s13  ;;  %4550 = vmatpush.msra.mxu2 %v3955_v50  ;;  %v3865_v50 = vmul.f32 %v3849_v8, %v3845_v25  ;;  %v3754_v25 = vsel %vm359_vm2, %v10154_v28, %v10110_v17  ;;  %v3753_v8 = vsel %vm359_vm2, %v10182_v6, %v10134_v18  ;;  %v13445_v17 = vld [vmem:[#allocation57_spill] sm:$0xff]  ;;  %v10532_v18 = vld [vmem:[%s12616_s3 + $0xf0] sm:$0xff] }
 0x741   : > { %4650 = vmatpush.msra.mxu3 %v3682_v12  ;;  %v10455_v3 = vpop.permute.xlu2 %4021  ;;  %v10457_v22 = vpop.permute.xlu0 %3999  ;;  %13446 = vst [vmem:[#allocation69_spill] sm:$0xff] %v10532_v18 }
 0x742   : > { %13440 = vst [vmem:[#allocation46_spill] sm:$0xff] %v10455_v3  ;;  %v10464_v43 = vpop.permute.xlu1 %4007  ;;  %4551 = vmatpush.msra.mxu2 %v3951_v60 }
 0x743   : > { %4651 = vmatpush.msra.mxu3 %v3678_v45  ;;  %v3759_v45 = vperm.slane %v10363_v34, 0 }
 0x744   : > { %4652 = vmatmul.f32.vlgmr.msra.gmra.mxu3 %v10462_v13  ;;  %4552 = vmatpush.msra.mxu2 %v3947_v40 }
 0x745   : > { %v3779_v40 = vmul.f32 %v3759_v45, %v3756_v31  ;;  %v3771_v27 = vmul.f32 %v3759_v45, %v3754_v25 }
 0x746   : > { %4553 = vmatpush.msra.mxu2 %v3869_v38  ;;  %v3775_v38 = vmul.f32 %v3759_v45, %v3755_v32  ;;  %v3669_v32 = vperm.slane %v10397_v51, 0 }
 0x747   : > { %4205 = vrot.lane.b32.xlu0 %v10012_v20, %s6460_s28  ;;  %4267 = vrot.lane.b32.xlu2 %v9938_v52, %s6461_s13 }
 0x748   : > { %4271 = vrot.lane.b32.xlu1 %v9956_v33, %s6461_s13  ;;  %4554 = vmatpush.msra.mxu2 %v3865_v50  ;;  %v3666_v50 = vsel %vm271_vm0, %v13445_v17, %v10092_v47 }
 0x749   : > { %v10490_v42 = vpop.permute.xlu2 %4085  ;;  %v10492_v12 = vpop.permute.xlu0 %4005  ;;  %v3689_v25 = vmul.f32 %v3669_v32, %v3666_v50 }
 0x74a   : > { %13442 = vst [vmem:[#allocation12_spill] sm:$0xff] %v10490_v42  ;;  %v10499_v60 = vpop.permute.xlu1 %4013  ;;  %4555 = vmatpush.msra.mxu2 %v3861_v5 }
 0x74c   : > { %4655 = vmatmul.f32.gmra.mxu3 %v10497_v61  ;;  %4556 = vmatpush.msra.mxu2 %v3857_v41  ;;  %v3767_v41 = vmul.f32 %v3759_v45, %v3753_v8  ;;  %v13450_v45 = vld [vmem:[#allocation49_spill] sm:$0xff] }
 0x74d   : > { %v3663_v8 = vsel %vm271_vm0, %v13450_v45, %v10080_v7 }
 0x74e   : > { %4557 = vmatpush.msra.mxu2 %v3779_v40  ;;  %v13448_v40 = vld [vmem:[#allocation63_spill] sm:$0xff] }
 0x74f   : > { %4269 = vrot.lane.b32.xlu0 %v9944_v46, %s6461_s13  ;;  %4273 = vrot.lane.b32.xlu2 %v13444_v15, %s6461_s13  ;;  %v3665_v47 = vsel %vm271_vm0, %v13448_v40, %v10056_v19 }
 0x750   : > { %4277 = vrot.lane.b32.xlu1 %v9966_v29, %s6461_s13  ;;  %4558 = vmatpush.msra.mxu2 %v3775_v38  ;;  %v13449_v38 = vld [vmem:[#allocation64_spill] sm:$0xff]  ;;  %v3685_v6 = vmul.f32 %v3669_v32, %v3665_v47  ;;  %v3677_v47 = vmul.f32 %v3669_v32, %v3663_v8 }
 0x751   : > { %v10525_v30 = vpop.permute.xlu2 %4091  ;;  %v10527_v5 = vpop.permute.xlu0 %4011  ;;  %v3664_v17 = vsel %vm271_vm0, %v13449_v38, %v10072_v26  ;;  %v6275_v38 = vld [vmem:[%s12617_s4 + $0x48] sm:$0xff] }
 0x752   : > { %v10534_v31 = vpop.permute.xlu1 %4019  ;;  %4559 = vmatpush.msra.mxu2 %v3771_v27  ;;  %v13451_v27 = vld [vmem:[#allocation22_spill] sm:$0xff]  ;;  %v3681_v19 = vmul.f32 %v3669_v32, %v3664_v17 }
 0x753   : > { %13447 = vst [vmem:[#allocation25_spill] sm:$0xff] %v10534_v31 }
 0x754   : > { %4658 = vmatmul.f32.gmra.mxu3 %v10532_v18  ;;  %4560 = vmatpush.msra.mxu2 %v3767_v41  ;;  %v10563_v41 = vld [vmem:[%s12616_s3 + $0x108] sm:$0xff] }
 0x755   : > { %13452 = vst [vmem:[#allocation6_spill] sm:$0xff] %v10563_v41 }
 0x756   : > { %4561 = vmatpush.msra.mxu2 %v3689_v25 }
 0x757   : > { %4275 = vrot.lane.b32.xlu0 %v13451_v27, %s6461_s13  ;;  %4279 = vrot.lane.b32.xlu2 %v9976_v56, %s6461_s13 }
 0x758   : > { %4283 = vrot.lane.b32.xlu1 %v9978_v55, %s6461_s13  ;;  %4562 = vmatpush.msra.mxu2 %v3685_v6 }
 0x759   : > { %v10556_v50 = vpop.permute.xlu2 %4097  ;;  %v10558_v26 = vpop.permute.xlu0 %4017 }
 0x75a   : > { %v10565_v7 = vpop.permute.xlu1 %4025  ;;  %4563 = vmatpush.msra.mxu2 %v3681_v19 }
 0x75c   : > { %4661 = vmatmul.f32.gmra.mxu3 %v10563_v41  ;;  %4564 = vmatpush.msra.mxu2 %v3677_v47  ;;  %v6274_v47 = vld [vmem:[%s12617_s4 + $0x40] sm:$0xff] }
 0x75d   : > { %4565 = vmatmul.f32.vlgmr.msra.gmra.mxu2 %v10462_v13 }
 0x75f   : > { %4281 = vrot.lane.b32.xlu0 %v9969_v0, %s6461_s13  ;;  %4285 = vrot.lane.b32.xlu2 %v9985_v57, %s6461_s13 }
 0x760   : > { %4289 = vrot.lane.b32.xlu1 %v9995_v48, %s6461_s13  ;;  %v6276_v48 = vld [vmem:[%s12617_s4 + $0x50] sm:$0xff] }
 0x761   : > { %v10575_v6 = vpop.permute.xlu2 %4103  ;;  %v10577_v17 = vpop.permute.xlu0 %4023 }
 0x762   : > { %v10579_v25 = vpop.permute.xlu1 %4089 }
 0x763   : > { %13453 = vst [vmem:[#allocation65_spill] sm:$0xff] %v10579_v25 }
 0x765   : > { %4568 = vmatmul.f32.gmra.mxu2 %v10497_v61 }
 0x767   : > { %4287 = vrot.lane.b32.xlu0 %v9991_v2, %s6461_s13  ;;  %4291 = vrot.lane.b32.xlu2 %v10000_v35, %s6461_s13 }
 0x768   : > { %4295 = vrot.lane.b32.xlu1 %v10012_v20, %s6461_s13 }
 0x769   : > { %v10588_v32 = vpop.permute.xlu2 %4109  ;;  %v10590_v8 = vpop.permute.xlu0 %4087 }
 0x76a   : > { %13454 = vst [vmem:[#allocation39_spill] sm:$0xff] %v10590_v8  ;;  %v10592_v19 = vpop.permute.xlu1 %4095 }
 0x76d   : > { %4571 = vmatmul.f32.gmra.mxu2 %v10532_v18  ;;  %v6277_v18 = vld [vmem:[%s12617_s4 + $0x58] sm:$0xff] }
 0x76f   : > { %4293 = vrot.lane.b32.xlu0 %v10005_v4, %s6461_s13  ;;  %4519 = vperm.xlu2 %6385, %v6274_v47  }
 0x770   : > { %4529 = vperm.xlu1 %6387, %v6276_v48  }
 0x771   : > { %v10603_v35 = vpop.permute.xlu2 %4115  ;;  %v10605_v20 = vpop.permute.xlu0 %4093 }
 0x772   : > { %v10607_v45 = vpop.permute.xlu1 %4101 }
 0x775   : > { %4574 = vmatmul.f32.gmra.mxu2 %v10563_v41  ;;  %v10637_v41 = vld [vmem:[%s12614_s1 + $0x1c] sm:$0xf] }
 0x776   : > { %v4226_v14 = vperm.slane %v10637_v41, 1  ;;  %v4225_v59 = vperm.slane %v10637_v41, 0 }
 0x777   : > { %4524 = vperm.xlu0 %6386, %v6275_v38   ;;  %4534 = vperm.xlu2 %6385, %v6277_v18  }
 0x779   : > { %v10616_v47 = vpop.permute.xlu2 %4179  ;;  %v4100_v48 = vpop.permute.xlu0 %4099 }
 0x77a   : > { %13455 = vst [vmem:[#allocation41_spill] sm:$0xff] %v10616_v47  ;;  %v10618_v4 = vpop.permute.xlu1 %4107 }
 0x781   : > { %v4186_v40 = vpop.permute.xlu2 %4185  ;;  %v10620_v61 = vpop.permute.xlu0 %4105 }
 0x782   : > { %v10622_v28 = vpop.permute.xlu1 %4113 }
 0x789   : > { %v10624_v63 = vpop.permute.xlu2 %4191  ;;  %v10626_v13 = vpop.permute.xlu0 %4111 }
 0x78a   : > { %v10628_v58 = vpop.permute.xlu1 %4177 }
 0x78b   : > { %13456 = vst [vmem:[#allocation83_spill] sm:$0xff] %v10628_v58  ;;  %v4216_v34 = vsel %vm861_vm6, %v10628_v58, %v4186_v40  ;;  %v4128_v58 = vsel %vm772_vm5, %v10525_v30, %v4100_v48 }
 0x791   : > { %v10630_v24 = vpop.permute.xlu0 %4175  ;;  %v10632_v38 = vpop.permute.xlu2 %4197 }
 0x792   : > { %13457 = vst [vmem:[#allocation31_spill] sm:$0xff] %v10630_v24  ;;  %v4184_v18 = vpop.permute.xlu1 %4183 }
 0x799   : > { %v10639_v10 = vpop.permute.xlu0 %4181  ;;  %v10649_v51 = vpop.permute.xlu2 %4203 }
 0x79a   : > { %13458 = vst [vmem:[#allocation80_spill] sm:$0xff] %v10639_v10  ;;  %v4190_v62 = vpop.permute.xlu1 %4189 }
 0x79b   : > { %v4214_v36 = vsel %vm861_vm6, %v4190_v62, %v10632_v38  ;;  %v4218_v37 = vsel %vm861_vm6, %v10639_v10, %v4190_v62 }
 0x79c   : > { %v4246_v1 = vmul.f32 %v4226_v14, %v4214_v36  ;;  %v4245_v39 = vmul.f32 %v4225_v59, %v4218_v37  ;;  %v4215_v36 = vsel %vm861_vm6, %v10630_v24, %v4184_v18 }
 0x79e   : > { %4578 = vmatpush.msra.mxu0 %v4245_v39  ;;  %4665 = vmatpush.msrb.mxu2 %v4246_v1  ;;  %v10668_v39 = vld [vmem:[%s12614_s1 + $0x18] sm:$0xf]  ;;  %v4237_v1 = vmul.f32 %v4225_v59, %v4216_v34  ;;  %v4126_v34 = vsel %vm772_vm5, %v10590_v8, %v10592_v19  ;;  %v4124_v8 = vsel %vm772_vm5, %v4100_v48, %v10618_v4 }
 0x79f   : > { %v4123_v48 = vsel %vm772_vm5, %v10556_v50, %v10620_v61 }
 0x7a1   : > { %v4188_v44 = vpop.permute.xlu0 %4187 }
 0x7a2   : > { %v10654_v0 = vpop.permute.xlu1 %4195  ;;  %v4217_v55 = vsel %vm861_vm6, %v10616_v47, %v4188_v44  ;;  %v10673_v47 = vpop.permute.xlu2 %4267 }
 0x7a3   : > { %v4213_v62 = vsel %vm861_vm6, %v4188_v44, %v10654_v0  ;;  %v4241_v10 = vmul.f32 %v4225_v59, %v4217_v55  ;;  %v4233_v55 = vmul.f32 %v4225_v59, %v4215_v36  ;;  %v4135_v44 = vperm.slane %v10668_v39, 0 }
 0x7a4   : > { %v4242_v37 = vmul.f32 %v4226_v14, %v4213_v62  ;;  %v4127_v62 = vsel %vm772_vm5, %v10579_v25, %v10556_v50  ;;  %v4211_v59 = vsel %vm861_vm6, %v4184_v18, %v10624_v63  ;;  %v10704_v18 = vld [vmem:[%s12614_s1 + $0x14] sm:$0xf] }
 0x7a5   : > { %4579 = vmatpush.msra.mxu0 %v4241_v10  ;;  %v4155_v10 = vmul.f32 %v4135_v44, %v4128_v58  ;;  %v4125_v58 = vsel %vm772_vm5, %v10490_v42, %v10605_v20 }
 0x7a6   : > { %4666 = vmatpush.msrb.mxu2 %v4242_v37  ;;  %v4143_v42 = vmul.f32 %v4135_v44, %v4125_v58 }
 0x7a7   : > { %4580 = vmatpush.msra.mxu0 %v4237_v1  ;;  %v4151_v1 = vmul.f32 %v4135_v44, %v4127_v62  ;;  %v4136_v62 = vperm.slane %v10668_v39, 1 }
 0x7a9   : > { %4581 = vmatpush.msra.mxu0 %v4233_v55  ;;  %v10680_v24 = vpop.permute.xlu0 %4193  ;;  %v4156_v25 = vmul.f32 %v4136_v62, %v4124_v8  ;;  %v4152_v8 = vmul.f32 %v4136_v62, %v4123_v48 }
 0x7aa   : > { %v10689_v36 = vpop.permute.xlu1 %4201  ;;  %v4212_v37 = vsel %vm861_vm6, %v4186_v40, %v10680_v24  ;;  %v4147_v40 = vmul.f32 %v4135_v44, %v4126_v34  ;;  %v4122_v34 = vsel %vm772_vm5, %v10592_v19, %v10575_v6  ;;  %v4035_v19 = vsel %vm683_vm4, %v10384_v49, %v10346_v23 }
 0x7ab   : > { %4582 = vmatpush.msra.mxu0 %v4155_v10  ;;  %v4238_v55 = vmul.f32 %v4226_v14, %v4212_v37  ;;  %v4234_v10 = vmul.f32 %v4226_v14, %v4211_v59  ;;  %v4038_v37 = vsel %vm683_vm4, %v10419_v53, %v10380_v54  ;;  %v4037_v14 = vsel %vm683_vm4, %v10457_v22, %v10464_v43  ;;  %v10724_v59 = vpop.permute.xlu2 %4273 }
 0x7ad   : > { %4583 = vmatpush.msra.mxu0 %v4151_v1  ;;  %4667 = vmatpush.msrb.mxu2 %v4238_v55  ;;  %v4045_v1 = vperm.slane %v10704_v18, 0  ;;  %v13459_v55 = vld [vmem:[#allocation91_spill] sm:$0xff] }
 0x7ae   : > { %v4036_v58 = vsel %vm683_vm4, %v13459_v55, %v10492_v12  ;;  %v4046_v55 = vperm.slane %v10704_v18, 1 }
 0x7af   : > { %4584 = vmatpush.msra.mxu0 %v4147_v40  ;;  %4668 = vmatpush.msrb.mxu2 %v4234_v10  ;;  %v4065_v44 = vmul.f32 %v4045_v1, %v4038_v37  ;;  %v4121_v40 = vsel %vm772_vm5, %v10605_v20, %v10607_v45  ;;  %v4034_v37 = vsel %vm683_vm4, %v10380_v54, %v10558_v26  ;;  %v10758_v54 = vld [vmem:[%s12614_s1 + $0x20] sm:$0xf] }
 0x7b0   : > { %v4057_v48 = vmul.f32 %v4045_v1, %v4036_v58  ;;  %v4144_v20 = vmul.f32 %v4136_v62, %v4121_v40 }
 0x7b1   : > { %4585 = vmatpush.msra.mxu0 %v4143_v42  ;;  %4669 = vmatpush.msrb.mxu2 %v4156_v25  ;;  %v10726_v50 = vpop.permute.xlu0 %4199  ;;  %v4061_v42 = vmul.f32 %v4045_v1, %v4037_v14  ;;  %v4148_v25 = vmul.f32 %v4136_v62, %v4122_v34  ;;  %v4033_v14 = vsel %vm683_vm4, %v10464_v43, %v10414_v16 }
 0x7b2   : > { %v10736_v10 = vpop.permute.xlu1 %4265  ;;  %v4032_v34 = vsel %vm683_vm4, %v10492_v12, %v10499_v60  ;;  %v4053_v62 = vmul.f32 %v4045_v1, %v4035_v19  ;;  %v4062_v43 = vmul.f32 %v4046_v55, %v4033_v14  ;;  %v4031_v12 = vsel %vm683_vm4, %v10346_v23, %v10527_v5 }
 0x7b3   : > { %4586 = vmatpush.msra.mxu0 %v4065_v44  ;;  %4670 = vmatpush.msrb.mxu2 %v4152_v8  ;;  %v4066_v44 = vmul.f32 %v4046_v55, %v4034_v37  ;;  %v4227_v8 = vperm.slane %v10637_v41, 2  ;;  %v10767_v40 = vpop.permute.xlu2 %4279  ;;  %v4058_v19 = vmul.f32 %v4046_v55, %v4032_v34  ;;  %v4209_v37 = vsel %vm861_vm6, %v10654_v0, %v10649_v51  ;;  %v10801_v34 = vld [vmem:[%s12616_s3 + $0xc8] sm:$0xff] }
 0x7b4   : > { %v4054_v0 = vmul.f32 %v4046_v55, %v4031_v12  ;;  %13460 = vst [vmem:[#allocation38_spill] sm:$0xff] %v10801_v34 }
 0x7b5   : > { %4587 = vmatpush.msra.mxu0 %v4061_v42  ;;  %4671 = vmatpush.msrb.mxu2 %v4148_v25  ;;  %v10770_v42 = vperm.slane %v10758_v54, 0  ;;  %v4243_v14 = vmul.f32 %v4227_v8, %v4209_v37  ;;  %v4029_v37 = vsel %vm683_vm4, %v10414_v16, %v10577_v17  ;;  %v10877_v16 = vld [vmem:[%s12616_s3 + $0xd0] sm:$0xff] }
 0x7b7   : > { %4588 = vmatpush.msra.mxu0 %v4057_v48  ;;  %4672 = vmatpush.msrb.mxu2 %v4144_v20 }
 0x7b9   : > { %4589 = vmatpush.msra.mxu0 %v4053_v62  ;;  %4673 = vmatpush.msrb.mxu2 %v4066_v44  ;;  %v10761_v58 = vpop.permute.xlu0 %4205  ;;  %v4137_v62 = vperm.slane %v10668_v39, 2  ;;  %v4119_v44 = vsel %vm772_vm5, %v10620_v61, %v10622_v28 }
 0x7ba   : > { %v10772_v25 = vpop.permute.xlu1 %4271  ;;  %v4210_v1 = vsel %vm861_vm6, %v10632_v38, %v10761_v58  ;;  %v4208_v38 = vsel %vm861_vm6, %v10680_v24, %v10689_v36  ;;  %v4120_v24 = vsel %vm772_vm5, %v10618_v4, %v10603_v35 }
 0x7bb   : > { %v4308_v23 = vsel %vm950_vm7, %v10772_v25, %v10767_v40  ;;  %v4247_v48 = vmul.f32 %v4227_v8, %v4210_v1  ;;  %4590 = vmatpush.msra.mxu0 %v9956_v33  ;;  %4674 = vmatpush.msrb.mxu2 %v4062_v43  ;;  %v4207_v33 = vsel %vm861_vm6, %v10624_v63, %v10726_v50 }
 0x7bc   : > { %v4335_v20 = vmul.f32 %v10770_v42, %v4308_v23  ;;  %v4235_v55 = vmul.f32 %v4227_v8, %v4207_v33  ;;  %v4157_v4 = vmul.f32 %v4137_v62, %v4120_v24  ;;  %v4153_v61 = vmul.f32 %v4137_v62, %v4119_v44 }
 0x7bd   : > { %4591 = vmatpush.msra.mxu0 %v9944_v46  ;;  %4675 = vmatpush.msrb.mxu2 %v4058_v19  ;;  %v4239_v46 = vmul.f32 %v4227_v8, %v4208_v38  ;;  %v4118_v8 = vsel %vm772_vm5, %v10575_v6, %v10626_v13  ;;  %v4117_v43 = vsel %vm772_vm5, %v10607_v45, %v10588_v32 }
 0x7be   : > { %4619 = vmatpush.msra.mxu1 %v4335_v20  ;;  %4752 = vmatpush.msrb.mxu3 %v4247_v48  ;;  %v4149_v6 = vmul.f32 %v4137_v62, %v4118_v8  ;;  %v4145_v19 = vmul.f32 %v4137_v62, %v4117_v43  ;;  %v13461_v48 = vld [vmem:[#allocation32_spill] sm:$0xff]  ;;  %v13462_v20 = vld [vmem:[#allocation35_spill] sm:$0xff]  ;;  %v13465_v62 = vld [vmem:[#allocation53_spill] sm:$0xff] }
 0x7bf   : > { %4592 = vmatpush.msra.mxu0 %v9938_v52  ;;  %4676 = vmatpush.msrb.mxu2 %v4054_v0  ;;  %v3928_v38 = vsel %vm537_vm3, %v13462_v20, %v13461_v48  ;;  %v13467_v8 = vld [vmem:[#allocation8_spill] sm:$0xff]  ;;  %v13470_v20 = vld [vmem:[#allocation61_spill] sm:$0xff] }
 0x7c0   : > { %4753 = vmatpush.msrb.mxu3 %v4243_v14  ;;  %v13463_v14 = vld [vmem:[#allocation89_spill] sm:$0xff] }
 0x7c1   : > { %4593 = vmatpush.msra.mxu0 %v9931_v11  ;;  %4677 = vmatpush.msrb.mxu2 %v9976_v56  ;;  %v10809_v63 = vpop.permute.xlu0 %4269  ;;  %v3941_v33 = vperm.slane %v13463_v14, 2 }
 0x7c2   : > { %v10811_v52 = vpop.permute.xlu1 %4277  ;;  %4754 = vmatpush.msrb.mxu3 %v4239_v46  ;;  %4594 = vmatmul.f32.vlgmr.msra.gmra.mxu0 %v10801_v34  ;;  %v4028_v46 = vsel %vm683_vm4, %v10499_v60, %v10455_v3  ;;  %v4027_v60 = vsel %vm683_vm4, %v10527_v5, %v10534_v31  ;;  %v13481_v31 = vld [vmem:[#allocation82_spill] sm:$0xff]  ;;  %v13482_v3 = vld [vmem:[#allocation11_spill] sm:$0xff] }
 0x7c3   : > { %v4307_v11 = vsel %vm950_vm7, %v10809_v63, %v10811_v52  ;;  %4678 = vmatpush.msrb.mxu2 %v9966_v29  ;;  %v10838_v29 = vld [vmem:[%s12616_s3 + $0xe0] sm:$0xff] }
 0x7c4   : > { %4755 = vmatpush.msrb.mxu3 %v4235_v55  ;;  %v4331_v56 = vmul.f32 %v10770_v42, %v4307_v11  ;;  %v13464_v55 = vld [vmem:[#allocation92_spill] sm:$0xff] }
 0x7c5   : > { %4679 = vmatpush.msrb.mxu2 %v13451_v27  ;;  %v4030_v27 = vsel %vm683_vm4, %v10558_v26, %v10565_v7  ;;  %v4047_v26 = vperm.slane %v10704_v18, 2  ;;  %v3927_v44 = vsel %vm537_vm3, %v13465_v62, %v13464_v55  ;;  %v3851_v62 = vperm.slane %v10329_v9, 2 }
 0x7c6   : > { %4620 = vmatpush.msra.mxu1 %v4331_v56  ;;  %4756 = vmatpush.msrb.mxu3 %v4157_v4  ;;  %v3961_v56 = vmul.f32 %v3941_v33, %v3928_v38  ;;  %v13466_v4 = vld [vmem:[#allocation76_spill] sm:$0xff]  ;;  %v13471_v38 = vld [vmem:[#allocation86_spill] sm:$0xff] }
 0x7c7   : > { %4680 = vmatpush.msrb.mxu2 %v13444_v15  ;;  %v4305_v15 = vsel %vm950_vm7, %v10736_v10, %v10724_v59  ;;  %v4067_v0 = vmul.f32 %v4047_v26, %v4030_v27  ;;  %v4063_v11 = vmul.f32 %v4047_v26, %v4029_v37  ;;  %v4059_v43 = vmul.f32 %v4047_v26, %v4028_v46  ;;  %v13468_v27 = vld [vmem:[#allocation15_spill] sm:$0xff] }
 0x7c8   : > { %4757 = vmatpush.msrb.mxu3 %v4153_v61  ;;  %4681 = vmatmul.f32.vlgmr.msrb.gmra.mxu2 %v10801_v34  ;;  %v4323_v24 = vmul.f32 %v10770_v42, %v4305_v15  ;;  %v3926_v61 = vsel %vm537_vm3, %v13467_v8, %v13466_v4  ;;  %v13469_v15 = vld [vmem:[#allocation17_spill] sm:$0xff]  ;;  %v4055_v37 = vmul.f32 %v4047_v26, %v4027_v60  ;;  %v13475_v8 = vld [vmem:[#allocation66_spill] sm:$0xff] }
 0x7c9   : > { %v10845_v12 = vpop.permute.xlu0 %4275 }
 0x7ca   : > { %v10851_v45 = vpop.permute.xlu1 %4283  ;;  %4758 = vmatpush.msrb.mxu3 %v4149_v6  ;;  %v4306_v1 = vsel %vm950_vm7, %v10673_v47, %v10845_v12  ;;  %4597 = vmatmul.f32.gmra.mxu0 %v10838_v29  ;;  %v3957_v6 = vmul.f32 %v3941_v33, %v3927_v44  ;;  %v13472_v44 = vld [vmem:[#allocation33_spill] sm:$0xff] }
 0x7cb   : > { %v4327_v23 = vmul.f32 %v10770_v42, %v4306_v1  ;;  %v10890_v42 = vld [vmem:[%s12616_s3 + $0xf8] sm:$0xff]  ;;  %v3925_v1 = vsel %vm537_vm3, %v13469_v15, %v13468_v27 }
 0x7cc   : > { %4759 = vmatpush.msrb.mxu3 %v4145_v19  ;;  %v3949_v46 = vmul.f32 %v3941_v33, %v3925_v1  ;;  %v4316_v1 = vperm.slane %v10758_v54, 1 }
 0x7cd   : > { %4621 = vmatpush.msra.mxu1 %v4327_v23  ;;  %v3953_v23 = vmul.f32 %v3941_v33, %v3926_v61  ;;  %v10926_v33 = vld [vmem:[%s12616_s3 + $0x110] sm:$0xff]  ;;  %v13476_v61 = vld [vmem:[#allocation21_spill] sm:$0xff] }
 0x7ce   : > { %4760 = vmatpush.msrb.mxu3 %v4067_v0  ;;  %v3838_v0 = vsel %vm448_vm1, %v13471_v38, %v13470_v20  ;;  %13474 = vst [vmem:[#allocation79_spill] sm:$0xff] %v10926_v33 }
 0x7cf   : > { %4622 = vmatpush.msra.mxu1 %v4323_v24  ;;  %v10915_v24 = vld [vmem:[%s12616_s3 + $0xe8] sm:$0xff]  ;;  %v3871_v60 = vmul.f32 %v3851_v62, %v3838_v0 }
 0x7d0   : > { %4761 = vmatpush.msrb.mxu3 %v4063_v11  ;;  %6278 = vmatmul.msk.f32.vlgmr.msra.gmra.mxu1 %vm1948_vm8, %v10877_v16  ;;  %v13473_v11 = vld [vmem:[#allocation67_spill] sm:$0xff] }
 0x7d1   : > { %4684 = vmatmul.f32.gmra.mxu2 %v10838_v29  ;;  %4723 = vmatpush.msrb.mxu1 %v3961_v56  ;;  %v10899_v5 = vpop.permute.xlu0 %4281  ;;  %v3837_v26 = vsel %vm448_vm1, %v13473_v11, %v13472_v44  ;;  %v4286_v56 = vpop.permute.xlu2 %4285  ;;  %v10949_v11 = vperm.slane %v10758_v54, 2 }
 0x7d2   : > { %v10905_v19 = vpop.permute.xlu1 %4289  ;;  %4762 = vmatpush.msrb.mxu3 %v4059_v43  ;;  %4600 = vmatmul.f32.gmra.mxu0 %v10890_v42  ;;  %v3836_v43 = vsel %vm448_vm1, %v13476_v61, %v13475_v8  ;;  %v4303_v38 = vsel %vm950_vm7, %v10811_v52, %v4286_v56 }
 0x7d3   : > { %4724 = vmatpush.msrb.mxu1 %v3957_v6  ;;  %v13477_v6 = vld [vmem:[#allocation85_spill] sm:$0xff] }
 0x7d4   : > { %4763 = vmatpush.msrb.mxu3 %v4055_v37 }
 0x7d5   : > { %4725 = vmatpush.msrb.mxu1 %v3953_v23  ;;  %v3867_v23 = vmul.f32 %v3851_v62, %v3837_v26 }
 0x7d6   : > { %4764 = vmatpush.msrb.mxu3 %v9991_v2  ;;  %v13478_v2 = vld [vmem:[#allocation94_spill] sm:$0xff] }
 0x7d7   : > { %4726 = vmatpush.msrb.mxu1 %v3949_v46  ;;  %v3835_v15 = vsel %vm448_vm1, %v13478_v2, %v13477_v6  ;;  %v13479_v46 = vld [vmem:[#allocation23_spill] sm:$0xff]  ;;  %v3863_v2 = vmul.f32 %v3851_v62, %v3836_v43  ;;  %v4332_v43 = vmul.f32 %v4316_v1, %v4303_v38 }
 0x7d8   : > { %4765 = vmatpush.msrb.mxu3 %v9985_v57  ;;  %6279 = vmatmul.msk.f32.gmra.mxu1 %vm1948_vm8, %v10915_v24  ;;  %v10945_v57 = vperm.slane %v10758_v54, 3  ;;  %v13487_v38 = vld [vmem:[#allocation55_spill] sm:$0xff] }
 0x7d9   : > { %4687 = vmatmul.f32.gmra.mxu2 %v10890_v42  ;;  %4727 = vmatpush.msrb.mxu1 %v3871_v60  ;;  %v4288_v37 = vpop.permute.xlu0 %4287 }
 0x7da   : > { %v4296_v0 = vpop.permute.xlu1 %4295  ;;  %4766 = vmatpush.msrb.mxu3 %v13479_v46  ;;  %v4304_v60 = vsel %vm950_vm7, %v10767_v40, %v4288_v37  ;;  %4603 = vmatmul.f32.gmra.mxu0 %v10926_v33  ;;  %v13480_v46 = vld [vmem:[#allocation70_spill] sm:$0xff] }
 0x7db   : > { %v4312_v26 = vsel %vm950_vm7, %v4296_v0, %v10772_v25  ;;  %v4300_v52 = vsel %vm950_vm7, %v4288_v37, %v4296_v0  ;;  %v4336_v61 = vmul.f32 %v4316_v1, %v4304_v60  ;;  %4728 = vmatpush.msrb.mxu1 %v3867_v23  ;;  %v3748_v54 = vsel %vm359_vm2, %v13481_v31, %v13480_v46  ;;  %v10974_v23 = vld [vmem:[%s12616_s3 + $0x100] sm:$0xff]  ;;  %v13483_v31 = vld [vmem:[#allocation34_spill] sm:$0xff]  ;;  %v13484_v60 = vld [vmem:[#allocation88_spill] sm:$0xff] }
 0x7dc   : > { %v4338_v49 = vmul.f32 %v10945_v57, %v4312_v26  ;;  %v4337_v40 = vmul.f32 %v10949_v11, %v4300_v52  ;;  %4767 = vmatpush.msrb.mxu3 %v13482_v3  ;;  %v4302_v25 = vsel %vm950_vm7, %v10845_v12, %v10851_v45  ;;  %v3859_v37 = vmul.f32 %v3851_v62, %v3835_v15  ;;  %v13485_v26 = vld [vmem:[#allocation84_spill] sm:$0xff]  ;;  %v13486_v15 = vld [vmem:[#allocation50_spill] sm:$0xff] }
 0x7dd   : > { %4729 = vmatpush.msrb.mxu1 %v3863_v2  ;;  %4706 = vmatpush.msrb.mxu0 %v4336_v61  ;;  %v3761_v0 = vperm.slane %v13483_v31, 2  ;;  %v3747_v3 = vsel %vm359_vm2, %v13485_v26, %v13484_v60  ;;  %v4301_v12 = vsel %vm950_vm7, %v10724_v59, %v10899_v5  ;;  %v3746_v52 = vsel %vm359_vm2, %v13487_v38, %v13486_v15  ;;  %v13489_v2 = vld [vmem:[#allocation47_spill] sm:$0xff]  ;;  %v13491_v38 = vld [vmem:[#allocation93_spill] sm:$0xff] }
 0x7de   : > { %4793 = vmatpush.msra.mxu2 %v4337_v40  ;;  %4880 = vmatpush.msra.mxu3 %v4338_v49  ;;  %v4328_v61 = vmul.f32 %v4316_v1, %v4302_v25  ;;  %v13488_v49 = vld [vmem:[#allocation74_spill] sm:$0xff]  ;;  %v3942_v59 = vperm.slane %v13463_v14, 3 }
 0x7df   : > { %4730 = vmatpush.msrb.mxu1 %v3859_v37  ;;  %4707 = vmatpush.msrb.mxu0 %v4332_v43  ;;  %v3781_v62 = vmul.f32 %v3761_v0, %v3748_v54  ;;  %v3745_v40 = vsel %vm359_vm2, %v13489_v2, %v13488_v49  ;;  %v13490_v37 = vld [vmem:[#allocation68_spill] sm:$0xff]  ;;  %v4292_v43 = vpop.permute.xlu2 %4291  ;;  %v3777_v25 = vmul.f32 %v3761_v0, %v3747_v3 }
 0x7e0   : > { %6280 = vmatmul.msk.f32.gmra.mxu1 %vm1948_vm8, %v10974_v23  ;;  %4768 = vmatmul.f32.vlgmr.msrb.gmra.mxu3 %v10801_v34  ;;  %v3924_v54 = vsel %vm537_vm3, %v13461_v48, %v13490_v37  ;;  %v3923_v34 = vsel %vm537_vm3, %v13464_v55, %v13491_v38  ;;  %v4324_v48 = vmul.f32 %v4316_v1, %v4301_v12  ;;  %v13492_v55 = vld [vmem:[#allocation62_spill] sm:$0xff]  ;;  %v13494_v1 = vld [vmem:[#allocation29_spill] sm:$0xff] }
 0x7e1   : > { %4690 = vmatmul.f32.gmra.mxu2 %v10926_v33  ;;  %4731 = vmatpush.msrb.mxu1 %v3781_v62  ;;  %v4294_v26 = vpop.permute.xlu0 %4293  ;;  %v4298_v62 = vsel %vm950_vm7, %v10851_v45, %v4292_v43  ;;  %v3773_v3 = vmul.f32 %v3761_v0, %v3746_v52  ;;  %v3962_v38 = vmul.f32 %v3942_v59, %v3924_v54 }
 0x7e2   : > { %4708 = vmatpush.msrb.mxu0 %v4328_v61  ;;  %v4299_v14 = vsel %vm950_vm7, %v4286_v56, %v4294_v26  ;;  %v4311_v2 = vsel %vm950_vm7, %v4294_v26, %v10809_v63  ;;  %v13493_v61 = vld [vmem:[#allocation60_spill] sm:$0xff]  ;;  %v4310_v63 = vsel %vm950_vm7, %v4292_v43, %v10673_v47  ;;  %v3922_v45 = vsel %vm537_vm3, %v13466_v4, %v13494_v1  ;;  %v13497_v26 = vld [vmem:[#allocation14_spill] sm:$0xff] }
 0x7e3   : > { %4732 = vmatpush.msrb.mxu1 %v3777_v25  ;;  %v4333_v37 = vmul.f32 %v10949_v11, %v4299_v14  ;;  %v4334_v33 = vmul.f32 %v10945_v57, %v4311_v2  ;;  %v3658_v56 = vsel %vm271_vm0, %v13493_v61, %v13492_v55  ;;  %v3769_v12 = vmul.f32 %v3761_v0, %v3745_v40  ;;  %v11041_v43 = vld [vmem:[%s12616_s3 + $0x118] sm:$0xff]  ;;  %v13496_v40 = vld [vmem:[#allocation54_spill] sm:$0xff] }
 0x7e4   : > { %4709 = vmatpush.msrb.mxu0 %v4324_v48  ;;  %v3958_v52 = vmul.f32 %v3942_v59, %v3923_v34  ;;  %v4309_v54 = vsel %vm950_vm7, %v10905_v19, %v10736_v10  ;;  %v4297_v47 = vsel %vm950_vm7, %v10899_v5, %v10905_v19  ;;  %v4329_v4 = vmul.f32 %v10949_v11, %v4298_v62  ;;  %v13495_v34 = vld [vmem:[#allocation51_spill] sm:$0xff]  ;;  %v13498_v25 = vld [vmem:[#allocation90_spill] sm:$0xff]  ;;  %v13499_v14 = vld [vmem:[#allocation56_spill] sm:$0xff] }
 0x7e5   : > { %6282 = vmatmul.msk.f32.vlgmr.msrb.gmra.mxu0 %vm1948_vm8, %v10877_v16  ;;  %4733 = vmatpush.msrb.mxu1 %v3773_v3  ;;  %v3671_v0 = vperm.slane %v13495_v34, 2  ;;  %v3657_v10 = vsel %vm271_vm0, %v13497_v26, %v13496_v40  ;;  %v3921_v5 = vsel %vm537_vm3, %v13468_v27, %v13498_v25  ;;  %v4330_v19 = vmul.f32 %v10945_v57, %v4310_v63  ;;  %v13500_v2 = vld [vmem:[#allocation28_spill] sm:$0xff] }
 0x7e6   : > { %4810 = vmatpush.msra.mxu0 %v3962_v38  ;;  %4794 = vmatpush.msra.mxu2 %v4333_v37  ;;  %v3656_v48 = vsel %vm271_vm0, %v13500_v2, %v13499_v14  ;;  %v3954_v3 = vmul.f32 %v3942_v59, %v3922_v45  ;;  %v13501_v37 = vld [vmem:[#allocation27_spill] sm:$0xff]  ;;  %v4325_v27 = vmul.f32 %v10949_v11, %v4297_v47  ;;  %v13502_v1 = vld [vmem:[#allocation16_spill] sm:$0xff] }
 0x7e7   : > { %4881 = vmatpush.msra.mxu3 %v4334_v33  ;;  %4734 = vmatpush.msrb.mxu1 %v3769_v12  ;;  %v3691_v62 = vmul.f32 %v3671_v0, %v3658_v56  ;;  %v3834_v61 = vsel %vm448_vm1, %v13470_v20, %v13501_v37  ;;  %v4326_v33 = vmul.f32 %v10945_v57, %v4309_v54  ;;  %v3852_v56 = vperm.slane %v10329_v9, 3  ;;  %v13503_v45 = vld [vmem:[#allocation20_spill] sm:$0xff]  ;;  %v13504_v20 = vld [vmem:[#allocation7_spill] sm:$0xff]  ;;  %v13506_v54 = vld [vmem:[#allocation81_spill] sm:$0xff] }
 0x7e8   : > { %4811 = vmatpush.msra.mxu0 %v3958_v52  ;;  %4795 = vmatpush.msra.mxu2 %v4329_v4  ;;  %v3687_v38 = vmul.f32 %v3671_v0, %v3657_v10  ;;  %v3950_v63 = vmul.f32 %v3942_v59, %v3921_v5  ;;  %v3655_v12 = vsel %vm271_vm0, %v13503_v45, %v13502_v1  ;;  %v13505_v11 = vld [vmem:[#allocation80_spill] sm:$0xff]  ;;  %v4228_v4 = vperm.slane %v10637_v41, 3  ;;  %v13509_v5 = vld [vmem:[#allocation83_spill] sm:$0xff] }
 0x7e9   : > { %4882 = vmatpush.msra.mxu3 %v4330_v19  ;;  %6281 = vmatmul.msk.f32.gmra.mxu1 %vm1948_vm8, %v11041_v43  ;;  %v3833_v52 = vsel %vm448_vm1, %v13472_v44, %v13504_v20  ;;  %v4222_v57 = vsel %vm861_vm6, %v10761_v58, %v13505_v11  ;;  %v3683_v9 = vmul.f32 %v3671_v0, %v3656_v48  ;;  %v13507_v44 = vld [vmem:[#allocation41_spill] sm:$0xff]  ;;  %v13508_v25 = vld [vmem:[#allocation52_spill] sm:$0xff] }
 0x7ea   : > { %4735 = vmatpush.msrb.mxu1 %v3691_v62  ;;  %4812 = vmatpush.msra.mxu0 %v3954_v3  ;;  %v3872_v59 = vmul.f32 %v3852_v56, %v3834_v61  ;;  %v3832_v47 = vsel %vm448_vm1, %v13475_v8, %v13506_v54  ;;  %v4221_v58 = vsel %vm861_vm6, %v10649_v51, %v13507_v44  ;;  %v13510_v2 = vld [vmem:[#allocation44_spill] sm:$0xff]  ;;  %v13511_v62 = vld [vmem:[#allocation31_spill] sm:$0xff]  ;;  %v13513_v61 = vld [vmem:[#allocation58_spill] sm:$0xff] }
 0x7eb   : > { %4796 = vmatpush.msra.mxu2 %v4325_v27  ;;  %4883 = vmatpush.msra.mxu3 %v4326_v33  ;;  %v3679_v26 = vmul.f32 %v3671_v0, %v3655_v12  ;;  %v3868_v10 = vmul.f32 %v3852_v56, %v3833_v52  ;;  %v3831_v41 = vsel %vm448_vm1, %v13477_v6, %v13508_v25  ;;  %v13512_v3 = vld [vmem:[#allocation40_spill] sm:$0xff]  ;;  %v13518_v52 = vld [vmem:[#allocation57_spill] sm:$0xff] }
 0x7ec   : > { %4736 = vmatpush.msrb.mxu1 %v3687_v38  ;;  %4813 = vmatpush.msra.mxu0 %v3950_v63  ;;  %v4248_v8 = vmul.f32 %v4228_v4, %v4222_v57  ;;  %v4220_v19 = vsel %vm861_vm6, %v10689_v36, %v13509_v5  ;;  %v3864_v51 = vmul.f32 %v3852_v56, %v3832_v47  ;;  %v3762_v36 = vperm.slane %v13483_v31, 3  ;;  %v13514_v38 = vld [vmem:[#allocation73_spill] sm:$0xff]  ;;  %v13521_v47 = vld [vmem:[#allocation63_spill] sm:$0xff] }
 0x7ed   : > { %6283 = vmatmul.msk.f32.gmra.mxu0 %vm1948_vm8, %v10915_v24  ;;  %6286 = vmatmul.msk.f32.vlgmr.msra.gmra.mxu2 %vm1948_vm8, %v10877_v16  ;;  %v3744_v0 = vsel %vm359_vm2, %v13480_v46, %v13510_v2  ;;  %v4244_v48 = vmul.f32 %v4228_v4, %v4221_v58  ;;  %v4219_v6 = vsel %vm861_vm6, %v10726_v50, %v13511_v62  ;;  %v13522_v58 = vld [vmem:[#allocation64_spill] sm:$0xff] }
 0x7ee   : > { %4737 = vmatpush.msrb.mxu1 %v3683_v9  ;;  %4814 = vmatpush.msra.mxu0 %v3872_v59  ;;  %v3860_v37 = vmul.f32 %v3852_v56, %v3831_v41  ;;  %v3743_v27 = vsel %vm359_vm2, %v13484_v60, %v13513_v61  ;;  %v4240_v46 = vmul.f32 %v4228_v4, %v4220_v19  ;;  %v4138_v60 = vperm.slane %v10668_v39, 3  ;;  %v13515_v56 = vld [vmem:[#allocation65_spill] sm:$0xff]  ;;  %v13517_v39 = vld [vmem:[#allocation39_spill] sm:$0xff]  ;;  %v13519_v9 = vld [vmem:[#allocation12_spill] sm:$0xff] }
 0x7ef   : > { %4771 = vmatmul.f32.gmra.mxu3 %v10838_v29  ;;  %v4132_v33 = vsel %vm772_vm5, %v10603_v35, %v10525_v30  ;;  %v3782_v50 = vmul.f32 %v3762_v36, %v3744_v0  ;;  %v3742_v63 = vsel %vm359_vm2, %v13486_v15, %v13514_v38  ;;  %v4236_v31 = vmul.f32 %v4228_v4, %v4219_v6  ;;  %v13516_v30 = vld [vmem:[#allocation87_spill] sm:$0xff]  ;;  %v13527_v19 = vld [vmem:[#allocation36_spill] sm:$0xff]  ;;  %v13529_v0 = vld [vmem:[#allocation69_spill] sm:$0xff] }
 0x7f0   : > { %4738 = vmatpush.msrb.mxu1 %v3679_v26  ;;  %4815 = vmatpush.msra.mxu0 %v3868_v10  ;;  %v4131_v45 = vsel %vm772_vm5, %v10622_v28, %v13515_v56  ;;  %v3778_v35 = vmul.f32 %v3762_v36, %v3743_v27  ;;  %v3741_v15 = vsel %vm359_vm2, %v13488_v49, %v13516_v30  ;;  %v13520_v59 = vld [vmem:[#allocation75_spill] sm:$0xff]  ;;  %v13530_v6 = vld [vmem:[#allocation78_spill] sm:$0xff]  ;;  %v13533_v61 = vld [vmem:[#allocation9_spill] sm:$0xff] }
 0x7f1   : > { %4739 = vmatmul.f32.vlgmr.msrb.gmra.mxu1 %v13512_v3  ;;  %v4158_v12 = vmul.f32 %v4138_v60, %v4132_v33  ;;  %v4130_v20 = vsel %vm772_vm5, %v10626_v13, %v13517_v39  ;;  %v3774_v28 = vmul.f32 %v3762_v36, %v3742_v63  ;;  %v3654_v11 = vsel %vm271_vm0, %v13492_v55, %v13518_v52  ;;  %v13524_v41 = vld [vmem:[#allocation79_spill] sm:$0xff]  ;;  %v13534_v27 = vld [vmem:[#allocation13_spill] sm:$0xff] }
 0x7f2   : > { %4839 = vmatpush.msra.mxu1 %v4248_v8  ;;  %4816 = vmatpush.msra.mxu0 %v3864_v51  ;;  %v4154_v57 = vmul.f32 %v4138_v60, %v4131_v45  ;;  %v4129_v49 = vsel %vm772_vm5, %v10588_v32, %v13519_v9  ;;  %v3770_v54 = vmul.f32 %v3762_v36, %v3741_v15  ;;  %v3672_v13 = vperm.slane %v13495_v34, 3  ;;  %v13526_v8 = vld [vmem:[#allocation46_spill] sm:$0xff]  ;;  %v13528_v51 = vld [vmem:[#allocation25_spill] sm:$0xff] }
 0x7f3   : > { %v3653_v4 = vsel %vm271_vm0, %v13496_v40, %v13521_v47  ;;  %v4150_v55 = vmul.f32 %v4138_v60, %v4130_v20  ;;  %v4042_v44 = vsel %vm683_vm4, %v10565_v7, %v10419_v53  ;;  %v3652_v26 = vsel %vm271_vm0, %v13499_v14, %v13522_v58  ;;  %v13523_v7 = vld [vmem:[#allocation49_spill] sm:$0xff]  ;;  %v13532_v36 = vld [vmem:[#allocation30_spill] sm:$0xff] }
 0x7f4   : > { %4840 = vmatpush.msra.mxu1 %v4244_v48  ;;  %4817 = vmatpush.msra.mxu0 %v3860_v37  ;;  %v3692_v32 = vmul.f32 %v3672_v13, %v3654_v11  ;;  %v4146_v34 = vmul.f32 %v4138_v60, %v4129_v49  ;;  %v4048_v40 = vperm.slane %v10704_v18, 3  ;;  %v4041_v10 = vsel %vm683_vm4, %v10577_v17, %v10457_v22  ;;  %v13525_v18 = vld [vmem:[#allocation91_spill] sm:$0xff]  ;;  %v13531_v37 = vld [vmem:[#allocation6_spill] sm:$0xff] }
 0x7f5   : > { %6284 = vmatmul.msk.f32.gmra.mxu0 %vm1948_vm8, %v10974_v23  ;;  %6287 = vmatmul.msk.f32.gmra.mxu2 %vm1948_vm8, %v10915_v24  ;;  %v3688_v53 = vmul.f32 %v3672_v13, %v3653_v4  ;;  %v3651_v14 = vsel %vm271_vm0, %v13502_v1, %v13523_v7  ;;  %v4040_v5 = vsel %vm683_vm4, %v13526_v8, %v13525_v18 }
 0x7f6   : > { %4841 = vmatpush.msra.mxu1 %v4240_v46  ;;  %4818 = vmatpush.msra.mxu0 %v3782_v50  ;;  %v4068_v25 = vmul.f32 %v4048_v40, %v4042_v44  ;;  %v3684_v22 = vmul.f32 %v3672_v13, %v3652_v26  ;;  %v4064_v17 = vmul.f32 %v4048_v40, %v4041_v10  ;;  %v4653_v50 = vpop.f32.mrf.mxu3 }
 0x7f7   : > { %4774 = vmatmul.f32.gmra.mxu3 %v10890_v42  ;;  %v4039_v2 = vsel %vm683_vm4, %v13528_v51, %v13527_v19  ;;  %v3680_v1 = vmul.f32 %v3672_v13, %v3651_v14  ;;  %v4060_v48 = vmul.f32 %v4048_v40, %v4040_v5 }
 0x7f8   : > { %4842 = vmatpush.msra.mxu1 %v4236_v31  ;;  %4819 = vmatpush.msra.mxu0 %v3778_v35  ;;  %v4056_v62 = vmul.f32 %v4048_v40, %v4039_v2  ;;  %v11208_v31 = vpop.permute.xlu2 %4519  ;;  %v11211_v35 = vpop.permute.xlu0 %4524 }
 0x7f9   : > { %4742 = vmatmul.f32.gmra.mxu1 %v13520_v59  ;;  %v4654_v4 = vadd.f32 %v4653_v50, %v11208_v31 }
 0x7fa   : > { %4843 = vmatpush.msra.mxu1 %v4158_v12  ;;  %4820 = vmatpush.msra.mxu0 %v3774_v28 }
 0x7fc   : > { %4844 = vmatpush.msra.mxu1 %v4154_v57  ;;  %4821 = vmatpush.msra.mxu0 %v3770_v54  ;;  %v11220_v57 = vpop.permute.xlu1 %4529 }
 0x7fd   : > { %6285 = vmatmul.msk.f32.gmra.mxu0 %vm1948_vm8, %v11041_v43  ;;  %6288 = vmatmul.msk.f32.gmra.mxu2 %vm1948_vm8, %v10974_v23 }
 0x7fe   : > { %4845 = vmatpush.msra.mxu1 %v4150_v55  ;;  %4822 = vmatpush.msra.mxu0 %v3692_v32  ;;  %v4656_v60 = vpop.f32.mrf.mxu3 }
 0x7ff   : > { %4777 = vmatmul.f32.gmra.mxu3 %v13524_v41  ;;  %v4657_v14 = vadd.f32 %v4656_v60, %v11211_v35 }
 0x800   : > { %4846 = vmatpush.msra.mxu1 %v4146_v34  ;;  %4823 = vmatpush.msra.mxu0 %v3688_v53  ;;  %v11228_v58 = vpop.permute.xlu2 %4534 }
 0x801   : > { %4745 = vmatmul.f32.gmra.mxu1 %v13529_v0 }
 0x802   : > { %4847 = vmatpush.msra.mxu1 %v4068_v25  ;;  %4824 = vmatpush.msra.mxu0 %v3684_v22 }
 0x804   : > { %4848 = vmatpush.msra.mxu1 %v4064_v17  ;;  %4825 = vmatpush.msra.mxu0 %v3680_v1 }
 0x805   : > { %4826 = vmatmul.f32.vlgmr.msra.gmra.mxu0 %v13512_v3  ;;  %6289 = vmatmul.msk.f32.gmra.mxu2 %vm1948_vm8, %v11041_v43  ;;  %v13535_v3 = vld [vmem:[#allocation38_spill] sm:$0xff] }
 0x806   : > { %4849 = vmatpush.msra.mxu1 %v4060_v48  ;;  %v4659_v28 = vpop.f32.mrf.mxu3 }
 0x807   : > { %6290 = vmatmul.msk.f32.vlgmr.msra.gmra.mxu3 %vm1948_vm8, %v10877_v16  ;;  %v4566_v16 = vpop.f32.mrf.mxu2  ;;  %v4660_v51 = vadd.f32 %v4659_v28, %v11220_v57 }
 0x808   : > { %4850 = vmatpush.msra.mxu1 %v4056_v62 }
 0x809   : > { %4748 = vmatmul.f32.gmra.mxu1 %v13531_v37 }
 0x80a   : > { %4851 = vmatpush.msra.mxu1 %v13530_v6 }
 0x80c   : > { %4852 = vmatpush.msra.mxu1 %v13532_v36 }
 0x80d   : > { %4829 = vmatmul.f32.gmra.mxu0 %v13520_v59 }
 0x80e   : > { %4853 = vmatpush.msra.mxu1 %v13533_v61  ;;  %v4662_v55 = vpop.f32.mrf.mxu3 }
 0x80f   : > { %6291 = vmatmul.msk.f32.gmra.mxu3 %vm1948_vm8, %v10915_v24  ;;  %v4569_v24 = vpop.f32.mrf.mxu2 }
 0x810   : > { %4854 = vmatpush.msra.mxu1 %v13534_v27  ;;  %v4570_v15 = vadd.f32 %v4569_v24, %v11211_v35 }
 0x811   : > { %4855 = vmatmul.f32.vlgmr.msra.gmra.mxu1 %v13535_v3 }
 0x815   : > { %4832 = vmatmul.f32.gmra.mxu0 %v13529_v0 }
 0x817   : > { %6292 = vmatmul.msk.f32.gmra.mxu3 %vm1948_vm8, %v10974_v23  ;;  %v4572_v46 = vpop.f32.mrf.mxu2 }
 0x818   : > { %v4573_v9 = vadd.f32 %v4572_v46, %v11220_v57 }
 0x819   : > { %4858 = vmatmul.f32.gmra.mxu1 %v10838_v29  ;;  %v4567_v29 = vadd.f32 %v4566_v16, %v11208_v31  ;;  %v4663_v16 = vadd.f32 %v4662_v55, %v11228_v58 }
 0x81d   : > { %4835 = vmatmul.f32.gmra.mxu0 %v13531_v37 }
 0x81f   : > { %6293 = vmatmul.msk.f32.gmra.mxu3 %vm1948_vm8, %v11041_v43  ;;  %v4575_v38 = vpop.f32.mrf.mxu2 }
 0x820   : > { %v4576_v34 = vadd.f32 %v4575_v38, %v11228_v58 }
 0x821   : > { %4861 = vmatmul.f32.gmra.mxu1 %v10890_v42 }
 0x829   : > { %4864 = vmatmul.f32.gmra.mxu1 %v13524_v41 }
 0x83f   : > { %v4595_v33 = vpop.f32.mrf.mxu0 }
 0x840   : > { %v4596_v56 = vadd.f32 %v4595_v33, %v4567_v29 }
 0x847   : > { %v4598_v63 = vpop.f32.mrf.mxu0 }
 0x848   : > { %v4599_v12 = vadd.f32 %v4598_v63, %v4570_v15 }
 0x84b   : > { %v4682_v23 = vpop.f32.mrf.mxu2 }
 0x84c   : > { %v4683_v32 = vadd.f32 %v4682_v23, %v4654_v4 }
 0x84d   : > { %v4624_v45 = vpop.f32.mrf.mxu1 }
 0x84e   : > { %v4625_v43 = vadd.f32 %v4624_v45, %v4596_v56 }
 0x84f   : > { %v4601_v30 = vpop.f32.mrf.mxu0 }
 0x850   : > { %v11213_v42 = vmax.f32 %v4625_v43, 0.0  ;;  %v4602_v59 = vadd.f32 %v4601_v30, %v4573_v9 }
 0x852   : > { %4917 = vrot.lane.b32.xlu0 %v11213_v42, %s6454_s18 }
 0x854   : > { %v4685_v39 = vpop.f32.mrf.mxu2 }
 0x855   : > { %v4627_v20 = vpop.f32.mrf.mxu1  ;;  %v4686_v8 = vadd.f32 %v4685_v39, %v4657_v14 }
 0x856   : > { %v4628_v52 = vadd.f32 %v4627_v20, %v4599_v12 }
 0x857   : > { %v4604_v49 = vpop.f32.mrf.mxu0 }
 0x858   : > { %v11218_v11 = vmax.f32 %v4628_v52, 0.0  ;;  %v4605_v10 = vadd.f32 %v4604_v49, %v4576_v34 }
 0x85a   : > { %4919 = vrot.lane.b32.xlu1 %v11218_v11, %s6454_s18 }
 0x85c   : > { %v4688_v13 = vpop.f32.mrf.mxu2 }
 0x85d   : > { %v4630_v54 = vpop.f32.mrf.mxu1  ;;  %v4689_v48 = vadd.f32 %v4688_v13, %v4660_v51 }
 0x85e   : > { %v4631_v47 = vadd.f32 %v4630_v54, %v4602_v59 }
 0x860   : > { %v11226_v44 = vmax.f32 %v4631_v47, 0.0 }
 0x862   : > { %v4711_v26 = vpop.f32.mrf.mxu0  ;;  %4921 = vrot.lane.b32.xlu2 %v11226_v44, %s6454_s18 }
 0x863   : > { %v4712_v40 = vadd.f32 %v4711_v26, %v4683_v32  ;;  %v4769_v18 = vpop.f32.mrf.mxu3 }
 0x864   : > { %v4691_v41 = vpop.f32.mrf.mxu2 }
 0x865   : > { %v11233_v53 = vmax.f32 %v4712_v40, 0.0  ;;  %v4692_v33 = vadd.f32 %v4691_v41, %v4663_v16 }
 0x866   : > { %v4633_v7 = vpop.f32.mrf.mxu1 }
 0x867   : > { %v4634_v25 = vadd.f32 %v4633_v7, %v4605_v10  ;;  %4925 = vrot.lane.b32.xlu1 %v11233_v53, %s6454_s18 }
 0x869   : > { %v11238_v5 = vmax.f32 %v4634_v25, 0.0 }
 0x86a   : > { %v4714_v22 = vpop.f32.mrf.mxu0 }
 0x86b   : > { %v4715_v17 = vadd.f32 %v4714_v22, %v4686_v8  ;;  %4923 = vrot.lane.b32.xlu0 %v11238_v5, %s6454_s18 }
 0x86d   : > { %v11242_v19 = vmax.f32 %v4715_v17, 0.0 }
 0x86e   : > { %v4740_v2 = vpop.f32.mrf.mxu1 }
 0x86f   : > { %4927 = vrot.lane.b32.xlu2 %v11242_v19, %s6454_s18  ;;  %v4741_v0 = vadd.f32 %v4740_v2, %v11208_v31 }
 0x870   : > { %v4798_v1 = vpop.f32.mrf.mxu2 }
 0x871   : > { %v4770_v62 = vadd.f32 %v4769_v18, %v4741_v0 }
 0x872   : > { %v4717_v6 = vpop.f32.mrf.mxu0  ;;  %v4772_v37 = vpop.f32.mrf.mxu3 }
 0x873   : > { %v4718_v36 = vadd.f32 %v4717_v6, %v4689_v48  ;;  %v4799_v61 = vadd.f32 %v4798_v1, %v4770_v62 }
 0x875   : > { %v11248_v27 = vmax.f32 %v4718_v36, 0.0  ;;  %v11250_v3 = vmax.f32 %v4799_v61, 0.0  ;;  %v4914_v61 = vld [vmem:[%s12618_s5 + $0x8] sm:$0xff] }
 0x876   : > { %v4743_v24 = vpop.f32.mrf.mxu1 }
 0x877   : > { %13536 = vst [vmem:[#allocation24_spill] sm:$0xff] %v11248_v27  ;;  %4929 = vrot.lane.b32.xlu0 %v11248_v27, %s6454_s18  ;;  %v4744_v46 = vadd.f32 %v4743_v24, %v11211_v35  ;;  %4933 = vrot.lane.b32.xlu2 %v11250_v3, %s6454_s18  ;;  %v4916_v24 = vld [vmem:[%s12618_s5 + $0x18] sm:$0xff] }
 0x878   : > { %13537 = vst [vmem:[#allocation42_spill] sm:$0xff] %v11250_v3  ;;  %v4801_v50 = vpop.f32.mrf.mxu2 }
 0x879   : > { %v4773_v38 = vadd.f32 %v4772_v37, %v4744_v46  ;;  %v6295_v46 = vld [vmem:[%s12618_s5 + $0x28] sm:$0xff] }
 0x87a   : > { %v4720_v63 = vpop.f32.mrf.mxu0  ;;  %v4775_v29 = vpop.f32.mrf.mxu3 }
 0x87b   : > { %v4721_v23 = vadd.f32 %v4720_v63, %v4692_v33  ;;  %v4802_v60 = vadd.f32 %v4801_v50, %v4773_v38  ;;  %v6296_v50 = vld [vmem:[%s12618_s5 + $0x30] sm:$0xff]  ;;  %v6294_v38 = vld [vmem:[%s12618_s5 + $0x20] sm:$0xff] }
 0x87d   : > { %v11258_v56 = vmax.f32 %v4721_v23, 0.0  ;;  %v11260_v45 = vmax.f32 %v4802_v60, 0.0 }
 0x87e   : > { %v4746_v43 = vpop.f32.mrf.mxu1 }
 0x87f   : > { %13538 = vst [vmem:[#allocation26_spill] sm:$0xff] %v11258_v56  ;;  %4931 = vrot.lane.b32.xlu1 %v11258_v56, %s6454_s18  ;;  %v4747_v30 = vadd.f32 %v4746_v43, %v11220_v57  ;;  %4935 = vrot.lane.b32.xlu0 %v11260_v45, %s6454_s18 }
 0x880   : > { %13539 = vst [vmem:[#allocation18_spill] sm:$0xff] %v11260_v45  ;;  %v4804_v15 = vpop.f32.mrf.mxu2 }
 0x881   : > { %v4776_v12 = vadd.f32 %v4775_v29, %v4747_v30  ;;  %v6297_v29 = vld [vmem:[%s12618_s5 + $0x38] sm:$0xff] }
 0x882   : > { %v4778_v39 = vpop.f32.mrf.mxu3  ;;  %v4827_v28 = vpop.f32.mrf.mxu0 }
 0x883   : > { %v4805_v20 = vadd.f32 %v4804_v15, %v4776_v12  ;;  %v4828_v4 = vadd.f32 %v4827_v28, %v11208_v31 }
 0x885   : > { %v11267_v52 = vmax.f32 %v4805_v20, 0.0 }
 0x886   : > { %v4749_v9 = vpop.f32.mrf.mxu1 }
 0x887   : > { %13540 = vst [vmem:[#allocation19_spill] sm:$0xff] %v11267_v52  ;;  %v4750_v49 = vadd.f32 %v4749_v9, %v11228_v58  ;;  %4937 = vrot.lane.b32.xlu1 %v11267_v52, %s6454_s18 }
 0x888   : > { %v4807_v59 = vpop.f32.mrf.mxu2 }
 0x889   : > { %v4779_v54 = vadd.f32 %v4778_v39, %v4750_v49 }
 0x88a   : > { %v4885_v13 = vpop.f32.mrf.mxu3  ;;  %v4830_v32 = vpop.f32.mrf.mxu0 }
 0x88b   : > { %v4808_v47 = vadd.f32 %v4807_v59, %v4779_v54  ;;  %v4831_v14 = vadd.f32 %v4830_v32, %v11211_v35  ;;  %v4913_v35 = vld [vmem:[%s12618_s5] sm:$0xff] }
 0x88d   : > { %v11273_v55 = vmax.f32 %v4808_v47, 0.0  ;;  %v6299_v47 = vld [vmem:[%s12618_s5 + $0x40] sm:$0xff] }
 0x88e   : > { %v4856_v26 = vpop.f32.mrf.mxu1 }
 0x88f   : > { %13541 = vst [vmem:[#allocation72_spill] sm:$0xff] %v11273_v55  ;;  %v4857_v34 = vadd.f32 %v4856_v26, %v4828_v4  ;;  %4939 = vrot.lane.b32.xlu2 %v11273_v55, %s6454_s18  ;;  %v6301_v4 = vld [vmem:[%s12618_s5 + $0x50] sm:$0xff] }
 0x891   : > { %v4886_v40 = vadd.f32 %v4885_v13, %v4857_v34 }
 0x892   : > { %v4888_v10 = vpop.f32.mrf.mxu3  ;;  %v4833_v31 = vpop.f32.mrf.mxu0 }
 0x893   : > { %v11277_v7 = vmax.f32 %v4886_v40, 0.0  ;;  %v4834_v17 = vadd.f32 %v4833_v31, %v11220_v57  ;;  %v6302_v40 = vld [vmem:[%s12618_s5 + $0x58] sm:$0xff] }
 0x895   : > { %13542 = vst [vmem:[#allocation43_spill] sm:$0xff] %v11277_v7  ;;  %4941 = vrot.lane.b32.xlu0 %v11277_v7, %s6454_s18 }
 0x896   : > { %v4859_v25 = vpop.f32.mrf.mxu1 }
 0x897   : > { %v4860_v41 = vadd.f32 %v4859_v25, %v4831_v14 }
 0x899   : > { %v4889_v18 = vadd.f32 %v4888_v10, %v4860_v41  ;;  %v6300_v10 = vld [vmem:[%s12618_s5 + $0x48] sm:$0xff] }
 0x89a   : > { %v4891_v22 = vpop.f32.mrf.mxu3  ;;  %v4836_v1 = vpop.f32.mrf.mxu0 }
 0x89b   : > { %v11282_v8 = vmax.f32 %v4889_v18, 0.0  ;;  %v4837_v62 = vadd.f32 %v4836_v1, %v11228_v58  ;;  %v4915_v58 = vld [vmem:[%s12618_s5 + $0x10] sm:$0xff] }
 0x89d   : > { %13543 = vst [vmem:[#allocation37_spill] sm:$0xff] %v11282_v8  ;;  %4943 = vrot.lane.b32.xlu1 %v11282_v8, %s6454_s18 }
 0x89e   : > { %v4862_v51 = vpop.f32.mrf.mxu1 }
 0x89f   : > { %v4863_v2 = vadd.f32 %v4862_v51, %v4834_v17 }
 0x8a1   : > { %v4892_v0 = vadd.f32 %v4891_v22, %v4863_v2 }
 0x8a2   : > { %v4894_v6 = vpop.f32.mrf.mxu3 }
 0x8a3   : > { %v11290_v48 = vmax.f32 %v4892_v0, 0.0 }
 0x8a5   : > { %13544 = vst [vmem:[#allocation48_spill] sm:$0xff] %v11290_v48  ;;  %4945 = vrot.lane.b32.xlu2 %v11290_v48, %s6454_s18  ;;  %4993 = vperm.xlu1 %6387, %v4913_v35  }
 0x8a6   : > { %v4865_v57 = vpop.f32.mrf.mxu1 }
 0x8a7   : > { %v4866_v37 = vadd.f32 %v4865_v57, %v4837_v62  ;;  %v6298_v57 = vld [vmem:[%s12614_s1 + $0x4] sm:$0xf] }
 0x8a9   : > { %v4895_v36 = vadd.f32 %v4894_v6, %v4866_v37 }
 0x8ab   : > { %v11298_v16 = vmax.f32 %v4895_v36, 0.0 }
 0x8ad   : > { %4947 = vrot.lane.b32.xlu0 %v11298_v16, %s6454_s18  ;;  %4998 = vperm.xlu2 %6385, %v4914_v61  }
 0x8ae   : > { %5008 = vperm.xlu1 %6387, %v4916_v24  }
 0x8b5   : > { %5003 = vperm.xlu0 %6386, %v4915_v58   ;;  %5048 = vrot.lane.b32.xlu2 %v11213_v42, %s6455_s19  ;;  %v4965_v58 = vld [vmem:[%s12614_s1] sm:$0xf] }
 0x8b6   : > { %5052 = vrot.lane.b32.xlu1 %v11226_v44, %s6455_s19 }
 0x8bc   : > { %v11339_v33 = vpop.permute.xlu2 %4921 }
 0x8bd   : > { %5054 = vrot.lane.b32.xlu2 %v11238_v5, %s6455_s19  ;;  %5050 = vrot.lane.b32.xlu0 %v11218_v11, %s6455_s19 }
 0x8be   : > { %5058 = vrot.lane.b32.xlu1 %v11242_v19, %s6455_s19 }
 0x8c4   : > { %v11366_v43 = vpop.permute.xlu0 %4917 }
 0x8c5   : > { %5060 = vrot.lane.b32.xlu2 %v11248_v27, %s6455_s19  ;;  %5056 = vrot.lane.b32.xlu0 %v11233_v53, %s6455_s19 }
 0x8c6   : > { %5064 = vrot.lane.b32.xlu1 %v11250_v3, %s6455_s19 }
 0x8c9   : > { %v11351_v63 = vpop.permute.xlu2 %4927 }
 0x8cc   : > { %v11358_v23 = vpop.permute.xlu1 %4919 }
 0x8cd   : > { %5066 = vrot.lane.b32.xlu2 %v11260_v45, %s6455_s19  ;;  %5062 = vrot.lane.b32.xlu0 %v11258_v56, %s6455_s19 }
 0x8ce   : > { %5070 = vrot.lane.b32.xlu1 %v11273_v55, %s6455_s19 }
 0x8d1   : > { %v11364_v60 = vpop.permute.xlu2 %4933 }
 0x8d2   : > { %13545 = vst [vmem:[#allocation45_spill] sm:$0xff] %v11364_v60 }
 0x8d5   : > { %5072 = vrot.lane.b32.xlu2 %v11277_v7, %s6455_s19  ;;  %5068 = vrot.lane.b32.xlu0 %v11267_v52, %s6455_s19 }
 0x8d6   : > { %5076 = vrot.lane.b32.xlu1 %v11290_v48, %s6455_s19 }
 0x8d9   : > { %v11368_v30 = vpop.permute.xlu1 %4925 }
 0x8dd   : > { %5078 = vrot.lane.b32.xlu2 %v11298_v16, %s6455_s19  ;;  %5074 = vrot.lane.b32.xlu0 %v11282_v8, %s6455_s19  ;;  %v11378_v12 = vpop.permute.xlu0 %4923 }
 0x8de   : > { %5129 = vperm.xlu1 %6387, %v6295_v46  }
 0x8e5   : > { %5134 = vperm.xlu2 %6385, %v6296_v50   ;;  %5124 = vperm.xlu0 %6386, %v6294_v38   ;;  %v11501_v38 = vperm.slane %v6298_v57, 1 }
 0x8e6   : > { %5179 = vrot.lane.b32.xlu1 %v11213_v42, %s6456_s16 }
 0x8e9   : > { %v11376_v15 = vpop.permute.xlu2 %4939  ;;  %v11390_v28 = vpop.permute.xlu0 %4929 }
 0x8ed   : > { %5181 = vrot.lane.b32.xlu2 %v11218_v11, %s6456_s16  ;;  %5139 = vperm.xlu0 %6386, %v6297_v29   ;;  %v4959_v29 = vsel %vm271_vm0, %v11339_v33, %v11390_v28 }
 0x8ee   : > { %5185 = vrot.lane.b32.xlu1 %v11238_v5, %s6456_s16 }
 0x8f1   : > { %v11380_v39 = vpop.permute.xlu1 %4931  ;;  %v11406_v59 = vpop.permute.xlu0 %4935 }
 0x8f5   : > { %5187 = vrot.lane.b32.xlu2 %v11233_v53, %s6456_s16  ;;  %5183 = vrot.lane.b32.xlu0 %v11226_v44, %s6456_s16 }
 0x8f6   : > { %5191 = vrot.lane.b32.xlu1 %v11248_v27, %s6456_s16 }
 0x8f9   : > { %v11398_v9 = vpop.permute.xlu1 %4937 }
 0x8fd   : > { %5193 = vrot.lane.b32.xlu2 %v11258_v56, %s6456_s16  ;;  %5189 = vrot.lane.b32.xlu0 %v11242_v19, %s6456_s16 }
 0x8fe   : > { %5197 = vrot.lane.b32.xlu1 %v11260_v45, %s6456_s16 }
 0x8ff   : > { %v11388_v20 = vpop.permute.xlu2 %4945 }
 0x905   : > { %5199 = vrot.lane.b32.xlu2 %v11267_v52, %s6456_s16  ;;  %5195 = vrot.lane.b32.xlu0 %v11250_v3, %s6456_s16 }
 0x906   : > { %5203 = vrot.lane.b32.xlu1 %v11277_v7, %s6456_s16 }
 0x907   : > { %v11400_v49 = vpop.permute.xlu2 %4998  ;;  %v11420_v32 = vpop.permute.xlu0 %4941 }
 0x908   : > { %13546 = vst [vmem:[#allocation59_spill] sm:$0xff] %v11420_v32 }
 0x90d   : > { %5205 = vrot.lane.b32.xlu2 %v11282_v8, %s6456_s16  ;;  %5201 = vrot.lane.b32.xlu0 %v11273_v55, %s6456_s16 }
 0x90e   : > { %5209 = vrot.lane.b32.xlu1 %v11298_v16, %s6456_s16 }
 0x90f   : > { %v5049_v54 = vpop.permute.xlu2 %5048  ;;  %v11410_v13 = vpop.permute.xlu1 %4943 }
 0x915   : > { %5255 = vperm.xlu2 %6385, %v6299_v47   ;;  %5207 = vrot.lane.b32.xlu0 %v11290_v48, %s6456_s16  ;;  %s6084_s16 = scalar_lea.hbm %s12619_s6, %s6334_s12 }
 0x916   : > { %5265 = vperm.xlu1 %6387, %v6301_v4   ;;  %s6088_s19 = sshll.u32 %s6084_s16, 4  ;;  %s6089_s19 = int_to_ptr.hbm [resolvable:$true] %s6088_s19 }
 0x917   : > { %v5055_v26 = vpop.permute.xlu2 %5054  ;;  %v11422_v34 = vpop.permute.xlu1 %4993  ;;  %s6403_s17 = sshra.s32 %s6089_s19, 4  ;;  %s6404_s17 = int_to_ptr.hbm [resolvable:$true] %s6403_s17 }
 0x918   : > { %p6410_p0 = scmp.lt.s32.totalorder %s6404_s17, %s12619_s6 }
 0x91d   : > { %5270 = vperm.xlu2 %6385, %v6302_v40   ;;  %5260 = vperm.xlu0 %6386, %v6300_v10  }
 0x91e   : > { %5312 = vrot.lane.b32.xlu1 %v11218_v11, %s6457_s14 }
 0x91f   : > { %v11432_v14 = vpop.permute.xlu2 %5060  ;;  %v11434_v25 = vpop.permute.xlu0 %4947 }
 0x920   : > { %v11436_v41 = vpop.permute.xlu1 %5008 }
 0x925   : > { %5314 = vrot.lane.b32.xlu2 %v11226_v44, %s6457_s14  ;;  %5310 = vrot.lane.b32.xlu0 %v11213_v42, %s6457_s14 }
 0x926   : > { %5318 = vrot.lane.b32.xlu1 %v11233_v53, %s6457_s14 }
 0x927   : > { %v11444_v31 = vpop.permute.xlu2 %5066  ;;  %v11446_v18 = vpop.permute.xlu0 %5003 }
 0x928   : > { %v5053_v22 = vpop.permute.xlu1 %5052 }
 0x929   : > { %v5090_v17 = vsel %vm359_vm2, %v5053_v22, %v11432_v14 }
 0x92a   : > { %v5115_v4 = vmul.f32 %v11501_v38, %v5090_v17 }
 0x92d   : > { %5320 = vrot.lane.b32.xlu2 %v11242_v19, %s6457_s14  ;;  %5316 = vrot.lane.b32.xlu0 %v11238_v5, %s6457_s14 }
 0x92e   : > { %5324 = vrot.lane.b32.xlu1 %v11258_v56, %s6457_s14 }
 0x92f   : > { %v5073_v51 = vpop.permute.xlu2 %5072  ;;  %v11457_v2 = vpop.permute.xlu0 %5050 }
 0x930   : > { %v11461_v0 = vsel %vm359_vm2, %v5073_v51, %v5049_v54  ;;  %v5059_v1 = vpop.permute.xlu1 %5058 }
 0x931   : > { %v11466_v35 = vsel %vm359_vm2, %v5059_v1, %v11444_v31  ;;  %v11471_v62 = vsel %vm359_vm2, %v11457_v2, %v5059_v1 }
 0x935   : > { %5326 = vrot.lane.b32.xlu2 %v11250_v3, %s6457_s14  ;;  %5322 = vrot.lane.b32.xlu0 %v11248_v27, %s6457_s14 }
 0x936   : > { %5330 = vrot.lane.b32.xlu1 %v11267_v52, %s6457_s14 }
 0x937   : > { %v5079_v6 = vpop.permute.xlu2 %5078  ;;  %v5057_v37 = vpop.permute.xlu0 %5056 }
 0x938   : > { %v11484_v36 = vsel %vm359_vm2, %v5079_v6, %v5055_v26  ;;  %v5065_v61 = vpop.permute.xlu1 %5064  ;;  %v11488_v24 = vsel %vm359_vm2, %v5049_v54, %v5057_v37  ;;  %v11507_v54 = vperm.slane %v4965_v58, 1 }
 0x939   : > { %v11495_v46 = vsel %vm359_vm2, %v5065_v61, %v5073_v51  ;;  %v11499_v50 = vsel %vm359_vm2, %v5057_v37, %v5065_v61 }
 0x93a   : > { %v4984_v47 = vmul.f32 %v11507_v54, %v4959_v29 }
 0x93c   : > { %v5020_v51 = vmul.f32 %v11446_v18, %v4984_v47  ;;  %v6304_v47 = vld [vmem:[%s12618_s5 + $0x60] sm:$0xff] }
 0x93d   : > { %5332 = vrot.lane.b32.xlu2 %v11273_v55, %s6457_s14  ;;  %5328 = vrot.lane.b32.xlu0 %v11260_v45, %s6457_s14 }
 0x93e   : > { %5336 = vrot.lane.b32.xlu1 %v11282_v8, %s6457_s14 }
 0x93f   : > { %v5135_v40 = vpop.permute.xlu2 %5134  ;;  %v5063_v10 = vpop.permute.xlu0 %5062 }
 0x940   : > { %v5151_v1 = vmul.f32 %v5135_v40, %v5115_v4  ;;  %v5071_v37 = vpop.permute.xlu1 %5070  ;;  %v11520_v61 = vsel %vm359_vm2, %v5055_v26, %v5063_v10  ;;  %v11539_v26 = vperm.slane %v4965_v58, 2  ;;  %v11545_v4 = vperm.slane %v4965_v58, 0 }
 0x941   : > { %v11524_v45 = vsel %vm359_vm2, %v5071_v37, %v5079_v6  ;;  %v11528_v17 = vsel %vm359_vm2, %v5063_v10, %v5071_v37  ;;  %v4955_v6 = vsel %vm271_vm0, %v11390_v28, %v11398_v9  ;;  %v11547_v10 = vperm.slane %v4965_v58, 3 }
 0x942   : > { %v11530_v29 = vadd.f32 %v5151_v1, %v5020_v51  ;;  %v4958_v51 = vsel %vm271_vm0, %v11358_v23, %v11351_v63  ;;  %v4951_v1 = vsel %vm271_vm0, %v11398_v9, %v11388_v20  ;;  %v4963_v28 = vsel %vm271_vm0, %v11388_v20, %v11339_v33 }
 0x943   : > { %v11561_v37 = vperm.slane %v6298_v57, 2  ;;  %v4985_v33 = vmul.f32 %v11539_v26, %v4955_v6 }
 0x944   : > { %13547 = vst [vmem:[#allocation10_spill] sm:$0xff] %v11530_v29  ;;  %v4954_v29 = vsel %vm271_vm0, %v11351_v63, %v11406_v59  ;;  %v4983_v63 = vmul.f32 %v11545_v4, %v4963_v28 }
 0x945   : > { %5338 = vrot.lane.b32.xlu2 %v11290_v48, %s6457_s14  ;;  %5334 = vrot.lane.b32.xlu0 %v11277_v7, %s6457_s14  ;;  %v11569_v7 = vperm.slane %v6298_v57, 0  ;;  %v11571_v48 = vperm.slane %v6298_v57, 3  ;;  %v4986_v57 = vmul.f32 %v11547_v10, %v4951_v1  ;;  %v5021_v6 = vmul.f32 %v11446_v18, %v4985_v33 }
 0x946   : > { %5386 = vperm.xlu1 %6387, %v6304_v47   ;;  %v5019_v28 = vmul.f32 %v11446_v18, %v4983_v63  ;;  %v4981_v60 = vmul.f32 %v11539_v26, %v4954_v29 }
 0x947   : > { %v11563_v58 = vpop.permute.xlu2 %5181  ;;  %v5069_v47 = vpop.permute.xlu0 %5068 }
 0x948   : > { %v5077_v9 = vpop.permute.xlu1 %5076  ;;  %v5086_v8 = vsel %vm359_vm2, %v11432_v14, %v5069_v47  ;;  %v6305_v14 = vld [vmem:[%s12618_s5 + $0x68] sm:$0xff] }
 0x949   : > { %v5094_v20 = vsel %vm359_vm2, %v5077_v9, %v5053_v22  ;;  %v5082_v55 = vsel %vm359_vm2, %v5069_v47, %v5077_v9  ;;  %v5116_v52 = vmul.f32 %v11561_v37, %v5086_v8  ;;  %v4950_v22 = vsel %vm271_vm0, %v11406_v59, %v11410_v13 }
 0x94a   : > { %v5114_v27 = vmul.f32 %v11569_v7, %v5094_v20  ;;  %v5117_v3 = vmul.f32 %v11571_v48, %v5082_v55  ;;  %v4962_v8 = vsel %vm271_vm0, %v11410_v13, %v11358_v23  ;;  %v6307_v55 = vld [vmem:[%s12618_s5 + $0x78] sm:$0xff]  ;;  %v5022_v47 = vmul.f32 %v11446_v18, %v4986_v57 }
 0x94b   : > { %v5152_v1 = vmul.f32 %v5135_v40, %v5116_v52  ;;  %v4980_v59 = vmul.f32 %v11507_v54, %v4958_v51  ;;  %v4979_v52 = vmul.f32 %v11545_v4, %v4962_v8  ;;  %v4982_v23 = vmul.f32 %v11547_v10, %v4950_v22 }
 0x94c   : > { %v5150_v9 = vmul.f32 %v5135_v40, %v5114_v27  ;;  %v5153_v20 = vmul.f32 %v5135_v40, %v5117_v3  ;;  %v5112_v27 = vmul.f32 %v11561_v37, %v11466_v35  ;;  %v5111_v3 = vmul.f32 %v11501_v38, %v11471_v62 }
 0x94d   : > { %v11605_v32 = vadd.f32 %v5152_v1, %v5021_v6  ;;  %5391 = vperm.xlu2 %6385, %v6305_v14   ;;  %5340 = vrot.lane.b32.xlu0 %v11298_v16, %s6457_s14  ;;  %v5016_v29 = vmul.f32 %v11400_v49, %v4980_v59  ;;  %v5017_v51 = vmul.f32 %v11400_v49, %v4981_v60  ;;  %v6309_v60 = vld [vmem:[%s12618_s5 + $0x80] sm:$0xff]  ;;  %s6086_s14 = sshll.u32 %s242_s25, 4  ;;  %s6087_s14 = int_to_ptr.vmem [resolvable:$true] %s6086_s14 }
 0x94e   : > { %v11611_v13 = vadd.f32 %v5150_v9, %v5019_v28  ;;  %v11613_v33 = vadd.f32 %v5153_v20, %v5022_v47  ;;  %5401 = vperm.xlu1 %6387, %v6307_v55   ;;  %v5015_v6 = vmul.f32 %v11400_v49, %v4979_v52  ;;  %v5018_v1 = vmul.f32 %v11400_v49, %v4982_v23  ;;  %v6311_v9 = vld [vmem:[%s12618_s5 + $0x90] sm:$0xff] }
 0x94f   : > { %v11619_v18 = vpop.permute.xlu2 %5187  ;;  %v5075_v40 = vpop.permute.xlu0 %5074  ;;  %v5106_v59 = vmul.f32 %v11569_v7, %v11461_v0  ;;  %v5109_v52 = vmul.f32 %v11571_v48, %v11495_v46  ;;  %v5107_v23 = vmul.f32 %v11501_v38, %v11488_v24 }
 0x950   : > { %v5130_v63 = vpop.permute.xlu1 %5129  ;;  %v5081_v57 = vsel %vm359_vm2, %v11444_v31, %v5075_v40  ;;  %v5093_v14 = vsel %vm359_vm2, %v5075_v40, %v11457_v2  ;;  %v6306_v31 = vld [vmem:[%s12618_s5 + $0x70] sm:$0xff] }
 0x951   : > { %v5147_v35 = vmul.f32 %v5130_v63, %v5111_v3  ;;  %v5148_v22 = vmul.f32 %v5130_v63, %v5112_v27  ;;  %v5110_v62 = vmul.f32 %v11569_v7, %v5093_v14  ;;  %v5113_v8 = vmul.f32 %v11571_v48, %v5081_v57 }
 0x952   : > { %v5108_v27 = vmul.f32 %v11561_v37, %v11499_v50  ;;  %v4964_v3 = vsel %vm271_vm0, %v11434_v25, %v11378_v12  ;;  %v4956_v57 = vsel %vm271_vm0, %v11380_v39, %v11376_v15  ;;  %v4960_v14 = vsel %vm271_vm0, %v11378_v12, %v11380_v39 }
 0x953   : > { %v11639_v55 = vadd.f32 %v5147_v35, %v5016_v29  ;;  %v11641_v2 = vadd.f32 %v5148_v22, %v5017_v51  ;;  %v5146_v28 = vmul.f32 %v5130_v63, %v5110_v62  ;;  %v5149_v47 = vmul.f32 %v5130_v63, %v5113_v8  ;;  %v6312_v22 = vld [vmem:[%s12618_s5 + $0x98] sm:$0xff]  ;;  %v6310_v62 = vld [vmem:[%s12618_s5 + $0x88] sm:$0xff] }
 0x954   : > { %v4952_v35 = vsel %vm271_vm0, %v11376_v15, %v11434_v25  ;;  %v4987_v8 = vmul.f32 %v11545_v4, %v4964_v3  ;;  %v5118_v15 = vmul.f32 %v11569_v7, %v11484_v36  ;;  %v5121_v39 = vmul.f32 %v11571_v48, %v11524_v45 }
 0x955   : > { %v11646_v20 = vadd.f32 %v5146_v28, %v5015_v6  ;;  %v11648_v49 = vadd.f32 %v5149_v47, %v5018_v1  ;;  %5443 = vperm.xlu2 %6385, %v6309_v60   ;;  %5396 = vperm.xlu0 %6386, %v6306_v31   ;;  %v4988_v6 = vmul.f32 %v11507_v54, %v4960_v14 }
 0x956   : > { %5453 = vperm.xlu1 %6387, %v6311_v9   ;;  %v4989_v1 = vmul.f32 %v11539_v26, %v4956_v57  ;;  %v4990_v12 = vmul.f32 %v11547_v10, %v4952_v35  ;;  %v5119_v25 = vmul.f32 %v11501_v38, %v11520_v61  ;;  %v5120_v60 = vmul.f32 %v11561_v37, %v11528_v17 }
 0x957   : > { %v11662_v40 = vpop.permute.xlu2 %5193  ;;  %v5125_v29 = vpop.permute.xlu0 %5124  ;;  %v5024_v31 = vmul.f32 %v11436_v41, %v4988_v6  ;;  %v5023_v47 = vmul.f32 %v11436_v41, %v4987_v8  ;;  %v4957_v35 = vsel %vm271_vm0, %v11366_v43, %v11368_v30 }
 0x958   : > { %v11664_v51 = vpop.permute.xlu1 %5179  ;;  %v11666_v0 = vmul.f32 %v5125_v29, %v5106_v59  ;;  %v5143_v46 = vmul.f32 %v5125_v29, %v5107_v23  ;;  %v11668_v63 = vmul.f32 %v5125_v29, %v5108_v27  ;;  %v11670_v24 = vmul.f32 %v5125_v29, %v5109_v52 }
 0x959   : > { %v5219_v50 = vsel %vm448_vm1, %v11664_v51, %v11619_v18  ;;  %v5025_v28 = vmul.f32 %v11436_v41, %v4989_v1  ;;  %v5026_v17 = vmul.f32 %v11436_v41, %v4990_v12  ;;  %v6303_v41 = vld [vmem:[%s12614_s1 + $0x8] sm:$0xf]  ;;  %v4976_v6 = vmul.f32 %v11507_v54, %v4957_v35 }
 0x95a   : > { %v11756_v8 = vperm.slane %v6303_v41, 1 }
 0x95b   : > { %v5012_v1 = vmul.f32 %v11422_v34, %v4976_v6  ;;  %v11805_v6 = vperm.slane %v6303_v41, 2 }
 0x95c   : > { %v5238_v12 = vmul.f32 %v11756_v8, %v5219_v50 }
 0x95d   : > { %5458 = vperm.xlu2 %6385, %v6312_v22   ;;  %5448 = vperm.xlu0 %6386, %v6310_v62  }
 0x95e   : > { %5500 = vrot.lane.b32.xlu1 %v11218_v11, %s6458_s10 }
 0x95f   : > { %v11711_v9 = vpop.permute.xlu2 %5199  ;;  %v5140_v7 = vpop.permute.xlu0 %5139 }
 0x960   : > { %v11713_v36 = vpop.permute.xlu1 %5185  ;;  %v5154_v45 = vmul.f32 %v5140_v7, %v5118_v15  ;;  %v5155_v48 = vmul.f32 %v5140_v7, %v5119_v25  ;;  %v5156_v38 = vmul.f32 %v5140_v7, %v5120_v60  ;;  %v5157_v61 = vmul.f32 %v5140_v7, %v5121_v39 }
 0x961   : > { %v5222_v37 = vsel %vm448_vm1, %v11713_v36, %v11662_v40  ;;  %v5159_v25 = vadd.f32 %v5143_v46, %v5012_v1 }
 0x962   : > { %v11720_v59 = vadd.f32 %v5154_v45, %v5023_v47  ;;  %v5171_v52 = vadd.f32 %v5155_v48, %v5024_v31  ;;  %v11722_v23 = vadd.f32 %v5156_v38, %v5025_v28  ;;  %v11724_v27 = vadd.f32 %v5157_v61, %v5026_v17  ;;  %v13548_v47 = vld [vmem:[#allocation59_spill] sm:$0xff]  ;;  %v13549_v45 = vld [vmem:[#allocation45_spill] sm:$0xff]  ;;  %v13550_v61 = vld [vmem:[#allocation42_spill] sm:$0xff] }
 0x963   : > { %v4961_v46 = vsel %vm271_vm0, %v13548_v47, %v11366_v43  ;;  %v4949_v48 = vsel %vm271_vm0, %v13549_v45, %v13548_v47  ;;  %v13551_v17 = vld [vmem:[#allocation24_spill] sm:$0xff]  ;;  %v5250_v43 = vmul.f32 %v11756_v8, %v5222_v37 }
 0x964   : > { %v4975_v38 = vmul.f32 %v11545_v4, %v4961_v46 }
 0x965   : > { %5502 = vrot.lane.b32.xlu2 %v11226_v44, %s6458_s10  ;;  %5498 = vrot.lane.b32.xlu0 %v11213_v42, %s6458_s10 }
 0x966   : > { %5506 = vrot.lane.b32.xlu1 %v11233_v53, %s6458_s10  ;;  %v5011_v35 = vmul.f32 %v11422_v34, %v4975_v38 }
 0x967   : > { %v5206_v3 = vpop.permute.xlu2 %5205  ;;  %v11735_v29 = vpop.permute.xlu0 %5183 }
 0x968   : > { %v11740_v57 = vsel %vm448_vm1, %v5206_v3, %v11563_v58  ;;  %v5192_v14 = vpop.permute.xlu1 %5191  ;;  %v5158_v38 = vadd.f32 %v11666_v0, %v5011_v35 }
 0x969   : > { %v11749_v22 = vsel %vm448_vm1, %v5192_v14, %v11711_v9  ;;  %v11754_v62 = vsel %vm448_vm1, %v11735_v29, %v5192_v14  ;;  %v4978_v14 = vmul.f32 %v11547_v10, %v4949_v48 }
 0x96d   : > { %5508 = vrot.lane.b32.xlu2 %v11242_v19, %s6458_s10  ;;  %5504 = vrot.lane.b32.xlu0 %v11238_v5, %s6458_s10 }
 0x96e   : > { %5512 = vrot.lane.b32.xlu1 %v11258_v56, %s6458_s10 }
 0x96f   : > { %v5256_v15 = vpop.permute.xlu2 %5255  ;;  %v5190_v39 = vpop.permute.xlu0 %5189 }
 0x970   : > { %v5274_v60 = vmul.f32 %v5256_v15, %v5238_v12  ;;  %v5198_v31 = vpop.permute.xlu1 %5197  ;;  %v11770_v54 = vsel %vm448_vm1, %v11563_v58, %v5190_v39  ;;  %v4953_v58 = vsel %vm271_vm0, %v11368_v30, %v13549_v45  ;;  %v11807_v12 = vperm.slane %v6303_v41, 0 }
 0x971   : > { %v11774_v28 = vsel %vm448_vm1, %v5198_v31, %v5206_v3  ;;  %v11778_v50 = vsel %vm448_vm1, %v5190_v39, %v5198_v31  ;;  %v13552_v3 = vld [vmem:[#allocation19_spill] sm:$0xff]  ;;  %v4977_v30 = vmul.f32 %v11539_v26, %v4953_v58  ;;  %v11809_v39 = vperm.slane %v6303_v41, 3 }
 0x972   : > { %v11784_v7 = vadd.f32 %v5274_v60, %v5159_v25  ;;  %v5014_v41 = vmul.f32 %v11422_v34, %v4978_v14 }
 0x973   : > { %v5013_v26 = vmul.f32 %v11422_v34, %v4977_v30  ;;  %v13554_v34 = vld [vmem:[#allocation18_spill] sm:$0xff] }
 0x975   : > { %5514 = vrot.lane.b32.xlu2 %v13550_v61, %s6458_s10  ;;  %5510 = vrot.lane.b32.xlu0 %v13551_v17, %s6458_s10 }
 0x976   : > { %5518 = vrot.lane.b32.xlu1 %v13552_v3, %s6458_s10 }
 0x977   : > { %v5271_v4 = vpop.permute.xlu2 %5270  ;;  %v5196_v1 = vpop.permute.xlu0 %5195 }
 0x978   : > { %v5286_v25 = vmul.f32 %v5271_v4, %v5250_v43  ;;  %v5204_v60 = vpop.permute.xlu1 %5203  ;;  %v5215_v37 = vsel %vm448_vm1, %v11619_v18, %v5196_v1  ;;  %v5160_v18 = vadd.f32 %v11668_v63, %v5013_v26  ;;  %v13555_v63 = vld [vmem:[#allocation37_spill] sm:$0xff] }
 0x979   : > { %v5223_v10 = vsel %vm448_vm1, %v5204_v60, %v11664_v51  ;;  %v5211_v31 = vsel %vm448_vm1, %v5196_v1, %v5204_v60  ;;  %v5239_v47 = vmul.f32 %v11805_v6, %v5215_v37  ;;  %v5161_v51 = vadd.f32 %v11670_v24, %v5014_v41  ;;  %v13553_v60 = vld [vmem:[#allocation72_spill] sm:$0xff]  ;;  %v6313_v41 = vld [vmem:[%s12618_s5 + $0xa0] sm:$0xff] }
 0x97a   : > { %v11822_v46 = vadd.f32 %v5286_v25, %v5171_v52  ;;  %v5237_v45 = vmul.f32 %v11807_v12, %v5223_v10  ;;  %v5240_v58 = vmul.f32 %v11809_v39, %v5211_v31 }
 0x97b   : > { %v5275_v48 = vmul.f32 %v5256_v15, %v5239_v47 }
 0x97c   : > { %v5273_v43 = vmul.f32 %v5256_v15, %v5237_v45  ;;  %v5276_v30 = vmul.f32 %v5256_v15, %v5240_v58 }
 0x97d   : > { %v11829_v1 = vadd.f32 %v5275_v48, %v5160_v18  ;;  %5520 = vrot.lane.b32.xlu2 %v13553_v60, %s6458_s10  ;;  %5516 = vrot.lane.b32.xlu0 %v13554_v34, %s6458_s10  ;;  %v13557_v18 = vld [vmem:[#allocation43_spill] sm:$0xff] }
 0x97e   : > { %v11835_v52 = vadd.f32 %v5273_v43, %v5158_v38  ;;  %v11837_v14 = vadd.f32 %v5276_v30, %v5161_v51  ;;  %5524 = vrot.lane.b32.xlu1 %v13555_v63, %s6458_s10  ;;  %v5247_v51 = vmul.f32 %v11805_v6, %v11749_v22 }
 0x97f   : > { %v11841_v0 = vpop.permute.xlu2 %5314  ;;  %v5202_v24 = vpop.permute.xlu0 %5201 }
 0x980   : > { %v5210_v35 = vpop.permute.xlu1 %5209  ;;  %v5218_v15 = vsel %vm448_vm1, %v11662_v40, %v5202_v24 }
 0x981   : > { %v5226_v25 = vsel %vm448_vm1, %v5210_v35, %v11713_v36  ;;  %v5214_v37 = vsel %vm448_vm1, %v5202_v24, %v5210_v35  ;;  %v5251_v26 = vmul.f32 %v11805_v6, %v5218_v15  ;;  %v13556_v36 = vld [vmem:[#allocation48_spill] sm:$0xff] }
 0x982   : > { %v5249_v10 = vmul.f32 %v11807_v12, %v5226_v25  ;;  %v5252_v31 = vmul.f32 %v11809_v39, %v5214_v37  ;;  %v13558_v25 = vld [vmem:[#allocation10_spill] sm:$0xff] }
 0x983   : > { %v5287_v47 = vmul.f32 %v5271_v4, %v5251_v26 }
 0x984   : > { %v5285_v45 = vmul.f32 %v5271_v4, %v5249_v10  ;;  %v5288_v40 = vmul.f32 %v5271_v4, %v5252_v31 }
 0x985   : > { %v11858_v58 = vadd.f32 %v5287_v47, %v11722_v23  ;;  %5526 = vrot.lane.b32.xlu2 %v13556_v36, %s6458_s10  ;;  %5522 = vrot.lane.b32.xlu0 %v13557_v18, %s6458_s10  ;;  %v5246_v23 = vmul.f32 %v11756_v8, %v11754_v62  ;;  %v6314_v62 = vld [vmem:[%s12618_s5 + $0xa8] sm:$0xff] }
 0x986   : > { %v11865_v48 = vadd.f32 %v5285_v45, %v11720_v59  ;;  %v11868_v38 = vadd.f32 %v5288_v40, %v11724_v27  ;;  %5574 = vperm.xlu1 %6387, %v6313_v41   ;;  %v5244_v41 = vmul.f32 %v11809_v39, %v11774_v28  ;;  %v5242_v45 = vmul.f32 %v11756_v8, %v11770_v54 }
 0x987   : > { %v11874_v4 = vpop.permute.xlu2 %5320  ;;  %v5208_v43 = vpop.permute.xlu0 %5207 }
 0x988   : > { %v5266_v30 = vpop.permute.xlu1 %5265  ;;  %v5213_v24 = vsel %vm448_vm1, %v11711_v9, %v5208_v43  ;;  %v5225_v59 = vsel %vm448_vm1, %v5208_v43, %v11735_v29  ;;  %v6316_v29 = vld [vmem:[%s12618_s5 + $0xb8] sm:$0xff] }
 0x989   : > { %v5282_v27 = vmul.f32 %v5266_v30, %v5246_v23  ;;  %v5283_v35 = vmul.f32 %v5266_v30, %v5247_v51  ;;  %v5245_v15 = vmul.f32 %v11807_v12, %v5225_v59  ;;  %v5248_v22 = vmul.f32 %v11809_v39, %v5213_v24 }
 0x98b   : > { %v11888_v37 = vadd.f32 %v5282_v27, %v13558_v25  ;;  %v11891_v26 = vadd.f32 %v5283_v35, %v11605_v32  ;;  %v5281_v9 = vmul.f32 %v5266_v30, %v5245_v15  ;;  %v5284_v10 = vmul.f32 %v5266_v30, %v5248_v22 }
 0x98c   : > { %v5241_v32 = vmul.f32 %v11807_v12, %v11740_v57 }
 0x98d   : > { %v11897_v31 = vadd.f32 %v5281_v9, %v11611_v13  ;;  %v11900_v47 = vadd.f32 %v5284_v10, %v11613_v33  ;;  %5579 = vperm.xlu2 %6385, %v6314_v62   ;;  %5528 = vrot.lane.b32.xlu0 %v11298_v16, %s6458_s10  ;;  %v5243_v13 = vmul.f32 %v11805_v6, %v11778_v50  ;;  %v6315_v50 = vld [vmem:[%s12618_s5 + $0xb0] sm:$0xff] }
 0x98e   : > { %5589 = vperm.xlu1 %6387, %v6316_v29  }
 0x98f   : > { %v11912_v40 = vpop.permute.xlu2 %5326  ;;  %v5261_v33 = vpop.permute.xlu0 %5260 }
 0x990   : > { %v5313_v51 = vpop.permute.xlu1 %5312  ;;  %v5277_v23 = vmul.f32 %v5261_v33, %v5241_v32  ;;  %v5278_v43 = vmul.f32 %v5261_v33, %v5242_v45  ;;  %v5279_v30 = vmul.f32 %v5261_v33, %v5243_v13  ;;  %v5280_v24 = vmul.f32 %v5261_v33, %v5244_v41 }
 0x991   : > { %v5351_v57 = vsel %vm537_vm3, %v5313_v51, %v11874_v4 }
 0x992   : > { %v5293_v28 = vadd.f32 %v5277_v23, %v11646_v20  ;;  %v5294_v8 = vadd.f32 %v5278_v43, %v11639_v55  ;;  %v5295_v54 = vadd.f32 %v5279_v30, %v11641_v2  ;;  %v5296_v6 = vadd.f32 %v5280_v24, %v11648_v49  ;;  %v6308_v49 = vld [vmem:[%s12614_s1 + $0xc] sm:$0xf] }
 0x993   : > { %v11961_v25 = vperm.slane %v6308_v49, 1  ;;  %v11991_v30 = vperm.slane %v6308_v49, 2  ;;  %v11993_v24 = vperm.slane %v6308_v49, 0 }
 0x995   : > { %5629 = vrot.lane.b32.xlu2 %v11213_v42, %s6459_s9  ;;  %5584 = vperm.xlu0 %6386, %v6315_v50   ;;  %v5373_v9 = vmul.f32 %v11961_v25, %v5351_v57  ;;  %v11995_v57 = vperm.slane %v6308_v49, 3 }
 0x996   : > { %5633 = vrot.lane.b32.xlu1 %v11226_v44, %s6459_s9 }
 0x997   : > { %v11928_v12 = vpop.permute.xlu2 %5332  ;;  %v5311_v20 = vpop.permute.xlu0 %5310 }
 0x998   : > { %v5319_v39 = vpop.permute.xlu1 %5318 }
 0x999   : > { %v5346_v55 = vsel %vm537_vm3, %v5319_v39, %v11912_v40  ;;  %v5350_v2 = vsel %vm537_vm3, %v5311_v20, %v5319_v39 }
 0x99d   : > { %5635 = vrot.lane.b32.xlu2 %v11238_v5, %s6459_s9  ;;  %5631 = vrot.lane.b32.xlu0 %v11218_v11, %s6459_s9 }
 0x99e   : > { %5639 = vrot.lane.b32.xlu1 %v11242_v19, %s6459_s9 }
 0x99f   : > { %v5339_v59 = vpop.permute.xlu2 %5338  ;;  %v11944_v27 = vpop.permute.xlu0 %5316 }
 0x9a0   : > { %v11949_v35 = vsel %vm537_vm3, %v5339_v59, %v11841_v0  ;;  %v5325_v15 = vpop.permute.xlu1 %5324 }
 0x9a1   : > { %v11954_v22 = vsel %vm537_vm3, %v5325_v15, %v11928_v12  ;;  %v11959_v62 = vsel %vm537_vm3, %v11944_v27, %v5325_v15 }
 0x9a5   : > { %5641 = vrot.lane.b32.xlu2 %v13551_v17, %s6459_s9  ;;  %5637 = vrot.lane.b32.xlu0 %v11233_v53, %s6459_s9 }
 0x9a6   : > { %5645 = vrot.lane.b32.xlu1 %v13550_v61, %s6459_s9 }
 0x9a7   : > { %v5392_v10 = vpop.permute.xlu2 %5391  ;;  %v5323_v29 = vpop.permute.xlu0 %5322 }
 0x9a8   : > { %v5409_v32 = vmul.f32 %v5392_v10, %v5373_v9  ;;  %v5331_v41 = vpop.permute.xlu1 %5330  ;;  %v11973_v45 = vsel %vm537_vm3, %v11841_v0, %v5323_v29 }
 0x9a9   : > { %v11977_v13 = vsel %vm537_vm3, %v5331_v41, %v5339_v59  ;;  %v11981_v33 = vsel %vm537_vm3, %v5323_v29, %v5331_v41 }
 0x9aa   : > { %v11983_v23 = vadd.f32 %v5409_v32, %v5294_v8 }
 0x9ad   : > { %5647 = vrot.lane.b32.xlu2 %v13554_v34, %s6459_s9  ;;  %5643 = vrot.lane.b32.xlu0 %v11258_v56, %s6459_s9 }
 0x9ae   : > { %5651 = vrot.lane.b32.xlu1 %v13553_v60, %s6459_s9 }
 0x9af   : > { %v5444_v0 = vpop.permute.xlu2 %5443  ;;  %v5329_v43 = vpop.permute.xlu0 %5328 }
 0x9b0   : > { %v5337_v50 = vpop.permute.xlu1 %5336  ;;  %v5347_v59 = vsel %vm537_vm3, %v11874_v4, %v5329_v43 }
 0x9b1   : > { %v5355_v8 = vsel %vm537_vm3, %v5337_v50, %v5313_v51  ;;  %v5343_v39 = vsel %vm537_vm3, %v5329_v43, %v5337_v50  ;;  %v5374_v9 = vmul.f32 %v11991_v30, %v5347_v59  ;;  %v5370_v43 = vmul.f32 %v11991_v30, %v5346_v55 }
 0x9b2   : > { %v5372_v15 = vmul.f32 %v11993_v24, %v5355_v8  ;;  %v5375_v29 = vmul.f32 %v11995_v57, %v5343_v39  ;;  %v5369_v8 = vmul.f32 %v11961_v25, %v5350_v2  ;;  %v5462_v55 = vmul.f32 %v5444_v0, %v11233_v53 }
 0x9b3   : > { %v5410_v49 = vmul.f32 %v5392_v10, %v5374_v9  ;;  %v5463_v2 = vmul.f32 %v5444_v0, %v13550_v61 }
 0x9b4   : > { %v5408_v32 = vmul.f32 %v5392_v10, %v5372_v15  ;;  %v5411_v41 = vmul.f32 %v5392_v10, %v5375_v29 }
 0x9b5   : > { %5653 = vrot.lane.b32.xlu2 %v13557_v18, %s6459_s9  ;;  %5649 = vrot.lane.b32.xlu0 %v13552_v3, %s6459_s9  ;;  %v12013_v50 = vadd.f32 %v5410_v49, %v5295_v54 }
 0x9b6   : > { %v12011_v51 = vadd.f32 %v5408_v32, %v5293_v28  ;;  %v12015_v4 = vadd.f32 %v5411_v41, %v5296_v6  ;;  %5657 = vrot.lane.b32.xlu1 %v13556_v36, %s6459_s9  ;;  %v6319_v41 = vld [vmem:[%s12618_s5 + $0xc8] sm:$0xff] }
 0x9b7   : > { %v5459_v10 = vpop.permute.xlu2 %5458  ;;  %v5335_v39 = vpop.permute.xlu0 %5334 }
 0x9b8   : > { %v5387_v59 = vpop.permute.xlu1 %5386  ;;  %v5342_v28 = vsel %vm537_vm3, %v11912_v40, %v5335_v39  ;;  %v5354_v54 = vsel %vm537_vm3, %v5335_v39, %v5311_v20 }
 0x9b9   : > { %v5405_v15 = vmul.f32 %v5387_v59, %v5369_v8  ;;  %v5406_v9 = vmul.f32 %v5387_v59, %v5370_v43  ;;  %v5368_v6 = vmul.f32 %v11993_v24, %v5354_v54  ;;  %v5371_v29 = vmul.f32 %v11995_v57, %v5342_v28 }
 0x9bb   : > { %v5421_v32 = vadd.f32 %v5405_v15, %v11784_v7  ;;  %v5422_v49 = vadd.f32 %v5406_v9, %v11829_v1  ;;  %v5404_v40 = vmul.f32 %v5387_v59, %v5368_v6  ;;  %v5407_v43 = vmul.f32 %v5387_v59, %v5371_v29 }
 0x9bc   : > { %v5461_v7 = vmul.f32 %v5444_v0, %v11213_v42  ;;  %v5464_v1 = vmul.f32 %v5444_v0, %v13557_v18  ;;  %v5382_v59 = vmul.f32 %v11991_v30, %v11954_v22  ;;  %v5381_v9 = vmul.f32 %v11961_v25, %v11959_v62 }
 0x9bd   : > { %5659 = vrot.lane.b32.xlu2 %v11298_v16, %s6459_s9  ;;  %5655 = vrot.lane.b32.xlu0 %v13555_v63, %s6459_s9  ;;  %v12039_v20 = vadd.f32 %v5462_v55, %v5421_v32  ;;  %v12041_v8 = vadd.f32 %v5463_v2, %v5422_v49  ;;  %v5420_v39 = vadd.f32 %v5404_v40, %v11835_v52  ;;  %v6320_v49 = vld [vmem:[%s12618_s5 + $0xd0] sm:$0xff] }
 0x9be   : > { %v5423_v15 = vadd.f32 %v5407_v43, %v11837_v14  ;;  %5710 = vperm.xlu1 %6387, %v6319_v41   ;;  %v5474_v32 = vmul.f32 %v5459_v10, %v11258_v56 }
 0x9bf   : > { %v12051_v28 = vpop.permute.xlu2 %5502  ;;  %v5341_v54 = vpop.permute.xlu0 %5340  ;;  %v12053_v6 = vadd.f32 %v5461_v7, %v5420_v39  ;;  %v5376_v7 = vmul.f32 %v11993_v24, %v11949_v35  ;;  %v5475_v39 = vmul.f32 %v5459_v10, %v13553_v60  ;;  %v5377_v35 = vmul.f32 %v11961_v25, %v11973_v45 }
 0x9c0   : > { %v5402_v29 = vpop.permute.xlu1 %5401  ;;  %v5345_v0 = vsel %vm537_vm3, %v11928_v12, %v5341_v54  ;;  %v5357_v52 = vsel %vm537_vm3, %v5341_v54, %v11944_v27  ;;  %v12061_v14 = vadd.f32 %v5464_v1, %v5423_v15  ;;  %v6318_v12 = vld [vmem:[%s12618_s5 + $0xc0] sm:$0xff]  ;;  %v5473_v1 = vmul.f32 %v5459_v10, %v11238_v5 }
 0x9c1   : > { %v5417_v22 = vmul.f32 %v5402_v29, %v5381_v9  ;;  %v5418_v55 = vmul.f32 %v5402_v29, %v5382_v59  ;;  %v5380_v62 = vmul.f32 %v11993_v24, %v5357_v52  ;;  %v5383_v2 = vmul.f32 %v11995_v57, %v5345_v0 }
 0x9c2   : > { %v5476_v15 = vmul.f32 %v5459_v10, %v11298_v16  ;;  %v5378_v24 = vmul.f32 %v11991_v30, %v11981_v33 }
 0x9c3   : > { %v5433_v27 = vadd.f32 %v5417_v22, %v11822_v46  ;;  %v5434_v41 = vadd.f32 %v5418_v55, %v11858_v58  ;;  %v5416_v40 = vmul.f32 %v5402_v29, %v5380_v62  ;;  %v5419_v43 = vmul.f32 %v5402_v29, %v5383_v2 }
 0x9c4   : > { %v5379_v58 = vmul.f32 %v11995_v57, %v11977_v13 }
 0x9c5   : > { %v5432_v59 = vadd.f32 %v5416_v40, %v11865_v48  ;;  %v5435_v9 = vadd.f32 %v5419_v43, %v11868_v38  ;;  %5715 = vperm.xlu2 %6385, %v6320_v49   ;;  %5705 = vperm.xlu0 %6386, %v6318_v12   ;;  %v12081_v46 = vadd.f32 %v5474_v32, %v5433_v27  ;;  %v6321_v49 = vld [vmem:[%s12618_s5 + $0xd8] sm:$0xff] }
 0x9c6   : > { %5760 = vrot.lane.b32.xlu1 %v11213_v42, %s6460_s28  ;;  %v12091_v10 = vadd.f32 %v5475_v39, %v5434_v41 }
 0x9c7   : > { %v12093_v48 = vadd.f32 %v5473_v1, %v5432_v59  ;;  %v12095_v38 = vpop.permute.xlu2 %5508  ;;  %v5397_v54 = vpop.permute.xlu0 %5396  ;;  %v12097_v29 = vadd.f32 %v5476_v15, %v5435_v9 }
 0x9c8   : > { %v5454_v0 = vpop.permute.xlu1 %5453  ;;  %v5412_v13 = vmul.f32 %v5397_v54, %v5376_v7  ;;  %v5413_v57 = vmul.f32 %v5397_v54, %v5377_v35  ;;  %v5414_v52 = vmul.f32 %v5397_v54, %v5378_v24  ;;  %v5415_v25 = vmul.f32 %v5397_v54, %v5379_v58 }
 0x9c9   : > { %v5469_v45 = vmul.f32 %v5454_v0, %v11226_v44  ;;  %v5470_v33 = vmul.f32 %v5454_v0, %v13551_v17  ;;  %v5471_v30 = vmul.f32 %v5454_v0, %v13552_v3  ;;  %v5472_v22 = vmul.f32 %v5454_v0, %v13556_v36 }
 0x9ca   : > { %v5428_v55 = vadd.f32 %v5412_v13, %v11897_v31  ;;  %v5429_v62 = vadd.f32 %v5413_v57, %v11888_v37  ;;  %v5430_v2 = vadd.f32 %v5414_v52, %v11891_v26  ;;  %v5431_v32 = vadd.f32 %v5415_v25, %v11900_v47 }
 0x9cc   : > { %v12110_v12 = vadd.f32 %v5469_v45, %v5428_v55  ;;  %v12112_v27 = vadd.f32 %v5470_v33, %v5429_v62  ;;  %v12114_v41 = vadd.f32 %v5471_v30, %v5430_v2  ;;  %v12116_v40 = vadd.f32 %v5472_v22, %v5431_v32 }
 0x9cd   : > { %5762 = vrot.lane.b32.xlu2 %v11218_v11, %s6460_s28  ;;  %5720 = vperm.xlu0 %6386, %v6321_v49  }
 0x9ce   : > { %5766 = vrot.lane.b32.xlu1 %v11238_v5, %s6460_s28 }
 0x9cf   : > { %v12122_v37 = vpop.permute.xlu2 %5514  ;;  %v5449_v26 = vpop.permute.xlu0 %5448 }
 0x9d0   : > { %v5501_v31 = vpop.permute.xlu1 %5500  ;;  %v5465_v47 = vmul.f32 %v5449_v26, %v11218_v11  ;;  %v5466_v43 = vmul.f32 %v5449_v26, %v11242_v19  ;;  %v5467_v7 = vmul.f32 %v5449_v26, %v13554_v34  ;;  %v5468_v1 = vmul.f32 %v5449_v26, %v13555_v63 }
 0x9d1   : > { %v5539_v39 = vsel %vm683_vm4, %v5501_v31, %v12095_v38 }
 0x9d2   : > { %v5481_v15 = vadd.f32 %v5465_v47, %v12011_v51  ;;  %v5482_v59 = vadd.f32 %v5466_v43, %v11983_v23  ;;  %v5483_v9 = vadd.f32 %v5467_v7, %v12013_v50  ;;  %v5484_v58 = vadd.f32 %v5468_v1, %v12015_v4  ;;  %v6317_v50 = vld [vmem:[%s12614_s1 + $0x14] sm:$0xf] }
 0x9d3   : > { %v12174_v45 = vperm.slane %v6317_v50, 0  ;;  %v5551_v7 = vperm.slane %v6317_v50, 3  ;;  %v5550_v1 = vperm.slane %v6317_v50, 2 }
 0x9d5   : > { %5768 = vrot.lane.b32.xlu2 %v11233_v53, %s6460_s28  ;;  %5764 = vrot.lane.b32.xlu0 %v11226_v44, %s6460_s28  ;;  %v5560_v33 = vmul.f32 %v12174_v45, %v5539_v39 }
 0x9d6   : > { %5772 = vrot.lane.b32.xlu1 %v13551_v17, %s6460_s28 }
 0x9d7   : > { %v12141_v35 = vpop.permute.xlu2 %5520  ;;  %v5499_v24 = vpop.permute.xlu0 %5498 }
 0x9d8   : > { %v5507_v54 = vpop.permute.xlu1 %5506 }
 0x9d9   : > { %v5534_v23 = vsel %vm683_vm4, %v5507_v54, %v12122_v37  ;;  %v5538_v51 = vsel %vm683_vm4, %v5499_v24, %v5507_v54 }
 0x9dd   : > { %5774 = vrot.lane.b32.xlu2 %v11258_v56, %s6460_s28  ;;  %5770 = vrot.lane.b32.xlu0 %v11242_v19, %s6460_s28 }
 0x9de   : > { %5778 = vrot.lane.b32.xlu1 %v13554_v34, %s6460_s28 }
 0x9df   : > { %v5527_v4 = vpop.permute.xlu2 %5526  ;;  %v12157_v0 = vpop.permute.xlu0 %5504 }
 0x9e0   : > { %v12162_v13 = vsel %vm683_vm4, %v5527_v4, %v12051_v28  ;;  %v5513_v57 = vpop.permute.xlu1 %5512 }
 0x9e1   : > { %v12167_v52 = vsel %vm683_vm4, %v5513_v57, %v12141_v35  ;;  %v12172_v25 = vsel %vm683_vm4, %v12157_v0, %v5513_v57 }
 0x9e5   : > { %5780 = vrot.lane.b32.xlu2 %v13552_v3, %s6460_s28  ;;  %5776 = vrot.lane.b32.xlu0 %v13550_v61, %s6460_s28 }
 0x9e6   : > { %5784 = vrot.lane.b32.xlu1 %v13557_v18, %s6460_s28 }
 0x9e7   : > { %v5580_v30 = vpop.permute.xlu2 %5579  ;;  %v5511_v22 = vpop.permute.xlu0 %5510 }
 0x9e8   : > { %v5596_v55 = vmul.f32 %v5580_v30, %v5560_v33  ;;  %v5519_v62 = vpop.permute.xlu1 %5518  ;;  %v12186_v2 = vsel %vm683_vm4, %v12051_v28, %v5511_v22  ;;  %v12204_v28 = vperm.slane %v6317_v50, 1 }
 0x9e9   : > { %v12190_v32 = vsel %vm683_vm4, %v5519_v62, %v5527_v4  ;;  %v12194_v49 = vsel %vm683_vm4, %v5511_v22, %v5519_v62  ;;  %v6325_v62 = vld [vmem:[%s12618_s5 + $0xf0] sm:$0xff] }
 0x9ea   : > { %v12196_v26 = vadd.f32 %v5596_v55, %v5481_v15  ;;  %v6323_v55 = vld [vmem:[%s12618_s5 + $0xe0] sm:$0xff] }
 0x9ec   : > { %13559 = vst [vmem:[#allocation71_spill] sm:$0xff] %v12196_v26 }
 0x9ed   : > { %5786 = vrot.lane.b32.xlu2 %v13555_v63, %s6460_s28  ;;  %5782 = vrot.lane.b32.xlu0 %v13553_v60, %s6460_s28 }
 0x9ee   : > { %5790 = vrot.lane.b32.xlu1 %v11298_v16, %s6460_s28 }
 0x9ef   : > { %v12206_v47 = vpop.permute.xlu2 %5629  ;;  %v5517_v43 = vpop.permute.xlu0 %5516 }
 0x9f0   : > { %v5525_v39 = vpop.permute.xlu1 %5524  ;;  %v5535_v15 = vsel %vm683_vm4, %v12095_v38, %v5517_v43 }
 0x9f1   : > { %v5543_v54 = vsel %vm683_vm4, %v5525_v39, %v5501_v31  ;;  %v5531_v4 = vsel %vm683_vm4, %v5517_v43, %v5525_v39  ;;  %v5561_v57 = vmul.f32 %v12204_v28, %v5535_v15  ;;  %v5557_v39 = vmul.f32 %v12204_v28, %v5534_v23  ;;  %v6326_v23 = vld [vmem:[%s12618_s5 + $0xf8] sm:$0xff] }
 0x9f2   : > { %v5563_v33 = vmul.f32 %v5551_v7, %v5543_v54  ;;  %v5562_v22 = vmul.f32 %v5550_v1, %v5531_v4  ;;  %v5556_v15 = vmul.f32 %v12174_v45, %v5538_v51  ;;  %v6324_v51 = vld [vmem:[%s12618_s5 + $0xe8] sm:$0xff] }
 0x9f3   : > { %v5597_v50 = vmul.f32 %v5580_v30, %v5561_v57 }
 0x9f4   : > { %v5599_v38 = vmul.f32 %v5580_v30, %v5563_v33  ;;  %v5598_v26 = vmul.f32 %v5580_v30, %v5562_v22 }
 0x9f5   : > { %v12222_v56 = vadd.f32 %v5597_v50, %v5482_v59  ;;  %5836 = vperm.xlu2 %6385, %v6323_v55   ;;  %5788 = vrot.lane.b32.xlu0 %v13556_v36, %s6460_s28  ;;  %s6405_s28 = scalar_lea.hbm %s6404_s17, 4 }
 0x9f6   : > { %v12226_v31 = vadd.f32 %v5599_v38, %v5484_v58  ;;  %v12228_v43 = vadd.f32 %v5598_v26, %v5483_v9  ;;  %5846 = vperm.xlu1 %6387, %v6325_v62   ;;  %p6406_p11 = scmp.ne.s32.totalorder %s6404_s17, %s6405_s28  ;;  %p6411_p1 = scmp.lt.s32.totalorder %s6409_s26, %s6405_s28 }
 0x9f7   : > { %v12232_v54 = vpop.permute.xlu2 %5635  ;;  %v5523_v4 = vpop.permute.xlu0 %5522 }
 0x9f8   : > { %v5575_v57 = vpop.permute.xlu1 %5574  ;;  %v5530_v59 = vsel %vm683_vm4, %v12122_v37, %v5523_v4  ;;  %v5542_v30 = vsel %vm683_vm4, %v5523_v4, %v5499_v24  ;;  %p6407_p12 = pnand %p6406_p11, %p6535_p5  ;;  %p6412_p2 = por %p6411_p1, %p6410_p0 }
 0x9f9   : > { %v5592_v58 = vmul.f32 %v5575_v57, %v5556_v15  ;;  %v5593_v33 = vmul.f32 %v5575_v57, %v5557_v39  ;;  %v5558_v9 = vmul.f32 %v5550_v1, %v5530_v59  ;;  %v5559_v26 = vmul.f32 %v5551_v7, %v5542_v30 }
 0x9fa   : > { %p6408_p13 = pneg %p6407_p12 }
 0x9fb   : > { %v12246_v22 = vadd.f32 %v5592_v58, %v12053_v6  ;;  %v12249_v37 = vadd.f32 %v5593_v33, %v12039_v20  ;;  %v5594_v55 = vmul.f32 %v5575_v57, %v5558_v9  ;;  %v5595_v24 = vmul.f32 %v5575_v57, %v5559_v26 }
 0x9fc   : > { %v5569_v6 = vmul.f32 %v12204_v28, %v12167_v52  ;;  %v5568_v20 = vmul.f32 %v12174_v45, %v12172_v25  ;;  %p6413_p3 = pnand %p6412_p2, %p6408_p13 }
 0x9fd   : > { %v12252_v50 = vadd.f32 %v5594_v55, %v12041_v8  ;;  %v12255_v62 = vadd.f32 %v5595_v24, %v12061_v14  ;;  %5851 = vperm.xlu2 %6385, %v6326_v23   ;;  %5841 = vperm.xlu0 %6386, %v6324_v51   ;;  %v6329_v24 = vld [vmem:[%s12618_s5 + $0x108] sm:$0xff] }
 0x9fe   : > { %5893 = vrot.lane.b32.xlu1 %v11218_v11, %s6461_s13 }
 0x9ff   : > { %v12263_v38 = vpop.permute.xlu2 %5641  ;;  %v5529_v39 = vpop.permute.xlu0 %5528 }
 0xa00   : > { %v5590_v15 = vpop.permute.xlu1 %5589  ;;  %v5533_v8 = vsel %vm683_vm4, %v12141_v35, %v5529_v39  ;;  %v5545_v14 = vsel %vm683_vm4, %v5529_v39, %v12157_v0  ;;  %v5566_v0 = vmul.f32 %v5550_v1, %v12190_v32 }
 0xa01   : > { %v5604_v4 = vmul.f32 %v5590_v15, %v5568_v20  ;;  %v5605_v11 = vmul.f32 %v5590_v15, %v5569_v6  ;;  %v5570_v57 = vmul.f32 %v5550_v1, %v5533_v8  ;;  %v5571_v59 = vmul.f32 %v5551_v7, %v5545_v14 }
 0xa03   : > { %v12272_v52 = vadd.f32 %v5604_v4, %v12093_v48  ;;  %v12275_v25 = vadd.f32 %v5605_v11, %v12081_v46  ;;  %v5606_v30 = vmul.f32 %v5590_v15, %v5570_v57  ;;  %v5607_v58 = vmul.f32 %v5590_v15, %v5571_v59  ;;  %v6328_v4 = vld [vmem:[%s12618_s5 + $0x100] sm:$0xff] }
 0xa04   : > { %v5567_v48 = vmul.f32 %v5551_v7, %v12162_v13  ;;  %v5564_v46 = vmul.f32 %v12174_v45, %v12186_v2 }
 0xa05   : > { %v12278_v33 = vadd.f32 %v5606_v30, %v12091_v10  ;;  %v12281_v35 = vadd.f32 %v5607_v58, %v12097_v29  ;;  %5899 = vrot.lane.b32.xlu2 %v11233_v53, %s6461_s13  ;;  %5891 = vrot.lane.b32.xlu0 %v11213_v42, %s6461_s13  ;;  %v5565_v10 = vmul.f32 %v12204_v28, %v12194_v49 }
 0xa06   : > { %5907 = vrot.lane.b32.xlu1 %v13550_v61, %s6461_s13 }
 0xa07   : > { %v12295_v29 = vpop.permute.xlu2 %5647  ;;  %v5585_v9 = vpop.permute.xlu0 %5584 }
 0xa08   : > { %v5634_v53 = vpop.permute.xlu1 %5633  ;;  %v5600_v26 = vmul.f32 %v5585_v9, %v5564_v46  ;;  %v5601_v23 = vmul.f32 %v5585_v9, %v5565_v10  ;;  %v5602_v42 = vmul.f32 %v5585_v9, %v5566_v0  ;;  %v5603_v51 = vmul.f32 %v5585_v9, %v5567_v48 }
 0xa09   : > { %v5671_v13 = vsel %vm772_vm5, %v5634_v53, %v12263_v38 }
 0xa0a   : > { %v5616_v45 = vadd.f32 %v5600_v26, %v12110_v12  ;;  %v5617_v2 = vadd.f32 %v5601_v23, %v12112_v27  ;;  %v5618_v32 = vadd.f32 %v5602_v42, %v12114_v41  ;;  %v5619_v61 = vadd.f32 %v5603_v51, %v12116_v40  ;;  %v6331_v26 = vld [vmem:[%s12618_s5 + $0x118] sm:$0xff] }
 0xa0d   : > { %5909 = vrot.lane.b32.xlu2 %v13554_v34, %s6461_s13  ;;  %5901 = vrot.lane.b32.xlu0 %v11242_v19, %s6461_s13  ;;  %v6322_v34 = vld [vmem:[%s12614_s1 + $0x18] sm:$0xf] }
 0xa0e   : > { %5917 = vrot.lane.b32.xlu1 %v13555_v63, %s6461_s13  ;;  %v12348_v55 = vperm.slane %v6322_v34, 0  ;;  %v5682_v59 = vperm.slane %v6322_v34, 3  ;;  %v5681_v30 = vperm.slane %v6322_v34, 2 }
 0xa0f   : > { %v5654_v49 = vpop.permute.xlu2 %5653  ;;  %v12310_v28 = vpop.permute.xlu0 %5631 }
 0xa10   : > { %v12315_v12 = vsel %vm772_vm5, %v5654_v49, %v12206_v47  ;;  %v5640_v27 = vpop.permute.xlu1 %5639 }
 0xa11   : > { %v5666_v41 = vsel %vm772_vm5, %v5640_v27, %v12295_v29  ;;  %v5670_v19 = vsel %vm772_vm5, %v12310_v28, %v5640_v27 }
 0xa15   : > { %5895 = vrot.lane.b32.xlu2 %v11226_v44, %s6461_s13  ;;  %5915 = vrot.lane.b32.xlu0 %v13557_v18, %s6461_s13 }
 0xa16   : > { %5911 = vrot.lane.b32.xlu1 %v13552_v3, %s6461_s13 }
 0xa17   : > { %v5660_v63 = vpop.permute.xlu2 %5659  ;;  %v5638_v40 = vpop.permute.xlu0 %5637 }
 0xa18   : > { %v12335_v7 = vsel %vm772_vm5, %v5660_v63, %v12232_v54  ;;  %v5646_v1 = vpop.permute.xlu1 %5645  ;;  %v12340_v44 = vsel %vm772_vm5, %v12206_v47, %v5638_v40  ;;  %v5695_v47 = vmul.f32 %v12348_v55, %v5671_v13 }
 0xa19   : > { %v5661_v3 = vsel %vm772_vm5, %v5646_v1, %v5654_v49  ;;  %v12346_v18 = vsel %vm772_vm5, %v5638_v40, %v5646_v1  ;;  %v5691_v49 = vmul.f32 %v12348_v55, %v5670_v19  ;;  %v13561_v19 = vld [vmem:[#allocation71_spill] sm:$0xff] }
 0xa1d   : > { %5919 = vrot.lane.b32.xlu2 %v13556_v36, %s6461_s13  ;;  %5903 = vrot.lane.b32.xlu0 %v13551_v17, %s6461_s13 }
 0xa1e   : > { %5972 = vperm.xlu1 %6387, %v6329_v24  }
 0xa1f   : > { %v5716_v6 = vpop.permute.xlu2 %5715  ;;  %v5644_v20 = vpop.permute.xlu0 %5643 }
 0xa20   : > { %v5731_v39 = vmul.f32 %v5716_v6, %v5695_v47  ;;  %v5652_v15 = vpop.permute.xlu1 %5651  ;;  %v12361_v8 = vsel %vm772_vm5, %v12232_v54, %v5644_v20  ;;  %v5680_v54 = vperm.slane %v6322_v34, 1 }
 0xa21   : > { %v12365_v14 = vsel %vm772_vm5, %v5652_v15, %v5660_v63  ;;  %v12369_v36 = vsel %vm772_vm5, %v5644_v20, %v5652_v15  ;;  %v5689_v15 = vmul.f32 %v5681_v30, %v5661_v3 }
 0xa22   : > { %v12371_v17 = vadd.f32 %v5731_v39, %v5616_v45  ;;  %v5692_v45 = vmul.f32 %v5680_v54, %v5666_v41  ;;  %v6330_v41 = vld [vmem:[%s12618_s5 + $0x110] sm:$0xff]  ;;  %v5690_v39 = vmul.f32 %v5682_v59, %v12315_v12 }
 0xa25   : > { %5897 = vrot.lane.b32.xlu2 %v11238_v5, %s6461_s13  ;;  %5967 = vperm.xlu0 %6386, %v6328_v4   ;;  %v5687_v4 = vmul.f32 %v12348_v55, %v12340_v44 }
 0xa26   : > { %5913 = vrot.lane.b32.xlu1 %v13553_v60, %s6461_s13 }
 0xa27   : > { %v12380_v11 = vpop.permute.xlu2 %5762  ;;  %v5650_v57 = vpop.permute.xlu0 %5649 }
 0xa28   : > { %v5658_v58 = vpop.permute.xlu1 %5657  ;;  %v5667_v48 = vsel %vm772_vm5, %v12263_v38, %v5650_v57  ;;  %v13560_v38 = vld [vmem:[#allocation26_spill] sm:$0xff] }
 0xa29   : > { %v5675_v0 = vsel %vm772_vm5, %v5658_v58, %v5634_v53  ;;  %v5663_v5 = vsel %vm772_vm5, %v5650_v57, %v5658_v58  ;;  %v5696_v46 = vmul.f32 %v5680_v54, %v5667_v48  ;;  %v5688_v57 = vmul.f32 %v5680_v54, %v12346_v18 }
 0xa2a   : > { %v5698_v10 = vmul.f32 %v5682_v59, %v5675_v0  ;;  %v5697_v60 = vmul.f32 %v5681_v30, %v5663_v5 }
 0xa2b   : > { %v5732_v9 = vmul.f32 %v5716_v6, %v5696_v46 }
 0xa2c   : > { %v5734_v23 = vmul.f32 %v5716_v6, %v5698_v10  ;;  %v5733_v42 = vmul.f32 %v5716_v6, %v5697_v60  ;;  %v5702_v10 = vmul.f32 %v5682_v59, %v12335_v7  ;;  %v5701_v60 = vmul.f32 %v5681_v30, %v12365_v14  ;;  %v6327_v14 = vld [vmem:[%s12614_s1 + $0x1c] sm:$0xf] }
 0xa2d   : > { %v12392_v51 = vadd.f32 %v5732_v9, %v5617_v2  ;;  %5921 = vrot.lane.b32.xlu2 %v11298_v16, %s6461_s13  ;;  %5905 = vrot.lane.b32.xlu0 %v13560_v38, %s6461_s13  ;;  %v5699_v9 = vmul.f32 %v12348_v55, %v12361_v8  ;;  %s6074_s13 = scalar_lea.sflag [#allocation4], %s240_s29 }
 0xa2e   : > { %v12398_v53 = vadd.f32 %v5734_v23, %v5619_v61  ;;  %v12400_v13 = vadd.f32 %v5733_v42, %v5618_v32  ;;  %5982 = vperm.xlu1 %6387, %v6331_v26   ;;  %v5700_v26 = vmul.f32 %v5680_v54, %v12369_v36 }
 0xa2f   : > { %v12403_v27 = vpop.permute.xlu2 %5768  ;;  %v5656_v34 = vpop.permute.xlu0 %5655 }
 0xa30   : > { %v5711_v63 = vpop.permute.xlu1 %5710  ;;  %v5662_v2 = vsel %vm772_vm5, %v12295_v29, %v5656_v34  ;;  %v5674_v16 = vsel %vm772_vm5, %v5656_v34, %v12310_v28  ;;  %v12461_v34 = vperm.slane %v6327_v14, 0 }
 0xa31   : > { %v5727_v61 = vmul.f32 %v5711_v63, %v5691_v49  ;;  %v5728_v40 = vmul.f32 %v5711_v63, %v5692_v45  ;;  %v5693_v32 = vmul.f32 %v5681_v30, %v5662_v2  ;;  %v5694_v1 = vmul.f32 %v5682_v59, %v5674_v16 }
 0xa33   : > { %v12415_v24 = vadd.f32 %v5727_v61, %v13561_v19  ;;  %v12418_v47 = vadd.f32 %v5728_v40, %v12222_v56  ;;  %v5729_v6 = vmul.f32 %v5711_v63, %v5693_v32  ;;  %v5730_v29 = vmul.f32 %v5711_v63, %v5694_v1 }
 0xa34   : > { %v5811_v1 = vperm.slane %v6327_v14, 1 }
 0xa35   : > { %v12421_v20 = vadd.f32 %v5729_v6, %v12228_v43  ;;  %v12424_v28 = vadd.f32 %v5730_v29, %v12226_v31  ;;  %5977 = vperm.xlu0 %6386, %v6330_v41   ;;  %v5813_v6 = vperm.slane %v6327_v14, 3  ;;  %v5812_v29 = vperm.slane %v6327_v14, 2 }
 0xa37   : > { %v12430_v58 = vpop.permute.xlu2 %5774  ;;  %v5706_v56 = vpop.permute.xlu0 %5705 }
 0xa38   : > { %v5761_v48 = vpop.permute.xlu1 %5760  ;;  %v5723_v0 = vmul.f32 %v5706_v56, %v5687_v4  ;;  %v5724_v5 = vmul.f32 %v5706_v56, %v5688_v57  ;;  %v5725_v43 = vmul.f32 %v5706_v56, %v5689_v15  ;;  %v5726_v46 = vmul.f32 %v5706_v56, %v5690_v39 }
 0xa39   : > { %v5800_v31 = vsel %vm861_vm6, %v5761_v48, %v12403_v27 }
 0xa3a   : > { %v5739_v12 = vadd.f32 %v5723_v0, %v12246_v22  ;;  %v5740_v3 = vadd.f32 %v5724_v5, %v12249_v37  ;;  %v5741_v44 = vadd.f32 %v5725_v43, %v12252_v50  ;;  %v5742_v18 = vadd.f32 %v5726_v46, %v12255_v62 }
 0xa3f   : > { %v12444_v23 = vpop.permute.xlu2 %5780  ;;  %v5721_v42 = vpop.permute.xlu0 %5720 }
 0xa40   : > { %v5767_v38 = vpop.permute.xlu1 %5766  ;;  %v5735_v22 = vmul.f32 %v5721_v42, %v5699_v9  ;;  %v5736_v45 = vmul.f32 %v5721_v42, %v5700_v26  ;;  %v5737_v37 = vmul.f32 %v5721_v42, %v5701_v60  ;;  %v5738_v49 = vmul.f32 %v5721_v42, %v5702_v10 }
 0xa41   : > { %v5803_v50 = vsel %vm861_vm6, %v5767_v38, %v12430_v58 }
 0xa42   : > { %v5751_v62 = vadd.f32 %v5735_v22, %v12272_v52  ;;  %v5752_v7 = vadd.f32 %v5736_v45, %v12275_v25  ;;  %v5753_v55 = vadd.f32 %v5737_v37, %v12278_v33  ;;  %v5754_v8 = vadd.f32 %v5738_v49, %v12281_v35 }
 0xa43   : > { %v5818_v25 = vmul.f32 %v12461_v34, %v5800_v31  ;;  %v5830_v32 = vmul.f32 %v12461_v34, %v5803_v50 }
 0xa47   : > { %v5787_v36 = vpop.permute.xlu2 %5786  ;;  %v5765_v54 = vpop.permute.xlu0 %5764 }
 0xa48   : > { %v5773_v59 = vpop.permute.xlu1 %5772 }
 0xa49   : > { %v5798_v30 = vsel %vm861_vm6, %v5773_v59, %v12444_v23  ;;  %v5802_v52 = vsel %vm861_vm6, %v5765_v54, %v5773_v59 }
 0xa4f   : > { %v5837_v33 = vpop.permute.xlu2 %5836  ;;  %v5771_v35 = vpop.permute.xlu0 %5770 }
 0xa50   : > { %v5854_v63 = vmul.f32 %v5837_v33, %v5818_v25  ;;  %v5779_v2 = vpop.permute.xlu1 %5778  ;;  %v5801_v16 = vsel %vm861_vm6, %v12380_v11, %v5771_v35  ;;  %v5827_v25 = vmul.f32 %v5811_v1, %v5798_v30 }
 0xa51   : > { %v5797_v61 = vsel %vm861_vm6, %v5771_v35, %v5779_v2 }
 0xa52   : > { %v12469_v40 = vadd.f32 %v5854_v63, %v5739_v12 }
 0xa57   : > { %v5852_v41 = vpop.permute.xlu2 %5851  ;;  %v5777_v19 = vpop.permute.xlu0 %5776 }
 0xa58   : > { %v5866_v39 = vmul.f32 %v5852_v41, %v5830_v32  ;;  %v5785_v15 = vpop.permute.xlu1 %5784  ;;  %v5796_v4 = vsel %vm861_vm6, %v12403_v27, %v5777_v19 }
 0xa59   : > { %v5804_v57 = vsel %vm861_vm6, %v5785_v15, %v5761_v48  ;;  %v5792_v56 = vsel %vm861_vm6, %v5777_v19, %v5785_v15  ;;  %v5819_v0 = vmul.f32 %v5811_v1, %v5796_v4 }
 0xa5a   : > { %v12479_v5 = vadd.f32 %v5866_v39, %v5751_v62  ;;  %v5821_v43 = vmul.f32 %v5813_v6, %v5804_v57  ;;  %v5820_v46 = vmul.f32 %v5812_v29, %v5792_v56  ;;  %v5822_v56 = vmul.f32 %v12461_v34, %v5801_v16 }
 0xa5b   : > { %v5855_v31 = vmul.f32 %v5837_v33, %v5819_v0 }
 0xa5c   : > { %v5857_v12 = vmul.f32 %v5837_v33, %v5821_v43  ;;  %v5856_v10 = vmul.f32 %v5837_v33, %v5820_v46 }
 0xa5d   : > { %v12481_v60 = vadd.f32 %v5855_v31, %v5740_v3 }
 0xa5e   : > { %v12483_v9 = vadd.f32 %v5857_v12, %v5742_v18  ;;  %v12485_v26 = vadd.f32 %v5856_v10, %v5741_v44 }
 0xa5f   : > { %v5783_v27 = vpop.permute.xlu0 %5782 }
 0xa60   : > { %v5791_v42 = vpop.permute.xlu1 %5790  ;;  %v5799_v48 = vsel %vm861_vm6, %v12430_v58, %v5783_v27  ;;  %v5826_v58 = vmul.f32 %v12461_v34, %v5802_v52 }
 0xa61   : > { %v5807_v22 = vsel %vm861_vm6, %v5791_v42, %v5767_v38  ;;  %v5795_v45 = vsel %vm861_vm6, %v5783_v27, %v5791_v42  ;;  %v5831_v37 = vmul.f32 %v5811_v1, %v5799_v48  ;;  %v6332_v48 = vld [vmem:[%s12614_s1 + $0x20] sm:$0xf] }
 0xa62   : > { %v5833_v49 = vmul.f32 %v5813_v6, %v5807_v22  ;;  %v5832_v3 = vmul.f32 %v5812_v29, %v5795_v45  ;;  %v5943_v22 = vperm.slane %v6332_v48, 2  ;;  %v5942_v45 = vperm.slane %v6332_v48, 1 }
 0xa63   : > { %v5867_v50 = vmul.f32 %v5852_v41, %v5831_v37  ;;  %v5941_v37 = vperm.slane %v6332_v48, 0 }
 0xa64   : > { %v5869_v18 = vmul.f32 %v5852_v41, %v5833_v49  ;;  %v5868_v62 = vmul.f32 %v5852_v41, %v5832_v3  ;;  %v5944_v3 = vperm.slane %v6332_v48, 3 }
 0xa65   : > { %v12494_v44 = vadd.f32 %v5867_v50, %v5752_v7 }
 0xa66   : > { %v12496_v14 = vadd.f32 %v5869_v18, %v5754_v8  ;;  %v12498_v59 = vadd.f32 %v5868_v62, %v5753_v55  ;;  %v5805_v55 = vsel %vm861_vm6, %v5787_v36, %v12380_v11  ;;  %v5793_v8 = vsel %vm861_vm6, %v5779_v2, %v5787_v36 }
 0xa67   : > { %v5789_v33 = vpop.permute.xlu0 %5788  ;;  %v5825_v57 = vmul.f32 %v5813_v6, %v5805_v55  ;;  %v5824_v11 = vmul.f32 %v5812_v29, %v5793_v8  ;;  %v5823_v36 = vmul.f32 %v5811_v1, %v5797_v61 }
 0xa68   : > { %v5847_v38 = vpop.permute.xlu1 %5846  ;;  %v5794_v35 = vsel %vm861_vm6, %v12444_v23, %v5789_v33  ;;  %v5806_v63 = vsel %vm861_vm6, %v5789_v33, %v5765_v54  ;;  %v5900_v54 = vpop.permute.xlu2 %5899 }
 0xa69   : > { %v5862_v32 = vmul.f32 %v5847_v38, %v5826_v58  ;;  %v5863_v41 = vmul.f32 %v5847_v38, %v5827_v25  ;;  %v5828_v7 = vmul.f32 %v5812_v29, %v5794_v35  ;;  %v5829_v19 = vmul.f32 %v5813_v6, %v5806_v63 }
 0xa6b   : > { %v5864_v30 = vmul.f32 %v5847_v38, %v5828_v7  ;;  %v5865_v52 = vmul.f32 %v5847_v38, %v5829_v19  ;;  %v12512_v39 = vadd.f32 %v5862_v32, %v12371_v17  ;;  %v12515_v23 = vadd.f32 %v5863_v41, %v12392_v51 }
 0xa6d   : > { %v12518_v15 = vadd.f32 %v5864_v30, %v12400_v13  ;;  %v12521_v4 = vadd.f32 %v5865_v52, %v12398_v53 }
 0xa6f   : > { %v5842_v2 = vpop.permute.xlu0 %5841 }
 0xa70   : > { %v5894_v0 = vpop.permute.xlu1 %5893  ;;  %v5858_v43 = vmul.f32 %v5842_v2, %v5822_v56  ;;  %v5859_v17 = vmul.f32 %v5842_v2, %v5823_v36  ;;  %v5860_v46 = vmul.f32 %v5842_v2, %v5824_v11  ;;  %v5861_v31 = vmul.f32 %v5842_v2, %v5825_v57  ;;  %v5910_v10 = vpop.permute.xlu2 %5909 }
 0xa72   : > { %v5874_v51 = vadd.f32 %v5858_v43, %v12415_v24  ;;  %v5875_v12 = vadd.f32 %v5859_v17, %v12418_v47  ;;  %v5876_v13 = vadd.f32 %v5860_v46, %v12421_v20  ;;  %v5877_v53 = vadd.f32 %v5861_v31, %v12424_v28 }
 0xa77   : > { %v5892_v6 = vpop.permute.xlu0 %5891 }
 0xa78   : > { %v5908_v29 = vpop.permute.xlu1 %5907  ;;  %v5896_v16 = vpop.permute.xlu2 %5895  ;;  %v5931_v18 = vsel %vm950_vm7, %v5892_v6, %v5900_v54 }
 0xa79   : > { %v5927_v50 = vsel %vm950_vm7, %v5900_v54, %v5908_v29  ;;  %v5949_v63 = vmul.f32 %v5941_v37, %v5931_v18 }
 0xa7a   : > { %v5950_v55 = vmul.f32 %v5942_v45, %v5927_v50 }
 0xa7f   : > { %v5902_v27 = vpop.permute.xlu0 %5901 }
 0xa80   : > { %v5918_v34 = vpop.permute.xlu1 %5917  ;;  %v5920_v42 = vpop.permute.xlu2 %5919  ;;  %v5928_v47 = vsel %vm950_vm7, %v5902_v27, %v5910_v10  ;;  %v5932_v20 = vsel %vm950_vm7, %v5894_v0, %v5902_v27 }
 0xa81   : > { %v5924_v49 = vsel %vm950_vm7, %v5910_v10, %v5918_v34  ;;  %v5936_v62 = vsel %vm950_vm7, %v5918_v34, %v5894_v0  ;;  %v5953_v25 = vmul.f32 %v5941_v37, %v5932_v20  ;;  %v5954_v58 = vmul.f32 %v5942_v45, %v5928_v47 }
 0xa82   : > { %v5955_v35 = vmul.f32 %v5943_v22, %v5924_v49  ;;  %v5956_v41 = vmul.f32 %v5944_v3, %v5936_v62 }
 0xa87   : > { %v5916_v61 = vpop.permute.xlu0 %5915 }
 0xa88   : > { %v5912_v1 = vpop.permute.xlu1 %5911  ;;  %v5923_v33 = vsel %vm950_vm7, %v5908_v29, %v5916_v61  ;;  %v5935_v38 = vsel %vm950_vm7, %v5916_v61, %v5892_v6  ;;  %v5898_v32 = vpop.permute.xlu2 %5897 }
 0xa89   : > { %v5951_v8 = vmul.f32 %v5943_v22, %v5923_v33  ;;  %v5952_v30 = vmul.f32 %v5944_v3, %v5935_v38 }
 0xa8f   : > { %v5904_v24 = vpop.permute.xlu0 %5903 }
 0xa90   : > { %v5973_v28 = vpop.permute.xlu1 %5972  ;;  %v5922_v20 = vpop.permute.xlu2 %5921 }
 0xa91   : > { %v5989_v7 = vmul.f32 %v5973_v28, %v5953_v25  ;;  %v5990_v19 = vmul.f32 %v5973_v28, %v5954_v58  ;;  %v5991_v52 = vmul.f32 %v5973_v28, %v5955_v35  ;;  %v5992_v54 = vmul.f32 %v5973_v28, %v5956_v41 }
 0xa93   : > { %v6005_v0 = vadd.f32 %v5989_v7, %v5874_v51  ;;  %v6006_v43 = vadd.f32 %v5990_v19, %v5875_v12  ;;  %v6007_v17 = vadd.f32 %v5991_v52, %v5876_v13  ;;  %v6008_v29 = vadd.f32 %v5992_v54, %v5877_v53 }
 0xa94   : > { %v5929_v13 = vsel %vm950_vm7, %v5904_v24, %v5912_v1  ;;  %v5933_v53 = vsel %vm950_vm7, %v5896_v16, %v5904_v24 }
 0xa95   : > { %v5957_v38 = vmul.f32 %v5941_v37, %v5933_v53  ;;  %v5958_v35 = vmul.f32 %v5942_v45, %v5929_v13 }
 0xa97   : > { %v5968_v57 = vpop.permute.xlu0 %5967 }
 0xa98   : > { %v5985_v11 = vmul.f32 %v5968_v57, %v5949_v63  ;;  %v5986_v56 = vmul.f32 %v5968_v57, %v5950_v55  ;;  %v5987_v36 = vmul.f32 %v5968_v57, %v5951_v8  ;;  %v5988_v2 = vmul.f32 %v5968_v57, %v5952_v30  ;;  %v5914_v46 = vpop.permute.xlu1 %5913 }
 0xa9a   : > { %v6001_v31 = vadd.f32 %v5985_v11, %v12469_v40  ;;  %v6002_v10 = vadd.f32 %v5986_v56, %v12481_v60  ;;  %v6003_v6 = vadd.f32 %v5987_v36, %v12485_v26  ;;  %v6004_v27 = vadd.f32 %v5988_v2, %v12483_v9 }
 0xa9b   : > { %v5937_v40 = vsel %vm950_vm7, %v5920_v42, %v5896_v16  ;;  %v5938_v60 = vsel %vm950_vm7, %v5922_v20, %v5898_v32  ;;  %v5925_v9 = vsel %vm950_vm7, %v5912_v1, %v5920_v42  ;;  %v5926_v26 = vsel %vm950_vm7, %v5914_v46, %v5922_v20 }
 0xa9c   : > { %v6017_v34 = vadd.f32 %v6005_v0, %v6001_v31  ;;  %v6026_v61 = vadd.f32 %v6006_v43, %v6002_v10  ;;  %v6035_v48 = vadd.f32 %v6007_v17, %v6003_v6  ;;  %v6044_v47 = vadd.f32 %v6008_v29, %v6004_v27 }
 0xa9d   : > { %v5964_v62 = vmul.f32 %v5944_v3, %v5938_v60  ;;  %v5963_v25 = vmul.f32 %v5943_v22, %v5926_v26  ;;  %v5960_v58 = vmul.f32 %v5944_v3, %v5937_v40  ;;  %v5959_v33 = vmul.f32 %v5943_v22, %v5925_v9 }
 0xa9f   : > { %v5906_v28 = vpop.permute.xlu0 %5905 }
 0xaa0   : > { %v5930_v51 = vsel %vm950_vm7, %v5906_v28, %v5914_v46  ;;  %v5934_v12 = vsel %vm950_vm7, %v5898_v32, %v5906_v28  ;;  %v5983_v18 = vpop.permute.xlu1 %5982 }
 0xaa1   : > { %v5961_v49 = vmul.f32 %v5941_v37, %v5934_v12  ;;  %v5962_v50 = vmul.f32 %v5942_v45, %v5930_v51  ;;  %v5999_v63 = vmul.f32 %v5983_v18, %v5963_v25  ;;  %v6000_v42 = vmul.f32 %v5983_v18, %v5964_v62 }
 0xaa3   : > { %v5997_v32 = vmul.f32 %v5983_v18, %v5961_v49  ;;  %v5998_v41 = vmul.f32 %v5983_v18, %v5962_v50  ;;  %v6015_v22 = vadd.f32 %v5999_v63, %v12498_v59  ;;  %v6016_v45 = vadd.f32 %v6000_v42, %v12496_v14  ;;  %v6388_v50 = vld [vmem:[%s6553_s15] sm:$0xf] }
 0xaa4   : > { %v13562_v49 = vlaneseq }
 0xaa5   : > { %v6013_v37 = vadd.f32 %v5997_v32, %v12479_v5  ;;  %v6014_v30 = vadd.f32 %v5998_v41, %v12494_v44 }
 0xaa6   : > { %vm6070_vm12 = vcmp.lt.s32.totalorder %v13562_v49, 512 }
 0xaa7   : > { %v5978_v7 = vpop.permute.xlu0 %5977 }
 0xaa8   : > { %v5993_v19 = vmul.f32 %v5978_v7, %v5957_v38  ;;  %v5994_v55 = vmul.f32 %v5978_v7, %v5958_v35  ;;  %v5995_v1 = vmul.f32 %v5978_v7, %v5959_v33  ;;  %v5996_v8 = vmul.f32 %v5978_v7, %v5960_v58 }
 0xaaa   : > { %v6009_v21 = vadd.f32 %v5993_v19, %v12512_v39  ;;  %v6010_v16 = vadd.f32 %v5994_v55, %v12515_v23  ;;  %v6011_v24 = vadd.f32 %v5995_v1, %v12518_v15  ;;  %v6012_v3 = vadd.f32 %v5996_v8, %v12521_v4 }
 0xaac   : > { %v6018_v52 = vadd.f32 %v6017_v34, %v6009_v21  ;;  %v6027_v54 = vadd.f32 %v6026_v61, %v6010_v16  ;;  %v6036_v57 = vadd.f32 %v6035_v48, %v6011_v24  ;;  %v6045_v11 = vadd.f32 %v6044_v47, %v6012_v3 }
 0xaae   : > { %v6019_v56 = vadd.f32 %v6018_v52, %v6013_v37  ;;  %v6028_v39 = vadd.f32 %v6027_v54, %v6014_v30  ;;  %v6037_v23 = vadd.f32 %v6036_v57, %v6015_v22  ;;  %v6046_v36 = vadd.f32 %v6045_v11, %v6016_v45 }
 0xab0   : > { %v6020_v15 = vrot.slane %v6019_v56, 4  ;;  %v6029_v2 = vrot.slane %v6028_v39, 4  ;;  %v6038_v4 = vrot.slane %v6037_v23, 4  ;;  %v6047_v59 = vrot.slane %v6046_v36, 4 }
 0xab2   : > { %v6021_v14 = vadd.f32 %v6020_v15, %v6019_v56  ;;  %v6030_v0 = vadd.f32 %v6029_v2, %v6028_v39  ;;  %v6039_v5 = vadd.f32 %v6038_v4, %v6037_v23  ;;  %v6048_v43 = vadd.f32 %v6047_v59, %v6046_v36 }
 0xab4   : > { %v6022_v44 = vrot.slane %v6021_v14, 2  ;;  %v6031_v17 = vrot.slane %v6030_v0, 2  ;;  %v6040_v46 = vrot.slane %v6039_v5, 2  ;;  %v6049_v31 = vrot.slane %v6048_v43, 2 }
 0xab6   : > { %v6023_v10 = vadd.f32 %v6022_v44, %v6021_v14  ;;  %v6032_v6 = vadd.f32 %v6031_v17, %v6030_v0  ;;  %v6041_v29 = vadd.f32 %v6040_v46, %v6039_v5  ;;  %v6050_v27 = vadd.f32 %v6049_v31, %v6048_v43 }
 0xab8   : > { %v6024_v34 = vrot.slane %v6023_v10, 1  ;;  %v6033_v61 = vrot.slane %v6032_v6, 1  ;;  %v6042_v48 = vrot.slane %v6041_v29, 1  ;;  %v6051_v47 = vrot.slane %v6050_v27, 1 }
 0xaba   : > { %v6034_v20 = vadd.f32 %v6033_v61, %v6032_v6  ;;  %v6043_v28 = vadd.f32 %v6042_v48, %v6041_v29  ;;  %v6052_v51 = vadd.f32 %v6051_v47, %v6050_v27  ;;  %v6025_v12 = vadd.f32 %v6024_v34, %v6023_v10 }
 0xabc   : > { %v6057_v40 = vrot.slane %v6034_v20, 7  ;;  %v6058_v60 = vrot.slane %v6043_v28, 6  ;;  %v6059_v9 = vrot.slane %v6052_v51, 5 }
 0xabe   : > { %v6061_v26 = vsel %vm6060_vm9, %v6025_v12, %v6057_v40  ;;  %v6063_v13 = vsel %vm6062_vm10, %v6058_v60, %v6059_v9 }
 0xabf   : > { %v6065_v53 = vsel %vm6064_vm11, %v6061_v26, %v6063_v13 }
 0xac0   : > { %v6067_v18 = vsub.f32 %v6388_v50, %v6065_v53 }
 0xac2   : > { %6072 = vst.msk [vmem:[%s242_s25] sm:$0xf] %vm6070_vm12, %v6067_v18 }
 0xac3   : > { %6416 = shalt.err (!%p6413_p3)
}
 0xac4   : > { %6337 = dma.vmem_to_hbm [thread:$0]  (%p6535_p5), %s6087_s14, 64, %s6089_s19, %s6074_s13  }
 0xac5 PF: > { %p6343_p4 = scmp.ge.s32.totalorder %s6451_s24, 2  ;;  %s6100_s15 = sand.u32 1, %s6439_s21  }
 0xac6   : > { %s6101_s29 = scalar_lea.sflag [#allocation4], %s6100_s15 }
 0xac7   : > { %p6340_p7 = pnand %p6343_p4, %p6539_p6 }
 0xac9   : > { %p6341_p8 = pneg %p6340_p7 }
 0xacb   : > { %6434 = dma.done.wait (%p6341_p8), %s6101_s29, 64  }
 0xacc   : > { %6436 = vsyncadd (%p6341_p8), %s6101_s29, 4294967232  ;;  %p16_p9 = scmp.ge.s32.totalorder %s6522_s27, 4   ;;  %s13563_s21 = smov %s6443_s22 }
 0xacd   : > { %s13564_s22 = smov %s6447_s23  ;;  %s13565_s23 = smov %s6533_s30 }
 0xace   : > { %s13566_s24 = smov %s6522_s27  ;;  %18 = sbr.rel (!%p16_p9) target bundleno = 3 (0x3), region = 106 }
 0xad3   :  { %6107 = vsyncpa [#allocation4], 1 }
 0xad4   :  { %6109 = vsyncpa [#allocation4 + $0x1], 1 }

</bundles_post_ra>
